<compile_context>
chip_gen: v7x
topology: tpu7x:2x2x1
jax: 0.10.0
libtpu: 0.0.40
codegen_flags: <defaults>
</compile_context>

<pallas_src>
from functools import partial

import jax
import jax.numpy as jnp
from jax import lax
from jax.experimental import pallas as pl
from jax.experimental.pallas import tpu as pltpu
import numpy as np


# ---------------------------------------------------------------------------
# Per-generation blocking / VMEM configuration.
# ---------------------------------------------------------------------------
def _hw_config():
    """Batch-block caps and scoped-VMEM limit per TPU generation."""
    vmem_cap = 64 * 1024 * 1024            # conservative default (v7x-sized)
    try:
        info = pltpu.get_tpu_info()
        vmem_cap = int(getattr(info, "vmem_capacity_bytes", vmem_cap))
    except Exception:                      # no query available: stay safe
        pass
    if vmem_cap >= 100 * 1024 * 1024:      # v5e / v6e: 128 MiB VMEM
        return {"conv_bn": 32, "fc_bn": 256, "vmem_limit": 96 * 1024 * 1024}
    # v7x: 64 MiB per TensorCore -> smaller blocks, leave headroom
    return {"conv_bn": 16, "fc_bn": 128, "vmem_limit": 40 * 1024 * 1024}


def _conv_block(n, cap):
    """Images per conv grid step (block *leading* dim, so no (8,128) rule) and
    the zero-padded batch.  Prefers >= 2 grid steps (v7x has 2 TensorCores)
    once blocks are big enough to amortize the per-step overhead."""
    if n <= 1:
        return 1, 1
    bn = min(cap, n)
    if n >= 16:
        bn = min(bn, (n + 1) // 2)
    n_pad = ((n + bn - 1) // bn) * bn
    return bn, n_pad


def _fc_block(n, cap):
    """Rows per fc grid step: a multiple of 8 dividing n (second-to-last block
    dim constraint), as large as possible, preferring >= 2 grid steps."""
    cands = [b for b in range(8, min(cap, n) + 1, 8) if n % b == 0]
    if not cands:
        return n                           # tiny batch: single full block
    two_step = [b for b in cands if n // b >= 2]
    return (two_step or cands)[-1]


# ---------------------------------------------------------------------------
# Fused conv3x3 (banded matmul) + 2x2 max-pool + bias + ReLU kernel.
# ---------------------------------------------------------------------------
def conv_pool_kernel(x_ref, w_ref, b_ref, o_ref, *, pad_out_rows):
    """One batch block of: pool(relu(conv3x3_same(x) + b)).

    x_ref: (bn, H+2, W*C)     bf16, lane-folded NHWC, zero rows at 0 and H+1
    w_ref: (3, W*C, 2*Wh*F)   bf16 block-banded weights; for kernel row ky,
                              column p*Wh*F + wh*F + f is the conv output at
                              (w = 2*wh + p, out-channel f)
    b_ref: (1, Wh*F)          f32 bias tiled along the pooled-W dim
    o_ref: (bn, Hh(+2), Wh*F) bf16 pooled output (optionally zero-padded in H
                              so it is directly the next conv's input)
    """
    bn, hp2, lp = x_ref.shape
    h = hp2 - 2
    hh = h // 2
    whf = b_ref.shape[1]

    # 3 deep MXU matmuls (one per kernel row), f32 accumulation.
    acc = None
    for ky in range(3):
        lhs = x_ref[:, ky:ky + h, :].reshape(bn * h, lp)
        term = jnp.dot(lhs, w_ref[ky], preferred_element_type=jnp.float32)
        acc = term if acc is None else acc + term

    # 2x2 max-pool.  W-pool: even/odd output-column parities are the two lane
    # halves (aligned 512-wide slices).  H-pool: adjacent row pairs.
    acc = jnp.maximum(acc[:, :whf], acc[:, whf:])          # (bn*h, whf)
    acc = acc.reshape(bn, hh, 2, whf)
    acc = jnp.maximum(acc[:, :, 0, :], acc[:, :, 1, :])    # (bn, hh, whf)
    out = jnp.maximum(acc + b_ref[...], 0.0).astype(o_ref.dtype)

    if pad_out_rows:      # emit the next conv's zero H-padding directly
        o_ref[...] = jnp.zeros_like(o_ref)
        o_ref[:, 1:1 + hh, :] = out
    else:
        o_ref[...] = out


def conv_pool(xp, w_banded, bias_tiled, *, bn, pad_out_rows, vmem_limit):
    n, hp2, lp = xp.shape
    hh = (hp2 - 2) // 2
    whf = bias_tiled.shape[1]
    out_rows = hh + 2 if pad_out_rows else hh
    return pl.pallas_call(
        partial(conv_pool_kernel, pad_out_rows=pad_out_rows),
        out_shape=jax.ShapeDtypeStruct((n, out_rows, whf), jnp.bfloat16),
        grid=(n // bn,),
        in_specs=[
            pl.BlockSpec((bn, hp2, lp), lambda i: (i, 0, 0)),
            pl.BlockSpec(w_banded.shape, lambda i: (0, 0, 0)),
            pl.BlockSpec(bias_tiled.shape, lambda i: (0, 0)),
        ],
        out_specs=pl.BlockSpec((bn, out_rows, whf), lambda i: (i, 0, 0)),
        compiler_params=pltpu.CompilerParams(
            dimension_semantics=("parallel",),
            vmem_limit_bytes=vmem_limit),
    )(xp, w_banded, bias_tiled)


# ---------------------------------------------------------------------------
# Fused fc1 (+ReLU) + fc2 kernel: one pallas_call for the whole classifier.
# ---------------------------------------------------------------------------
def fc_fused_kernel(x_ref, w1_ref, b1_ref, w2_ref, b2_ref, o_ref):
    h = jnp.dot(x_ref[...], w1_ref[...], preferred_element_type=jnp.float32)
    h = jnp.maximum(h + b1_ref[...], 0.0)
    y = jnp.dot(h.astype(jnp.bfloat16), w2_ref[...],
                preferred_element_type=jnp.float32)
    o_ref[...] = y + b2_ref[...]


def fc_fused(x, w1, b1, w2, b2, *, bn, vmem_limit):
    n, din = x.shape
    dh = w1.shape[1]
    dout = w2.shape[1]
    return pl.pallas_call(
        fc_fused_kernel,
        out_shape=jax.ShapeDtypeStruct((n, dout), jnp.float32),
        grid=(n // bn,),
        in_specs=[
            pl.BlockSpec((bn, din), lambda i: (i, 0)),
            pl.BlockSpec((din, dh), lambda i: (0, 0)),
            pl.BlockSpec((1, dh), lambda i: (0, 0)),
            pl.BlockSpec((dh, dout), lambda i: (0, 0)),
            pl.BlockSpec((1, dout), lambda i: (0, 0)),
        ],
        out_specs=pl.BlockSpec((bn, dout), lambda i: (i, 0)),
        compiler_params=pltpu.CompilerParams(
            dimension_semantics=("parallel",),
            vmem_limit_bytes=vmem_limit),
    )(x, w1, b1, w2, b2)


# ---------------------------------------------------------------------------
# Full SimpleCNN forward (NCHW input, like the PyTorch module).
# ---------------------------------------------------------------------------
def simple_cnn_forward(x_nchw, params):
    n, c_in, hs, ws = x_nchw.shape
    cfg = _hw_config()
    bn, n_pad = _conv_block(n, cfg["conv_bn"])
    vmem = cfg["vmem_limit"]

    # NHWC, fold channels into the lane dim (lane-dense), bf16; zero-pad the
    # batch to a whole number of blocks and H by one row on each side (the
    # W-border taps are folded into the banded weights, so no W padding).
    x = jnp.transpose(x_nchw, (0, 2, 3, 1)).astype(jnp.bfloat16)
    x = x.reshape(n, hs, ws * c_in)
    x = jnp.pad(x, ((0, n_pad - n), (1, 1), (0, 0)))       # (n_pad, 34, 96)

    # conv1 + ReLU + pool -> (n_pad, 18, 16*32), already H-padded for conv2.
    h1 = conv_pool(x, params["w1b"], params["b1t"], bn=bn,
                   pad_out_rows=True, vmem_limit=vmem)
    # conv2 + ReLU + pool -> (n_pad, 8, 8*64), lane-folded NHWC.
    h2 = conv_pool(h1, params["w2b"], params["b2t"], bn=bn,
                   pad_out_rows=False, vmem_limit=vmem)

    # Lane-folded NHWC flatten; wf1m rows were pre-permuted to match PyTorch's
    # NCHW x.view(-1, 64*8*8), so no activation transpose is needed in HBM.
    feat = h2.reshape(n_pad, h2.shape[1] * h2.shape[2])    # (n_pad, 4096)
    bn_fc = _fc_block(n_pad, cfg["fc_bn"])
    out = fc_fused(feat, params["wf1m"], params["bf1r"],
                   params["wf2m"], params["bf2r"], bn=bn_fc, vmem_limit=vmem)
    return out[:n]


# ---------------------------------------------------------------------------
# Parameters: raw (f32, PyTorch-equivalent layout) + kernel-ready forms.
# ---------------------------------------------------------------------------
def init_params(key):
    ks = jax.random.split(key, 8)
    return {
        # conv weights directly in HWIO (3,3,Cin,Cout)
        "w1": 0.05 * jax.random.normal(ks[0], (3, 3, 3, 32), jnp.float32),
        "b1": 0.05 * jax.random.normal(ks[1], (32,), jnp.float32),
        "w2": 0.05 * jax.random.normal(ks[2], (3, 3, 32, 64), jnp.float32),
        "b2": 0.05 * jax.random.normal(ks[3], (64,), jnp.float32),
        # fc weights as (in, out) so forward is x @ W + b; wf1 rows NCHW order
        "wf1": 0.02 * jax.random.normal(ks[4], (64 * 8 * 8, 128), jnp.float32),
        "bf1": 0.02 * jax.random.normal(ks[5], (128,), jnp.float32),
        "wf2": 0.02 * jax.random.normal(ks[6], (128, 10), jnp.float32),
        "bf2": 0.02 * jax.random.normal(ks[7], (10,), jnp.float32),
    }


def _banded_conv_pool_weights(w_hwio, spatial):
    """(3,3,C,F) HWIO -> (3, W*C, 2*(W//2)*F) block-banded matrices.

    B[ky, (2*wh + p + kx - 1)*C + c, p*Wh*F + wh*F + f] = w[ky, kx, c, f]
    (taps falling outside [0, W) are dropped -> SAME padding along W), so that
    sum_ky  x_rows[ky] @ B[ky]  yields the conv outputs for the even (p=0) and
    odd (p=1) columns in the two lane halves; the 2x2 W-pool is then a max of
    those halves.  One-time numpy prep, done outside the kernels.
    """
    _, _, c_in, f_out = w_hwio.shape
    w_sp = spatial
    wh_n = w_sp // 2
    lp = w_sp * c_in
    b = np.zeros((3, lp, 2 * wh_n * f_out), dtype=np.float32)
    w_np = np.asarray(w_hwio, dtype=np.float32)
    for ky in range(3):
        for kx in range(3):
            for parity in range(2):
                for wh in range(wh_n):
                    w_in = 2 * wh + parity + kx - 1
                    if 0 <= w_in < w_sp:
                        r0 = w_in * c_in
                        c0 = parity * wh_n * f_out + wh * f_out
                        b[ky, r0:r0 + c_in, c0:c0 + f_out] = w_np[ky, kx]
    return jnp.asarray(b, dtype=jnp.bfloat16)


def prepare_params(raw):
    """One-time parameter prep: banded conv+pool weights, W-tiled biases, and
    fc1 rows permuted from PyTorch's NCHW flatten to our lane-folded NHWC."""
    wf1_perm = jnp.transpose(raw["wf1"].reshape(64, 8, 8, 128),
                             (1, 2, 0, 3)).reshape(64 * 8 * 8, 128)
    return {
        "w1b": _banded_conv_pool_weights(raw["w1"], spatial=32),
        "b1t": jnp.tile(raw["b1"], 16).reshape(1, 16 * 32).astype(jnp.float32),
        "w2b": _banded_conv_pool_weights(raw["w2"], spatial=16),
        "b2t": jnp.tile(raw["b2"], 8).reshape(1, 8 * 64).astype(jnp.float32),
        "wf1m": wf1_perm.astype(jnp.bfloat16),
        "bf1r": raw["bf1"].reshape(1, 128).astype(jnp.float32),
        "wf2m": raw["wf2"].astype(jnp.bfloat16),
        "bf2r": raw["bf2"].reshape(1, 10).astype(jnp.float32),
    }


# ---------------------------------------------------------------------------
# Pure-JAX f32 reference (correctness check only).
# ---------------------------------------------------------------------------
def reference_forward(x_nchw, raw):
    x = jnp.transpose(x_nchw, (0, 2, 3, 1))

    def block(x, w, b):
        y = lax.conv_general_dilated(
            x, w, window_strides=(1, 1), padding="SAME",
            dimension_numbers=("NHWC", "HWIO", "NHWC"),
            precision=lax.Precision.HIGHEST)
        y = jax.nn.relu(y + b)
        return lax.reduce_window(y, -jnp.inf, lax.max,
                                 (1, 2, 2, 1), (1, 2, 2, 1), "VALID")

    x = block(x, raw["w1"], raw["b1"])
    x = block(x, raw["w2"], raw["b2"])
    x = jnp.transpose(x, (0, 3, 1, 2)).reshape(x.shape[0], -1)   # NCHW flatten
    x = jax.nn.relu(x @ raw["wf1"] + raw["bf1"])
    return x @ raw["wf2"] + raw["bf2"]


if __name__ == "__main__":
    key = jax.random.PRNGKey(0)
    kx, kp = jax.random.split(key)
    # fc1 expects 64*8*8 features => input spatial size must be 32x32.
    x = jax.random.normal(kx, (2, 3, 32, 32), jnp.float32)
    raw = init_params(kp)
    params = prepare_params(raw)

    fwd = jax.jit(simple_cnn_forward)
    out = jax.block_until_ready(fwd(x, params))
    ref = jax.block_until_ready(reference_forward(x, raw))

    assert out.shape == (2, 10), out.shape
    assert np.allclose(np.asarray(out), np.asarray(ref), rtol=2e-2, atol=2e-2), (
        "Pallas output deviates from reference")
    print("KERNEL_OK")
</pallas_src>

<mosaic_0001>
module attributes {stable_mosaic.version = 11 : i64} {
  func.func @conv_pool_kernel(%arg0: i32, %arg1: memref<2x34x96xbf16, #tpu.memory_space<vmem>>, %arg2: memref<3x96x1024xbf16, #tpu.memory_space<vmem>>, %arg3: memref<1x512xf32, #tpu.memory_space<vmem>>, %arg4: memref<2x18x512xbf16, #tpu.memory_space<vmem>>) attributes {dimension_semantics = [#tpu.dimension_semantics<parallel>], iteration_bounds = array<i64: 1>, scalar_prefetch = 0 : i64, scratch_operands = 0 : i64, tpu.core_type = #tpu.core_type<tc>, window_params = [{transform_indices = @transform_0, window_bounds = array<i64: 2, 34, 96>}, {pipeline_mode = #tpu.pipeline_mode<synchronous>, transform_indices = @transform_1, window_bounds = array<i64: 3, 96, 1024>}, {pipeline_mode = #tpu.pipeline_mode<synchronous>, transform_indices = @transform_2, window_bounds = array<i64: 1, 512>}, {transform_indices = @transform_3, window_bounds = array<i64: 2, 18, 512>}]} {
    %c0 = arith.constant 0 : index
    %c0_0 = arith.constant 0 : index
    %c0_1 = arith.constant 0 : index
    %0 = vector.load %arg1[%c0, %c0_0, %c0_1] : memref<2x34x96xbf16, #tpu.memory_space<vmem>>, vector<2x32x96xbf16>
    %1 = vector.shape_cast %0 : vector<2x32x96xbf16> to vector<64x96xbf16>
    %c0_2 = arith.constant 0 : index
    %c0_3 = arith.constant 0 : index
    %c0_4 = arith.constant 0 : index
    %2 = vector.load %arg2[%c0_2, %c0_3, %c0_4] : memref<3x96x1024xbf16, #tpu.memory_space<vmem>>, vector<1x96x1024xbf16>
    %3 = vector.shape_cast %2 : vector<1x96x1024xbf16> to vector<96x1024xbf16>
    %cst = arith.constant dense<0.000000e+00> : vector<64x1024xf32>
    %4 = tpu.matmul %1, %3, %cst {dimension_numbers = #tpu.dot_dimension_numbers<[1], [0], [0], [1], [0, 0, 1, 1], [], []>} : vector<64x96xbf16>, vector<96x1024xbf16>, vector<64x1024xf32> -> vector<64x1024xf32>
    %c0_5 = arith.constant 0 : index
    %c1 = arith.constant 1 : index
    %c0_6 = arith.constant 0 : index
    %5 = vector.load %arg1[%c0_5, %c1, %c0_6] : memref<2x34x96xbf16, #tpu.memory_space<vmem>>, vector<2x32x96xbf16>
    %6 = vector.shape_cast %5 : vector<2x32x96xbf16> to vector<64x96xbf16>
    %c1_7 = arith.constant 1 : index
    %c0_8 = arith.constant 0 : index
    %c0_9 = arith.constant 0 : index
    %7 = vector.load %arg2[%c1_7, %c0_8, %c0_9] : memref<3x96x1024xbf16, #tpu.memory_space<vmem>>, vector<1x96x1024xbf16>
    %8 = vector.shape_cast %7 : vector<1x96x1024xbf16> to vector<96x1024xbf16>
    %cst_10 = arith.constant dense<0.000000e+00> : vector<64x1024xf32>
    %9 = tpu.matmul %6, %8, %cst_10 {dimension_numbers = #tpu.dot_dimension_numbers<[1], [0], [0], [1], [0, 0, 1, 1], [], []>} : vector<64x96xbf16>, vector<96x1024xbf16>, vector<64x1024xf32> -> vector<64x1024xf32>
    %10 = arith.addf %4, %9 : vector<64x1024xf32>
    %c0_11 = arith.constant 0 : index
    %c2 = arith.constant 2 : index
    %c0_12 = arith.constant 0 : index
    %11 = vector.load %arg1[%c0_11, %c2, %c0_12] : memref<2x34x96xbf16, #tpu.memory_space<vmem>>, vector<2x32x96xbf16>
    %12 = vector.shape_cast %11 : vector<2x32x96xbf16> to vector<64x96xbf16>
    %c2_13 = arith.constant 2 : index
    %c0_14 = arith.constant 0 : index
    %c0_15 = arith.constant 0 : index
    %13 = vector.load %arg2[%c2_13, %c0_14, %c0_15] : memref<3x96x1024xbf16, #tpu.memory_space<vmem>>, vector<1x96x1024xbf16>
    %14 = vector.shape_cast %13 : vector<1x96x1024xbf16> to vector<96x1024xbf16>
    %cst_16 = arith.constant dense<0.000000e+00> : vector<64x1024xf32>
    %15 = tpu.matmul %12, %14, %cst_16 {dimension_numbers = #tpu.dot_dimension_numbers<[1], [0], [0], [1], [0, 0, 1, 1], [], []>} : vector<64x96xbf16>, vector<96x1024xbf16>, vector<64x1024xf32> -> vector<64x1024xf32>
    %16 = arith.addf %10, %15 : vector<64x1024xf32>
    %17 = vector.extract_strided_slice %16 {offsets = [0, 0], sizes = [64, 512], strides = [1, 1]} : vector<64x1024xf32> to vector<64x512xf32>
    %18 = vector.extract_strided_slice %16 {offsets = [0, 512], sizes = [64, 512], strides = [1, 1]} : vector<64x1024xf32> to vector<64x512xf32>
    %19 = arith.maximumf %17, %18 : vector<64x512xf32>
    %20 = vector.shape_cast %19 : vector<64x512xf32> to vector<2x16x2x512xf32>
    %21 = vector.extract_strided_slice %20 {offsets = [0, 0, 0, 0], sizes = [2, 16, 1, 512], strides = [1, 1, 1, 1]} : vector<2x16x2x512xf32> to vector<2x16x1x512xf32>
    %22 = vector.shape_cast %21 : vector<2x16x1x512xf32> to vector<2x16x512xf32>
    %23 = vector.extract_strided_slice %20 {offsets = [0, 0, 1, 0], sizes = [2, 16, 1, 512], strides = [1, 1, 1, 1]} : vector<2x16x2x512xf32> to vector<2x16x1x512xf32>
    %24 = vector.shape_cast %23 : vector<2x16x1x512xf32> to vector<2x16x512xf32>
    %25 = arith.maximumf %22, %24 : vector<2x16x512xf32>
    %c0_17 = arith.constant 0 : index
    %c0_18 = arith.constant 0 : index
    %26 = vector.load %arg3[%c0_17, %c0_18] : memref<1x512xf32, #tpu.memory_space<vmem>>, vector<1x512xf32>
    %27 = vector.shape_cast %26 : vector<1x512xf32> to vector<1x1x512xf32>
    %28 = vector.broadcast %27 : vector<1x1x512xf32> to vector<2x16x512xf32>
    %29 = arith.addf %25, %28 : vector<2x16x512xf32>
    %cst_19 = arith.constant 0.000000e+00 : f32
    %30 = vector.broadcast %cst_19 : f32 to vector<2x16x512xf32>
    %31 = arith.maximumf %29, %30 : vector<2x16x512xf32>
    %32 = arith.truncf %31 : vector<2x16x512xf32> to vector<2x16x512xbf16>
    %cst_20 = arith.constant 0.000000e+00 : bf16
    %33 = vector.broadcast %cst_20 : bf16 to vector<2x18x512xbf16>
    %c0_21 = arith.constant 0 : index
    %c0_22 = arith.constant 0 : index
    %c0_23 = arith.constant 0 : index
    %34 = vector.load %arg4[%c0_21, %c0_22, %c0_23] : memref<2x18x512xbf16, #tpu.memory_space<vmem>>, vector<2x18x512xbf16>
    tpu.vector_store %arg4[%c0_21, %c0_22, %c0_23], %33 {strides = array<i32>} : memref<2x18x512xbf16, #tpu.memory_space<vmem>>, vector<2x18x512xbf16>,
    %c0_24 = arith.constant 0 : index
    %c1_25 = arith.constant 1 : index
    %c0_26 = arith.constant 0 : index
    %35 = vector.load %arg4[%c0_24, %c1_25, %c0_26] : memref<2x18x512xbf16, #tpu.memory_space<vmem>>, vector<2x16x512xbf16>
    tpu.vector_store %arg4[%c0_24, %c1_25, %c0_26], %32 {strides = array<i32>} : memref<2x18x512xbf16, #tpu.memory_space<vmem>>, vector<2x16x512xbf16>,
    return
  }
  func.func @transform_0(%arg0: i32) -> (i32, i32, i32) {
    %c0_i32 = arith.constant 0 : i32
    %c0_i32_0 = arith.constant 0 : i32
    %c0_i32_1 = arith.constant 0 : i32
    return %arg0, %c0_i32, %c0_i32_0 : i32, i32, i32
  }
  func.func @transform_1(%arg0: i32) -> (i32, i32, i32) {
    %c0_i32 = arith.constant 0 : i32
    %c0_i32_0 = arith.constant 0 : i32
    %c0_i32_1 = arith.constant 0 : i32
    %c0_i32_2 = arith.constant 0 : i32
    return %c0_i32, %c0_i32_0, %c0_i32_1 : i32, i32, i32
  }
  func.func @transform_2(%arg0: i32) -> (i32, i32) {
    %c0_i32 = arith.constant 0 : i32
    %c0_i32_0 = arith.constant 0 : i32
    %c0_i32_1 = arith.constant 0 : i32
    return %c0_i32, %c0_i32_0 : i32, i32
  }
  func.func @transform_3(%arg0: i32) -> (i32, i32, i32) {
    %c0_i32 = arith.constant 0 : i32
    %c0_i32_0 = arith.constant 0 : i32
    %c0_i32_1 = arith.constant 0 : i32
    return %arg0, %c0_i32, %c0_i32_0 : i32, i32, i32
  }
}

module attributes {stable_mosaic.version = 11 : i64} {
  func.func @conv_pool_kernel(%arg0: i32, %arg1: memref<2x18x512xbf16, #tpu.memory_space<vmem>>, %arg2: memref<3x512x1024xbf16, #tpu.memory_space<vmem>>, %arg3: memref<1x512xf32, #tpu.memory_space<vmem>>, %arg4: memref<2x8x512xbf16, #tpu.memory_space<vmem>>) attributes {dimension_semantics = [#tpu.dimension_semantics<parallel>], iteration_bounds = array<i64: 1>, scalar_prefetch = 0 : i64, scratch_operands = 0 : i64, tpu.core_type = #tpu.core_type<tc>, window_params = [{transform_indices = @transform_0, window_bounds = array<i64: 2, 18, 512>}, {pipeline_mode = #tpu.pipeline_mode<synchronous>, transform_indices = @transform_1, window_bounds = array<i64: 3, 512, 1024>}, {pipeline_mode = #tpu.pipeline_mode<synchronous>, transform_indices = @transform_2, window_bounds = array<i64: 1, 512>}, {transform_indices = @transform_3, window_bounds = array<i64: 2, 8, 512>}]} {
    %c0 = arith.constant 0 : index
    %c0_0 = arith.constant 0 : index
    %c0_1 = arith.constant 0 : index
    %0 = vector.load %arg1[%c0, %c0_0, %c0_1] : memref<2x18x512xbf16, #tpu.memory_space<vmem>>, vector<2x16x512xbf16>
    %1 = vector.shape_cast %0 : vector<2x16x512xbf16> to vector<32x512xbf16>
    %c0_2 = arith.constant 0 : index
    %c0_3 = arith.constant 0 : index
    %c0_4 = arith.constant 0 : index
    %2 = vector.load %arg2[%c0_2, %c0_3, %c0_4] : memref<3x512x1024xbf16, #tpu.memory_space<vmem>>, vector<1x512x1024xbf16>
    %3 = vector.shape_cast %2 : vector<1x512x1024xbf16> to vector<512x1024xbf16>
    %cst = arith.constant dense<0.000000e+00> : vector<32x1024xf32>
    %4 = tpu.matmul %1, %3, %cst {dimension_numbers = #tpu.dot_dimension_numbers<[1], [0], [0], [1], [0, 0, 1, 1], [], []>} : vector<32x512xbf16>, vector<512x1024xbf16>, vector<32x1024xf32> -> vector<32x1024xf32>
    %c0_5 = arith.constant 0 : index
    %c1 = arith.constant 1 : index
    %c0_6 = arith.constant 0 : index
    %5 = vector.load %arg1[%c0_5, %c1, %c0_6] : memref<2x18x512xbf16, #tpu.memory_space<vmem>>, vector<2x16x512xbf16>
    %6 = vector.shape_cast %5 : vector<2x16x512xbf16> to vector<32x512xbf16>
    %c1_7 = arith.constant 1 : index
    %c0_8 = arith.constant 0 : index
    %c0_9 = arith.constant 0 : index
    %7 = vector.load %arg2[%c1_7, %c0_8, %c0_9] : memref<3x512x1024xbf16, #tpu.memory_space<vmem>>, vector<1x512x1024xbf16>
    %8 = vector.shape_cast %7 : vector<1x512x1024xbf16> to vector<512x1024xbf16>
    %cst_10 = arith.constant dense<0.000000e+00> : vector<32x1024xf32>
    %9 = tpu.matmul %6, %8, %cst_10 {dimension_numbers = #tpu.dot_dimension_numbers<[1], [0], [0], [1], [0, 0, 1, 1], [], []>} : vector<32x512xbf16>, vector<512x1024xbf16>, vector<32x1024xf32> -> vector<32x1024xf32>
    %10 = arith.addf %4, %9 : vector<32x1024xf32>
    %c0_11 = arith.constant 0 : index
    %c2 = arith.constant 2 : index
    %c0_12 = arith.constant 0 : index
    %11 = vector.load %arg1[%c0_11, %c2, %c0_12] : memref<2x18x512xbf16, #tpu.memory_space<vmem>>, vector<2x16x512xbf16>
    %12 = vector.shape_cast %11 : vector<2x16x512xbf16> to vector<32x512xbf16>
    %c2_13 = arith.constant 2 : index
    %c0_14 = arith.constant 0 : index
    %c0_15 = arith.constant 0 : index
    %13 = vector.load %arg2[%c2_13, %c0_14, %c0_15] : memref<3x512x1024xbf16, #tpu.memory_space<vmem>>, vector<1x512x1024xbf16>
    %14 = vector.shape_cast %13 : vector<1x512x1024xbf16> to vector<512x1024xbf16>
    %cst_16 = arith.constant dense<0.000000e+00> : vector<32x1024xf32>
    %15 = tpu.matmul %12, %14, %cst_16 {dimension_numbers = #tpu.dot_dimension_numbers<[1], [0], [0], [1], [0, 0, 1, 1], [], []>} : vector<32x512xbf16>, vector<512x1024xbf16>, vector<32x1024xf32> -> vector<32x1024xf32>
    %16 = arith.addf %10, %15 : vector<32x1024xf32>
    %17 = vector.extract_strided_slice %16 {offsets = [0, 0], sizes = [32, 512], strides = [1, 1]} : vector<32x1024xf32> to vector<32x512xf32>
    %18 = vector.extract_strided_slice %16 {offsets = [0, 512], sizes = [32, 512], strides = [1, 1]} : vector<32x1024xf32> to vector<32x512xf32>
    %19 = arith.maximumf %17, %18 : vector<32x512xf32>
    %20 = vector.shape_cast %19 : vector<32x512xf32> to vector<2x8x2x512xf32>
    %21 = vector.extract_strided_slice %20 {offsets = [0, 0, 0, 0], sizes = [2, 8, 1, 512], strides = [1, 1, 1, 1]} : vector<2x8x2x512xf32> to vector<2x8x1x512xf32>
    %22 = vector.shape_cast %21 : vector<2x8x1x512xf32> to vector<2x8x512xf32>
    %23 = vector.extract_strided_slice %20 {offsets = [0, 0, 1, 0], sizes = [2, 8, 1, 512], strides = [1, 1, 1, 1]} : vector<2x8x2x512xf32> to vector<2x8x1x512xf32>
    %24 = vector.shape_cast %23 : vector<2x8x1x512xf32> to vector<2x8x512xf32>
    %25 = arith.maximumf %22, %24 : vector<2x8x512xf32>
    %c0_17 = arith.constant 0 : index
    %c0_18 = arith.constant 0 : index
    %26 = vector.load %arg3[%c0_17, %c0_18] : memref<1x512xf32, #tpu.memory_space<vmem>>, vector<1x512xf32>
    %27 = vector.shape_cast %26 : vector<1x512xf32> to vector<1x1x512xf32>
    %28 = vector.broadcast %27 : vector<1x1x512xf32> to vector<2x8x512xf32>
    %29 = arith.addf %25, %28 : vector<2x8x512xf32>
    %cst_19 = arith.constant 0.000000e+00 : f32
    %30 = vector.broadcast %cst_19 : f32 to vector<2x8x512xf32>
    %31 = arith.maximumf %29, %30 : vector<2x8x512xf32>
    %32 = arith.truncf %31 : vector<2x8x512xf32> to vector<2x8x512xbf16>
    %c0_20 = arith.constant 0 : index
    %c0_21 = arith.constant 0 : index
    %c0_22 = arith.constant 0 : index
    %33 = vector.load %arg4[%c0_20, %c0_21, %c0_22] : memref<2x8x512xbf16, #tpu.memory_space<vmem>>, vector<2x8x512xbf16>
    tpu.vector_store %arg4[%c0_20, %c0_21, %c0_22], %32 {strides = array<i32>} : memref<2x8x512xbf16, #tpu.memory_space<vmem>>, vector<2x8x512xbf16>,
    return
  }
  func.func @transform_0(%arg0: i32) -> (i32, i32, i32) {
    %c0_i32 = arith.constant 0 : i32
    %c0_i32_0 = arith.constant 0 : i32
    %c0_i32_1 = arith.constant 0 : i32
    return %arg0, %c0_i32, %c0_i32_0 : i32, i32, i32
  }
  func.func @transform_1(%arg0: i32) -> (i32, i32, i32) {
    %c0_i32 = arith.constant 0 : i32
    %c0_i32_0 = arith.constant 0 : i32
    %c0_i32_1 = arith.constant 0 : i32
    %c0_i32_2 = arith.constant 0 : i32
    return %c0_i32, %c0_i32_0, %c0_i32_1 : i32, i32, i32
  }
  func.func @transform_2(%arg0: i32) -> (i32, i32) {
    %c0_i32 = arith.constant 0 : i32
    %c0_i32_0 = arith.constant 0 : i32
    %c0_i32_1 = arith.constant 0 : i32
    return %c0_i32, %c0_i32_0 : i32, i32
  }
  func.func @transform_3(%arg0: i32) -> (i32, i32, i32) {
    %c0_i32 = arith.constant 0 : i32
    %c0_i32_0 = arith.constant 0 : i32
    %c0_i32_1 = arith.constant 0 : i32
    return %arg0, %c0_i32, %c0_i32_0 : i32, i32, i32
  }
}

module attributes {stable_mosaic.version = 11 : i64} {
  func.func @fc_fused_kernel(%arg0: i32, %arg1: memref<2x4096xbf16, #tpu.memory_space<vmem>>, %arg2: memref<4096x128xbf16, #tpu.memory_space<vmem>>, %arg3: memref<1x128xf32, #tpu.memory_space<vmem>>, %arg4: memref<128x10xbf16, #tpu.memory_space<vmem>>, %arg5: memref<1x10xf32, #tpu.memory_space<vmem>>, %arg6: memref<2x10xf32, #tpu.memory_space<vmem>>) attributes {dimension_semantics = [#tpu.dimension_semantics<parallel>], iteration_bounds = array<i64: 1>, scalar_prefetch = 0 : i64, scratch_operands = 0 : i64, tpu.core_type = #tpu.core_type<tc>, window_params = [{transform_indices = @transform_0, window_bounds = array<i64: 2, 4096>}, {pipeline_mode = #tpu.pipeline_mode<synchronous>, transform_indices = @transform_1, window_bounds = array<i64: 4096, 128>}, {pipeline_mode = #tpu.pipeline_mode<synchronous>, transform_indices = @transform_2, window_bounds = array<i64: 1, 128>}, {pipeline_mode = #tpu.pipeline_mode<synchronous>, transform_indices = @transform_3, window_bounds = array<i64: 128, 10>}, {pipeline_mode = #tpu.pipeline_mode<synchronous>, transform_indices = @transform_4, window_bounds = array<i64: 1, 10>}, {transform_indices = @transform_5, window_bounds = array<i64: 2, 10>}]} {
    %c0 = arith.constant 0 : index
    %c0_0 = arith.constant 0 : index
    %0 = vector.load %arg1[%c0, %c0_0] : memref<2x4096xbf16, #tpu.memory_space<vmem>>, vector<2x4096xbf16>
    %c0_1 = arith.constant 0 : index
    %c0_2 = arith.constant 0 : index
    %1 = vector.load %arg2[%c0_1, %c0_2] : memref<4096x128xbf16, #tpu.memory_space<vmem>>, vector<4096x128xbf16>
    %cst = arith.constant dense<0.000000e+00> : vector<2x128xf32>
    %2 = tpu.matmul %0, %1, %cst {dimension_numbers = #tpu.dot_dimension_numbers<[1], [0], [0], [1], [0, 0, 1, 1], [], []>} : vector<2x4096xbf16>, vector<4096x128xbf16>, vector<2x128xf32> -> vector<2x128xf32>
    %c0_3 = arith.constant 0 : index
    %c0_4 = arith.constant 0 : index
    %3 = vector.load %arg3[%c0_3, %c0_4] : memref<1x128xf32, #tpu.memory_space<vmem>>, vector<1x128xf32>
    %4 = vector.broadcast %3 : vector<1x128xf32> to vector<2x128xf32>
    %5 = arith.addf %2, %4 : vector<2x128xf32>
    %cst_5 = arith.constant 0.000000e+00 : f32
    %6 = vector.broadcast %cst_5 : f32 to vector<2x128xf32>
    %7 = arith.maximumf %5, %6 : vector<2x128xf32>
    %8 = arith.truncf %7 : vector<2x128xf32> to vector<2x128xbf16>
    %c0_6 = arith.constant 0 : index
    %c0_7 = arith.constant 0 : index
    %9 = vector.load %arg4[%c0_6, %c0_7] : memref<128x10xbf16, #tpu.memory_space<vmem>>, vector<128x10xbf16>
    %cst_8 = arith.constant dense<0.000000e+00> : vector<2x10xf32>
    %10 = tpu.matmul %8, %9, %cst_8 {dimension_numbers = #tpu.dot_dimension_numbers<[1], [0], [0], [1], [0, 0, 1, 1], [], []>} : vector<2x128xbf16>, vector<128x10xbf16>, vector<2x10xf32> -> vector<2x10xf32>
    %c0_9 = arith.constant 0 : index
    %c0_10 = arith.constant 0 : index
    %11 = vector.load %arg5[%c0_9, %c0_10] : memref<1x10xf32, #tpu.memory_space<vmem>>, vector<1x10xf32>
    %12 = vector.broadcast %11 : vector<1x10xf32> to vector<2x10xf32>
    %13 = arith.addf %10, %12 : vector<2x10xf32>
    %c0_11 = arith.constant 0 : index
    %c0_12 = arith.constant 0 : index
    %14 = vector.load %arg6[%c0_11, %c0_12] : memref<2x10xf32, #tpu.memory_space<vmem>>, vector<2x10xf32>
    tpu.vector_store %arg6[%c0_11, %c0_12], %13 {strides = array<i32>} : memref<2x10xf32, #tpu.memory_space<vmem>>, vector<2x10xf32>,
    return
  }
  func.func @transform_0(%arg0: i32) -> (i32, i32) {
    %c0_i32 = arith.constant 0 : i32
    %c0_i32_0 = arith.constant 0 : i32
    return %arg0, %c0_i32 : i32, i32
  }
  func.func @transform_1(%arg0: i32) -> (i32, i32) {
    %c0_i32 = arith.constant 0 : i32
    %c0_i32_0 = arith.constant 0 : i32
    %c0_i32_1 = arith.constant 0 : i32
    return %c0_i32, %c0_i32_0 : i32, i32
  }
  func.func @transform_2(%arg0: i32) -> (i32, i32) {
    %c0_i32 = arith.constant 0 : i32
    %c0_i32_0 = arith.constant 0 : i32
    %c0_i32_1 = arith.constant 0 : i32
    return %c0_i32, %c0_i32_0 : i32, i32
  }
  func.func @transform_3(%arg0: i32) -> (i32, i32) {
    %c0_i32 = arith.constant 0 : i32
    %c0_i32_0 = arith.constant 0 : i32
    %c0_i32_1 = arith.constant 0 : i32
    return %c0_i32, %c0_i32_0 : i32, i32
  }
  func.func @transform_4(%arg0: i32) -> (i32, i32) {
    %c0_i32 = arith.constant 0 : i32
    %c0_i32_0 = arith.constant 0 : i32
    %c0_i32_1 = arith.constant 0 : i32
    return %c0_i32, %c0_i32_0 : i32, i32
  }
  func.func @transform_5(%arg0: i32) -> (i32, i32) {
    %c0_i32 = arith.constant 0 : i32
    %c0_i32_0 = arith.constant 0 : i32
    return %arg0, %c0_i32 : i32, i32
  }
}

</mosaic_0001>

<bundles_post_ra>
// kernel: simple_cnn_forward.5
= control target key start
LH: loop header
LB: loop body
LE: loop exit
PB: predicated region body
PF: predicated region fallthrough
CT: control target
= control target key end

     0   :  { %v553_v28 = vlaneseq  ;;  %v4025_v36 = vmov 1966171168   ;;  %s4927_s0 = inlined_call_operand.vmem [shape: bf16[2,4096], index: 0, kind: input, shape index: {}]   ;;  %s4928_s1 = inlined_call_operand.vmem [shape: bf16[4096,128], index: 1, kind: input, shape index: {}]   ;;  %s4929_s2 = inlined_call_operand.vmem [shape: f32[1,128], index: 2, kind: input, shape index: {}]   ;;  %s4930_s3 = inlined_call_operand.vmem [shape: bf16[128,10], index: 3, kind: input, shape index: {}]   ;;  %s4931_s4 = inlined_call_operand.vmem [shape: f32[1,10], index: 4, kind: input, shape index: {}]   ;;  %s4932_s5 = inlined_call_operand.hbm [shape: f32[2,10], index: 5, kind: output, shape index: {}]  }
   0x1   :  { %v3733_v0 = vld [vmem:[%s4928_s1 + $0x40] sm:$0xff]   ;;  %v3737_v4 = vld [vmem:[%s4928_s1 + $0x48] sm:$0xff]   ;;  %v3741_v8 = vld [vmem:[%s4928_s1 + $0x50] sm:$0xff]   ;;  %v551_v37 = vunpack.c.l.s4 %v4025_v36 }
   0x2   :  { %v3734_v1 = vld [vmem:[%s4928_s1 + $0xc0] sm:$0xff]   ;;  %3348 = vmatprep.subr.bf16.mxu0 %v3733_v0  ;;  %v3738_v5 = vld [vmem:[%s4928_s1 + $0xc8] sm:$0xff]   ;;  %v3742_v9 = vld [vmem:[%s4928_s1 + $0xd0] sm:$0xff]   ;;  %v554_v33 = vshrl.u32 %v553_v28, 7 }
   0x3   :  { %v3735_v2 = vld [vmem:[%s4928_s1] sm:$0xff]   ;;  %3370 = vmatprep.subr.bf16.mxu1 %v3734_v1  ;;  %v3739_v6 = vld [vmem:[%s4928_s1 + $0x8] sm:$0xff]   ;;  %v3743_v10 = vld [vmem:[%s4928_s1 + $0x10] sm:$0xff]   ;;  %v552_v40 = vunpack.c.0.s8 %v551_v37 }
   0x4   :  { %v3736_v3 = vld [vmem:[%s4928_s1 + $0x80] sm:$0xff]   ;;  %3349 = vmatpush3.bf16.msra.mxu0 %v3735_v2  ;;  %v3740_v7 = vld [vmem:[%s4928_s1 + $0x88] sm:$0xff]   ;;  %v3744_v11 = vld [vmem:[%s4928_s1 + $0x90] sm:$0xff]  }
   0x5   :  { %3371 = vmatpush3.bf16.msra.mxu1 %v3736_v3  ;;  %3350 = vmatprep.subr.bf16.mxu0 %v3737_v4  ;;  %v3745_v12 = vld [vmem:[%s4928_s1 + $0x58] sm:$0xff]   ;;  %v3749_v16 = vld [vmem:[%s4928_s1 + $0x60] sm:$0xff]   ;;  %v3753_v20 = vld [vmem:[%s4928_s1 + $0x68] sm:$0xff]   ;;  %v4164_v41 = vsub.s32 %v552_v40, %v554_v33 }
   0x6   :  { %3372 = vmatprep.subr.bf16.mxu1 %v3738_v5  ;;  %v3746_v13 = vld [vmem:[%s4928_s1 + $0xd8] sm:$0xff]   ;;  %v3750_v17 = vld [vmem:[%s4928_s1 + $0xe0] sm:$0xff]   ;;  %v3754_v21 = vld [vmem:[%s4928_s1 + $0xe8] sm:$0xff]  }
   0x7   :  { %v3747_v14 = vld [vmem:[%s4928_s1 + $0x18] sm:$0xff]   ;;  %v3751_v18 = vld [vmem:[%s4928_s1 + $0x20] sm:$0xff]   ;;  %v3755_v22 = vld [vmem:[%s4928_s1 + $0x28] sm:$0xff]  }
   0x8   :  { %3351 = vmatpush3.bf16.msra.mxu0 %v3739_v6  ;;  %v3748_v15 = vld [vmem:[%s4928_s1 + $0x98] sm:$0xff]   ;;  %v3752_v19 = vld [vmem:[%s4928_s1 + $0xa0] sm:$0xff]   ;;  %v3756_v23 = vld [vmem:[%s4928_s1 + $0xa8] sm:$0xff]  }
   0x9   :  { %3373 = vmatpush3.bf16.msra.mxu1 %v3740_v7  ;;  %3352 = vmatprep.subr.bf16.mxu0 %v3741_v8  ;;  %v3757_v24 = vld [vmem:[%s4928_s1 + $0x70] sm:$0xff]   ;;  %v3761_v29 = vld [vmem:[%s4928_s1 + $0x78] sm:$0xff]   ;;  %v22_v34 = vld [vmem:[%s4927_s0] sm:$0xff] }
   0xa   :  { %3374 = vmatprep.subr.bf16.mxu1 %v3742_v9  ;;  %v3758_v25 = vld [vmem:[%s4928_s1 + $0xf0] sm:$0xff]   ;;  %v3762_v30 = vld [vmem:[%s4928_s1 + $0xf8] sm:$0xff]   ;;  %v3766_v35 = vld [vmem:[%s4928_s1 + $0x140] sm:$0xff]   ;;  %v549_v39 = vcombine.high %v22_v34, %v22_v34  ;;  %v556_v42 = vrot.slane %v22_v34, %v4164_v41 }
   0xb   :  { %v3759_v26 = vld [vmem:[%s4928_s1 + $0x30] sm:$0xff]   ;;  %v3763_v31 = vld [vmem:[%s4928_s1 + $0x38] sm:$0xff]   ;;  %v3767_v38 = vld [vmem:[%s4928_s1 + $0x1c0] sm:$0xff]  }
   0xc   :  { %3353 = vmatpush3.bf16.msra.mxu0 %v3743_v10  ;;  %v3760_v27 = vld [vmem:[%s4928_s1 + $0xb0] sm:$0xff]   ;;  %v3764_v32 = vld [vmem:[%s4928_s1 + $0xb8] sm:$0xff]   ;;  %v4168_v43 = vrot.slane %v549_v39, %v4164_v41  ;;  %v564_v44 = vcombine.high %v556_v42, %v556_v42  ;;  %v572_v45 = vrot.slane %v556_v42, %v4164_v41  ;;  %v3768_v47 = vld [vmem:[%s4928_s1 + $0x100] sm:$0xff]  }
   0xd   :  { %3375 = vmatpush3.bf16.msra.mxu1 %v3744_v11  ;;  %3354 = vmatprep.subr.bf16.mxu0 %v3745_v12  ;;  %v3769_v49 = vld [vmem:[%s4928_s1 + $0x180] sm:$0xff]   ;;  %v3770_v52 = vld [vmem:[%s4928_s1 + $0x148] sm:$0xff]   ;;  %v3774_v58 = vld [vmem:[%s4928_s1 + $0x150] sm:$0xff]  }
   0xe   :  { %3376 = vmatprep.subr.bf16.mxu1 %v3746_v13  ;;  %v565_v46 = vcombine.high %v4168_v43, %v4168_v43  ;;  %v586_v48 = vrot.slane %v564_v44, %v4164_v41  ;;  %v594_v51 = vcombine.high %v572_v45, %v572_v45  ;;  %v3771_v54 = vld [vmem:[%s4928_s1 + $0x1c8] sm:$0xff]   ;;  %v3775_v59 = vld [vmem:[%s4928_s1 + $0x1d0] sm:$0xff]   ;;  %v3778_v62 = vld [vmem:[%s4928_s1 + $0x158] sm:$0xff]  }
   0xf   :  { %v3772_v55 = vld [vmem:[%s4928_s1 + $0x108] sm:$0xff]   ;;  %v3776_v60 = vld [vmem:[%s4928_s1 + $0x110] sm:$0xff]   ;;  %v3779_v63 = vld [vmem:[%s4928_s1 + $0x1d8] sm:$0xff]  }
  0x10   :  { %3355 = vmatpush3.bf16.msra.mxu0 %v3747_v14  ;;  %v593_v50 = vrot.slane %v565_v46, %v4164_v41  ;;  %2345 = vmatprep.mubr.bf16.mxu0 %v586_v48  ;;  %v596_v53 = vcombine.high %v586_v48, %v586_v48  ;;  %v3773_v57 = vld [vmem:[%s4928_s1 + $0x188] sm:$0xff]   ;;  %v3777_v61 = vld [vmem:[%s4928_s1 + $0x190] sm:$0xff]   ;;  %v3780_v0 = vld [vmem:[%s4928_s1 + $0x118] sm:$0xff]  }
  0x11   :  { %3377 = vmatpush3.bf16.msra.mxu1 %v3748_v15  ;;  %3356 = vmatprep.subr.bf16.mxu0 %v3749_v16  ;;  %v3781_v1 = vld [vmem:[%s4928_s1 + $0x198] sm:$0xff]   ;;  %v3782_v2 = vld [vmem:[%s4928_s1 + $0x160] sm:$0xff]   ;;  %v3786_v6 = vld [vmem:[%s4928_s1 + $0x168] sm:$0xff]  }
  0x12   :  { %3378 = vmatprep.subr.bf16.mxu1 %v3750_v17  ;;  %v597_v56 = vcombine.high %v593_v50, %v593_v50  ;;  %2385 = vmatprep.mubr.bf16.mxu1 %v596_v53  ;;  %v3783_v3 = vld [vmem:[%s4928_s1 + $0x1e0] sm:$0xff]   ;;  %v3787_v7 = vld [vmem:[%s4928_s1 + $0x1e8] sm:$0xff]   ;;  %v3790_v10 = vld [vmem:[%s4928_s1 + $0x170] sm:$0xff]  }
  0x13   :  { %v3784_v4 = vld [vmem:[%s4928_s1 + $0x120] sm:$0xff]   ;;  %v3788_v8 = vld [vmem:[%s4928_s1 + $0x128] sm:$0xff]   ;;  %v3791_v11 = vld [vmem:[%s4928_s1 + $0x1f0] sm:$0xff]  }
  0x14   :  { %3357 = vmatpush3.bf16.msra.mxu0 %v3751_v18  ;;  %v3785_v5 = vld [vmem:[%s4928_s1 + $0x1a0] sm:$0xff]   ;;  %v3789_v9 = vld [vmem:[%s4928_s1 + $0x1a8] sm:$0xff]   ;;  %v3792_v12 = vld [vmem:[%s4928_s1 + $0x130] sm:$0xff]   ;;  %v579_v18 = vrot.slane %v4168_v43, %v4164_v41 }
  0x15   :  { %3379 = vmatpush3.bf16.msra.mxu1 %v3752_v19  ;;  %3358 = vmatprep.subr.bf16.mxu0 %v3753_v20  ;;  %v3793_v13 = vld [vmem:[%s4928_s1 + $0x1b0] sm:$0xff]   ;;  %v3794_v14 = vld [vmem:[%s4928_s1 + $0x178] sm:$0xff]   ;;  %v3798_v19 = vld [vmem:[%s4928_s1 + $0x240] sm:$0xff]  }
  0x16   :  { %3380 = vmatprep.subr.bf16.mxu1 %v3754_v21  ;;  %v3795_v15 = vld [vmem:[%s4928_s1 + $0x1f8] sm:$0xff]   ;;  %v3799_v20 = vld [vmem:[%s4928_s1 + $0x2c0] sm:$0xff]   ;;  %v3806_v28 = vld [vmem:[%s4928_s1 + $0x250] sm:$0xff]  }
  0x17   :  { %v3796_v16 = vld [vmem:[%s4928_s1 + $0x138] sm:$0xff]   ;;  %v3800_v21 = vld [vmem:[%s4928_s1 + $0x200] sm:$0xff]   ;;  %v3818_v40 = vld [vmem:[%s4928_s1 + $0x268] sm:$0xff]  }
  0x18   :  { %3359 = vmatpush3.bf16.msra.mxu0 %v3755_v22  ;;  %v3797_v17 = vld [vmem:[%s4928_s1 + $0x1b8] sm:$0xff]   ;;  %v3801_v22 = vld [vmem:[%s4928_s1 + $0x280] sm:$0xff]   ;;  %v3819_v42 = vld [vmem:[%s4928_s1 + $0x2e8] sm:$0xff]  }
  0x19   :  { %3381 = vmatpush3.bf16.msra.mxu1 %v3756_v23  ;;  %3360 = vmatprep.subr.bf16.mxu0 %v3757_v24  ;;  %v595_v23 = vcombine.high %v579_v18, %v579_v18  ;;  %v3802_v24 = vld [vmem:[%s4928_s1 + $0x248] sm:$0xff]   ;;  %v3811_v33 = vld [vmem:[%s4928_s1 + $0x2d8] sm:$0xff]   ;;  %v3814_v36 = vld [vmem:[%s4928_s1 + $0x260] sm:$0xff]  }
  0x1a   :  { %3382 = vmatprep.subr.bf16.mxu1 %v3758_v25  ;;  %v3803_v25 = vld [vmem:[%s4928_s1 + $0x2c8] sm:$0xff]   ;;  %v3812_v34 = vld [vmem:[%s4928_s1 + $0x218] sm:$0xff]   ;;  %v3815_v37 = vld [vmem:[%s4928_s1 + $0x2e0] sm:$0xff]  }
  0x1b   :  { %v3817_v39 = vld [vmem:[%s4928_s1 + $0x2a0] sm:$0xff]   ;;  %v3820_v43 = vld [vmem:[%s4928_s1 + $0x228] sm:$0xff]  }
  0x1c   :  { %3361 = vmatpush3.bf16.msra.mxu0 %v3759_v26  ;;  %v3804_v26 = vld [vmem:[%s4928_s1 + $0x208] sm:$0xff]  }
  0x1d   :  { %3383 = vmatpush3.bf16.msra.mxu1 %v3760_v27  ;;  %3362 = vmatprep.subr.bf16.mxu0 %v3761_v29  ;;  %v3805_v27 = vld [vmem:[%s4928_s1 + $0x288] sm:$0xff]   ;;  %v3807_v29 = vld [vmem:[%s4928_s1 + $0x2d0] sm:$0xff]  }
  0x1e   :  { %3384 = vmatprep.subr.bf16.mxu1 %v3762_v30  ;;  %v3808_v30 = vld [vmem:[%s4928_s1 + $0x210] sm:$0xff]   ;;  %v3821_v44 = vld [vmem:[%s4928_s1 + $0x2a8] sm:$0xff]  }
  0x1f   :  { %v23_v46 = vld [vmem:[%s4927_s0 + $0x8] sm:$0xff] }
  0x20   :  { %3363 = vmatpush3.bf16.msra.mxu0 %v3763_v31  ;;  %v3809_v31 = vld [vmem:[%s4928_s1 + $0x290] sm:$0xff]   ;;  %v605_v48 = vrot.slane %v23_v46, %v4164_v41 }
  0x21   :  { %3385 = vmatpush3.bf16.msra.mxu1 %v3764_v32  ;;  %3392 = vmatprep.subr.bf16.mxu0 %v3766_v35  ;;  %v3810_v32 = vld [vmem:[%s4928_s1 + $0x258] sm:$0xff]  }
  0x22   :  { %3414 = vmatprep.subr.bf16.mxu1 %v3767_v38  ;;  %v3813_v35 = vld [vmem:[%s4928_s1 + $0x298] sm:$0xff]   ;;  %v3816_v38 = vld [vmem:[%s4928_s1 + $0x220] sm:$0xff]  }
  0x23   :  { %2346 = vmatmul.mubr.bf16.vlgmr.msra.gmra.mrb[0].mxu0 %v572_v45  ;;  %v3822_v45 = vld [vmem:[%s4928_s1 + $0x270] sm:$0xff]  }
  0x24   :  { %3393 = vmatpush3.bf16.msra.mxu0 %v3768_v47  ;;  %2386 = vmatmul.mubr.bf16.vlgmr.msra.gmra.mrb[0].mxu1 %v594_v51  ;;  %v3823_v47 = vld [vmem:[%s4928_s1 + $0x2f0] sm:$0xff]  }
  0x25   :  { %3394 = vmatprep.subr.bf16.mxu0 %v3770_v52  ;;  %3415 = vmatpush3.bf16.msra.mxu1 %v3769_v49  ;;  %v598_v49 = vcombine.high %v23_v46, %v23_v46  ;;  %v3825_v51 = vld [vmem:[%s4928_s1 + $0x2b0] sm:$0xff]   ;;  %v613_v52 = vcombine.high %v605_v48, %v605_v48 }
  0x26   :  { %2425 = vmatprep.mubr.bf16.mxu0 %v593_v50  ;;  %3416 = vmatprep.subr.bf16.mxu1 %v3771_v54  ;;  %v3824_v50 = vld [vmem:[%s4928_s1 + $0x230] sm:$0xff]   ;;  %v3826_v54 = vld [vmem:[%s4928_s1 + $0x278] sm:$0xff]  }
  0x27   :  { %2465 = vmatprep.mubr.bf16.mxu1 %v597_v56  ;;  %v4356_v53 = vrot.slane %v598_v49, %v4164_v41  ;;  %v635_v56 = vrot.slane %v613_v52, %v4164_v41  ;;  %v3873_v46 = vld [vmem:[%s4928_s1 + $0x410] sm:$0xff]   ;;  %v3876_v49 = vld [vmem:[%s4928_s1 + $0x4d8] sm:$0xff]   ;;  %v3879_v52 = vld [vmem:[%s4928_s1 + $0x460] sm:$0xff]  }
  0x28   :  { %3395 = vmatpush3.bf16.msra.mxu0 %v3772_v55  ;;  %v3827_v55 = vld [vmem:[%s4928_s1 + $0x2f8] sm:$0xff]  }
  0x29   :  { %3396 = vmatprep.subr.bf16.mxu0 %v3774_v58  ;;  %3417 = vmatpush3.bf16.msra.mxu1 %v3773_v57  ;;  %v614_v57 = vcombine.high %v4356_v53, %v4356_v53  ;;  %v3828_v58 = vld [vmem:[%s4928_s1 + $0x238] sm:$0xff]  }
  0x2a   :  { %3418 = vmatprep.subr.bf16.mxu1 %v3775_v59  ;;  %v3829_v59 = vld [vmem:[%s4928_s1 + $0x2b8] sm:$0xff]  }
  0x2c   :  { %3397 = vmatpush3.bf16.msra.mxu0 %v3776_v60  ;;  %v645_v60 = vcombine.high %v635_v56, %v635_v56 }
  0x2d   :  { %3398 = vmatprep.subr.bf16.mxu0 %v3778_v62  ;;  %3419 = vmatpush3.bf16.msra.mxu1 %v3777_v61  ;;  %v621_v61 = vrot.slane %v605_v48, %v4164_v41  ;;  %v3830_v62 = vld [vmem:[%s4928_s1 + $0x340] sm:$0xff]   ;;  %v3875_v48 = vld [vmem:[%s4928_s1 + $0x458] sm:$0xff]  }
  0x2e   :  { %3420 = vmatprep.subr.bf16.mxu1 %v3779_v63  ;;  %v3831_v63 = vld [vmem:[%s4928_s1 + $0x3c0] sm:$0xff]  }
  0x30   :  { %3399 = vmatpush3.bf16.msra.mxu0 %v3780_v0  ;;  %v642_v0 = vrot.slane %v614_v57, %v4164_v41  ;;  %v3884_v57 = vld [vmem:[%s4928_s1 + $0x4e8] sm:$0xff]  }
  0x31   :  { %3400 = vmatprep.subr.bf16.mxu0 %v3782_v2  ;;  %3421 = vmatpush3.bf16.msra.mxu1 %v3781_v1  ;;  %v3832_v1 = vld [vmem:[%s4928_s1 + $0x300] sm:$0xff]  }
  0x32   :  { %3422 = vmatprep.subr.bf16.mxu1 %v3783_v3  ;;  %v3833_v2 = vld [vmem:[%s4928_s1 + $0x380] sm:$0xff]   ;;  %v643_v3 = vcombine.high %v621_v61, %v621_v61 }
  0x34   :  { %3401 = vmatpush3.bf16.msra.mxu0 %v3784_v4  ;;  %v3834_v4 = vld [vmem:[%s4928_s1 + $0x348] sm:$0xff]  }
  0x35   :  { %3402 = vmatprep.subr.bf16.mxu0 %v3786_v6  ;;  %3423 = vmatpush3.bf16.msra.mxu1 %v3785_v5  ;;  %v3835_v5 = vld [vmem:[%s4928_s1 + $0x3c8] sm:$0xff]   ;;  %v646_v6 = vcombine.high %v642_v0, %v642_v0 }
  0x36   :  { %3424 = vmatprep.subr.bf16.mxu1 %v3787_v7  ;;  %v3836_v7 = vld [vmem:[%s4928_s1 + $0x308] sm:$0xff]  }
  0x38   :  { %3403 = vmatpush3.bf16.msra.mxu0 %v3788_v8  ;;  %v3837_v8 = vld [vmem:[%s4928_s1 + $0x388] sm:$0xff]  }
  0x39   :  { %3404 = vmatprep.subr.bf16.mxu0 %v3790_v10  ;;  %3425 = vmatpush3.bf16.msra.mxu1 %v3789_v9  ;;  %v3838_v9 = vld [vmem:[%s4928_s1 + $0x350] sm:$0xff]  }
  0x3a   :  { %3426 = vmatprep.subr.bf16.mxu1 %v3791_v11  ;;  %v3839_v10 = vld [vmem:[%s4928_s1 + $0x3d0] sm:$0xff]  }
  0x3b   :  { %v3840_v11 = vld [vmem:[%s4928_s1 + $0x310] sm:$0xff]  }
  0x3c   :  { %3405 = vmatpush3.bf16.msra.mxu0 %v3792_v12  ;;  %v3841_v12 = vld [vmem:[%s4928_s1 + $0x390] sm:$0xff]  }
  0x3d   :  { %3406 = vmatprep.subr.bf16.mxu0 %v3794_v14  ;;  %3427 = vmatpush3.bf16.msra.mxu1 %v3793_v13  ;;  %v3842_v13 = vld [vmem:[%s4928_s1 + $0x358] sm:$0xff]  }
  0x3e   :  { %3428 = vmatprep.subr.bf16.mxu1 %v3795_v15  ;;  %v3843_v14 = vld [vmem:[%s4928_s1 + $0x3d8] sm:$0xff]  }
  0x3f   :  { %v3844_v15 = vld [vmem:[%s4928_s1 + $0x318] sm:$0xff]  }
  0x40   :  { %3407 = vmatpush3.bf16.msra.mxu0 %v3796_v16  ;;  %v3845_v16 = vld [vmem:[%s4928_s1 + $0x398] sm:$0xff]  }
  0x41   :  { %3436 = vmatprep.subr.bf16.mxu0 %v3798_v19  ;;  %3429 = vmatpush3.bf16.msra.mxu1 %v3797_v17  ;;  %v3846_v17 = vld [vmem:[%s4928_s1 + $0x360] sm:$0xff]  }
  0x42   :  { %3458 = vmatprep.subr.bf16.mxu1 %v3799_v20  ;;  %v3848_v19 = vld [vmem:[%s4928_s1 + $0x320] sm:$0xff]  }
  0x43   :  { %2426 = vmatmul.mubr.bf16.vlgmr.msra.gmra.mrb[4].mxu0 %v579_v18  ;;  %v3847_v18 = vld [vmem:[%s4928_s1 + $0x3e0] sm:$0xff]  }
  0x44   :  { %3437 = vmatpush3.bf16.msra.mxu0 %v3800_v21  ;;  %2466 = vmatmul.mubr.bf16.vlgmr.msra.gmra.mrb[4].mxu1 %v595_v23  ;;  %v3849_v20 = vld [vmem:[%s4928_s1 + $0x3a0] sm:$0xff]   ;;  %v3850_v21 = vld [vmem:[%s4928_s1 + $0x368] sm:$0xff]  }
  0x45   :  { %3438 = vmatprep.subr.bf16.mxu0 %v3802_v24  ;;  %3459 = vmatpush3.bf16.msra.mxu1 %v3801_v22  ;;  %v3851_v22 = vld [vmem:[%s4928_s1 + $0x3e8] sm:$0xff]  }
  0x46   :  { %3460 = vmatprep.subr.bf16.mxu1 %v3803_v25  ;;  %2505 = vmatprep.mubr.bf16.mxu0 %v635_v56  ;;  %v3852_v23 = vld [vmem:[%s4928_s1 + $0x328] sm:$0xff]   ;;  %v3854_v25 = vld [vmem:[%s4928_s1 + $0x370] sm:$0xff]  }
  0x47   :  { %2545 = vmatprep.mubr.bf16.mxu1 %v645_v60  ;;  %v3853_v24 = vld [vmem:[%s4928_s1 + $0x3a8] sm:$0xff]   ;;  %v3887_v60 = vld [vmem:[%s4928_s1 + $0x470] sm:$0xff]  }
  0x48   :  { %3439 = vmatpush3.bf16.msra.mxu0 %v3804_v26  ;;  %v3855_v26 = vld [vmem:[%s4928_s1 + $0x3f0] sm:$0xff]   ;;  %v3883_v56 = vld [vmem:[%s4928_s1 + $0x468] sm:$0xff]  }
  0x49   :  { %3440 = vmatprep.subr.bf16.mxu0 %v3806_v28  ;;  %3461 = vmatpush3.bf16.msra.mxu1 %v3805_v27  ;;  %v3856_v27 = vld [vmem:[%s4928_s1 + $0x330] sm:$0xff]  }
  0x4a   :  { %3462 = vmatprep.subr.bf16.mxu1 %v3807_v29  ;;  %v3857_v28 = vld [vmem:[%s4928_s1 + $0x3b0] sm:$0xff]   ;;  %v3858_v29 = vld [vmem:[%s4928_s1 + $0x378] sm:$0xff]  }
  0x4c   :  { %3441 = vmatpush3.bf16.msra.mxu0 %v3808_v30  ;;  %v3859_v30 = vld [vmem:[%s4928_s1 + $0x3f8] sm:$0xff]  }
  0x4d   :  { %3442 = vmatprep.subr.bf16.mxu0 %v3810_v32  ;;  %3463 = vmatpush3.bf16.msra.mxu1 %v3809_v31  ;;  %v3860_v31 = vld [vmem:[%s4928_s1 + $0x338] sm:$0xff]  }
  0x4e   :  { %3464 = vmatprep.subr.bf16.mxu1 %v3811_v33  ;;  %v3861_v32 = vld [vmem:[%s4928_s1 + $0x3b8] sm:$0xff]   ;;  %v628_v33 = vrot.slane %v4356_v53, %v4164_v41  ;;  %v3880_v53 = vld [vmem:[%s4928_s1 + $0x4e0] sm:$0xff]  }
  0x50   :  { %3443 = vmatpush3.bf16.msra.mxu0 %v3812_v34  ;;  %v3863_v34 = vld [vmem:[%s4928_s1 + $0x440] sm:$0xff]  }
  0x51   :  { %3444 = vmatprep.subr.bf16.mxu0 %v3814_v36  ;;  %3465 = vmatpush3.bf16.msra.mxu1 %v3813_v35  ;;  %v3864_v35 = vld [vmem:[%s4928_s1 + $0x4c0] sm:$0xff]  }
  0x52   :  { %3466 = vmatprep.subr.bf16.mxu1 %v3815_v37  ;;  %v3865_v36 = vld [vmem:[%s4928_s1 + $0x400] sm:$0xff]  }
  0x53   :  { %v3866_v37 = vld [vmem:[%s4928_s1 + $0x480] sm:$0xff]  }
  0x54   :  { %3445 = vmatpush3.bf16.msra.mxu0 %v3816_v38  ;;  %v644_v38 = vcombine.high %v628_v33, %v628_v33 }
  0x55   :  { %3446 = vmatprep.subr.bf16.mxu0 %v3818_v40  ;;  %3467 = vmatpush3.bf16.msra.mxu1 %v3817_v39  ;;  %v3867_v39 = vld [vmem:[%s4928_s1 + $0x448] sm:$0xff]  }
  0x56   :  { %3468 = vmatprep.subr.bf16.mxu1 %v3819_v42  ;;  %v3868_v40 = vld [vmem:[%s4928_s1 + $0x4c8] sm:$0xff]  }
  0x57   :  { %v3869_v42 = vld [vmem:[%s4928_s1 + $0x408] sm:$0xff]  }
  0x58   :  { %3447 = vmatpush3.bf16.msra.mxu0 %v3820_v43  ;;  %v3870_v43 = vld [vmem:[%s4928_s1 + $0x488] sm:$0xff]  }
  0x59   :  { %3448 = vmatprep.subr.bf16.mxu0 %v3822_v45  ;;  %3469 = vmatpush3.bf16.msra.mxu1 %v3821_v44  ;;  %v3871_v44 = vld [vmem:[%s4928_s1 + $0x450] sm:$0xff]  }
  0x5a   :  { %3470 = vmatprep.subr.bf16.mxu1 %v3823_v47  ;;  %v3872_v45 = vld [vmem:[%s4928_s1 + $0x4d0] sm:$0xff]  }
  0x5b   :  { %v3874_v47 = vld [vmem:[%s4928_s1 + $0x490] sm:$0xff]  }
  0x5c   :  { %3449 = vmatpush3.bf16.msra.mxu0 %v3824_v50  ;;  %v3877_v50 = vld [vmem:[%s4928_s1 + $0x418] sm:$0xff]  }
  0x5d   :  { %3450 = vmatprep.subr.bf16.mxu0 %v3826_v54  ;;  %3471 = vmatpush3.bf16.msra.mxu1 %v3825_v51  ;;  %v3878_v51 = vld [vmem:[%s4928_s1 + $0x498] sm:$0xff]   ;;  %v3881_v54 = vld [vmem:[%s4928_s1 + $0x420] sm:$0xff]  }
  0x5e   :  { %3472 = vmatprep.subr.bf16.mxu1 %v3827_v55  ;;  %v3882_v55 = vld [vmem:[%s4928_s1 + $0x4a0] sm:$0xff]  }
  0x60   :  { %3451 = vmatpush3.bf16.msra.mxu0 %v3828_v58  ;;  %v3885_v58 = vld [vmem:[%s4928_s1 + $0x428] sm:$0xff]  }
  0x61   :  { %3480 = vmatprep.subr.bf16.mxu0 %v3830_v62  ;;  %3473 = vmatpush3.bf16.msra.mxu1 %v3829_v59  ;;  %v3886_v59 = vld [vmem:[%s4928_s1 + $0x4a8] sm:$0xff]   ;;  %v3888_v62 = vld [vmem:[%s4928_s1 + $0x4f0] sm:$0xff]  }
  0x62   :  { %3502 = vmatprep.subr.bf16.mxu1 %v3831_v63 }
  0x63   :  { %2506 = vmatmul.mubr.bf16.vlgmr.msra.gmra.mrb[8].mxu0 %v621_v61  ;;  %v24_v61 = vld [vmem:[%s4927_s0 + $0x10] sm:$0xff] }
  0x64   :  { %3481 = vmatpush3.bf16.msra.mxu0 %v3832_v1  ;;  %2585 = vmatprep.mubr.bf16.mxu0 %v642_v0  ;;  %v654_v63 = vrot.slane %v24_v61, %v4164_v41  ;;  %v647_v0 = vcombine.high %v24_v61, %v24_v61  ;;  %v3889_v1 = vld [vmem:[%s4928_s1 + $0x430] sm:$0xff]  }
  0x65   :  { %2546 = vmatmul.mubr.bf16.vlgmr.msra.gmra.mrb[8].mxu1 %v643_v3  ;;  %3482 = vmatprep.subr.bf16.mxu0 %v3834_v4  ;;  %v3938_v61 = vld [vmem:[%s4928_s1 + $0x610] sm:$0xff]  }
  0x66   :  { %3503 = vmatpush3.bf16.msra.mxu1 %v3833_v2  ;;  %2625 = vmatprep.mubr.bf16.mxu1 %v646_v6  ;;  %v3890_v2 = vld [vmem:[%s4928_s1 + $0x4b0] sm:$0xff]   ;;  %v662_v3 = vcombine.high %v654_v63, %v654_v63  ;;  %v4562_v4 = vrot.slane %v647_v0, %v4164_v41  ;;  %v3892_v6 = vld [vmem:[%s4928_s1 + $0x4f8] sm:$0xff]  }
  0x67   :  { %3504 = vmatprep.subr.bf16.mxu1 %v3835_v5  ;;  %v3891_v5 = vld [vmem:[%s4928_s1 + $0x478] sm:$0xff]  }
  0x68   :  { %3483 = vmatpush3.bf16.msra.mxu0 %v3836_v7  ;;  %v684_v7 = vrot.slane %v662_v3, %v4164_v41  ;;  %v3941_v0 = vld [vmem:[%s4928_s1 + $0x6d8] sm:$0xff]   ;;  %v3944_v3 = vld [vmem:[%s4928_s1 + $0x660] sm:$0xff]  }
  0x69   :  { %3484 = vmatprep.subr.bf16.mxu0 %v3838_v9  ;;  %v3893_v9 = vld [vmem:[%s4928_s1 + $0x438] sm:$0xff]  }
  0x6a   :  { %3505 = vmatpush3.bf16.msra.mxu1 %v3837_v8  ;;  %v663_v8 = vcombine.high %v4562_v4, %v4562_v4 }
  0x6b   :  { %3506 = vmatprep.subr.bf16.mxu1 %v3839_v10  ;;  %v3894_v10 = vld [vmem:[%s4928_s1 + $0x4b8] sm:$0xff]  }
  0x6c   :  { %3485 = vmatpush3.bf16.msra.mxu0 %v3840_v11  ;;  %v694_v11 = vcombine.high %v684_v7, %v684_v7 }
  0x6d   :  { %3486 = vmatprep.subr.bf16.mxu0 %v3842_v13  ;;  %v3895_v13 = vld [vmem:[%s4928_s1 + $0x540] sm:$0xff]  }
  0x6e   :  { %3507 = vmatpush3.bf16.msra.mxu1 %v3841_v12  ;;  %v670_v12 = vrot.slane %v654_v63, %v4164_v41  ;;  %v3940_v63 = vld [vmem:[%s4928_s1 + $0x658] sm:$0xff]  }
  0x6f   :  { %3508 = vmatprep.subr.bf16.mxu1 %v3843_v14  ;;  %v3896_v14 = vld [vmem:[%s4928_s1 + $0x5c0] sm:$0xff]  }
  0x70   :  { %3487 = vmatpush3.bf16.msra.mxu0 %v3844_v15  ;;  %v691_v15 = vrot.slane %v663_v8, %v4164_v41  ;;  %v3949_v8 = vld [vmem:[%s4928_s1 + $0x6e8] sm:$0xff]  }
  0x71   :  { %3488 = vmatprep.subr.bf16.mxu0 %v3846_v17  ;;  %v3898_v17 = vld [vmem:[%s4928_s1 + $0x580] sm:$0xff]  }
  0x72   :  { %3509 = vmatpush3.bf16.msra.mxu1 %v3845_v16  ;;  %v3897_v16 = vld [vmem:[%s4928_s1 + $0x500] sm:$0xff]  }
  0x73   :  { %3510 = vmatprep.subr.bf16.mxu1 %v3847_v18  ;;  %v692_v18 = vcombine.high %v670_v12, %v670_v12 }
  0x74   :  { %3489 = vmatpush3.bf16.msra.mxu0 %v3848_v19  ;;  %v3899_v19 = vld [vmem:[%s4928_s1 + $0x548] sm:$0xff]  }
  0x75   :  { %3490 = vmatprep.subr.bf16.mxu0 %v3850_v21  ;;  %v695_v21 = vcombine.high %v691_v15, %v691_v15 }
  0x76   :  { %3511 = vmatpush3.bf16.msra.mxu1 %v3849_v20  ;;  %v3900_v20 = vld [vmem:[%s4928_s1 + $0x5c8] sm:$0xff]  }
  0x77   :  { %3512 = vmatprep.subr.bf16.mxu1 %v3851_v22  ;;  %v3901_v22 = vld [vmem:[%s4928_s1 + $0x508] sm:$0xff]  }
  0x78   :  { %3491 = vmatpush3.bf16.msra.mxu0 %v3852_v23  ;;  %v3902_v23 = vld [vmem:[%s4928_s1 + $0x588] sm:$0xff]  }
  0x79   :  { %3492 = vmatprep.subr.bf16.mxu0 %v3854_v25  ;;  %v3904_v25 = vld [vmem:[%s4928_s1 + $0x5d0] sm:$0xff]  }
  0x7a   :  { %3513 = vmatpush3.bf16.msra.mxu1 %v3853_v24  ;;  %v3903_v24 = vld [vmem:[%s4928_s1 + $0x550] sm:$0xff]  }
  0x7b   :  { %3514 = vmatprep.subr.bf16.mxu1 %v3855_v26  ;;  %v3905_v26 = vld [vmem:[%s4928_s1 + $0x510] sm:$0xff]  }
  0x7c   :  { %3493 = vmatpush3.bf16.msra.mxu0 %v3856_v27  ;;  %v3906_v27 = vld [vmem:[%s4928_s1 + $0x590] sm:$0xff]  }
  0x7d   :  { %3494 = vmatprep.subr.bf16.mxu0 %v3858_v29  ;;  %v3908_v29 = vld [vmem:[%s4928_s1 + $0x5d8] sm:$0xff]  }
  0x7e   :  { %3515 = vmatpush3.bf16.msra.mxu1 %v3857_v28  ;;  %v3907_v28 = vld [vmem:[%s4928_s1 + $0x558] sm:$0xff]  }
  0x7f   :  { %3516 = vmatprep.subr.bf16.mxu1 %v3859_v30  ;;  %v3909_v30 = vld [vmem:[%s4928_s1 + $0x518] sm:$0xff]  }
  0x80   :  { %3495 = vmatpush3.bf16.msra.mxu0 %v3860_v31  ;;  %v3910_v31 = vld [vmem:[%s4928_s1 + $0x598] sm:$0xff]  }
  0x81   :  { %3524 = vmatprep.subr.bf16.mxu0 %v3863_v34  ;;  %v3913_v34 = vld [vmem:[%s4928_s1 + $0x520] sm:$0xff]  }
  0x82   :  { %3517 = vmatpush3.bf16.msra.mxu1 %v3861_v32  ;;  %v3911_v32 = vld [vmem:[%s4928_s1 + $0x560] sm:$0xff]  }
  0x83   :  { %2586 = vmatmul.mubr.bf16.vlgmr.msra.gmra.mrb[12].mxu0 %v628_v33  ;;  %3546 = vmatprep.subr.bf16.mxu1 %v3864_v35  ;;  %v3912_v33 = vld [vmem:[%s4928_s1 + $0x5e0] sm:$0xff]  }
  0x84   :  { %3525 = vmatpush3.bf16.msra.mxu0 %v3865_v36  ;;  %2665 = vmatprep.mubr.bf16.mxu0 %v684_v7  ;;  %v3914_v35 = vld [vmem:[%s4928_s1 + $0x5a0] sm:$0xff]   ;;  %v3915_v36 = vld [vmem:[%s4928_s1 + $0x568] sm:$0xff]  }
  0x85   :  { %2626 = vmatmul.mubr.bf16.vlgmr.msra.gmra.mrb[12].mxu1 %v644_v38  ;;  %3526 = vmatprep.subr.bf16.mxu0 %v3867_v39  ;;  %v3917_v38 = vld [vmem:[%s4928_s1 + $0x528] sm:$0xff]  }
  0x86   :  { %3547 = vmatpush3.bf16.msra.mxu1 %v3866_v37  ;;  %2705 = vmatprep.mubr.bf16.mxu1 %v694_v11  ;;  %v3916_v37 = vld [vmem:[%s4928_s1 + $0x5e8] sm:$0xff]   ;;  %v3952_v11 = vld [vmem:[%s4928_s1 + $0x670] sm:$0xff]  }
  0x87   :  { %3548 = vmatprep.subr.bf16.mxu1 %v3868_v40  ;;  %v3918_v39 = vld [vmem:[%s4928_s1 + $0x5a8] sm:$0xff]   ;;  %v3919_v40 = vld [vmem:[%s4928_s1 + $0x570] sm:$0xff]  }
  0x88   :  { %3527 = vmatpush3.bf16.msra.mxu0 %v3869_v42  ;;  %v3920_v42 = vld [vmem:[%s4928_s1 + $0x5f0] sm:$0xff]   ;;  %v3948_v7 = vld [vmem:[%s4928_s1 + $0x668] sm:$0xff]  }
  0x89   :  { %3528 = vmatprep.subr.bf16.mxu0 %v3871_v44  ;;  %v3922_v44 = vld [vmem:[%s4928_s1 + $0x5b0] sm:$0xff]  }
  0x8a   :  { %3549 = vmatpush3.bf16.msra.mxu1 %v3870_v43  ;;  %v3921_v43 = vld [vmem:[%s4928_s1 + $0x530] sm:$0xff]  }
  0x8b   :  { %3550 = vmatprep.subr.bf16.mxu1 %v3872_v45  ;;  %v3923_v45 = vld [vmem:[%s4928_s1 + $0x578] sm:$0xff]  }
  0x8c   :  { %3529 = vmatpush3.bf16.msra.mxu0 %v3873_v46  ;;  %v3924_v46 = vld [vmem:[%s4928_s1 + $0x5f8] sm:$0xff]  }
  0x8d   :  { %3530 = vmatprep.subr.bf16.mxu0 %v3875_v48  ;;  %v3926_v48 = vld [vmem:[%s4928_s1 + $0x5b8] sm:$0xff]  }
  0x8e   :  { %3551 = vmatpush3.bf16.msra.mxu1 %v3874_v47  ;;  %v3925_v47 = vld [vmem:[%s4928_s1 + $0x538] sm:$0xff]  }
  0x8f   :  { %3552 = vmatprep.subr.bf16.mxu1 %v3876_v49  ;;  %v677_v49 = vrot.slane %v4562_v4, %v4164_v41  ;;  %v3945_v4 = vld [vmem:[%s4928_s1 + $0x6e0] sm:$0xff]  }
  0x90   :  { %3531 = vmatpush3.bf16.msra.mxu0 %v3877_v50  ;;  %v3928_v50 = vld [vmem:[%s4928_s1 + $0x640] sm:$0xff]  }
  0x91   :  { %3532 = vmatprep.subr.bf16.mxu0 %v3879_v52  ;;  %v3930_v52 = vld [vmem:[%s4928_s1 + $0x600] sm:$0xff]  }
  0x92   :  { %3553 = vmatpush3.bf16.msra.mxu1 %v3878_v51  ;;  %v3929_v51 = vld [vmem:[%s4928_s1 + $0x6c0] sm:$0xff]  }
  0x93   :  { %3554 = vmatprep.subr.bf16.mxu1 %v3880_v53  ;;  %v3931_v53 = vld [vmem:[%s4928_s1 + $0x680] sm:$0xff]  }
  0x94   :  { %3533 = vmatpush3.bf16.msra.mxu0 %v3881_v54  ;;  %v693_v54 = vcombine.high %v677_v49, %v677_v49 }
  0x95   :  { %3534 = vmatprep.subr.bf16.mxu0 %v3883_v56  ;;  %v3933_v56 = vld [vmem:[%s4928_s1 + $0x6c8] sm:$0xff]  }
  0x96   :  { %3555 = vmatpush3.bf16.msra.mxu1 %v3882_v55  ;;  %v3932_v55 = vld [vmem:[%s4928_s1 + $0x648] sm:$0xff]  }
  0x97   :  { %3556 = vmatprep.subr.bf16.mxu1 %v3884_v57  ;;  %v3934_v57 = vld [vmem:[%s4928_s1 + $0x608] sm:$0xff]  }
  0x98   :  { %3535 = vmatpush3.bf16.msra.mxu0 %v3885_v58  ;;  %v3935_v58 = vld [vmem:[%s4928_s1 + $0x688] sm:$0xff]  }
  0x99   :  { %3536 = vmatprep.subr.bf16.mxu0 %v3887_v60  ;;  %v3937_v60 = vld [vmem:[%s4928_s1 + $0x6d0] sm:$0xff]  }
  0x9a   :  { %3557 = vmatpush3.bf16.msra.mxu1 %v3886_v59  ;;  %v3936_v59 = vld [vmem:[%s4928_s1 + $0x650] sm:$0xff]  }
  0x9b   :  { %3558 = vmatprep.subr.bf16.mxu1 %v3888_v62  ;;  %v3939_v62 = vld [vmem:[%s4928_s1 + $0x690] sm:$0xff]  }
  0x9c   :  { %3537 = vmatpush3.bf16.msra.mxu0 %v3889_v1  ;;  %v3942_v1 = vld [vmem:[%s4928_s1 + $0x618] sm:$0xff]  }
  0x9d   :  { %3538 = vmatprep.subr.bf16.mxu0 %v3891_v5  ;;  %v3946_v5 = vld [vmem:[%s4928_s1 + $0x620] sm:$0xff]  }
  0x9e   :  { %3559 = vmatpush3.bf16.msra.mxu1 %v3890_v2  ;;  %v3943_v2 = vld [vmem:[%s4928_s1 + $0x698] sm:$0xff]  }
  0x9f   :  { %3560 = vmatprep.subr.bf16.mxu1 %v3892_v6  ;;  %v3947_v6 = vld [vmem:[%s4928_s1 + $0x6a0] sm:$0xff]  }
  0xa0   :  { %3539 = vmatpush3.bf16.msra.mxu0 %v3893_v9  ;;  %v3950_v9 = vld [vmem:[%s4928_s1 + $0x628] sm:$0xff]  }
  0xa1   :  { %3568 = vmatprep.subr.bf16.mxu0 %v3895_v13  ;;  %v3953_v13 = vld [vmem:[%s4928_s1 + $0x6f0] sm:$0xff]  }
  0xa2   :  { %3561 = vmatpush3.bf16.msra.mxu1 %v3894_v10  ;;  %v3951_v10 = vld [vmem:[%s4928_s1 + $0x6a8] sm:$0xff]  }
  0xa3   :  { %2666 = vmatmul.mubr.bf16.vlgmr.msra.gmra.mrb[16].mxu0 %v670_v12  ;;  %3590 = vmatprep.subr.bf16.mxu1 %v3896_v14  ;;  %v25_v12 = vld [vmem:[%s4927_s0 + $0x18] sm:$0xff] }
  0xa4   :  { %3569 = vmatpush3.bf16.msra.mxu0 %v3897_v16  ;;  %2745 = vmatprep.mubr.bf16.mxu0 %v691_v15  ;;  %v703_v14 = vrot.slane %v25_v12, %v4164_v41  ;;  %v696_v15 = vcombine.high %v25_v12, %v25_v12  ;;  %v3954_v16 = vld [vmem:[%s4928_s1 + $0x630] sm:$0xff]  }
  0xa5   :  { %2706 = vmatmul.mubr.bf16.vlgmr.msra.gmra.mrb[16].mxu1 %v692_v18  ;;  %3570 = vmatprep.subr.bf16.mxu0 %v3899_v19 }
  0xa6   :  { %3591 = vmatpush3.bf16.msra.mxu1 %v3898_v17  ;;  %2785 = vmatprep.mubr.bf16.mxu1 %v695_v21  ;;  %v3956_v17 = vld [vmem:[%s4928_s1 + $0x678] sm:$0xff]   ;;  %v711_v18 = vcombine.high %v703_v14, %v703_v14  ;;  %v4768_v19 = vrot.slane %v696_v15, %v4164_v41 }
  0xa7   :  { %3592 = vmatprep.subr.bf16.mxu1 %v3900_v20  ;;  %v3955_v20 = vld [vmem:[%s4928_s1 + $0x6b0] sm:$0xff]   ;;  %v3957_v21 = vld [vmem:[%s4928_s1 + $0x6f8] sm:$0xff]  }
  0xa8   :  { %3571 = vmatpush3.bf16.msra.mxu0 %v3901_v22  ;;  %v733_v22 = vrot.slane %v711_v18, %v4164_v41  ;;  %v726_v12 = vrot.slane %v4768_v19, %v4164_v41 }
  0xa9   :  { %3572 = vmatprep.subr.bf16.mxu0 %v3903_v24  ;;  %v3958_v24 = vld [vmem:[%s4928_s1 + $0x638] sm:$0xff]  }
  0xaa   :  { %3593 = vmatpush3.bf16.msra.mxu1 %v3902_v23  ;;  %v712_v23 = vcombine.high %v4768_v19, %v4768_v19 }
  0xab   :  { %3594 = vmatprep.subr.bf16.mxu1 %v3904_v25  ;;  %v743_v25 = vcombine.high %v733_v22, %v733_v22 }
  0xac   :  { %3573 = vmatpush3.bf16.msra.mxu0 %v3905_v26  ;;  %v719_v26 = vrot.slane %v703_v14, %v4164_v41 }
  0xad   :  { %3574 = vmatprep.subr.bf16.mxu0 %v3907_v28  ;;  %v3959_v28 = vld [vmem:[%s4928_s1 + $0x6b8] sm:$0xff]  }
  0xae   :  { %3595 = vmatpush3.bf16.msra.mxu1 %v3906_v27  ;;  %v3960_v27 = vld [vmem:[%s4928_s1 + $0x740] sm:$0xff]  }
  0xaf   :  { %3596 = vmatprep.subr.bf16.mxu1 %v3908_v29  ;;  %v740_v29 = vrot.slane %v712_v23, %v4164_v41 }
  0xb0   :  { %3575 = vmatpush3.bf16.msra.mxu0 %v3909_v30  ;;  %v3961_v30 = vld [vmem:[%s4928_s1 + $0x7c0] sm:$0xff]  }
  0xb1   :  { %3576 = vmatprep.subr.bf16.mxu0 %v3911_v32  ;;  %v741_v32 = vcombine.high %v719_v26, %v719_v26 }
  0xb2   :  { %3597 = vmatpush3.bf16.msra.mxu1 %v3910_v31  ;;  %v3962_v31 = vld [vmem:[%s4928_s1 + $0x700] sm:$0xff]  }
  0xb3   :  { %3598 = vmatprep.subr.bf16.mxu1 %v3912_v33  ;;  %v3964_v33 = vld [vmem:[%s4928_s1 + $0x748] sm:$0xff]  }
  0xb4   :  { %3577 = vmatpush3.bf16.msra.mxu0 %v3913_v34  ;;  %v3963_v34 = vld [vmem:[%s4928_s1 + $0x780] sm:$0xff]  }
  0xb5   :  { %3578 = vmatprep.subr.bf16.mxu0 %v3915_v36  ;;  %v3965_v36 = vld [vmem:[%s4928_s1 + $0x7c8] sm:$0xff]  }
  0xb6   :  { %3599 = vmatpush3.bf16.msra.mxu1 %v3914_v35  ;;  %v744_v35 = vcombine.high %v740_v29, %v740_v29 }
  0xb7   :  { %3600 = vmatprep.subr.bf16.mxu1 %v3916_v37  ;;  %v3966_v37 = vld [vmem:[%s4928_s1 + $0x708] sm:$0xff]  }
  0xb8   :  { %3579 = vmatpush3.bf16.msra.mxu0 %v3917_v38  ;;  %v3968_v38 = vld [vmem:[%s4928_s1 + $0x750] sm:$0xff]  }
  0xb9   :  { %3580 = vmatprep.subr.bf16.mxu0 %v3919_v40  ;;  %v3969_v40 = vld [vmem:[%s4928_s1 + $0x7d0] sm:$0xff]  }
  0xba   :  { %3601 = vmatpush3.bf16.msra.mxu1 %v3918_v39  ;;  %v3967_v39 = vld [vmem:[%s4928_s1 + $0x788] sm:$0xff]  }
  0xbb   :  { %3602 = vmatprep.subr.bf16.mxu1 %v3920_v42  ;;  %v3970_v42 = vld [vmem:[%s4928_s1 + $0x710] sm:$0xff]  }
  0xbc   :  { %3581 = vmatpush3.bf16.msra.mxu0 %v3921_v43  ;;  %v3972_v43 = vld [vmem:[%s4928_s1 + $0x758] sm:$0xff]  }
  0xbd   :  { %3582 = vmatprep.subr.bf16.mxu0 %v3923_v45  ;;  %v3973_v45 = vld [vmem:[%s4928_s1 + $0x7d8] sm:$0xff]  }
  0xbe   :  { %3603 = vmatpush3.bf16.msra.mxu1 %v3922_v44  ;;  %v3971_v44 = vld [vmem:[%s4928_s1 + $0x790] sm:$0xff]  }
  0xbf   :  { %3604 = vmatprep.subr.bf16.mxu1 %v3924_v46  ;;  %v3974_v46 = vld [vmem:[%s4928_s1 + $0x718] sm:$0xff]  }
  0xc0   :  { %3583 = vmatpush3.bf16.msra.mxu0 %v3925_v47  ;;  %v3975_v47 = vld [vmem:[%s4928_s1 + $0x798] sm:$0xff]  }
  0xc1   :  { %3612 = vmatprep.subr.bf16.mxu0 %v3928_v50  ;;  %v3978_v50 = vld [vmem:[%s4928_s1 + $0x720] sm:$0xff]  }
  0xc2   :  { %3605 = vmatpush3.bf16.msra.mxu1 %v3926_v48  ;;  %v3976_v48 = vld [vmem:[%s4928_s1 + $0x760] sm:$0xff]  }
  0xc3   :  { %2746 = vmatmul.mubr.bf16.vlgmr.msra.gmra.mrb[20].mxu0 %v677_v49  ;;  %3634 = vmatprep.subr.bf16.mxu1 %v3929_v51  ;;  %v3977_v49 = vld [vmem:[%s4928_s1 + $0x7e0] sm:$0xff]  }
  0xc4   :  { %3613 = vmatpush3.bf16.msra.mxu0 %v3930_v52  ;;  %2825 = vmatprep.mubr.bf16.mxu0 %v733_v22  ;;  %v3979_v51 = vld [vmem:[%s4928_s1 + $0x7a0] sm:$0xff]   ;;  %v3980_v52 = vld [vmem:[%s4928_s1 + $0x768] sm:$0xff]  }
  0xc5   :  { %2786 = vmatmul.mubr.bf16.vlgmr.msra.gmra.mrb[20].mxu1 %v693_v54  ;;  %3614 = vmatprep.subr.bf16.mxu0 %v3932_v55  ;;  %v3982_v54 = vld [vmem:[%s4928_s1 + $0x728] sm:$0xff]  }
  0xc6   :  { %3635 = vmatpush3.bf16.msra.mxu1 %v3931_v53  ;;  %2865 = vmatprep.mubr.bf16.mxu1 %v743_v25  ;;  %v3981_v53 = vld [vmem:[%s4928_s1 + $0x7e8] sm:$0xff]  }
  0xc7   :  { %3636 = vmatprep.subr.bf16.mxu1 %v3933_v56  ;;  %v3983_v55 = vld [vmem:[%s4928_s1 + $0x7a8] sm:$0xff]   ;;  %v3984_v56 = vld [vmem:[%s4928_s1 + $0x770] sm:$0xff]  }
  0xc8   :  { %3615 = vmatpush3.bf16.msra.mxu0 %v3934_v57  ;;  %v3082_v57 = vld [vmem:[%s4929_s2] ss:$0 sm:$0xff] }
  0xc9   :  { %3616 = vmatprep.subr.bf16.mxu0 %v3936_v59 }
  0xca   :  { %3637 = vmatpush3.bf16.msra.mxu1 %v3935_v58  ;;  %v3985_v58 = vld [vmem:[%s4928_s1 + $0x7f0] sm:$0xff]  }
  0xcb   :  { %3638 = vmatprep.subr.bf16.mxu1 %v3937_v60  ;;  %v3986_v60 = vld [vmem:[%s4928_s1 + $0x730] sm:$0xff]  }
  0xcc   :  { %3617 = vmatpush3.bf16.msra.mxu0 %v3938_v61 }
  0xcd   :  { %3618 = vmatprep.subr.bf16.mxu0 %v3940_v63 }
  0xce   :  { %3639 = vmatpush3.bf16.msra.mxu1 %v3939_v62  ;;  %v3988_v62 = vld [vmem:[%s4928_s1 + $0x778] sm:$0xff]  }
  0xcf   :  { %3640 = vmatprep.subr.bf16.mxu1 %v3941_v0 }
  0xd0   :  { %3619 = vmatpush3.bf16.msra.mxu0 %v3942_v1 }
  0xd1   :  { %3620 = vmatprep.subr.bf16.mxu0 %v3944_v3 }
  0xd2   :  { %3641 = vmatpush3.bf16.msra.mxu1 %v3943_v2  ;;  %v3987_v2 = vld [vmem:[%s4928_s1 + $0x7b0] sm:$0xff]  }
  0xd3   :  { %3642 = vmatprep.subr.bf16.mxu1 %v3945_v4 }
  0xd4   :  { %3621 = vmatpush3.bf16.msra.mxu0 %v3946_v5 }
  0xd5   :  { %3622 = vmatprep.subr.bf16.mxu0 %v3948_v7 }
  0xd6   :  { %3643 = vmatpush3.bf16.msra.mxu1 %v3947_v6 }
  0xd7   :  { %3644 = vmatprep.subr.bf16.mxu1 %v3949_v8  ;;  %v3989_v8 = vld [vmem:[%s4928_s1 + $0x7f8] sm:$0xff]  }
  0xd8   :  { %3623 = vmatpush3.bf16.msra.mxu0 %v3950_v9 }
  0xd9   :  { %3624 = vmatprep.subr.bf16.mxu0 %v3952_v11 }
  0xda   :  { %3645 = vmatpush3.bf16.msra.mxu1 %v3951_v10  ;;  %v3990_v10 = vld [vmem:[%s4928_s1 + $0x738] sm:$0xff]  }
  0xdb   :  { %3646 = vmatprep.subr.bf16.mxu1 %v3953_v13 }
  0xdc   :  { %3625 = vmatpush3.bf16.msra.mxu0 %v3954_v16 }
  0xdd   :  { %3626 = vmatprep.subr.bf16.mxu0 %v3956_v17 }
  0xde   :  { %3647 = vmatpush3.bf16.msra.mxu1 %v3955_v20 }
  0xdf   :  { %3648 = vmatprep.subr.bf16.mxu1 %v3957_v21 }
  0xe0   :  { %3627 = vmatpush3.bf16.msra.mxu0 %v3958_v24 }
  0xe1   :  { %3656 = vmatprep.subr.bf16.mxu0 %v3960_v27 }
  0xe2   :  { %3649 = vmatpush3.bf16.msra.mxu1 %v3959_v28 }
  0xe3   :  { %2826 = vmatmul.mubr.bf16.vlgmr.msra.gmra.mrb[24].mxu0 %v719_v26  ;;  %3678 = vmatprep.subr.bf16.mxu1 %v3961_v30 }
  0xe4   :  { %3657 = vmatpush3.bf16.msra.mxu0 %v3962_v31  ;;  %2905 = vmatprep.mubr.bf16.mxu0 %v740_v29 }
  0xe5   :  { %2866 = vmatmul.mubr.bf16.vlgmr.msra.gmra.mrb[24].mxu1 %v741_v32  ;;  %3658 = vmatprep.subr.bf16.mxu0 %v3964_v33 }
  0xe6   :  { %3679 = vmatpush3.bf16.msra.mxu1 %v3963_v34  ;;  %2945 = vmatprep.mubr.bf16.mxu1 %v744_v35 }
  0xe7   :  { %3680 = vmatprep.subr.bf16.mxu1 %v3965_v36 }
  0xe8   :  { %3659 = vmatpush3.bf16.msra.mxu0 %v3966_v37 }
  0xe9   :  { %3660 = vmatprep.subr.bf16.mxu0 %v3968_v38 }
  0xea   :  { %3681 = vmatpush3.bf16.msra.mxu1 %v3967_v39 }
  0xeb   :  { %3682 = vmatprep.subr.bf16.mxu1 %v3969_v40 }
  0xec   :  { %3661 = vmatpush3.bf16.msra.mxu0 %v3970_v42 }
  0xed   :  { %3662 = vmatprep.subr.bf16.mxu0 %v3972_v43 }
  0xee   :  { %3683 = vmatpush3.bf16.msra.mxu1 %v3971_v44 }
  0xef   :  { %3684 = vmatprep.subr.bf16.mxu1 %v3973_v45 }
  0xf0   :  { %3663 = vmatpush3.bf16.msra.mxu0 %v3974_v46 }
  0xf1   :  { %3664 = vmatprep.subr.bf16.mxu0 %v3976_v48 }
  0xf2   :  { %3685 = vmatpush3.bf16.msra.mxu1 %v3975_v47 }
  0xf3   :  { %3686 = vmatprep.subr.bf16.mxu1 %v3977_v49 }
  0xf4   :  { %3665 = vmatpush3.bf16.msra.mxu0 %v3978_v50 }
  0xf5   :  { %3666 = vmatprep.subr.bf16.mxu0 %v3980_v52 }
  0xf6   :  { %3687 = vmatpush3.bf16.msra.mxu1 %v3979_v51  ;;  %v3364_v59 = vpop.f32.mrb[0].mxu0 }
  0xf7   :  { %v3365_v61 = vpop.f32.mrb[1].mxu0  ;;  %3688 = vmatprep.subr.bf16.mxu1 %v3981_v53  ;;  %v3386_v63 = vpop.f32.mrb[0].mxu1 }
  0xf8   :  { %v3366_v0 = vadd.f32 %v3365_v61, %v3364_v59  ;;  %v3367_v1 = vpop.f32.mrb[2].mxu0  ;;  %3667 = vmatpush3.bf16.msra.mxu0 %v3982_v54  ;;  %v3387_v3 = vpop.f32.mrb[1].mxu1 }
  0xf9   :  { %v3368_v4 = vpop.f32.mrb[3].mxu0  ;;  %3668 = vmatprep.subr.bf16.mxu0 %v3984_v56  ;;  %v3388_v6 = vadd.f32 %v3387_v3, %v3386_v63  ;;  %v3389_v7 = vpop.f32.mrb[2].mxu1 }
  0xfa   :  { %v2348_v5 = vadd.f32 %v3366_v0, %v3082_v57  ;;  %3689 = vmatpush3.bf16.msra.mxu1 %v3983_v55  ;;  %v3390_v9 = vpop.f32.mrb[3].mxu1 }
  0xfb   :  { %3690 = vmatprep.subr.bf16.mxu1 %v3985_v58 }
  0xfc   :  { %v2388_v11 = vadd.f32 %v3388_v6, %v2348_v5  ;;  %3669 = vmatpush3.bf16.msra.mxu0 %v3986_v60 }
  0xfd   :  { %3670 = vmatprep.subr.bf16.mxu0 %v3988_v62 }
  0xfe   :  { %10 = vsyncpa [#allocation3], 0  ;;  %3691 = vmatpush3.bf16.msra.mxu1 %v3987_v2  ;;  %v3991_v13 = vld [vmem:[%s4928_s1 + $0x7b8] sm:$0xff]   ;;  %v742_v14 = vcombine.high %v726_v12, %v726_v12  ;;  %v3993_v38 = vld [vmem:[%s4930_s3] sm:$0xff]   ;;  %v4026_v39 = vmov 0.0   ;;  %vm4027_vm0 = vmmov 0  }
  0xff   :  { %3692 = vmatprep.subr.bf16.mxu1 %v3989_v8  ;;  %v3994_v40 = vld [vmem:[%s4930_s3 + $0x8] sm:$0xff]   ;;  %v3995_v42 = vld [vmem:[%s4930_s3 + $0x10] sm:$0xff]   ;;  %v3996_v43 = vld [vmem:[%s4930_s3 + $0x18] sm:$0xff]   ;;  %s4028_s26 = smov [#allocation2]   ;;  %vm3066_vm1 = vcmask 74752  }
 0x100   :  { %3671 = vmatpush3.bf16.msra.mxu0 %v3990_v10  ;;  %v3997_v44 = vld [vmem:[%s4930_s3 + $0x20] sm:$0xff]   ;;  %v3998_v47 = vld [vmem:[%s4930_s3 + $0x28] sm:$0xff]   ;;  %v3999_v57 = vld [vmem:[%s4930_s3 + $0x30] sm:$0xff]   ;;  %s3074_s27 = sshll.u32 %s4028_s26, 4  ;;  %s3075_s27 = int_to_ptr.vmem [resolvable:$true] %s3074_s27 }
 0x101   :  { %3709 = vmatprep.subr.bf16.mxu0 %v4026_v39  ;;  %v4000_v59 = vld [vmem:[%s4930_s3 + $0x38] sm:$0xff]   ;;  %s4001_s28 = scalar_lea.vmem %s3075_s27, 32  ;;  %p4006_p1 = scmp.lt.s32.totalorder %s3075_s27, %s3075_s27 }
 0x102   :  { %3693 = vmatpush3.bf16.msra.mxu1 %v3991_v13  ;;  %p4002_p0 = scmp.ne.s32.totalorder %s3075_s27, %s4001_s28  ;;  %p4007_p2 = scmp.lt.s32.totalorder %s4001_s28, %s4001_s28 }
 0x103   :  { %2906 = vmatmul.mubr.bf16.vlgmr.msra.gmra.mrb[28].mxu0 %v726_v12 }
 0x104   :  { %3710 = vmatpush3.bf16.msra.mxu0 %v3993_v38  ;;  %3725 = vmatprep.mubr.msk.bf16.mxu0 %vm4027_vm0, %v4026_v39  ;;  %p4008_p3 = por %p4007_p2, %p4006_p1 }
 0x105   :  { %2946 = vmatmul.mubr.bf16.vlgmr.msra.gmra.mrb[28].mxu1 %v742_v14  ;;  %3711 = vmatprep.subr.bf16.mxu0 %v4026_v39 }
 0x106   :  { %p4009_p4 = pnand %p4008_p3, %p4002_p0 }
 0x108   :  { %3712 = vmatpush3.bf16.msra.mxu0 %v3994_v40 }
 0x109   :  { %3713 = vmatprep.subr.bf16.mxu0 %v4026_v39 }
 0x10c   :  { %3714 = vmatpush3.bf16.msra.mxu0 %v3995_v42 }
 0x10d   :  { %3715 = vmatprep.subr.bf16.mxu0 %v4026_v39 }
 0x110   :  { %3716 = vmatpush3.bf16.msra.mxu0 %v3996_v43 }
 0x111   :  { %3717 = vmatprep.subr.bf16.mxu0 %v4026_v39 }
 0x114   :  { %3718 = vmatpush3.bf16.msra.mxu0 %v3997_v44 }
 0x115   :  { %3719 = vmatprep.subr.bf16.mxu0 %v4026_v39 }
 0x116   :  { %v3408_v15 = vpop.f32.mrb[4].mxu0 }
 0x117   :  { %v3409_v16 = vpop.f32.mrb[5].mxu0  ;;  %v3430_v17 = vpop.f32.mrb[4].mxu1 }
 0x118   :  { %v3410_v18 = vadd.f32 %v3409_v16, %v3408_v15  ;;  %v3411_v20 = vpop.f32.mrb[6].mxu0  ;;  %v3431_v21 = vpop.f32.mrb[5].mxu1  ;;  %3720 = vmatpush3.bf16.msra.mxu0 %v3998_v47 }
 0x119   :  { %v3412_v22 = vpop.f32.mrb[7].mxu0  ;;  %v3432_v19 = vadd.f32 %v3431_v21, %v3430_v17  ;;  %v3433_v23 = vpop.f32.mrb[6].mxu1  ;;  %3721 = vmatprep.subr.bf16.mxu0 %v4026_v39 }
 0x11a   :  { %v2428_v41 = vadd.f32 %v3410_v18, %v2388_v11  ;;  %v3434_v24 = vpop.f32.mrb[7].mxu1 }
 0x11c   :  { %v2468_v25 = vadd.f32 %v3432_v19, %v2428_v41  ;;  %3722 = vmatpush3.bf16.msra.mxu0 %v3999_v57 }
 0x11d   :  { %3723 = vmatprep.subr.bf16.mxu0 %v4026_v39 }
 0x120   :  { %3724 = vmatpush3.bf16.msra.mxu0 %v4000_v59 }
 0x136   :  { %v3452_v26 = vpop.f32.mrb[8].mxu0 }
 0x137   :  { %v3453_v27 = vpop.f32.mrb[9].mxu0 }
 0x138   :  { %v3474_v28 = vpop.f32.mrb[8].mxu1  ;;  %v3454_v29 = vadd.f32 %v3453_v27, %v3452_v26  ;;  %v3455_v30 = vpop.f32.mrb[10].mxu0 }
 0x139   :  { %v3475_v31 = vpop.f32.mrb[9].mxu1  ;;  %v3456_v32 = vpop.f32.mrb[11].mxu0 }
 0x13a   :  { %v2508_v33 = vadd.f32 %v3454_v29, %v2468_v25  ;;  %v3476_v34 = vadd.f32 %v3475_v31, %v3474_v28  ;;  %v3477_v35 = vpop.f32.mrb[10].mxu1 }
 0x13b   :  { %v3478_v36 = vpop.f32.mrb[11].mxu1 }
 0x13c   :  { %v2548_v37 = vadd.f32 %v3476_v34, %v2508_v33 }
 0x156   :  { %v3496_v45 = vpop.f32.mrb[12].mxu0 }
 0x157   :  { %v3497_v46 = vpop.f32.mrb[13].mxu0 }
 0x158   :  { %v3518_v48 = vpop.f32.mrb[12].mxu1  ;;  %v3498_v49 = vadd.f32 %v3497_v46, %v3496_v45  ;;  %v3499_v50 = vpop.f32.mrb[14].mxu0  ;;  %v3339_v46 = vld [vmem:[%s4931_s4] ss:$0 sm:$0xff] }
 0x159   :  { %v3519_v51 = vpop.f32.mrb[13].mxu1  ;;  %v3500_v52 = vpop.f32.mrb[15].mxu0 }
 0x15a   :  { %v2588_v53 = vadd.f32 %v3498_v49, %v2548_v37  ;;  %v3520_v54 = vadd.f32 %v3519_v51, %v3518_v48  ;;  %v3521_v55 = vpop.f32.mrb[14].mxu1 }
 0x15b   :  { %v3522_v56 = vpop.f32.mrb[15].mxu1 }
 0x15c   :  { %v2628_v58 = vadd.f32 %v3520_v54, %v2588_v53 }
 0x176   :  { %v3540_v60 = vpop.f32.mrb[16].mxu0 }
 0x177   :  { %v3541_v61 = vpop.f32.mrb[17].mxu0 }
 0x178   :  { %v3562_v62 = vpop.f32.mrb[16].mxu1  ;;  %v3542_v63 = vadd.f32 %v3541_v61, %v3540_v60  ;;  %v3543_v0 = vpop.f32.mrb[18].mxu0 }
 0x179   :  { %v3563_v1 = vpop.f32.mrb[17].mxu1  ;;  %v3544_v2 = vpop.f32.mrb[19].mxu0 }
 0x17a   :  { %v2668_v3 = vadd.f32 %v3542_v63, %v2628_v58  ;;  %v3564_v4 = vadd.f32 %v3563_v1, %v3562_v62  ;;  %v3565_v5 = vpop.f32.mrb[18].mxu1 }
 0x17b   :  { %v3566_v6 = vpop.f32.mrb[19].mxu1 }
 0x17c   :  { %v2708_v7 = vadd.f32 %v3564_v4, %v2668_v3 }
 0x196   :  { %v3584_v8 = vpop.f32.mrb[20].mxu0 }
 0x197   :  { %v3585_v9 = vpop.f32.mrb[21].mxu0 }
 0x198   :  { %v3606_v10 = vpop.f32.mrb[20].mxu1  ;;  %v3586_v11 = vadd.f32 %v3585_v9, %v3584_v8  ;;  %v3587_v12 = vpop.f32.mrb[22].mxu0 }
 0x199   :  { %v3607_v13 = vpop.f32.mrb[21].mxu1  ;;  %v3588_v14 = vpop.f32.mrb[23].mxu0 }
 0x19a   :  { %v2748_v15 = vadd.f32 %v3586_v11, %v2708_v7  ;;  %v3608_v16 = vadd.f32 %v3607_v13, %v3606_v10  ;;  %v3609_v17 = vpop.f32.mrb[22].mxu1 }
 0x19b   :  { %v3610_v18 = vpop.f32.mrb[23].mxu1 }
 0x19c   :  { %v2788_v20 = vadd.f32 %v3608_v16, %v2748_v15 }
 0x1b6   :  { %v3628_v21 = vpop.f32.mrb[24].mxu0 }
 0x1b7   :  { %v3629_v22 = vpop.f32.mrb[25].mxu0 }
 0x1b8   :  { %v3650_v41 = vpop.f32.mrb[24].mxu1  ;;  %v3630_v19 = vadd.f32 %v3629_v22, %v3628_v21  ;;  %v3631_v23 = vpop.f32.mrb[26].mxu0 }
 0x1b9   :  { %v3651_v24 = vpop.f32.mrb[25].mxu1  ;;  %v3632_v25 = vpop.f32.mrb[27].mxu0 }
 0x1ba   :  { %v2828_v26 = vadd.f32 %v3630_v19, %v2788_v20  ;;  %v3652_v27 = vadd.f32 %v3651_v24, %v3650_v41  ;;  %v3653_v28 = vpop.f32.mrb[26].mxu1 }
 0x1bb   :  { %v3654_v29 = vpop.f32.mrb[27].mxu1 }
 0x1bc   :  { %v2868_v30 = vadd.f32 %v3652_v27, %v2828_v26 }
 0x1d6   :  { %v3672_v31 = vpop.f32.mrb[28].mxu0 }
 0x1d7   :  { %v3673_v32 = vpop.f32.mrb[29].mxu0 }
 0x1d8   :  { %v3694_v33 = vpop.f32.mrb[28].mxu1  ;;  %v3674_v34 = vadd.f32 %v3673_v32, %v3672_v31  ;;  %v3675_v35 = vpop.f32.mrb[30].mxu0 }
 0x1d9   :  { %v3695_v36 = vpop.f32.mrb[29].mxu1  ;;  %v3676_v37 = vpop.f32.mrb[31].mxu0 }
 0x1da   :  { %v2908_v38 = vadd.f32 %v3674_v34, %v2868_v30  ;;  %v3696_v39 = vadd.f32 %v3695_v36, %v3694_v33  ;;  %v3697_v40 = vpop.f32.mrb[30].mxu1 }
 0x1db   :  { %v3698_v42 = vpop.f32.mrb[31].mxu1 }
 0x1dc   :  { %v2948_v43 = vadd.f32 %v3696_v39, %v2908_v38 }
 0x1de   :  { %v2953_v44 = vmax.f32 %v2948_v43, 0.0 }
 0x1e0   :  { %v2954_v45 = vpack.c.bf16 %v2953_v44, %v2953_v44 }
 0x1e2   :  { %3726 = vmatmul.mubr.bf16.vlgmr.msra.gmra.mrb[32].mxu0 %v2954_v45 }
 0x2b5   :  { %v3060_v47 = vpop.f32.mrb[32].mxu0 }
 0x2b6   :  { %v3061_v48 = vadd.f32 %v3339_v46, %v3060_v47  ;;  %v3727_v49 = vpop.f32.mrb[33].mxu0 }
 0x2b7   :  { %v3063_v50 = vpop.f32.mrb[34].mxu0 }
 0x2b8   :  { %v3728_v51 = vpop.f32.mrb[35].mxu0  ;;  %3067 = vst.msk [vmem:[#allocation2] sm:$0x3] %vm3066_vm1, %v3061_v48 }
 0x2b9   :  { %4012 = shalt.err (!%p4009_p4)
}
 0x2ba   :  { %s4013_s4 = scalar_lea.hbm %s4932_s5, 32 }
 0x2bb   :  { %p4014_p5 = scmp.ne.s32.totalorder %s4932_s5, %s4013_s4  ;;  %p4017_p6 = scmp.lt.u32.totalorder %s4013_s4, %s4932_s5 }
 0x2bd   :  { %p4019_p7 = pnand %p4017_p6, %p4014_p5 }
 0x2bf   :  { %4022 = shalt.err (!%p4019_p7)
}
 0x2c0   :  { %3077 = dma.vmem_to_hbm [thread:$0]  %s3075_s27, 32, %s4932_s5, [#allocation3]  }
 0x2c1   :  { %4023 = dma.done.wait [#allocation3], 32  }
 0x2c2   :  { %4024 = vsyncadd [#allocation3], 4294967264 }
 0x2c3   :  { %3081 = vsyncpa [#allocation3], 1 }

// kernel: simple_cnn_forward.3
= control target key start
LH: loop header
LB: loop body
LE: loop exit
PB: predicated region body
PF: predicated region fallthrough
CT: control target
= control target key end

     0   :  { %8 = vsyncpa [#allocation3], 0  ;;  %s5950_s0 = inlined_call_operand.vmem [shape: bf16[2,34,96], index: 0, kind: input, shape index: {}]   ;;  %s5951_s1 = inlined_call_operand.hbm [shape: bf16[3,96,1024], index: 1, kind: input, shape index: {}]   ;;  %s5952_s2 = inlined_call_operand.hbm [shape: f32[1,512], index: 2, kind: input, shape index: {}]   ;;  %s5953_s3 = inlined_call_operand.vmem [shape: bf16[2,18,512], index: 3, kind: output, shape index: {}]  }
   0x1   :  { %9 = vsyncpa [#allocation5], 0  ;;  %s4813_s12 = smov [#allocation2]   ;;  %s4765_s16 = scalar_lea.hbm %s5951_s1, 18432 }
   0x2   :  { %s17_s13 = sshll.u32 %s4813_s12, 4  ;;  %p4766_p0 = scmp.ne.s32.totalorder %s5951_s1, %s4765_s16  ;;  %s18_s13 = int_to_ptr.vmem [resolvable:$true] %s17_s13 }
   0x3   :  { %p4769_p1 = scmp.lt.u32.totalorder %s4765_s16, %s5951_s1 }
   0x5   :  { %p4771_p2 = pnand %p4769_p1, %p4766_p0 }
   0x7   :  { %4774 = shalt.err (!%p4771_p2)
}
   0x8   :  { %s4775_s21 = scalar_lea.vmem %s18_s13, 18432  ;;  %p4780_p4 = scmp.lt.s32.totalorder %s18_s13, %s18_s13 }
   0x9   :  { %p4776_p3 = scmp.ne.s32.totalorder %s18_s13, %s4775_s21  ;;  %p4781_p5 = scmp.lt.s32.totalorder %s4775_s21, %s4775_s21 }
   0xb   :  { %p4782_p6 = por %p4781_p5, %p4780_p4 }
   0xd   :  { %p4783_p7 = pnand %p4782_p6, %p4776_p3 }
   0xf   :  { %4786 = shalt.err (!%p4783_p7)
}
  0x10   :  { %s4814_s22 = smov 512   ;;  %s4815_s23 = smov 32  }
  0x11   :  { %23 = dma.hbm_to_vmem [thread:$0]  %s5951_s1, 18432, %s18_s13, [#allocation3], %s4814_s22, %s4814_s22, %s4815_s23  }
  0x12   :  { %s4816_s26 = smov [#allocation4]   ;;  %s4787_s30 = scalar_lea.hbm %s5952_s2, 64 }
  0x13   :  { %s30_s27 = sshll.u32 %s4816_s26, 4  ;;  %p4788_p8 = scmp.ne.s32.totalorder %s5952_s2, %s4787_s30  ;;  %s31_s27 = int_to_ptr.vmem [resolvable:$true] %s30_s27 }
  0x14   :  { %p4791_p9 = scmp.lt.u32.totalorder %s4787_s30, %s5952_s2 }
  0x16   :  { %p4793_p10 = pnand %p4791_p9, %p4788_p8 }
  0x18   :  { %4796 = shalt.err (!%p4793_p10)
}
  0x19   :  { %s4797_s8 = scalar_lea.vmem %s31_s27, 64  ;;  %p4802_p12 = scmp.lt.s32.totalorder %s31_s27, %s31_s27 }
  0x1a   :  { %p4798_p11 = scmp.ne.s32.totalorder %s31_s27, %s4797_s8  ;;  %p4803_p13 = scmp.lt.s32.totalorder %s4797_s8, %s4797_s8 }
  0x1c   :  { %p4804_p0 = por %p4803_p13, %p4802_p12 }
  0x1e   :  { %p4805_p1 = pnand %p4804_p0, %p4798_p11 }
  0x20   :  { %4808 = shalt.err (!%p4805_p1)
}
  0x21   :  { %33 = dma.hbm_to_vmem [thread:$0]  %s5952_s2, 64, %s31_s27, [#allocation5]  }
  0x22   :  { %4809 = dma.done.wait [#allocation3], 18432  }
  0x23   :  { %4810 = vsyncadd [#allocation3], 4294948864 }
  0x24   :  { %4811 = dma.done.wait [#allocation5], 64  }
  0x25   :  { %4812 = vsyncadd [#allocation5], 4294967232  ;;  %v4817_v0 = vmov 0   ;;  %v191_v1 = vld [vmem:[#allocation2 + $0x180] sm:$0xff]  ;;  %v192_v3 = vld [vmem:[#allocation2 + $0x188] sm:$0xff]  ;;  %vm491_vm3 = vcmask 785408  }
  0x26   :  { %536 = vmatprep.mubr.bf16.mxu0 %v4817_v0  ;;  %3510 = vst [vmem:[%s5953_s3 + $0x20] sm:$0x11] %v4817_v0  ;;  %3511 = vst [vmem:[%s5953_s3 + $0x28] sm:$0x11] %v4817_v0  ;;  %609 = vmatprep.mubr.bf16.mxu1 %v4817_v0  ;;  %v195_v2 = vld [vmem:[#allocation2 + $0x1a0] sm:$0xff]  ;;  %v196_v5 = vld [vmem:[#allocation2 + $0x1a8] sm:$0xff] }
  0x27   :  { %3516 = vst [vmem:[%s5953_s3 + $0x50] sm:$0x11] %v4817_v0  ;;  %3517 = vst [vmem:[%s5953_s3 + $0x58] sm:$0x11] %v4817_v0  ;;  %v4266_v4 = vcombine.high %v191_v1, %v195_v2  ;;  %v4265_v6 = vcombine.low %v191_v1, %v195_v2  ;;  %v199_v7 = vld [vmem:[#allocation2 + $0x1c0] sm:$0xff]  ;;  %v4268_v9 = vcombine.high %v192_v3, %v196_v5  ;;  %v200_v12 = vld [vmem:[#allocation2 + $0x1c8] sm:$0xff] }
  0x28   :  { %v203_v8 = vld [vmem:[#allocation2 + $0x1e0] sm:$0xff]  ;;  %v4267_v10 = vcombine.low %v192_v3, %v196_v5  ;;  %v204_v13 = vld [vmem:[#allocation2 + $0x1e8] sm:$0xff]  ;;  %vm99_vm0 = vsmask.f32 3328  ;;  %vm100_vm1 = vsmask.f32 7440 }
  0x29   :  { %v4274_v11 = vcombine.high %v199_v7, %v203_v8  ;;  %v207_v14 = vld [vmem:[#allocation2 + $0x200] sm:$0xff]  ;;  %504 = vmatprep.subr.bf16.mxu0 %v4266_v4  ;;  %v4276_v15 = vcombine.high %v200_v12, %v204_v13  ;;  %v208_v17 = vld [vmem:[#allocation2 + $0x208] sm:$0xff]  ;;  %577 = vmatprep.subr.bf16.mxu1 %v4268_v9  ;;  %v4273_v19 = vcombine.low %v199_v7, %v203_v8  ;;  %vm4910_vm2 = vmor %vm99_vm0, %vm100_vm1  ;;  %vm1366_vm4 = vcmask 1042432  }
  0x2a   :  { %v211_v16 = vld [vmem:[#allocation2 + $0x220] sm:$0xff]  ;;  %v212_v18 = vld [vmem:[#allocation2 + $0x228] sm:$0xff]  ;;  %505 = vmatpush1.bf16.msra.mxu0 %v4265_v6  ;;  %578 = vmatpush1.bf16.msra.mxu1 %v4267_v10  ;;  %v4275_v20 = vcombine.low %v200_v12, %v204_v13  ;;  %v4917_v1 = vld [vmem:[%s5950_s0 + $0x10] sm:$0x1]  ;;  %vm1367_vm5 = vcmask 1046532   ;;  %vm3968_vm7 = vcmask 1042434  }
  0x2b   :  { %506 = vmatprep.subr.bf16.mxu0 %v4274_v11  ;;  %v4282_v21 = vcombine.high %v207_v14, %v211_v16  ;;  %v215_v22 = vld [vmem:[#allocation2 + $0x240] sm:$0xff]  ;;  %579 = vmatprep.subr.bf16.mxu1 %v4276_v15  ;;  %v4284_v24 = vcombine.high %v208_v17, %v212_v18  ;;  %v216_v25 = vld [vmem:[#allocation2 + $0x248] sm:$0xff]  ;;  %v4281_v27 = vcombine.low %v207_v14, %v211_v16  ;;  %v4925_v6 = vld [vmem:[%s5950_s0 + $0x14] sm:$0xf]  ;;  %v142_v16 = vshll.u32 %v4917_v1, 16 }
  0x2c   :  { %v219_v23 = vld [vmem:[#allocation2 + $0x260] sm:$0xff]  ;;  %v220_v26 = vld [vmem:[#allocation2 + $0x268] sm:$0xff]  ;;  %v4283_v28 = vcombine.low %v208_v17, %v212_v18  ;;  %v4930_v10 = vld [vmem:[%s5950_s0 + $0x18] sm:$0xf]  ;;  %vm3971_vm8 = vcmask 1043459   ;;  %vm3974_vm9 = vcmask 1044484  }
  0x2d   :  { %v4290_v29 = vcombine.high %v215_v22, %v219_v23  ;;  %v4884_v30 = vld [vmem:[%s5950_s0] sm:$0xf]  ;;  %v4889_v31 = vld [vmem:[%s5950_s0 + $0x4] sm:$0xf]  ;;  %v4894_v32 = vld [vmem:[%s5950_s0 + $0x8] sm:$0xf]  ;;  %v4292_v37 = vcombine.high %v216_v25, %v220_v26  ;;  %v4289_v47 = vcombine.low %v215_v22, %v219_v23  ;;  %v4291_v48 = vcombine.low %v216_v25, %v220_v26 }
  0x2e   :  { %507 = vmatpush1.bf16.msra.mxu0 %v4273_v19  ;;  %580 = vmatpush1.bf16.msra.mxu1 %v4275_v20  ;;  %v103_v33 = vshrl.u32 %v4884_v30, 16  ;;  %v106_v34 = vshll.u32 %v4884_v30, 16  ;;  %v112_v35 = vshll.u32 %v4889_v31, 16  ;;  %v116_v36 = vshrl.u32 %v4889_v31, 16  ;;  %v223_v38 = vld [vmem:[#allocation2 + $0x280] sm:$0xff]  ;;  %v224_v41 = vld [vmem:[#allocation2 + $0x288] sm:$0xff]  ;;  %vm5043_vm6 = vmor %vm1366_vm4, %vm1367_vm5 }
  0x2f   :  { %508 = vmatprep.subr.bf16.mxu0 %v4282_v21  ;;  %581 = vmatprep.subr.bf16.mxu1 %v4284_v24  ;;  %v227_v39 = vld [vmem:[#allocation2 + $0x2a0] sm:$0xff]  ;;  %v122_v40 = vshll.u32 %v4894_v32, 16  ;;  %v228_v42 = vld [vmem:[#allocation2 + $0x2a8] sm:$0xff]  ;;  %v126_v54 = vshrl.u32 %v4894_v32, 16  ;;  %v193_v14 = vld [vmem:[#allocation2 + $0x190] sm:$0xff]  ;;  %v147_v21 = vshrl.u32 %v4925_v6, 16 }
  0x30   :  { %v105_v43 = vrot.slane %v103_v33, 4  ;;  %v108_v44 = vrot.slane %v106_v34, 5  ;;  %v114_v45 = vrot.slane %v112_v35, 5  ;;  %v118_v46 = vrot.slane %v116_v36, 4  ;;  %v4904_v49 = vld [vmem:[%s5950_s0 + $0xc] sm:$0xf] }
  0x31   :  { %v4298_v50 = vcombine.high %v223_v38, %v227_v39  ;;  %v231_v51 = vld [vmem:[#allocation2 + $0x2c0] sm:$0xff]  ;;  %v4300_v55 = vcombine.high %v224_v41, %v228_v42  ;;  %v232_v57 = vld [vmem:[#allocation2 + $0x2c8] sm:$0xff]  ;;  %v124_v59 = vrot.slane %v122_v40, 5  ;;  %v132_v60 = vshll.u32 %v4904_v49, 16  ;;  %v197_v15 = vld [vmem:[#allocation2 + $0x1b0] sm:$0xff] }
  0x32   :  { %509 = vmatpush1.bf16.msra.mxu0 %v4281_v27  ;;  %582 = vmatpush1.bf16.msra.mxu1 %v4283_v28  ;;  %v109_v52 = vor.u32 %v108_v44, %v105_v43  ;;  %v119_v53 = vor.u32 %v118_v46, %v114_v45  ;;  %v235_v56 = vld [vmem:[#allocation2 + $0x2e0] sm:$0xff]  ;;  %v236_v58 = vld [vmem:[#allocation2 + $0x2e8] sm:$0xff]  ;;  %v128_v2 = vrot.slane %v126_v54, 4  ;;  %v136_v3 = vshrl.u32 %v4904_v49, 16  ;;  %v194_v17 = vld [vmem:[#allocation2 + $0x198] sm:$0xff] }
  0x33   :  { %510 = vmatprep.subr.bf16.mxu0 %v4290_v29  ;;  %583 = vmatprep.subr.bf16.mxu1 %v4292_v37  ;;  %v4297_v4 = vcombine.low %v223_v38, %v227_v39  ;;  %v4920_v5 = vrot.slane %v132_v60, 5  ;;  %v4299_v7 = vcombine.low %v224_v41, %v228_v42  ;;  %v4306_v8 = vcombine.high %v231_v51, %v235_v56  ;;  %v198_v18 = vld [vmem:[#allocation2 + $0x1b8] sm:$0xff]  ;;  %v201_v33 = vld [vmem:[#allocation2 + $0x1d0] sm:$0xff] }
  0x34   :  { %v110_v62 = vrot.slane %v109_v52, 4  ;;  %v120_v63 = vrot.slane %v119_v53, 4  ;;  %v138_v9 = vrot.slane %v136_v3, 4  ;;  %v4308_v11 = vcombine.high %v232_v57, %v236_v58  ;;  %v205_v34 = vld [vmem:[#allocation2 + $0x1f0] sm:$0xff]  ;;  %v202_v36 = vld [vmem:[#allocation2 + $0x1d8] sm:$0xff] }
  0x35   :  { %v129_v19 = vor.u32 %v128_v2, %v124_v59  ;;  %v150_v22 = vshll.u32 %v4925_v6, 16  ;;  %v4305_v23 = vcombine.low %v231_v51, %v235_v56  ;;  %v156_v24 = vshll.u32 %v4930_v10, 16  ;;  %v206_v37 = vld [vmem:[#allocation2 + $0x1f8] sm:$0xff]  ;;  %v209_v52 = vld [vmem:[#allocation2 + $0x210] sm:$0xff] }
  0x36   :  { %511 = vmatpush1.bf16.msra.mxu0 %v4289_v47  ;;  %584 = vmatpush1.bf16.msra.mxu1 %v4291_v48  ;;  %v115_v12 = vsel %vm4910_vm2, %v110_v62, %v114_v45  ;;  %v125_v13 = vsel %vm4910_vm2, %v120_v63, %v124_v59  ;;  %v139_v20 = vor.u32 %v138_v9, %v4920_v5  ;;  %v160_v25 = vshrl.u32 %v4930_v10, 16  ;;  %v4947_v43 = vld [vmem:[%s5950_s0 + $0x1c] sm:$0xf]  ;;  %v4954_v48 = vld [vmem:[%s5950_s0 + $0x20] sm:$0xf]  ;;  %v213_v53 = vld [vmem:[#allocation2 + $0x230] sm:$0xff] }
  0x37   :  { %512 = vmatprep.subr.bf16.mxu0 %v4298_v50  ;;  %585 = vmatprep.subr.bf16.mxu1 %v4300_v55  ;;  %v4307_v26 = vcombine.low %v232_v57, %v236_v58  ;;  %v4270_v27 = vcombine.high %v193_v14, %v197_v15  ;;  %v4942_v28 = vcombine.low %v115_v12, %v125_v13  ;;  %v144_v35 = vrot.slane %v142_v16, 5  ;;  %v210_v56 = vld [vmem:[#allocation2 + $0x218] sm:$0xff]  ;;  %v217_v12 = vld [vmem:[#allocation2 + $0x250] sm:$0xff] }
  0x38   :  { %v4272_v29 = vcombine.high %v194_v17, %v198_v18  ;;  %v130_v38 = vrot.slane %v129_v19, 4  ;;  %v140_v39 = vrot.slane %v139_v20, 4  ;;  %v149_v40 = vrot.slane %v147_v21, 4  ;;  %v214_v57 = vld [vmem:[#allocation2 + $0x238] sm:$0xff]  ;;  %v221_v13 = vld [vmem:[#allocation2 + $0x270] sm:$0xff] }
  0x39   :  { %v152_v41 = vrot.slane %v150_v22, 5  ;;  %v4269_v42 = vcombine.low %v193_v14, %v197_v15  ;;  %v4949_v44 = vrot.slane %v156_v24, 5  ;;  %v162_v45 = vrot.slane %v160_v25, 4  ;;  %v218_v15 = vld [vmem:[#allocation2 + $0x258] sm:$0xff]  ;;  %v4979_v21 = vld [vmem:[%s5950_s0 + $0x24] sm:$0x1] }
  0x3a   :  { %513 = vmatpush1.bf16.msra.mxu0 %v4297_v4  ;;  %586 = vmatpush1.bf16.msra.mxu1 %v4299_v7  ;;  %v4271_v46 = vcombine.low %v194_v17, %v198_v18  ;;  %v4278_v47 = vcombine.high %v201_v33, %v205_v34  ;;  %v4277_v50 = vcombine.low %v201_v33, %v205_v34  ;;  %v166_v59 = vshll.u32 %v4947_v43, 16  ;;  %v222_v16 = vld [vmem:[#allocation2 + $0x278] sm:$0xff]  ;;  %v229_v24 = vld [vmem:[#allocation2 + $0x2b0] sm:$0xff] }
  0x3b   :  { %514 = vmatprep.subr.bf16.mxu0 %v4306_v8  ;;  %587 = vmatprep.subr.bf16.mxu1 %v4308_v11  ;;  %v4280_v51 = vcombine.high %v202_v36, %v206_v37  ;;  %v135_v54 = vsel %vm4910_vm2, %v130_v38, %v4920_v5  ;;  %v145_v55 = vsel %vm4910_vm2, %v140_v39, %v144_v35  ;;  %v170_v62 = vshrl.u32 %v4947_v43, 16  ;;  %v230_v33 = vld [vmem:[#allocation2 + $0x2b8] sm:$0xff] }
  0x3c   :  { %v153_v58 = vor.u32 %v152_v41, %v149_v40  ;;  %v163_v60 = vor.u32 %v162_v45, %v4949_v44  ;;  %v176_v63 = vshll.u32 %v4954_v48, 16  ;;  %v180_v2 = vshrl.u32 %v4954_v48, 16 }
  0x3d   :  { %v4279_v3 = vcombine.low %v202_v36, %v206_v37  ;;  %v4286_v4 = vcombine.high %v209_v52, %v213_v53  ;;  %v4288_v5 = vcombine.high %v210_v56, %v214_v57  ;;  %v4972_v7 = vcombine.low %v135_v54, %v145_v55 }
  0x3e   :  { %515 = vmatpush1.bf16.msra.mxu0 %v4305_v23  ;;  %588 = vmatpush1.bf16.msra.mxu1 %v4307_v26  ;;  %v4285_v8 = vcombine.low %v209_v52, %v213_v53  ;;  %v154_v9 = vrot.slane %v153_v58, 4  ;;  %v168_v11 = vrot.slane %v166_v59, 5  ;;  %v164_v14 = vrot.slane %v163_v60, 4  ;;  %v225_v23 = vld [vmem:[#allocation2 + $0x290] sm:$0xff]  ;;  %v238_v52 = vld [vmem:[#allocation2 + $0x2f8] sm:$0xff]  ;;  %v5010_v58 = vld [vmem:[#allocation2] sm:$0xff] }
  0x3f   :  { %650 = vmatprep.subr.bf16.mxu0 %v4270_v27  ;;  %723 = vmatprep.subr.bf16.mxu1 %v4272_v29  ;;  %v172_v17 = vrot.slane %v170_v62, 4  ;;  %v4974_v18 = vrot.slane %v176_v63, 5  ;;  %v182_v19 = vrot.slane %v180_v2, 4  ;;  %v4287_v20 = vcombine.low %v210_v56, %v214_v57  ;;  %v226_v29 = vld [vmem:[#allocation2 + $0x298] sm:$0xff]  ;;  %v5012_v59 = vld [vmem:[#allocation2 + $0x20] sm:$0xff]  ;;  %v5022_v62 = vld [vmem:[#allocation2 + $0x8] sm:$0xff] }
  0x40   :  { %v4294_v22 = vcombine.high %v217_v12, %v221_v13  ;;  %v159_v25 = vsel %vm4910_vm2, %v154_v9, %v4949_v44  ;;  %v4293_v26 = vcombine.low %v217_v12, %v221_v13  ;;  %v4296_v27 = vcombine.high %v218_v15, %v222_v16  ;;  %v237_v44 = vld [vmem:[#allocation2 + $0x2f0] sm:$0xff]  ;;  %v5024_v63 = vld [vmem:[#allocation2 + $0x28] sm:$0xff] }
  0x41   :  { %4313 = vmatmul.mubr.msk.bf16.vlgmr.msra.gmra.mrb[0].mxu0 %vm491_vm3, %v4942_v28  ;;  %4317 = vmatmul.mubr.msk.bf16.vlgmr.msra.gmra.mrb[0].mxu1 %vm491_vm3, %v4942_v28  ;;  %v169_v34 = vsel %vm4910_vm2, %v164_v14, %v168_v11  ;;  %v173_v35 = vor.u32 %v172_v17, %v168_v11  ;;  %v183_v36 = vor.u32 %v182_v19, %v4974_v18  ;;  %v186_v37 = vshll.u32 %v4979_v21, 16  ;;  %v57_v19 = vld [vmem:[#allocation2 + $0x40] sm:$0xff] }
  0x42   :  { %651 = vmatpush1.bf16.msra.mxu0 %v4269_v42  ;;  %724 = vmatpush1.bf16.msra.mxu1 %v4271_v46  ;;  %v4295_v38 = vcombine.low %v218_v15, %v222_v16  ;;  %v4302_v39 = vcombine.high %v225_v23, %v229_v24  ;;  %v4304_v40 = vcombine.high %v226_v29, %v230_v33  ;;  %v233_v42 = vld [vmem:[#allocation2 + $0x2d0] sm:$0xff]  ;;  %v1374_v13 = vrot.slane %v4894_v32, 5 }
  0x43   :  { %652 = vmatprep.subr.bf16.mxu0 %v4278_v47  ;;  %725 = vmatprep.subr.bf16.mxu1 %v4280_v51  ;;  %v4994_v41 = vcombine.low %v159_v25, %v169_v34  ;;  %v4998_v45 = vcombine.low %v4884_v30, %v4889_v31  ;;  %v174_v46 = vrot.slane %v173_v35, 4  ;;  %v184_v47 = vrot.slane %v183_v36, 4  ;;  %v234_v51 = vld [vmem:[#allocation2 + $0x2d8] sm:$0xff] }
  0x44   :  { %546 = vmatprep.mubr.bf16.mxu0 %v4817_v0  ;;  %619 = vmatprep.mubr.bf16.mxu1 %v4817_v0  ;;  %v4301_v53 = vcombine.low %v225_v23, %v229_v24  ;;  %v5002_v54 = vcombine.low %v4894_v32, %v4904_v49  ;;  %v4303_v55 = vcombine.low %v226_v29, %v230_v33  ;;  %v1384_v16 = vrot.slane %v4930_v10, 5 }
  0x45   :  { %v4310_v56 = vcombine.high %v233_v42, %v237_v44  ;;  %v5006_v30 = vcombine.low %v4925_v6, %v4930_v10  ;;  %v4312_v57 = vcombine.high %v234_v51, %v238_v52  ;;  %v179_v60 = vsel %vm4910_vm2, %v174_v46, %v4974_v18  ;;  %v66_v46 = vld [vmem:[#allocation2 + $0x88] sm:$0xff] }
  0x46   :  { %653 = vmatpush1.bf16.msra.mxu0 %v4277_v50  ;;  %726 = vmatpush1.bf16.msra.mxu1 %v4279_v3  ;;  %v188_v50 = vrot.slane %v186_v37, 5  ;;  %v4309_v2 = vcombine.low %v233_v42, %v237_v44  ;;  %v5029_v3 = vcombine.low %v4947_v43, %v4954_v48  ;;  %v4334_v61 = vcombine.high %v5010_v58, %v5012_v59 }
  0x47   :  { %654 = vmatprep.subr.bf16.mxu0 %v4286_v4  ;;  %727 = vmatprep.subr.bf16.mxu1 %v4288_v5  ;;  %v1371_v4 = vrot.slane %v4889_v31, 5  ;;  %v4311_v5 = vcombine.low %v234_v51, %v238_v52  ;;  %v4336_v11 = vcombine.high %v5022_v62, %v5024_v63  ;;  %v1377_v31 = vrot.slane %v4904_v49, 5  ;;  %v1361_v49 = vld [vmem:[%s5950_s0 + $0x14] sm:$0xe] }
  0x48   :  { %v189_v6 = vsel %vm4910_vm2, %v184_v47, %v188_v50  ;;  %v1376_v32 = vrot.slane %v1374_v13, 4  ;;  %v1380_v18 = vrot.slane %v4917_v1, 5  ;;  %v4398_v23 = vrot.slane %v1361_v49, 9  ;;  %v70_v47 = vld [vmem:[#allocation2 + $0xa8] sm:$0xff]  ;;  %v93_v49 = vld [vmem:[#allocation2 + $0x160] sm:$0xff] }
  0x49   :  { %4314 = vmatmul.mubr.msk.bf16.gmra.mrb[4].mxu0 %vm491_vm3, %v4972_v7  ;;  %4318 = vmatmul.mubr.msk.bf16.gmra.mrb[4].mxu1 %vm491_vm3, %v4972_v7  ;;  %v5037_v9 = vcombine.low %v179_v60, %v189_v6  ;;  %v1373_v15 = vrot.slane %v1371_v4, 4  ;;  %v1379_v17 = vrot.slane %v1377_v31, 4  ;;  %v1386_v24 = vrot.slane %v1384_v16, 4  ;;  %v77_v60 = vld [vmem:[#allocation2 + $0xe0] sm:$0xff]  ;;  %v74_v6 = vld [vmem:[#allocation2 + $0xc8] sm:$0xff] }
  0x4a   :  { %655 = vmatpush1.bf16.msra.mxu0 %v4285_v8  ;;  %728 = vmatpush1.bf16.msra.mxu1 %v4287_v20  ;;  %v1360_v8 = vld [vmem:[%s5950_s0] sm:$0xe]  ;;  %v1387_v25 = vrot.slane %v4947_v43, 5  ;;  %v4333_v1 = vcombine.low %v5010_v58, %v5012_v59  ;;  %v1378_v33 = vsel %vm5043_vm6, %v1376_v32, %v1377_v31  ;;  %v4335_v35 = vcombine.low %v5022_v62, %v5024_v63  ;;  %v78_v62 = vld [vmem:[#allocation2 + $0xe8] sm:$0xff] }
  0x4b   :  { %556 = vmatprep.mubr.bf16.mxu0 %v4817_v0  ;;  %629 = vmatprep.mubr.bf16.mxu1 %v4817_v0  ;;  %v4397_v12 = vrot.slane %v1360_v8, 9  ;;  %v61_v20 = vld [vmem:[#allocation2 + $0x60] sm:$0xff]  ;;  %v1381_v34 = vsel %vm5043_vm6, %v1379_v17, %v1380_v18  ;;  %v1390_v52 = vrot.slane %v4954_v48, 5  ;;  %v4360_v8 = vcombine.high %v74_v6, %v78_v62  ;;  %v86_v31 = vld [vmem:[#allocation2 + $0x128] sm:$0xff] }
  0x4c   :  { %656 = vmatprep.subr.bf16.mxu0 %v4294_v22  ;;  %729 = vmatprep.subr.bf16.mxu1 %v4296_v27  ;;  %v1375_v22 = vsel %vm5043_vm6, %v1373_v15, %v1374_v13  ;;  %v62_v27 = vld [vmem:[#allocation2 + $0x68] sm:$0xff]  ;;  %v4342_v36 = vcombine.high %v57_v19, %v61_v20  ;;  %v5073_v37 = vcombine.low %v1378_v33, %v1381_v34  ;;  %v1389_v44 = vrot.slane %v1387_v25, 4  ;;  %v63_v33 = vld [vmem:[#allocation2 + $0x70] sm:$0xff]  ;;  %v60_v34 = vld [vmem:[#allocation2 + $0x58] sm:$0xff] }
  0x4d   :  { %v1372_v10 = vsel %vm5043_vm6, %v4397_v12, %v1371_v4  ;;  %v1388_v42 = vsel %vm5043_vm6, %v1386_v24, %v1387_v25  ;;  %v4341_v51 = vcombine.low %v57_v19, %v61_v20  ;;  %v1392_v59 = vrot.slane %v1390_v52, 4  ;;  %v90_v32 = vld [vmem:[#allocation2 + $0x148] sm:$0xff]  ;;  %v51_v20 = vld [vmem:[#allocation2 + $0x10] sm:$0xff]  ;;  %v56_v24 = vld [vmem:[#allocation2 + $0x38] sm:$0xff] }
  0x4e   :  { %657 = vmatpush1.bf16.msra.mxu0 %v4293_v26  ;;  %730 = vmatpush1.bf16.msra.mxu1 %v4295_v38  ;;  %v58_v26 = vld [vmem:[#allocation2 + $0x48] sm:$0xff]  ;;  %v5063_v29 = vcombine.low %v1372_v10, %v1375_v22  ;;  %v65_v38 = vld [vmem:[#allocation2 + $0x80] sm:$0xff]  ;;  %v1391_v58 = vsel %vm5043_vm6, %v1389_v44, %v1390_v52  ;;  %v4359_v13 = vcombine.low %v74_v6, %v78_v62  ;;  %v55_v22 = vld [vmem:[#allocation2 + $0x30] sm:$0xff]  ;;  %vm4213_vm10 = vcmask 1043456  }
  0x4f   :  { %658 = vmatprep.subr.bf16.mxu0 %v4302_v39  ;;  %731 = vmatprep.subr.bf16.mxu1 %v4304_v40  ;;  %v4344_v43 = vcombine.high %v58_v26, %v62_v27  ;;  %v69_v39 = vld [vmem:[#allocation2 + $0xa0] sm:$0xff]  ;;  %v1385_v40 = vsel %vm5043_vm6, %v4398_v23, %v1384_v16  ;;  %v94_v17 = vld [vmem:[#allocation2 + $0x168] sm:$0xff]  ;;  %v52_v23 = vld [vmem:[#allocation2 + $0x18] sm:$0xff]  ;;  %vm4214_vm11 = vsmask.f32 7938  ;;  %vm3977_vm12 = vcmask 1045509  }
  0x50   :  { %v5081_v50 = vcombine.low %v1385_v40, %v1388_v42  ;;  %v4349_v48 = vcombine.low %v65_v38, %v69_v39  ;;  %v89_v16 = vld [vmem:[#allocation2 + $0x140] sm:$0xff]  ;;  %v4376_v19 = vcombine.high %v90_v32, %v94_v17  ;;  %v67_v40 = vld [vmem:[#allocation2 + $0x90] sm:$0xff]  ;;  %v68_v44 = vld [vmem:[#allocation2 + $0x98] sm:$0xff]  ;;  %vm4216_vm13 = vcmask 1047556  }
  0x51   :  { %4315 = vmatmul.mubr.msk.bf16.gmra.mrb[8].mxu0 %vm491_vm3, %v4994_v41  ;;  %4319 = vmatmul.mubr.msk.bf16.gmra.mrb[8].mxu1 %vm491_vm3, %v4994_v41  ;;  %v4374_v10 = vcombine.high %v89_v16, %v93_v49  ;;  %v4373_v25 = vcombine.low %v89_v16, %v93_v49  ;;  %v71_v42 = vld [vmem:[#allocation2 + $0xb0] sm:$0xff]  ;;  %v84_v62 = vld [vmem:[#allocation2 + $0x118] sm:$0xff]  ;;  %v1396_v49 = vld [vmem:[#allocation2 + $0x300] sm:$0xff]  ;;  %vm4217_vm14 = vsmask.f32 7954  ;;  %vm3980_vm15 = vcmask 1046534  }
  0x52   :  { %566 = vmatprep.mubr.bf16.mxu0 %v4817_v0  ;;  %639 = vmatprep.mubr.bf16.mxu1 %v4817_v0  ;;  %vm3983_vm0 = vcmask 1047559   ;;  %vm5459_vm1 = vmand %vm4213_vm10, %vm4214_vm11  ;;  %vm4025_vm4 = vcmask 1041409   ;;  %vm4228_vm5 = vcmask 1040384   ;;  %vm4232_vm10 = vsmask.f32 4352 }
  0x53   :  { %659 = vmatpush1.bf16.msra.mxu0 %v4301_v53  ;;  %732 = vmatpush1.bf16.msra.mxu1 %v4303_v55  ;;  %v4343_v53 = vcombine.low %v58_v26, %v62_v27  ;;  %v4350_v55 = vcombine.high %v65_v38, %v69_v39  ;;  %v4375_v26 = vcombine.low %v90_v32, %v94_v17  ;;  %v1400_v32 = vld [vmem:[#allocation2 + $0x320] sm:$0xff]  ;;  %v1397_v17 = vld [vmem:[#allocation2 + $0x308] sm:$0xff]  ;;  %vm4218_vm2 = vmand %vm4216_vm13, %vm4217_vm14 }
  0x54   :  { %660 = vmatprep.subr.bf16.mxu0 %v4310_v56  ;;  %733 = vmatprep.subr.bf16.mxu1 %v4312_v57  ;;  %v1393_v56 = vrot.slane %v4979_v21, 5  ;;  %v4352_v57 = vcombine.high %v66_v46, %v70_v47  ;;  %v4351_v21 = vcombine.low %v66_v46, %v70_v47  ;;  %v4338_v27 = vcombine.high %v51_v20, %v55_v22  ;;  %v72_v46 = vld [vmem:[#allocation2 + $0xb8] sm:$0xff]  ;;  %vm4233_vm13 = vmand %vm3974_vm9, %vm4232_vm10 }
  0x55   :  { %v4356_v52 = vcombine.high %v68_v44, %v72_v46 }
  0x56   :  { %v1394_v63 = vsel %vm5043_vm6, %v1392_v59, %v1393_v56  ;;  %v4353_v56 = vcombine.low %v67_v40, %v71_v42  ;;  %v4355_v59 = vcombine.low %v68_v44, %v72_v46  ;;  %v1424_v44 = vld [vmem:[#allocation2 + $0x3e0] sm:$0xff]  ;;  %vm4229_vm6 = vsmask.f32 256 }
  0x57   :  { %661 = vmatpush1.bf16.msra.mxu0 %v4309_v2  ;;  %734 = vmatpush1.bf16.msra.mxu1 %v4311_v5  ;;  %v5093_v2 = vcombine.low %v1391_v58, %v1394_v63  ;;  %v81_v5 = vld [vmem:[#allocation2 + $0x100] sm:$0xff]  ;;  %v80_v58 = vld [vmem:[#allocation2 + $0xf8] sm:$0xff]  ;;  %vm5631_vm11 = vmand %vm4228_vm5, %vm4229_vm6 }
  0x58   :  { %1068 = vmatprep.subr.bf16.mxu0 %v4334_v61  ;;  %1141 = vmatprep.subr.bf16.mxu1 %v4336_v11  ;;  %v85_v61 = vld [vmem:[#allocation2 + $0x120] sm:$0xff]  ;;  %v82_v11 = vld [vmem:[#allocation2 + $0x108] sm:$0xff]  ;;  %v88_v63 = vld [vmem:[#allocation2 + $0x138] sm:$0xff] }
  0x59   :  { %4316 = vmatmul.mubr.msk.bf16.gmra.mrb[12].mxu0 %vm491_vm3, %v5037_v9  ;;  %4320 = vmatmul.mubr.msk.bf16.gmra.mrb[12].mxu1 %vm491_vm3, %v5037_v9  ;;  %v4366_v14 = vcombine.high %v81_v5, %v85_v61  ;;  %v4368_v15 = vcombine.high %v82_v11, %v86_v31  ;;  %v4365_v18 = vcombine.low %v81_v5, %v85_v61  ;;  %vm5646_vm14 = vmor %vm4233_vm13, %vm5631_vm11 }
  0x5a   :  { %682 = vmatprep.mubr.bf16.mxu0 %v4817_v0  ;;  %755 = vmatprep.mubr.bf16.mxu1 %v4817_v0  ;;  %v4372_v61 = vcombine.high %v84_v62, %v88_v63 }
  0x61   :  { %4321 = vmatmul.mubr.msk.bf16.vlgmr.msra.gmra.mrb[16].mxu0 %vm491_vm3, %v4942_v28  ;;  %4325 = vmatmul.mubr.msk.bf16.vlgmr.msra.gmra.mrb[16].mxu1 %vm491_vm3, %v4942_v28  ;;  %v73_v28 = vld [vmem:[#allocation2 + $0xc0] sm:$0xff] }
  0x62   :  { %1069 = vmatpush1.bf16.msra.mxu0 %v4333_v1  ;;  %1142 = vmatpush1.bf16.msra.mxu1 %v4335_v35  ;;  %v4358_v4 = vcombine.high %v73_v28, %v77_v60  ;;  %v4357_v12 = vcombine.low %v73_v28, %v77_v60  ;;  %v4340_v1 = vcombine.high %v52_v23, %v56_v24  ;;  %v64_v35 = vld [vmem:[#allocation2 + $0x78] sm:$0xff]  ;;  %v83_v60 = vld [vmem:[#allocation2 + $0x110] sm:$0xff] }
  0x63   :  { %1070 = vmatprep.subr.bf16.mxu0 %v4342_v36  ;;  %1143 = vmatprep.subr.bf16.mxu1 %v4344_v43  ;;  %v4337_v36 = vcombine.low %v51_v20, %v55_v22  ;;  %v4339_v43 = vcombine.low %v52_v23, %v56_v24  ;;  %v4348_v39 = vcombine.high %v60_v34, %v64_v35  ;;  %v1404_v22 = vld [vmem:[#allocation2 + $0x340] sm:$0xff]  ;;  %v1405_v24 = vld [vmem:[#allocation2 + $0x348] sm:$0xff] }
  0x64   :  { %692 = vmatprep.mubr.bf16.mxu0 %v4817_v0  ;;  %765 = vmatprep.mubr.bf16.mxu1 %v4817_v0  ;;  %v4347_v47 = vcombine.low %v60_v34, %v64_v35  ;;  %v1408_v23 = vld [vmem:[#allocation2 + $0x360] sm:$0xff]  ;;  %v1413_v35 = vld [vmem:[#allocation2 + $0x388] sm:$0xff] }
  0x65   :  { %v1416_v34 = vld [vmem:[#allocation2 + $0x3a0] sm:$0xff] }
  0x66   :  { %1071 = vmatpush1.bf16.msra.mxu0 %v4341_v51  ;;  %1144 = vmatpush1.bf16.msra.mxu1 %v4343_v53  ;;  %v4354_v51 = vcombine.high %v67_v40, %v71_v42  ;;  %v75_v53 = vld [vmem:[#allocation2 + $0xd0] sm:$0xff]  ;;  %v1420_v42 = vld [vmem:[#allocation2 + $0x3c0] sm:$0xff] }
  0x67   :  { %1072 = vmatprep.subr.bf16.mxu0 %v4350_v55  ;;  %1145 = vmatprep.subr.bf16.mxu1 %v4352_v57  ;;  %v79_v55 = vld [vmem:[#allocation2 + $0xf0] sm:$0xff]  ;;  %v76_v57 = vld [vmem:[#allocation2 + $0xd8] sm:$0xff] }
  0x68   :  { %v4362_v28 = vcombine.high %v75_v53, %v79_v55  ;;  %v4364_v6 = vcombine.high %v76_v57, %v80_v58 }
  0x69   :  { %4322 = vmatmul.mubr.msk.bf16.gmra.mrb[20].mxu0 %vm491_vm3, %v4972_v7  ;;  %4326 = vmatmul.mubr.msk.bf16.gmra.mrb[20].mxu1 %vm491_vm3, %v4972_v7  ;;  %v4367_v7 = vcombine.low %v82_v11, %v86_v31  ;;  %v95_v11 = vld [vmem:[#allocation2 + $0x170] sm:$0xff]  ;;  %v92_v31 = vld [vmem:[#allocation2 + $0x158] sm:$0xff] }
  0x6a   :  { %1073 = vmatpush1.bf16.msra.mxu0 %v4349_v48  ;;  %1146 = vmatpush1.bf16.msra.mxu1 %v4351_v21  ;;  %v87_v48 = vld [vmem:[#allocation2 + $0x130] sm:$0xff]  ;;  %v4361_v21 = vcombine.low %v75_v53, %v79_v55  ;;  %v1432_v53 = vld [vmem:[#allocation2 + $0x420] sm:$0xff] }
  0x6b   :  { %702 = vmatprep.mubr.bf16.mxu0 %v4817_v0  ;;  %775 = vmatprep.mubr.bf16.mxu1 %v4817_v0  ;;  %v4370_v5 = vcombine.high %v83_v60, %v87_v48 }
  0x6c   :  { %1074 = vmatprep.subr.bf16.mxu0 %v4358_v4  ;;  %1147 = vmatprep.subr.bf16.mxu1 %v4360_v8  ;;  %v4363_v4 = vcombine.low %v76_v57, %v80_v58  ;;  %v91_v8 = vld [vmem:[#allocation2 + $0x150] sm:$0xff]  ;;  %v1433_v57 = vld [vmem:[#allocation2 + $0x428] sm:$0xff]  ;;  %v4427_v58 = vcombine.low %v1420_v42, %v1424_v44 }
  0x6e   :  { %1075 = vmatpush1.bf16.msra.mxu0 %v4357_v12  ;;  %1148 = vmatpush1.bf16.msra.mxu1 %v4359_v13  ;;  %v96_v12 = vld [vmem:[#allocation2 + $0x178] sm:$0xff]  ;;  %v4369_v13 = vcombine.low %v83_v60, %v87_v48  ;;  %v1436_v48 = vld [vmem:[#allocation2 + $0x440] sm:$0xff] }
  0x6f   :  { %1076 = vmatprep.subr.bf16.mxu0 %v4366_v14  ;;  %1149 = vmatprep.subr.bf16.mxu1 %v4368_v15  ;;  %v4371_v14 = vcombine.low %v84_v62, %v88_v63  ;;  %v4378_v15 = vcombine.high %v91_v8, %v95_v11  ;;  %v4380_v16 = vcombine.high %v92_v31, %v96_v12  ;;  %v1437_v62 = vld [vmem:[#allocation2 + $0x448] sm:$0xff] }
  0x70   :  { %v1441_v63 = vld [vmem:[#allocation2 + $0x468] sm:$0xff] }
  0x71   :  { %4323 = vmatmul.mubr.msk.bf16.gmra.mrb[24].mxu0 %vm491_vm3, %v4994_v41  ;;  %4327 = vmatmul.mubr.msk.bf16.gmra.mrb[24].mxu1 %vm491_vm3, %v4994_v41  ;;  %v59_v41 = vld [vmem:[#allocation2 + $0x50] sm:$0xff] }
  0x72   :  { %712 = vmatprep.mubr.bf16.mxu0 %v4817_v0  ;;  %785 = vmatprep.mubr.bf16.mxu1 %v4817_v0  ;;  %v4346_v38 = vcombine.high %v59_v41, %v63_v33 }
  0x73   :  { %1077 = vmatpush1.bf16.msra.mxu0 %v4365_v18  ;;  %1150 = vmatpush1.bf16.msra.mxu1 %v4367_v7  ;;  %v1401_v18 = vld [vmem:[#allocation2 + $0x328] sm:$0xff]  ;;  %v4377_v7 = vcombine.low %v91_v8, %v95_v11  ;;  %v1402_v8 = vld [vmem:[#allocation2 + $0x330] sm:$0xff]  ;;  %v1399_v11 = vld [vmem:[#allocation2 + $0x318] sm:$0xff] }
  0x74   :  { %1078 = vmatprep.subr.bf16.mxu0 %v4374_v10  ;;  %1151 = vmatprep.subr.bf16.mxu1 %v4376_v19  ;;  %v4379_v10 = vcombine.low %v92_v31, %v96_v12  ;;  %v4404_v19 = vcombine.high %v1396_v49, %v1400_v32  ;;  %v4406_v20 = vcombine.high %v1397_v17, %v1401_v18  ;;  %v1403_v31 = vld [vmem:[#allocation2 + $0x338] sm:$0xff] }
  0x77   :  { %1079 = vmatpush1.bf16.msra.mxu0 %v4373_v25  ;;  %1152 = vmatpush1.bf16.msra.mxu1 %v4375_v26  ;;  %v1409_v25 = vld [vmem:[#allocation2 + $0x368] sm:$0xff]  ;;  %v4403_v26 = vcombine.low %v1396_v49, %v1400_v32  ;;  %v1407_v49 = vld [vmem:[#allocation2 + $0x358] sm:$0xff] }
  0x78   :  { %1214 = vmatprep.subr.bf16.mxu0 %v4338_v27  ;;  %1287 = vmatprep.subr.bf16.mxu1 %v4340_v1  ;;  %v4405_v27 = vcombine.low %v1397_v17, %v1401_v18  ;;  %v4412_v1 = vcombine.high %v1404_v22, %v1408_v23  ;;  %v1411_v32 = vld [vmem:[#allocation2 + $0x378] sm:$0xff]  ;;  %v4409_v18 = vcombine.low %v1399_v11, %v1403_v31 }
  0x79   :  { %4324 = vmatmul.mubr.msk.bf16.gmra.mrb[28].mxu0 %vm491_vm3, %v5037_v9  ;;  %4328 = vmatmul.mubr.msk.bf16.gmra.mrb[28].mxu1 %vm491_vm3, %v5037_v9  ;;  %v4345_v9 = vcombine.low %v59_v41, %v63_v33  ;;  %v4414_v41 = vcombine.high %v1405_v24, %v1409_v25  ;;  %v1412_v33 = vld [vmem:[#allocation2 + $0x380] sm:$0xff] }
  0x7a   :  { %1100 = vmatprep.mubr.bf16.mxu0 %v4817_v0  ;;  %1173 = vmatprep.mubr.bf16.mxu1 %v4817_v0  ;;  %v4419_v46 = vcombine.low %v1412_v33, %v1416_v34 }
  0x81   :  { %4381 = vmatmul.mubr.msk.bf16.vlgmr.msra.gmra.mrb[0].mxu0 %vm491_vm3, %v4998_v45  ;;  %4385 = vmatmul.mubr.msk.bf16.vlgmr.msra.gmra.mrb[0].mxu1 %vm491_vm3, %v4998_v45 }
  0x82   :  { %1215 = vmatpush1.bf16.msra.mxu0 %v4337_v36  ;;  %1288 = vmatpush1.bf16.msra.mxu1 %v4339_v43  ;;  %v1417_v36 = vld [vmem:[#allocation2 + $0x3a8] sm:$0xff]  ;;  %v4411_v43 = vcombine.low %v1404_v22, %v1408_v23  ;;  %v1415_v22 = vld [vmem:[#allocation2 + $0x398] sm:$0xff] }
  0x83   :  { %1216 = vmatprep.subr.bf16.mxu0 %v4346_v38  ;;  %1289 = vmatprep.subr.bf16.mxu1 %v4348_v39  ;;  %v4413_v38 = vcombine.low %v1405_v24, %v1409_v25  ;;  %v4420_v39 = vcombine.high %v1412_v33, %v1416_v34  ;;  %v4422_v40 = vcombine.high %v1413_v35, %v1417_v36  ;;  %v1419_v23 = vld [vmem:[#allocation2 + $0x3b8] sm:$0xff] }
  0x84   :  { %1110 = vmatprep.mubr.bf16.mxu0 %v4817_v0  ;;  %1183 = vmatprep.mubr.bf16.mxu1 %v4817_v0  ;;  %v4417_v24 = vcombine.low %v1407_v49, %v1411_v32  ;;  %v1423_v33 = vld [vmem:[#allocation2 + $0x3d8] sm:$0xff] }
  0x85   :  { %v1427_v34 = vld [vmem:[#allocation2 + $0x3f8] sm:$0xff] }
  0x86   :  { %1217 = vmatpush1.bf16.msra.mxu0 %v4345_v9  ;;  %1290 = vmatpush1.bf16.msra.mxu1 %v4347_v47  ;;  %v1421_v9 = vld [vmem:[#allocation2 + $0x3c8] sm:$0xff] }
  0x87   :  { %1218 = vmatprep.subr.bf16.mxu0 %v4354_v51  ;;  %1291 = vmatprep.subr.bf16.mxu1 %v4356_v52  ;;  %v1425_v47 = vld [vmem:[#allocation2 + $0x3e8] sm:$0xff]  ;;  %v4428_v51 = vcombine.high %v1420_v42, %v1424_v44  ;;  %v1428_v52 = vld [vmem:[#allocation2 + $0x400] sm:$0xff]  ;;  %v1435_v42 = vld [vmem:[#allocation2 + $0x438] sm:$0xff] }
  0x88   :  { %v4430_v55 = vcombine.high %v1421_v9, %v1425_v47 }
  0x89   :  { %4382 = vmatmul.mubr.msk.bf16.gmra.mrb[4].mxu0 %vm491_vm3, %v5002_v54  ;;  %4386 = vmatmul.mubr.msk.bf16.gmra.mrb[4].mxu1 %vm491_vm3, %v5002_v54 }
  0x8a   :  { %1219 = vmatpush1.bf16.msra.mxu0 %v4353_v56  ;;  %1292 = vmatpush1.bf16.msra.mxu1 %v4355_v59  ;;  %v1429_v56 = vld [vmem:[#allocation2 + $0x408] sm:$0xff]  ;;  %v4429_v59 = vcombine.low %v1421_v9, %v1425_v47 }
  0x8b   :  { %1120 = vmatprep.mubr.bf16.mxu0 %v4817_v0  ;;  %1193 = vmatprep.mubr.bf16.mxu1 %v4817_v0  ;;  %v4438_v60 = vcombine.high %v1429_v56, %v1433_v57 }
  0x8c   :  { %1220 = vmatprep.subr.bf16.mxu0 %v4362_v28  ;;  %1293 = vmatprep.subr.bf16.mxu1 %v4364_v6  ;;  %v4436_v28 = vcombine.high %v1428_v52, %v1432_v53  ;;  %v1440_v6 = vld [vmem:[#allocation2 + $0x460] sm:$0xff] }
  0x8d   :  { %v4443_v12 = vcombine.low %v1436_v48, %v1440_v6 }
  0x8e   :  { %1221 = vmatpush1.bf16.msra.mxu0 %v4361_v21  ;;  %1294 = vmatpush1.bf16.msra.mxu1 %v4363_v4  ;;  %v4435_v21 = vcombine.low %v1428_v52, %v1432_v53  ;;  %v4444_v4 = vcombine.high %v1436_v48, %v1440_v6  ;;  %v1439_v52 = vld [vmem:[#allocation2 + $0x458] sm:$0xff] }
  0x8f   :  { %1222 = vmatprep.subr.bf16.mxu0 %v4370_v5  ;;  %1295 = vmatprep.subr.bf16.mxu1 %v4372_v61  ;;  %v4446_v5 = vcombine.high %v1437_v62, %v1441_v63  ;;  %v1398_v61 = vld [vmem:[#allocation2 + $0x310] sm:$0xff]  ;;  %v1443_v53 = vld [vmem:[#allocation2 + $0x478] sm:$0xff] }
  0x90   :  { %v4407_v17 = vcombine.low %v1398_v61, %v1402_v8 }
  0x91   :  { %4383 = vmatmul.mubr.msk.bf16.gmra.mrb[8].mxu0 %vm491_vm3, %v5006_v30  ;;  %4387 = vmatmul.mubr.msk.bf16.gmra.mrb[8].mxu1 %vm491_vm3, %v5006_v30 }
  0x92   :  { %1130 = vmatprep.mubr.bf16.mxu0 %v4817_v0  ;;  %1203 = vmatprep.mubr.bf16.mxu1 %v4817_v0 }
  0x93   :  { %1223 = vmatpush1.bf16.msra.mxu0 %v4369_v13  ;;  %1296 = vmatpush1.bf16.msra.mxu1 %v4371_v14  ;;  %v4445_v13 = vcombine.low %v1437_v62, %v1441_v63  ;;  %v4408_v14 = vcombine.high %v1398_v61, %v1402_v8 }
  0x94   :  { %1224 = vmatprep.subr.bf16.mxu0 %v4378_v15  ;;  %1297 = vmatprep.subr.bf16.mxu1 %v4380_v16  ;;  %v4410_v15 = vcombine.high %v1399_v11, %v1403_v31  ;;  %v1410_v16 = vld [vmem:[#allocation2 + $0x370] sm:$0xff] }
  0x97   :  { %1225 = vmatpush1.bf16.msra.mxu0 %v4377_v7  ;;  %1298 = vmatpush1.bf16.msra.mxu1 %v4379_v10  ;;  %v4418_v10 = vcombine.high %v1407_v49, %v1411_v32 }
  0x98   :  { %1708 = vmatprep.subr.bf16.mxu0 %v4404_v19  ;;  %1781 = vmatprep.subr.bf16.mxu1 %v4406_v20  ;;  %v1414_v19 = vld [vmem:[#allocation2 + $0x390] sm:$0xff] }
  0x99   :  { %4384 = vmatmul.mubr.msk.bf16.gmra.mrb[12].mxu0 %vm491_vm3, %v5029_v3  ;;  %4388 = vmatmul.mubr.msk.bf16.gmra.mrb[12].mxu1 %vm491_vm3, %v5029_v3  ;;  %v1418_v20 = vld [vmem:[#allocation2 + $0x3b0] sm:$0xff] }
  0x9a   :  { %1246 = vmatprep.mubr.bf16.mxu0 %v4817_v0  ;;  %1319 = vmatprep.mubr.bf16.mxu1 %v4817_v0  ;;  %v4424_v25 = vcombine.high %v1414_v19, %v1418_v20 }
  0xa1   :  { %4389 = vmatmul.mubr.msk.bf16.vlgmr.msra.gmra.mrb[16].mxu0 %vm491_vm3, %v4998_v45  ;;  %4393 = vmatmul.mubr.msk.bf16.vlgmr.msra.gmra.mrb[16].mxu1 %vm491_vm3, %v4998_v45  ;;  %v4421_v45 = vcombine.low %v1413_v35, %v1417_v36  ;;  %v4425_v35 = vcombine.low %v1415_v22, %v1419_v23 }
  0xa2   :  { %1709 = vmatpush1.bf16.msra.mxu0 %v4403_v26  ;;  %1782 = vmatpush1.bf16.msra.mxu1 %v4405_v27  ;;  %v4426_v26 = vcombine.high %v1415_v22, %v1419_v23  ;;  %v1422_v27 = vld [vmem:[#allocation2 + $0x3d0] sm:$0xff] }
  0xa3   :  { %1710 = vmatprep.subr.bf16.mxu0 %v4412_v1  ;;  %1783 = vmatprep.subr.bf16.mxu1 %v4414_v41  ;;  %v1426_v1 = vld [vmem:[#allocation2 + $0x3f0] sm:$0xff]  ;;  %v4423_v41 = vcombine.low %v1414_v19, %v1418_v20 }
  0xa4   :  { %1256 = vmatprep.mubr.bf16.mxu0 %v4817_v0  ;;  %1329 = vmatprep.mubr.bf16.mxu1 %v4817_v0  ;;  %v4432_v36 = vcombine.high %v1422_v27, %v1426_v1  ;;  %v4431_v44 = vcombine.low %v1422_v27, %v1426_v1 }
  0xa6   :  { %1711 = vmatpush1.bf16.msra.mxu0 %v4411_v43  ;;  %1784 = vmatpush1.bf16.msra.mxu1 %v4413_v38  ;;  %v1430_v43 = vld [vmem:[#allocation2 + $0x410] sm:$0xff] }
  0xa7   :  { %1712 = vmatprep.subr.bf16.mxu0 %v4420_v39  ;;  %1785 = vmatprep.subr.bf16.mxu1 %v4422_v40  ;;  %v1434_v38 = vld [vmem:[#allocation2 + $0x430] sm:$0xff]  ;;  %v4434_v39 = vcombine.high %v1423_v33, %v1427_v34  ;;  %v1431_v40 = vld [vmem:[#allocation2 + $0x418] sm:$0xff] }
  0xa8   :  { %v4440_v9 = vcombine.high %v1430_v43, %v1434_v38  ;;  %v4442_v47 = vcombine.high %v1431_v40, %v1435_v42 }
  0xa9   :  { %4390 = vmatmul.mubr.msk.bf16.gmra.mrb[20].mxu0 %vm491_vm3, %v5002_v54  ;;  %4394 = vmatmul.mubr.msk.bf16.gmra.mrb[20].mxu1 %vm491_vm3, %v5002_v54  ;;  %v4437_v54 = vcombine.low %v1429_v56, %v1433_v57  ;;  %v4441_v56 = vcombine.low %v1431_v40, %v1435_v42 }
  0xaa   :  { %1713 = vmatpush1.bf16.msra.mxu0 %v4419_v46  ;;  %1786 = vmatpush1.bf16.msra.mxu1 %v4421_v45  ;;  %v4433_v46 = vcombine.low %v1423_v33, %v1427_v34  ;;  %v1438_v45 = vld [vmem:[#allocation2 + $0x450] sm:$0xff] }
  0xab   :  { %1266 = vmatprep.mubr.bf16.mxu0 %v4817_v0  ;;  %1339 = vmatprep.mubr.bf16.mxu1 %v4817_v0 }
  0xac   :  { %1714 = vmatprep.subr.bf16.mxu0 %v4428_v51  ;;  %1787 = vmatprep.subr.bf16.mxu1 %v4430_v55  ;;  %v1442_v51 = vld [vmem:[#allocation2 + $0x470] sm:$0xff]  ;;  %v4439_v55 = vcombine.low %v1430_v43, %v1434_v38 }
  0xad   :  { %v4448_v57 = vcombine.high %v1438_v45, %v1442_v51 }
  0xae   :  { %1715 = vmatpush1.bf16.msra.mxu0 %v4427_v58  ;;  %1788 = vmatpush1.bf16.msra.mxu1 %v4429_v59  ;;  %v4450_v58 = vcombine.high %v1439_v52, %v1443_v53  ;;  %v4447_v59 = vcombine.low %v1438_v45, %v1442_v51 }
  0xaf   :  { %1716 = vmatprep.subr.bf16.mxu0 %v4436_v28  ;;  %1789 = vmatprep.subr.bf16.mxu1 %v4438_v60  ;;  %v4449_v28 = vcombine.low %v1439_v52, %v1443_v53 }
  0xb1   :  { %4391 = vmatmul.mubr.msk.bf16.gmra.mrb[24].mxu0 %vm491_vm3, %v5006_v30  ;;  %4395 = vmatmul.mubr.msk.bf16.gmra.mrb[24].mxu1 %vm491_vm3, %v5006_v30  ;;  %v1406_v30 = vld [vmem:[#allocation2 + $0x350] sm:$0xff] }
  0xb2   :  { %1276 = vmatprep.mubr.bf16.mxu0 %v4817_v0  ;;  %1349 = vmatprep.mubr.bf16.mxu1 %v4817_v0  ;;  %v4416_v7 = vcombine.high %v1406_v30, %v1410_v16 }
  0xb3   :  { %1717 = vmatpush1.bf16.msra.mxu0 %v4435_v21  ;;  %1790 = vmatpush1.bf16.msra.mxu1 %v4437_v54 }
  0xb4   :  { %1718 = vmatprep.subr.bf16.mxu0 %v4444_v4  ;;  %1791 = vmatprep.subr.bf16.mxu1 %v4446_v5 }
  0xb7   :  { %1719 = vmatpush1.bf16.msra.mxu0 %v4443_v12  ;;  %1792 = vmatpush1.bf16.msra.mxu1 %v4445_v13 }
  0xb8   :  { %1854 = vmatprep.subr.bf16.mxu0 %v4408_v14  ;;  %1927 = vmatprep.subr.bf16.mxu1 %v4410_v15 }
  0xb9   :  { %4392 = vmatmul.mubr.msk.bf16.gmra.mrb[28].mxu0 %vm491_vm3, %v5029_v3  ;;  %4396 = vmatmul.mubr.msk.bf16.gmra.mrb[28].mxu1 %vm491_vm3, %v5029_v3  ;;  %v4415_v3 = vcombine.low %v1406_v30, %v1410_v16  ;;  %v2576_v30 = vld [vmem:[#allocation4] sm:$0xf]  ;;  %v4818_v16 = vmov 1983009808  }
  0xba   :  { %1740 = vmatprep.mubr.bf16.mxu0 %v4817_v0  ;;  %1813 = vmatprep.mubr.bf16.mxu1 %v4817_v0  ;;  %v2133_v49 = vunpack.c.l.s4 %v4818_v16 }
  0xc1   :  { %4451 = vmatmul.mubr.msk.bf16.vlgmr.msra.gmra.mrb[0].mxu0 %vm491_vm3, %v5063_v29  ;;  %4455 = vmatmul.mubr.msk.bf16.vlgmr.msra.gmra.mrb[0].mxu1 %vm491_vm3, %v5063_v29 }
  0xc2   :  { %1855 = vmatpush1.bf16.msra.mxu0 %v4407_v17  ;;  %1928 = vmatpush1.bf16.msra.mxu1 %v4409_v18 }
  0xc3   :  { %1856 = vmatprep.subr.bf16.mxu0 %v4416_v7  ;;  %1929 = vmatprep.subr.bf16.mxu1 %v4418_v10 }
  0xc4   :  { %1750 = vmatprep.mubr.bf16.mxu0 %v4817_v0  ;;  %1823 = vmatprep.mubr.bf16.mxu1 %v4817_v0 }
  0xc6   :  { %1857 = vmatpush1.bf16.msra.mxu0 %v4415_v3  ;;  %1930 = vmatpush1.bf16.msra.mxu1 %v4417_v24 }
  0xc7   :  { %1858 = vmatprep.subr.bf16.mxu0 %v4424_v25  ;;  %1931 = vmatprep.subr.bf16.mxu1 %v4426_v26  ;;  %v2134_v25 = vunpack.c.0.s8 %v2133_v49 }
  0xc9   :  { %4452 = vmatmul.mubr.msk.bf16.gmra.mrb[4].mxu0 %vm491_vm3, %v5073_v37  ;;  %4456 = vmatmul.mubr.msk.bf16.gmra.mrb[4].mxu1 %vm491_vm3, %v5073_v37 }
  0xca   :  { %1859 = vmatpush1.bf16.msra.mxu0 %v4423_v41  ;;  %1932 = vmatpush1.bf16.msra.mxu1 %v4425_v35 }
  0xcb   :  { %1760 = vmatprep.mubr.bf16.mxu0 %v4817_v0  ;;  %1833 = vmatprep.mubr.bf16.mxu1 %v4817_v0 }
  0xcc   :  { %1860 = vmatprep.subr.bf16.mxu0 %v4432_v36  ;;  %1933 = vmatprep.subr.bf16.mxu1 %v4434_v39 }
  0xce   :  { %1861 = vmatpush1.bf16.msra.mxu0 %v4431_v44  ;;  %1934 = vmatpush1.bf16.msra.mxu1 %v4433_v46 }
  0xcf   :  { %1862 = vmatprep.subr.bf16.mxu0 %v4440_v9  ;;  %1935 = vmatprep.subr.bf16.mxu1 %v4442_v47 }
  0xd1   :  { %4453 = vmatmul.mubr.msk.bf16.gmra.mrb[8].mxu0 %vm491_vm3, %v5081_v50  ;;  %4457 = vmatmul.mubr.msk.bf16.gmra.mrb[8].mxu1 %vm491_vm3, %v5081_v50 }
  0xd2   :  { %1770 = vmatprep.mubr.bf16.mxu0 %v4817_v0  ;;  %1843 = vmatprep.mubr.bf16.mxu1 %v4817_v0 }
  0xd3   :  { %1863 = vmatpush1.bf16.msra.mxu0 %v4439_v55  ;;  %1936 = vmatpush1.bf16.msra.mxu1 %v4441_v56 }
  0xd4   :  { %1864 = vmatprep.subr.bf16.mxu0 %v4448_v57  ;;  %1937 = vmatprep.subr.bf16.mxu1 %v4450_v58 }
  0xd7   :  { %1865 = vmatpush1.bf16.msra.mxu0 %v4447_v59  ;;  %1938 = vmatpush1.bf16.msra.mxu1 %v4449_v28 }
  0xd9   :  { %4454 = vmatmul.mubr.msk.bf16.gmra.mrb[12].mxu0 %vm491_vm3, %v5093_v2  ;;  %4458 = vmatmul.mubr.msk.bf16.gmra.mrb[12].mxu1 %vm491_vm3, %v5093_v2 }
  0xda   :  { %1886 = vmatprep.mubr.bf16.mxu0 %v4817_v0  ;;  %1959 = vmatprep.mubr.bf16.mxu1 %v4817_v0 }
  0xe1   :  { %4459 = vmatmul.mubr.msk.bf16.vlgmr.msra.gmra.mrb[16].mxu0 %vm491_vm3, %v5063_v29  ;;  %4463 = vmatmul.mubr.msk.bf16.vlgmr.msra.gmra.mrb[16].mxu1 %vm491_vm3, %v5063_v29 }
  0xe2   :  { %1896 = vmatprep.mubr.bf16.mxu0 %v4817_v0  ;;  %1969 = vmatprep.mubr.bf16.mxu1 %v4817_v0 }
  0xe9   :  { %4460 = vmatmul.mubr.msk.bf16.gmra.mrb[20].mxu0 %vm491_vm3, %v5073_v37  ;;  %4464 = vmatmul.mubr.msk.bf16.gmra.mrb[20].mxu1 %vm491_vm3, %v5073_v37 }
  0xea   :  { %1906 = vmatprep.mubr.bf16.mxu0 %v4817_v0  ;;  %1979 = vmatprep.mubr.bf16.mxu1 %v4817_v0 }
  0xf1   :  { %4461 = vmatmul.mubr.msk.bf16.gmra.mrb[24].mxu0 %vm491_vm3, %v5081_v50  ;;  %4465 = vmatmul.mubr.msk.bf16.gmra.mrb[24].mxu1 %vm491_vm3, %v5081_v50 }
  0xf2   :  { %1916 = vmatprep.mubr.bf16.mxu0 %v4817_v0  ;;  %1989 = vmatprep.mubr.bf16.mxu1 %v4817_v0  ;;  %v2135_v0 = vlaneseq }
  0xf9   :  { %4462 = vmatmul.mubr.msk.bf16.gmra.mrb[28].mxu0 %vm491_vm3, %v5093_v2  ;;  %4466 = vmatmul.mubr.msk.bf16.gmra.mrb[28].mxu1 %vm491_vm3, %v5093_v2  ;;  %v5223_v2 = vshrl.u32 %v2135_v0, 7  ;;  %vm5482_vm3 = vmor %vm4218_vm2, %vm5459_vm1 }
  0xfb   :  { %v5236_v12 = vsub.s32 0, %v5223_v2  ;;  %v2584_v13 = vsub.s32 1, %v5223_v2  ;;  %v5240_v14 = vsub.s32 2, %v5223_v2  ;;  %v2592_v15 = vsub.s32 3, %v5223_v2 }
  0xfc   :  { %v5262_v41 = vsub.s32 %v2134_v25, %v5223_v2 }
  0xfd   :  { %v2581_v7 = vrot.slane %v2576_v30, %v5236_v12  ;;  %v2585_v10 = vrot.slane %v2576_v30, %v2584_v13  ;;  %v2589_v19 = vrot.slane %v2576_v30, %v5240_v14  ;;  %v2593_v20 = vrot.slane %v2576_v30, %v2592_v15 }
  0xfe   :  { %v5295_v15 = vsub.s32 4, %v5223_v2 }
  0xff   :  { %v2594_v27 = vcombine.low %v2581_v7, %v2585_v10  ;;  %v2596_v1 = vcombine.low %v2589_v19, %v2593_v20  ;;  %v2595_v44 = vcombine.high %v2581_v7, %v2585_v10  ;;  %v2597_v46 = vcombine.high %v2589_v19, %v2593_v20 }
 0x101   :  { %v2604_v36 = vrot.slane %v2594_v27, %v5262_v41  ;;  %v2618_v43 = vrot.slane %v2596_v1, %v5262_v41  ;;  %v2611_v51 = vrot.slane %v2595_v44, %v5262_v41  ;;  %v2625_v52 = vrot.slane %v2597_v46, %v5262_v41 }
 0x103   :  { %v5282_v47 = vcombine.low %v2604_v36, %v2618_v43  ;;  %v5284_v45 = vcombine.high %v2604_v36, %v2618_v43  ;;  %v5299_v10 = vcombine.low %v2611_v51, %v2625_v52  ;;  %v5301_v19 = vcombine.high %v2611_v51, %v2625_v52 }
 0x104   :  { %v5306_v43 = vsub.s32 6, %v5223_v2 }
 0x105   :  { %5986 = vst [vmem:[#allocation20_spill] sm:$0xff] %v5282_v47  ;;  %5987 = vst [vmem:[#allocation21_spill] sm:$0xff] %v5284_v45  ;;  %v5289_v58 = vrot.slane %v5282_v47, 1  ;;  %v5292_v13 = vrot.slane %v5284_v45, 1  ;;  %v5316_v2 = vrot.slane %v5299_v10, 1 }
 0x106   :  { %5990 = vst [vmem:[#allocation24_spill] sm:$0xff] %v5299_v10  ;;  %5991 = vst [vmem:[#allocation25_spill] sm:$0xff] %v5301_v19 }
 0x107   :  { %5988 = vst [vmem:[#allocation22_spill] sm:$0xff] %v5289_v58  ;;  %5989 = vst [vmem:[#allocation23_spill] sm:$0xff] %v5292_v13 }
 0x108   :  { %5992 = vst [vmem:[#allocation26_spill] sm:$0xff] %v5316_v2 }
 0x194   :  { %v1742_v29 = vpop.f32.mrb[0].mxu0  ;;  %v1815_v37 = vpop.f32.mrb[0].mxu1 }
 0x195   :  { %v1744_v60 = vpop.f32.mrb[1].mxu0  ;;  %v5207_v48 = vpop.f32.mrb[1].mxu1 }
 0x196   :  { %v5209_v6 = vpop.f32.mrb[2].mxu0  ;;  %v5211_v62 = vpop.f32.mrb[2].mxu1 }
 0x197   :  { %v5213_v50 = vpop.f32.mrb[3].mxu0  ;;  %v5215_v63 = vpop.f32.mrb[3].mxu1 }
 0x19c   :  { %v5217_v21 = vpop.f32.mrb[4].mxu0  ;;  %v5219_v54 = vpop.f32.mrb[4].mxu1 }
 0x19d   :  { %v5221_v4 = vpop.f32.mrb[5].mxu0  ;;  %v5225_v5 = vpop.f32.mrb[5].mxu1 }
 0x19e   :  { %v5227_v61 = vpop.f32.mrb[6].mxu0  ;;  %v5229_v8 = vpop.f32.mrb[6].mxu1 }
 0x19f   :  { %v5231_v11 = vpop.f32.mrb[7].mxu0  ;;  %v5233_v31 = vpop.f32.mrb[7].mxu1 }
 0x1a4   :  { %v5243_v32 = vpop.f32.mrb[8].mxu0  ;;  %v5245_v17 = vpop.f32.mrb[8].mxu1 }
 0x1a5   :  { %v5247_v18 = vpop.f32.mrb[9].mxu0  ;;  %v5251_v22 = vpop.f32.mrb[9].mxu1 }
 0x1a6   :  { %v5253_v23 = vpop.f32.mrb[10].mxu0  ;;  %v5255_v3 = vpop.f32.mrb[10].mxu1 }
 0x1a7   :  { %5974 = vst [vmem:[#allocation8_spill] sm:$0xff] %v5253_v23  ;;  %5975 = vst [vmem:[#allocation9_spill] sm:$0xff] %v5255_v3  ;;  %v5257_v24 = vpop.f32.mrb[11].mxu0  ;;  %v5259_v26 = vpop.f32.mrb[11].mxu1 }
 0x1a8   :  { %5976 = vst [vmem:[#allocation10_spill] sm:$0xff] %v5257_v24  ;;  %5977 = vst [vmem:[#allocation11_spill] sm:$0xff] %v5259_v26 }
 0x1ac   :  { %v5264_v33 = vpop.f32.mrb[12].mxu0  ;;  %v5266_v34 = vpop.f32.mrb[12].mxu1 }
 0x1ad   :  { %5978 = vst [vmem:[#allocation12_spill] sm:$0xff] %v5264_v33  ;;  %5979 = vst [vmem:[#allocation13_spill] sm:$0xff] %v5266_v34  ;;  %v5268_v35 = vpop.f32.mrb[13].mxu0  ;;  %v5272_v38 = vpop.f32.mrb[13].mxu1 }
 0x1ae   :  { %5980 = vst [vmem:[#allocation14_spill] sm:$0xff] %v5268_v35  ;;  %5981 = vst [vmem:[#allocation15_spill] sm:$0xff] %v5272_v38  ;;  %v5274_v39 = vpop.f32.mrb[14].mxu0  ;;  %v5276_v40 = vpop.f32.mrb[14].mxu1 }
 0x1af   :  { %5982 = vst [vmem:[#allocation16_spill] sm:$0xff] %v5274_v39  ;;  %5983 = vst [vmem:[#allocation17_spill] sm:$0xff] %v5276_v40  ;;  %v5278_v42 = vpop.f32.mrb[15].mxu0  ;;  %v5280_v9 = vpop.f32.mrb[15].mxu1 }
 0x1b0   :  { %5984 = vst [vmem:[#allocation18_spill] sm:$0xff] %v5278_v42  ;;  %5985 = vst [vmem:[#allocation19_spill] sm:$0xff] %v5280_v9 }
 0x1b4   :  { %v1888_v53 = vpop.f32.mrb[16].mxu0  ;;  %v1961_v56 = vpop.f32.mrb[16].mxu1 }
 0x1b5   :  { %v2064_v55 = vmax.f32 %v1742_v29, %v1888_v53  ;;  %v1890_v57 = vpop.f32.mrb[17].mxu0  ;;  %v2066_v59 = vmax.f32 %v1815_v37, %v1961_v56  ;;  %v1963_v0 = vpop.f32.mrb[17].mxu1 }
 0x1b6   :  { %v2065_v28 = vmax.f32 %v1744_v60, %v1890_v57  ;;  %v1892_v30 = vpop.f32.mrb[18].mxu0  ;;  %v2067_v16 = vmax.f32 %v5207_v48, %v1963_v0  ;;  %v1965_v29 = vpop.f32.mrb[18].mxu1 }
 0x1b7   :  { %v2068_v49 = vmax.f32 %v5209_v6, %v1892_v30  ;;  %v1894_v7 = vpop.f32.mrb[19].mxu0  ;;  %v2070_v20 = vmax.f32 %v5211_v62, %v1965_v29  ;;  %v1967_v27 = vpop.f32.mrb[19].mxu1 }
 0x1b8   :  { %v2128_v37 = vcombine.low %v2064_v55, %v2065_v28  ;;  %v2129_v60 = vcombine.high %v2064_v55, %v2065_v28  ;;  %v2069_v25 = vmax.f32 %v5213_v50, %v1894_v7  ;;  %v2130_v1 = vcombine.low %v2066_v59, %v2067_v16 }
 0x1b9   :  { %v2131_v36 = vcombine.high %v2066_v59, %v2067_v16  ;;  %v2071_v48 = vmax.f32 %v5215_v63, %v1967_v27  ;;  %v5319_v63 = vrot.slane %v5301_v19, 1 }
 0x1ba   :  { %v2138_v6 = vrot.slane %v2128_v37, %v5262_v41  ;;  %v2145_v44 = vrot.slane %v2129_v60, %v5262_v41  ;;  %v2164_v46 = vcombine.low %v2068_v49, %v2069_v25  ;;  %v2165_v51 = vcombine.high %v2068_v49, %v2069_v25 }
 0x1bb   :  { %v2152_v52 = vrot.slane %v2130_v1, %v5262_v41  ;;  %v2159_v62 = vrot.slane %v2131_v36, %v5262_v41  ;;  %v2166_v53 = vcombine.low %v2070_v20, %v2071_v48  ;;  %v2167_v50 = vcombine.high %v2070_v20, %v2071_v48  ;;  %5993 = vst [vmem:[#allocation27_spill] sm:$0xff] %v5319_v63 }
 0x1bc   :  { %v2174_v55 = vrot.slane %v2164_v46, %v5262_v41  ;;  %v2181_v56 = vrot.slane %v2165_v51, %v5262_v41  ;;  %v1898_v57 = vpop.f32.mrb[20].mxu0  ;;  %v1971_v16 = vpop.f32.mrb[20].mxu1 }
 0x1bd   :  { %v2160_v59 = vcombine.low %v2138_v6, %v2152_v52  ;;  %v2161_v28 = vcombine.high %v2138_v6, %v2152_v52  ;;  %v2162_v0 = vcombine.low %v2145_v44, %v2159_v62  ;;  %v2163_v30 = vcombine.high %v2145_v44, %v2159_v62  ;;  %v5321_v49 = vpop.f32.mrb[21].mxu0  ;;  %v5331_v20 = vpop.f32.mrb[21].mxu1 }
 0x1be   :  { %v2188_v29 = vrot.slane %v2166_v53, %v5262_v41  ;;  %v2195_v7 = vrot.slane %v2167_v50, %v5262_v41  ;;  %v5326_v37 = vmax.f32 %v5217_v21, %v1898_v57  ;;  %v5329_v60 = vmax.f32 %v5219_v54, %v1971_v16  ;;  %v5333_v25 = vpop.f32.mrb[22].mxu0  ;;  %v5335_v6 = vpop.f32.mrb[22].mxu1 }
 0x1bf   :  { %v4467_v27 = vrot.slane %v2160_v59, 9  ;;  %v4468_v1 = vrot.slane %v2161_v28, 9  ;;  %v4469_v36 = vrot.slane %v2162_v0, 9  ;;  %v4470_v48 = vrot.slane %v2163_v30, 9  ;;  %v5337_v44 = vpop.f32.mrb[23].mxu0  ;;  %v5339_v62 = vpop.f32.mrb[23].mxu1 }
 0x1c0   :  { %v2196_v46 = vcombine.low %v2174_v55, %v2188_v29  ;;  %v2197_v51 = vcombine.high %v2174_v55, %v2188_v29  ;;  %v2198_v52 = vcombine.low %v2181_v56, %v2195_v7  ;;  %v2199_v21 = vcombine.high %v2181_v56, %v2195_v7 }
 0x1c1   :  { %v2544_v54 = vmax.f32 %v2160_v59, %v4467_v27  ;;  %v2545_v53 = vmax.f32 %v2161_v28, %v4468_v1  ;;  %v2546_v50 = vmax.f32 %v2162_v0, %v4469_v36  ;;  %v2547_v57 = vmax.f32 %v2163_v30, %v4470_v48 }
 0x1c2   :  { %v4471_v16 = vrot.slane %v2196_v46, 9  ;;  %v4472_v9 = vrot.slane %v2197_v51, 9  ;;  %v4473_v42 = vrot.slane %v2198_v52, 9  ;;  %v4474_v40 = vrot.slane %v2199_v21, 9 }
 0x1c3   :  { %v2642_v39 = vadd.f32 %v5282_v47, %v2544_v54  ;;  %v2643_v38 = vadd.f32 %v5289_v58, %v2545_v53  ;;  %v2644_v35 = vadd.f32 %v5284_v45, %v2546_v50  ;;  %v2645_v55 = vadd.f32 %v5292_v13, %v2547_v57 }
 0x1c4   :  { %v2548_v29 = vmax.f32 %v2196_v46, %v4471_v16  ;;  %v2549_v56 = vmax.f32 %v2197_v51, %v4472_v9  ;;  %v2550_v7 = vmax.f32 %v2198_v52, %v4473_v42  ;;  %v2551_v34 = vmax.f32 %v2199_v21, %v4474_v40  ;;  %v5345_v59 = vpop.f32.mrb[24].mxu0  ;;  %v5347_v1 = vpop.f32.mrb[24].mxu1 }
 0x1c5   :  { %v2674_v28 = vmax.f32 %v2642_v39, 0.0  ;;  %v2675_v0 = vmax.f32 %v2643_v38, 0.0  ;;  %v2676_v30 = vmax.f32 %v2644_v35, 0.0  ;;  %v2677_v27 = vmax.f32 %v2645_v55, 0.0  ;;  %v5349_v36 = vpop.f32.mrb[25].mxu0  ;;  %v5363_v39 = vpop.f32.mrb[25].mxu1 }
 0x1c6   :  { %v5352_v48 = vadd.f32 %v5299_v10, %v2548_v29  ;;  %v5355_v54 = vadd.f32 %v5316_v2, %v2549_v56  ;;  %v5358_v9 = vadd.f32 %v5301_v19, %v2550_v7  ;;  %v5361_v40 = vadd.f32 %v5319_v63, %v2551_v34  ;;  %v5365_v35 = vpop.f32.mrb[26].mxu0  ;;  %v5371_v52 = vpop.f32.mrb[26].mxu1 }
 0x1c7   :  { %5994 = vst [vmem:[#allocation28_spill] sm:$0xff] %v5365_v35  ;;  %v2741_v38 = vrot.slane %v2674_v28, %v5236_v12  ;;  %v2745_v42 = vrot.slane %v2674_v28, %v5240_v14  ;;  %v2749_v46 = vrot.slane %v2674_v28, %v5295_v15  ;;  %v2753_v51 = vrot.slane %v2674_v28, %v5306_v43  ;;  %v5373_v21 = vpop.f32.mrb[27].mxu0  ;;  %v5379_v16 = vpop.f32.mrb[27].mxu1 }
 0x1c8   :  { %5995 = vst [vmem:[#allocation29_spill] sm:$0xff] %v5371_v52  ;;  %5996 = vst [vmem:[#allocation30_spill] sm:$0xff] %v5373_v21  ;;  %v2757_v53 = vrot.slane %v2675_v0, %v5236_v12  ;;  %v2761_v34 = vrot.slane %v2675_v0, %v5240_v14  ;;  %v2765_v50 = vrot.slane %v2675_v0, %v5295_v15 }
 0x1c9   :  { %v2769_v57 = vrot.slane %v2675_v0, %v5306_v43  ;;  %5997 = vst [vmem:[#allocation31_spill] sm:$0xff] %v5379_v16  ;;  %v2773_v55 = vrot.slane %v2676_v30, %v5236_v12  ;;  %v2777_v29 = vrot.slane %v2676_v30, %v5240_v14  ;;  %v2781_v56 = vrot.slane %v2676_v30, %v5295_v15 }
 0x1ca   :  { %v2785_v7 = vrot.slane %v2676_v30, %v5306_v43  ;;  %v2789_v28 = vrot.slane %v2677_v27, %v5236_v12  ;;  %v2793_v33 = vrot.slane %v2677_v27, %v5240_v14  ;;  %v2797_v26 = vrot.slane %v2677_v27, %v5295_v15 }
 0x1cb   :  { %v2801_v0 = vrot.slane %v2677_v27, %v5306_v43  ;;  %v4563_v24 = vpack.c.bf16 %v2745_v42, %v2741_v38  ;;  %v4564_v16 = vpack.c.bf16 %v2753_v51, %v2749_v46  ;;  %v4565_v21 = vpack.c.bf16 %v2761_v34, %v2757_v53 }
 0x1cc   :  { %v4566_v3 = vpack.c.bf16 %v2769_v57, %v2765_v50  ;;  %v4567_v52 = vpack.c.bf16 %v2777_v29, %v2773_v55  ;;  %v4568_v23 = vpack.c.bf16 %v2785_v7, %v2781_v56  ;;  %v4569_v35 = vpack.c.bf16 %v2793_v33, %v2789_v28  ;;  %v5389_v19 = vpop.f32.mrb[28].mxu0  ;;  %v5391_v45 = vpop.f32.mrb[28].mxu1 }
 0x1cd   :  { %v4570_v63 = vpack.c.bf16 %v2801_v0, %v2797_v26  ;;  %5998 = vst [vmem:[#allocation32_spill] sm:$0xff] %v5389_v19  ;;  %v3838_v30 = vunpack.c.l.b16 %v4563_v24  ;;  %v3839_v2 = vunpack.c.h.b16 %v4563_v24  ;;  %v3840_v10 = vunpack.c.l.b16 %v4564_v16  ;;  %5999 = vst [vmem:[#allocation33_spill] sm:$0xff] %v5391_v45  ;;  %v5393_v58 = vpop.f32.mrb[29].mxu0  ;;  %v5395_v46 = vpop.f32.mrb[29].mxu1 }
 0x1ce   :  { %v3841_v13 = vunpack.c.h.b16 %v4564_v16  ;;  %6000 = vst [vmem:[#allocation34_spill] sm:$0xff] %v5393_v58  ;;  %v3842_v27 = vunpack.c.l.b16 %v4565_v21  ;;  %v3843_v47 = vunpack.c.h.b16 %v4565_v21  ;;  %v3844_v38 = vunpack.c.l.b16 %v4566_v3  ;;  %6001 = vst [vmem:[#allocation35_spill] sm:$0xff] %v5395_v46 }
 0x1cf   :  { %v3845_v42 = vunpack.c.h.b16 %v4566_v3  ;;  %v3846_v51 = vunpack.c.l.b16 %v4567_v52  ;;  %v3847_v53 = vunpack.c.h.b16 %v4567_v52  ;;  %v3848_v33 = vunpack.c.l.b16 %v4568_v23 }
 0x1d0   :  { %v3849_v26 = vunpack.c.h.b16 %v4568_v23  ;;  %v3850_v34 = vunpack.c.l.b16 %v4569_v35  ;;  %v3851_v50 = vunpack.c.h.b16 %v4569_v35  ;;  %v3852_v57 = vunpack.c.l.b16 %v4570_v63 }
 0x1d1   :  { %v3853_v24 = vunpack.c.h.b16 %v4570_v63  ;;  %v3966_v55 = vrot.slane %v3838_v30, 7  ;;  %v3967_v16 = vrot.slane %v3842_v27, 6  ;;  %v3970_v29 = vrot.slane %v3846_v51, 5 }
 0x1d2   :  { %v3985_v56 = vrot.slane %v3839_v2, 7  ;;  %v3973_v7 = vrot.slane %v3850_v34, 4  ;;  %v3986_v28 = vrot.slane %v3843_v47, 6  ;;  %v3988_v0 = vrot.slane %v3847_v53, 5 }
 0x1d3   :  { %v3990_v21 = vrot.slane %v3851_v50, 4  ;;  %v3969_v3 = vsel %vm3968_vm7, %v3967_v16, %v3966_v55  ;;  %v3998_v58 = vrot.slane %v3840_v10, 7  ;;  %v3999_v46 = vrot.slane %v3844_v38, 6 }
 0x1d4   :  { %v4001_v45 = vrot.slane %v3848_v33, 5  ;;  %v3972_v52 = vsel %vm3971_vm8, %v3970_v29, %v3969_v3  ;;  %v3987_v23 = vsel %vm3968_vm7, %v3986_v28, %v3985_v56  ;;  %v4003_v35 = vrot.slane %v3852_v57, 4 }
 0x1d5   :  { %v4011_v19 = vrot.slane %v3841_v13, 7  ;;  %v5401_v63 = vsel %vm3974_vm9, %v3973_v7, %v3972_v52  ;;  %v3989_v2 = vsel %vm3971_vm8, %v3988_v0, %v3987_v23  ;;  %v4000_v47 = vsel %vm3968_vm7, %v3999_v46, %v3998_v58  ;;  %v5422_v46 = vpop.f32.mrb[30].mxu0 }
 0x1d6   :  { %v4012_v30 = vrot.slane %v3845_v42, 6  ;;  %v5406_v27 = vsel %vm3974_vm9, %v3990_v21, %v3989_v2  ;;  %v4002_v10 = vsel %vm3971_vm8, %v4001_v45, %v4000_v47  ;;  %v4014_v38 = vrot.slane %v3849_v26, 5  ;;  %6002 = vst [vmem:[#allocation36_spill] sm:$0xff] %v5422_v46  ;;  %v5424_v26 = vpop.f32.mrb[30].mxu1 }
 0x1d7   :  { %v4016_v51 = vrot.slane %v3853_v24, 4  ;;  %v5410_v53 = vsel %vm3974_vm9, %v4003_v35, %v4002_v10  ;;  %v2678_v33 = vmax.f32 %v5352_v48, 0.0  ;;  %v2679_v34 = vmax.f32 %v5355_v54, 0.0  ;;  %6003 = vst [vmem:[#allocation37_spill] sm:$0xff] %v5424_v26 }
 0x1d8   :  { %v4013_v13 = vsel %vm3968_vm7, %v4012_v30, %v4011_v19  ;;  %v2680_v58 = vmax.f32 %v5358_v9, 0.0  ;;  %v2681_v42 = vmax.f32 %v5361_v40, 0.0  ;;  %v5420_v45 = vmax.f32 %v5221_v4, %v5321_v49  ;;  %v5432_v9 = vpop.f32.mrb[31].mxu0  ;;  %v5434_v40 = vpop.f32.mrb[31].mxu1 }
 0x1d9   :  { %v4015_v50 = vsel %vm3971_vm8, %v4014_v38, %v4013_v13  ;;  %v2805_v48 = vrot.slane %v2678_v33, %v5236_v12  ;;  %v2809_v54 = vrot.slane %v2678_v33, %v5240_v14  ;;  %v2813_v57 = vrot.slane %v2678_v33, %v5295_v15  ;;  %6004 = vst [vmem:[#allocation38_spill] sm:$0xff] %v5432_v9 }
 0x1da   :  { %v5427_v19 = vsel %vm3974_vm9, %v4016_v51, %v4015_v50  ;;  %6005 = vst [vmem:[#allocation39_spill] sm:$0xff] %v5434_v40  ;;  %v2817_v4 = vrot.slane %v2678_v33, %v5306_v43  ;;  %v2821_v49 = vrot.slane %v2679_v34, %v5236_v12  ;;  %v2825_v24 = vrot.slane %v2679_v34, %v5240_v14 }
 0x1db   :  { %v2829_v55 = vrot.slane %v2679_v34, %v5295_v15  ;;  %v2833_v16 = vrot.slane %v2679_v34, %v5306_v43  ;;  %v2837_v29 = vrot.slane %v2680_v58, %v5236_v12  ;;  %v2841_v56 = vrot.slane %v2680_v58, %v5240_v14 }
 0x1dc   :  { %v2845_v7 = vrot.slane %v2680_v58, %v5295_v15  ;;  %v2849_v28 = vrot.slane %v2680_v58, %v5306_v43  ;;  %v2853_v0 = vrot.slane %v2681_v42, %v5236_v12  ;;  %v2857_v21 = vrot.slane %v2681_v42, %v5240_v14 }
 0x1dd   :  { %v2861_v3 = vrot.slane %v2681_v42, %v5295_v15  ;;  %v2865_v52 = vrot.slane %v2681_v42, %v5306_v43  ;;  %v4571_v23 = vpack.c.bf16 %v2809_v54, %v2805_v48  ;;  %v4572_v35 = vpack.c.bf16 %v2817_v4, %v2813_v57 }
 0x1de   :  { %v4573_v2 = vpack.c.bf16 %v2825_v24, %v2821_v49  ;;  %v4574_v47 = vpack.c.bf16 %v2833_v16, %v2829_v55  ;;  %v4575_v30 = vpack.c.bf16 %v2841_v56, %v2837_v29  ;;  %v4576_v10 = vpack.c.bf16 %v2849_v28, %v2845_v7 }
 0x1df   :  { %v5449_v38 = vpack.c.bf16 %v2857_v21, %v2853_v0  ;;  %v5451_v51 = vpack.c.bf16 %v2865_v52, %v2861_v3  ;;  %v3854_v13 = vunpack.c.l.b16 %v4571_v23  ;;  %v3855_v33 = vunpack.c.h.b16 %v4571_v23 }
 0x1e0   :  { %v3856_v34 = vunpack.c.l.b16 %v4572_v35  ;;  %v3857_v50 = vunpack.c.h.b16 %v4572_v35  ;;  %v3858_v58 = vunpack.c.l.b16 %v4573_v2  ;;  %v3859_v40 = vunpack.c.h.b16 %v4573_v2 }
 0x1e1   :  { %v3860_v9 = vunpack.c.l.b16 %v4574_v47  ;;  %v3861_v26 = vunpack.c.h.b16 %v4574_v47  ;;  %v3862_v46 = vunpack.c.l.b16 %v4575_v30  ;;  %v3863_v42 = vunpack.c.h.b16 %v4575_v30 }
 0x1e2   :  { %v3864_v48 = vunpack.c.l.b16 %v4576_v10  ;;  %v3865_v54 = vunpack.c.h.b16 %v4576_v10  ;;  %v3866_v57 = vunpack.c.l.b16 %v5449_v38  ;;  %v3867_v4 = vunpack.c.h.b16 %v5449_v38 }
 0x1e3   :  { %v3868_v49 = vunpack.c.l.b16 %v5451_v51  ;;  %v3869_v24 = vunpack.c.h.b16 %v5451_v51  ;;  %v3976_v55 = vrot.slane %v3854_v13, 3  ;;  %v3979_v16 = vrot.slane %v3858_v58, 2 }
 0x1e4   :  { %v3982_v29 = vrot.slane %v3862_v46, 1  ;;  %v3992_v56 = vrot.slane %v3855_v33, 3  ;;  %v3994_v7 = vrot.slane %v3859_v40, 2  ;;  %v3996_v28 = vrot.slane %v3863_v42, 1 }
 0x1e5   :  { %v4005_v0 = vrot.slane %v3856_v34, 3  ;;  %v3978_v3 = vsel %vm3977_vm12, %v3976_v55, %v5401_v63  ;;  %v4007_v52 = vrot.slane %v3860_v9, 2  ;;  %v4009_v23 = vrot.slane %v3864_v48, 1 }
 0x1e6   :  { %v4018_v35 = vrot.slane %v3857_v50, 3  ;;  %v3981_v46 = vsel %vm3980_vm15, %v3979_v16, %v3978_v3  ;;  %v3993_v40 = vsel %vm3977_vm12, %v3992_v56, %v5406_v27  ;;  %v4020_v47 = vrot.slane %v3861_v26, 2 }
 0x1e7   :  { %v4006_v2 = vsel %vm3977_vm12, %v4005_v0, %v5410_v53  ;;  %v3984_v30 = vsel %vm3983_vm0, %v3982_v29, %v3981_v46  ;;  %v3995_v10 = vsel %vm3980_vm15, %v3994_v7, %v3993_v40  ;;  %v4022_v27 = vrot.slane %v3865_v54, 1 }
 0x1e8   :  { %v4008_v63 = vsel %vm3980_vm15, %v4007_v52, %v4006_v2  ;;  %v4019_v9 = vsel %vm3977_vm12, %v4018_v35, %v5427_v19  ;;  %v3997_v13 = vsel %vm3983_vm0, %v3996_v28, %v3995_v10  ;;  %v2200_v50 = vcombine.low %v5326_v37, %v5420_v45 }
 0x1e9   :  { %v4010_v33 = vsel %vm3983_vm0, %v4009_v23, %v4008_v63  ;;  %v4021_v34 = vsel %vm3980_vm15, %v4020_v47, %v4019_v9  ;;  %v4189_v26 = vpack.c.b16 %v3997_v13, %v3984_v30  ;;  %v2201_v19 = vcombine.high %v5326_v37, %v5420_v45 }
 0x1ea   :  { %v2075_v58 = vmax.f32 %v5225_v5, %v5331_v20  ;;  %v4023_v42 = vsel %vm3983_vm0, %v4022_v27, %v4021_v34  ;;  %v2076_v48 = vmax.f32 %v5227_v61, %v5333_v25  ;;  %v2078_v54 = vmax.f32 %v5229_v8, %v5335_v6 }
 0x1eb   :  { %v2077_v55 = vmax.f32 %v5231_v11, %v5337_v44  ;;  %v4190_v16 = vpack.c.b16 %v4023_v42, %v4010_v33  ;;  %v4221_v29 = vsel %vm5482_vm3, %v4189_v26, 0  ;;  %v2210_v37 = vrot.slane %v2200_v50, %v5262_v41  ;;  %v6010_v26 = vld [vmem:[#allocation20_spill] sm:$0xff]  ;;  %v6012_v42 = vld [vmem:[#allocation21_spill] sm:$0xff] }
 0x1ec   :  { %v2217_v45 = vrot.slane %v2201_v19, %v5262_v41  ;;  %4222 = vst [vmem:[%s5953_s3] sm:$0xff] %v4221_v29  ;;  %v2202_v5 = vcombine.low %v5329_v60, %v2075_v58  ;;  %v2203_v61 = vcombine.high %v5329_v60, %v2075_v58  ;;  %v2079_v25 = vmax.f32 %v5233_v31, %v5339_v62  ;;  %v6011_v19 = vld [vmem:[#allocation22_spill] sm:$0xff] }
 0x1ed   :  { %v2236_v8 = vcombine.low %v2076_v48, %v2077_v55  ;;  %v2237_v20 = vcombine.high %v2076_v48, %v2077_v55  ;;  %v4224_v11 = vsel %vm5482_vm3, %v4190_v16, 0  ;;  %v5514_v6 = vmax.f32 %v5243_v32, %v5345_v59 }
 0x1ee   :  { %v5518_v44 = vmax.f32 %v5245_v17, %v5347_v1  ;;  %4225 = vst [vmem:[%s5953_s3 + $0x8] sm:$0xff] %v4224_v11  ;;  %v2224_v60 = vrot.slane %v2202_v5, %v5262_v41  ;;  %v2231_v56 = vrot.slane %v2203_v61, %v5262_v41  ;;  %v2238_v62 = vcombine.low %v2078_v54, %v2079_v25  ;;  %v6014_v11 = vld [vmem:[#allocation24_spill] sm:$0xff] }
 0x1ef   :  { %v2246_v7 = vrot.slane %v2236_v8, %v5262_v41  ;;  %v2253_v31 = vrot.slane %v2237_v20, %v5262_v41  ;;  %v2239_v28 = vcombine.high %v2078_v54, %v2079_v25  ;;  %v5529_v32 = vmax.f32 %v5247_v18, %v5349_v36  ;;  %v6013_v54 = vld [vmem:[#allocation23_spill] sm:$0xff] }
 0x1f0   :  { %v5533_v17 = vmax.f32 %v5251_v22, %v5363_v39  ;;  %v2232_v59 = vcombine.low %v2210_v37, %v2224_v60  ;;  %v2233_v1 = vcombine.high %v2210_v37, %v2224_v60  ;;  %v2234_v0 = vcombine.low %v2217_v45, %v2231_v56  ;;  %v6015_v60 = vld [vmem:[#allocation26_spill] sm:$0xff] }
 0x1f1   :  { %v2235_v21 = vcombine.high %v2217_v45, %v2231_v56  ;;  %v2260_v3 = vrot.slane %v2238_v62, %v5262_v41  ;;  %v2267_v52 = vrot.slane %v2239_v28, %v5262_v41  ;;  %v6017_v62 = vld [vmem:[#allocation27_spill] sm:$0xff] }
 0x1f2   :  { %v4475_v18 = vrot.slane %v2232_v59, 9  ;;  %v4476_v36 = vrot.slane %v2233_v1, 9  ;;  %v4477_v46 = vrot.slane %v2234_v0, 9 }
 0x1f3   :  { %v4478_v40 = vrot.slane %v2235_v21, 9  ;;  %v2268_v22 = vcombine.low %v2246_v7, %v2260_v3  ;;  %v2269_v39 = vcombine.high %v2246_v7, %v2260_v3  ;;  %v2270_v2 = vcombine.low %v2253_v31, %v2267_v52  ;;  %v6016_v7 = vld [vmem:[#allocation25_spill] sm:$0xff] }
 0x1f4   :  { %v2271_v47 = vcombine.high %v2253_v31, %v2267_v52  ;;  %v2552_v30 = vmax.f32 %v2232_v59, %v4475_v18  ;;  %v2553_v10 = vmax.f32 %v2233_v1, %v4476_v36  ;;  %v2554_v63 = vmax.f32 %v2234_v0, %v4477_v46 }
 0x1f5   :  { %v2555_v9 = vmax.f32 %v2235_v21, %v4478_v40  ;;  %v4479_v13 = vrot.slane %v2268_v22, 9  ;;  %v4480_v33 = vrot.slane %v2269_v39, 9  ;;  %v4481_v34 = vrot.slane %v2270_v2, 9 }
 0x1f6   :  { %v4482_v27 = vrot.slane %v2271_v47, 9  ;;  %v2650_v50 = vadd.f32 %v6010_v26, %v2552_v30  ;;  %v2651_v58 = vadd.f32 %v6011_v19, %v2553_v10  ;;  %v2652_v48 = vadd.f32 %v6012_v42, %v2554_v63 }
 0x1f7   :  { %v2653_v55 = vadd.f32 %v6013_v54, %v2555_v9  ;;  %v2556_v16 = vmax.f32 %v2268_v22, %v4479_v13  ;;  %v2557_v29 = vmax.f32 %v2269_v39, %v4480_v33  ;;  %v2558_v37 = vmax.f32 %v2270_v2, %v4481_v34 }
 0x1f8   :  { %v2559_v45 = vmax.f32 %v2271_v47, %v4482_v27  ;;  %v2682_v5 = vmax.f32 %v2650_v50, 0.0  ;;  %v2683_v61 = vmax.f32 %v2651_v58, 0.0  ;;  %v2684_v8 = vmax.f32 %v2652_v48, 0.0 }
 0x1f9   :  { %v2685_v20 = vmax.f32 %v2653_v55, 0.0  ;;  %v5546_v25 = vadd.f32 %v6014_v11, %v2556_v16  ;;  %v5549_v56 = vadd.f32 %v6015_v60, %v2557_v29  ;;  %v5552_v31 = vadd.f32 %v6016_v7, %v2558_v37 }
 0x1fa   :  { %v5555_v28 = vadd.f32 %v6017_v62, %v2559_v45  ;;  %v2869_v59 = vrot.slane %v2682_v5, %v5236_v12  ;;  %v2873_v1 = vrot.slane %v2682_v5, %v5240_v14  ;;  %v2877_v0 = vrot.slane %v2682_v5, %v5295_v15 }
 0x1fb   :  { %v2881_v21 = vrot.slane %v2682_v5, %v5306_v43  ;;  %v2885_v3 = vrot.slane %v2683_v61, %v5236_v12  ;;  %v2889_v52 = vrot.slane %v2683_v61, %v5240_v14  ;;  %v2893_v18 = vrot.slane %v2683_v61, %v5295_v15 }
 0x1fc   :  { %v2897_v36 = vrot.slane %v2683_v61, %v5306_v43  ;;  %v2901_v46 = vrot.slane %v2684_v8, %v5236_v12  ;;  %v2905_v40 = vrot.slane %v2684_v8, %v5240_v14  ;;  %v2909_v22 = vrot.slane %v2684_v8, %v5295_v15 }
 0x1fd   :  { %v2913_v39 = vrot.slane %v2684_v8, %v5306_v43  ;;  %v2917_v2 = vrot.slane %v2685_v20, %v5236_v12  ;;  %v2921_v47 = vrot.slane %v2685_v20, %v5240_v14  ;;  %v2925_v30 = vrot.slane %v2685_v20, %v5295_v15 }
 0x1fe   :  { %v2929_v10 = vrot.slane %v2685_v20, %v5306_v43  ;;  %v4579_v63 = vpack.c.bf16 %v2873_v1, %v2869_v59  ;;  %v4580_v9 = vpack.c.bf16 %v2881_v21, %v2877_v0  ;;  %v4581_v13 = vpack.c.bf16 %v2889_v52, %v2885_v3 }
 0x1ff   :  { %v4582_v33 = vpack.c.bf16 %v2897_v36, %v2893_v18  ;;  %v4583_v34 = vpack.c.bf16 %v2905_v40, %v2901_v46  ;;  %v4584_v27 = vpack.c.bf16 %v2913_v39, %v2909_v22  ;;  %v4585_v50 = vpack.c.bf16 %v2921_v47, %v2917_v2 }
 0x200   :  { %v4586_v58 = vpack.c.bf16 %v2929_v10, %v2925_v30  ;;  %v3870_v48 = vunpack.c.l.b16 %v4579_v63  ;;  %v3871_v55 = vunpack.c.h.b16 %v4579_v63  ;;  %v3872_v16 = vunpack.c.l.b16 %v4580_v9 }
 0x201   :  { %v3873_v29 = vunpack.c.h.b16 %v4580_v9  ;;  %v3874_v37 = vunpack.c.l.b16 %v4581_v13  ;;  %v3875_v45 = vunpack.c.h.b16 %v4581_v13  ;;  %v3876_v5 = vunpack.c.l.b16 %v4582_v33 }
 0x202   :  { %v3877_v61 = vunpack.c.h.b16 %v4582_v33  ;;  %v3878_v8 = vunpack.c.l.b16 %v4583_v34  ;;  %v3879_v35 = vunpack.c.h.b16 %v4583_v34  ;;  %v3880_v23 = vunpack.c.l.b16 %v4584_v27 }
 0x203   :  { %v3881_v20 = vunpack.c.h.b16 %v4584_v27  ;;  %v3882_v59 = vunpack.c.l.b16 %v4585_v50  ;;  %v3883_v1 = vunpack.c.h.b16 %v4585_v50  ;;  %v3884_v0 = vunpack.c.l.b16 %v4586_v58 }
 0x204   :  { %v3885_v21 = vunpack.c.h.b16 %v4586_v58  ;;  %v4024_v3 = vrot.slane %v3870_v48, 7  ;;  %v4027_v52 = vrot.slane %v3874_v37, 6  ;;  %v4029_v18 = vrot.slane %v3878_v8, 5 }
 0x205   :  { %v4039_v36 = vrot.slane %v3871_v55, 7  ;;  %v4031_v46 = vrot.slane %v3882_v59, 4  ;;  %v4041_v40 = vrot.slane %v3875_v45, 6  ;;  %v4043_v22 = vrot.slane %v3879_v35, 5 }
 0x206   :  { %v4045_v39 = vrot.slane %v3883_v1, 4  ;;  %v4026_v2 = vsel %vm4025_vm4, %v4024_v3, %v3866_v57  ;;  %v4053_v30 = vrot.slane %v3872_v16, 7  ;;  %v4055_v10 = vrot.slane %v3876_v5, 6 }
 0x207   :  { %v4040_v47 = vsel %vm4025_vm4, %v4039_v36, %v3867_v4  ;;  %v4028_v63 = vsel %vm3968_vm7, %v4027_v52, %v4026_v2  ;;  %v4057_v13 = vrot.slane %v3880_v23, 5  ;;  %v4059_v33 = vrot.slane %v3884_v0, 4 }
 0x208   :  { %v4042_v9 = vsel %vm3968_vm7, %v4041_v40, %v4040_v47  ;;  %v4030_v34 = vsel %vm3971_vm8, %v4029_v18, %v4028_v63  ;;  %v4054_v57 = vsel %vm4025_vm4, %v4053_v30, %v3868_v49  ;;  %v4067_v27 = vrot.slane %v3873_v29, 7 }
 0x209   :  { %v4044_v35 = vsel %vm3971_vm8, %v4043_v22, %v4042_v9  ;;  %v5587_v38 = vsel %vm3974_vm9, %v4031_v46, %v4030_v34  ;;  %v4056_v50 = vsel %vm3968_vm7, %v4055_v10, %v4054_v57  ;;  %v4069_v58 = vrot.slane %v3877_v61, 6 }
 0x20a   :  { %v5590_v4 = vsel %vm3974_vm9, %v4045_v39, %v4044_v35  ;;  %v4058_v23 = vsel %vm3971_vm8, %v4057_v13, %v4056_v50  ;;  %v4068_v48 = vsel %vm4025_vm4, %v4067_v27, %v3869_v24  ;;  %v4071_v55 = vrot.slane %v3881_v20, 5 }
 0x20b   :  { %v4073_v16 = vrot.slane %v3885_v21, 4  ;;  %v4060_v49 = vsel %vm3974_vm9, %v4059_v33, %v4058_v23  ;;  %v4070_v29 = vsel %vm3968_vm7, %v4069_v58, %v4068_v48  ;;  %v2686_v37 = vmax.f32 %v5546_v25, 0.0 }
 0x20c   :  { %v2687_v45 = vmax.f32 %v5549_v56, 0.0  ;;  %v4072_v5 = vsel %vm3971_vm8, %v4071_v55, %v4070_v29  ;;  %v2688_v61 = vmax.f32 %v5552_v31, 0.0  ;;  %v2689_v51 = vmax.f32 %v5555_v28, 0.0 }
 0x20d   :  { %v6018_v24 = vcombine.low %v5514_v6, %v5529_v32  ;;  %v5611_v20 = vsel %vm3974_vm9, %v4073_v16, %v4072_v5  ;;  %v2933_v25 = vrot.slane %v2686_v37, %v5236_v12  ;;  %v2937_v56 = vrot.slane %v2686_v37, %v5240_v14 }
 0x20e   :  { %v2941_v59 = vrot.slane %v2686_v37, %v5295_v15  ;;  %v2945_v1 = vrot.slane %v2686_v37, %v5306_v43  ;;  %v2949_v31 = vrot.slane %v2687_v45, %v5236_v12  ;;  %v2953_v28 = vrot.slane %v2687_v45, %v5240_v14  ;;  %v6031_v37 = vld [vmem:[#allocation11_spill] sm:$0xff] }
 0x20f   :  { %v5608_v8 = vrot.slane %v6018_v24, %v5262_v41  ;;  %v2957_v0 = vrot.slane %v2687_v45, %v5295_v15  ;;  %v2961_v21 = vrot.slane %v2687_v45, %v5306_v43  ;;  %v2965_v3 = vrot.slane %v2688_v61, %v5236_v12 }
 0x210   :  { %v2969_v52 = vrot.slane %v2688_v61, %v5240_v14  ;;  %v2973_v18 = vrot.slane %v2688_v61, %v5295_v15  ;;  %v2977_v36 = vrot.slane %v2688_v61, %v5306_v43  ;;  %v2981_v46 = vrot.slane %v2689_v51, %v5236_v12 }
 0x211   :  { %v2985_v40 = vrot.slane %v2689_v51, %v5240_v14  ;;  %v2989_v22 = vrot.slane %v2689_v51, %v5295_v15  ;;  %v2993_v39 = vrot.slane %v2689_v51, %v5306_v43  ;;  %v4587_v2 = vpack.c.bf16 %v2937_v56, %v2933_v25 }
 0x212   :  { %v4588_v47 = vpack.c.bf16 %v2945_v1, %v2941_v59  ;;  %v4589_v30 = vpack.c.bf16 %v2953_v28, %v2949_v31  ;;  %v4590_v10 = vpack.c.bf16 %v2961_v21, %v2957_v0  ;;  %v4591_v63 = vpack.c.bf16 %v2969_v52, %v2965_v3 }
 0x213   :  { %v4592_v9 = vpack.c.bf16 %v2977_v36, %v2973_v18  ;;  %v4593_v13 = vpack.c.bf16 %v2985_v40, %v2981_v46  ;;  %v4594_v33 = vpack.c.bf16 %v2993_v39, %v2989_v22  ;;  %v3886_v34 = vunpack.c.l.b16 %v4587_v2 }
 0x214   :  { %v3887_v35 = vunpack.c.h.b16 %v4587_v2  ;;  %v3888_v57 = vunpack.c.l.b16 %v4588_v47  ;;  %v3889_v27 = vunpack.c.h.b16 %v4588_v47  ;;  %v3890_v50 = vunpack.c.l.b16 %v4589_v30 }
 0x215   :  { %v3891_v58 = vunpack.c.h.b16 %v4589_v30  ;;  %v3892_v23 = vunpack.c.l.b16 %v4590_v10  ;;  %v3893_v48 = vunpack.c.h.b16 %v4590_v10  ;;  %v3894_v55 = vunpack.c.l.b16 %v4591_v63 }
 0x216   :  { %v3895_v16 = vunpack.c.h.b16 %v4591_v63  ;;  %v3896_v29 = vunpack.c.l.b16 %v4592_v9  ;;  %v3897_v45 = vunpack.c.h.b16 %v4592_v9  ;;  %v4033_v5 = vrot.slane %v3886_v34, 3 }
 0x217   :  { %v4035_v61 = vrot.slane %v3890_v50, 2  ;;  %v4047_v51 = vrot.slane %v3887_v35, 3  ;;  %v4037_v24 = vrot.slane %v3894_v55, 1  ;;  %v4049_v25 = vrot.slane %v3891_v58, 2  ;;  %v6026_v50 = vld [vmem:[#allocation29_spill] sm:$0xff]  ;;  %v6029_v55 = vld [vmem:[#allocation10_spill] sm:$0xff] }
 0x218   :  { %v4051_v56 = vrot.slane %v3895_v16, 1  ;;  %v4061_v59 = vrot.slane %v3888_v57, 3  ;;  %v4034_v1 = vsel %vm3977_vm12, %v4033_v5, %v5587_v38  ;;  %v4063_v28 = vrot.slane %v3892_v23, 2  ;;  %v4235_v38 = vld [vmem:[%s5953_s3 + $0x20] sm:$0x11]  ;;  %v6027_v58 = vld [vmem:[#allocation9_spill] sm:$0xff] }
 0x219   :  { %v4048_v31 = vsel %vm3977_vm12, %v4047_v51, %v5590_v4  ;;  %v4065_v0 = vrot.slane %v3896_v29, 1  ;;  %v4036_v21 = vsel %vm3980_vm15, %v4035_v61, %v4034_v1  ;;  %v4075_v18 = vrot.slane %v3889_v27, 3  ;;  %v4238_v4 = vld [vmem:[%s5953_s3 + $0x28] sm:$0x11]  ;;  %v6030_v29 = vld [vmem:[#allocation31_spill] sm:$0xff] }
 0x21a   :  { %v4050_v3 = vsel %vm3980_vm15, %v4049_v25, %v4048_v31  ;;  %v4062_v52 = vsel %vm3977_vm12, %v4061_v59, %v4060_v49  ;;  %v4038_v46 = vsel %vm3983_vm0, %v4037_v24, %v4036_v21  ;;  %v4077_v22 = vrot.slane %v3893_v48, 2  ;;  %v6028_v48 = vld [vmem:[#allocation30_spill] sm:$0xff]  ;;  %v6032_v51 = vld [vmem:[#allocation32_spill] sm:$0xff]  ;;  %v6035_v25 = vld [vmem:[#allocation13_spill] sm:$0xff] }
 0x21b   :  { %v4052_v40 = vsel %vm3983_vm0, %v4051_v56, %v4050_v3  ;;  %v4064_v49 = vsel %vm3980_vm15, %v4063_v28, %v4062_v52  ;;  %v4076_v2 = vsel %vm3977_vm12, %v4075_v18, %v5611_v20  ;;  %v4079_v47 = vrot.slane %v3897_v45, 1  ;;  %v6033_v24 = vld [vmem:[#allocation12_spill] sm:$0xff] }
 0x21c   :  { %v4066_v39 = vsel %vm3983_vm0, %v4065_v0, %v4064_v49  ;;  %v4191_v30 = vpack.c.b16 %v4052_v40, %v4038_v46  ;;  %v4078_v10 = vsel %vm3980_vm15, %v4077_v22, %v4076_v2  ;;  %v4236_v63 = vsel %vm5646_vm14, %v4593_v13, %v4235_v38  ;;  %v6025_v13 = vld [vmem:[#allocation8_spill] sm:$0xff] }
 0x21d   :  { %v4239_v9 = vsel %vm5646_vm14, %v4594_v33, %v4238_v4  ;;  %v6023_v34 = vcombine.high %v5514_v6, %v5529_v32  ;;  %v4080_v57 = vsel %vm3983_vm0, %v4079_v47, %v4078_v10  ;;  %4237 = vst [vmem:[%s5953_s3 + $0x20] sm:$0x11] %v4236_v63  ;;  %v2274_v20 = vcombine.low %v5518_v44, %v5533_v17  ;;  %v6024_v32 = vld [vmem:[#allocation28_spill] sm:$0xff] }
 0x21e   :  { %4226 = vst [vmem:[%s5953_s3 + $0x10] sm:$0xff] %v4191_v30  ;;  %4240 = vst [vmem:[%s5953_s3 + $0x28] sm:$0x11] %v4239_v9  ;;  %v2275_v6 = vcombine.high %v5518_v44, %v5533_v17  ;;  %v2084_v33 = vmax.f32 %v6025_v13, %v6024_v32  ;;  %v4192_v27 = vpack.c.b16 %v4080_v57, %v4066_v39  ;;  %v6034_v17 = vld [vmem:[#allocation33_spill] sm:$0xff] }
 0x21f   :  { %v2289_v35 = vrot.slane %v6023_v34, %v5262_v41  ;;  %v2086_v23 = vmax.f32 %v6027_v58, %v6026_v50  ;;  %v2085_v16 = vmax.f32 %v6029_v55, %v6028_v48  ;;  %v2087_v45 = vmax.f32 %v6031_v37, %v6030_v29 }
 0x220   :  { %v2296_v5 = vrot.slane %v2274_v20, %v5262_v41  ;;  %v2303_v61 = vrot.slane %v2275_v6, %v5262_v41  ;;  %v5697_v44 = vmax.f32 %v6033_v24, %v6032_v51  ;;  %v5701_v56 = vmax.f32 %v6035_v25, %v6034_v17  ;;  %4227 = vst [vmem:[%s5953_s3 + $0x18] sm:$0xff] %v4192_v27 }
 0x221   :  { %v2308_v59 = vcombine.low %v2084_v33, %v2085_v16  ;;  %v2309_v1 = vcombine.high %v2084_v33, %v2085_v16  ;;  %v2310_v31 = vcombine.low %v2086_v23, %v2087_v45  ;;  %v2311_v28 = vcombine.high %v2086_v23, %v2087_v45 }
 0x222   :  { %v2304_v0 = vcombine.low %v5608_v8, %v2296_v5  ;;  %v2305_v21 = vcombine.high %v5608_v8, %v2296_v5  ;;  %v2306_v3 = vcombine.low %v2289_v35, %v2303_v61  ;;  %v2307_v52 = vcombine.high %v2289_v35, %v2303_v61 }
 0x223   :  { %v2318_v18 = vrot.slane %v2308_v59, %v5262_v41  ;;  %v2325_v38 = vrot.slane %v2309_v1, %v5262_v41  ;;  %v2332_v4 = vrot.slane %v2310_v31, %v5262_v41  ;;  %v2339_v46 = vrot.slane %v2311_v28, %v5262_v41 }
 0x224   :  { %v4483_v40 = vrot.slane %v2304_v0, 9  ;;  %v4484_v49 = vrot.slane %v2305_v21, 9  ;;  %v4485_v22 = vrot.slane %v2306_v3, 9  ;;  %v4486_v39 = vrot.slane %v2307_v52, 9 }
 0x225   :  { %v2340_v2 = vcombine.low %v2318_v18, %v2332_v4  ;;  %v2341_v47 = vcombine.high %v2318_v18, %v2332_v4  ;;  %v2342_v30 = vcombine.low %v2325_v38, %v2339_v46  ;;  %v2343_v10 = vcombine.high %v2325_v38, %v2339_v46 }
 0x226   :  { %v2560_v63 = vmax.f32 %v2304_v0, %v4483_v40  ;;  %v2561_v8 = vmax.f32 %v2305_v21, %v4484_v49  ;;  %v2562_v9 = vmax.f32 %v2306_v3, %v4485_v22  ;;  %v2563_v34 = vmax.f32 %v2307_v52, %v4486_v39 }
 0x227   :  { %v4487_v35 = vrot.slane %v2340_v2, 9  ;;  %v4488_v57 = vrot.slane %v2341_v47, 9  ;;  %v4489_v20 = vrot.slane %v2342_v30, 9  ;;  %v4490_v6 = vrot.slane %v2343_v10, 9 }
 0x228   :  { %v2658_v32 = vadd.f32 %v6010_v26, %v2560_v63  ;;  %v2659_v13 = vadd.f32 %v6011_v19, %v2561_v8  ;;  %v2660_v33 = vadd.f32 %v6012_v42, %v2562_v9  ;;  %v2661_v27 = vadd.f32 %v6013_v54, %v2563_v34 }
 0x229   :  { %v2564_v50 = vmax.f32 %v2340_v2, %v4487_v35  ;;  %v2565_v58 = vmax.f32 %v2341_v47, %v4488_v57  ;;  %v2566_v23 = vmax.f32 %v2342_v30, %v4489_v20  ;;  %v2567_v48 = vmax.f32 %v2343_v10, %v4490_v6 }
 0x22a   :  { %v2690_v55 = vmax.f32 %v2658_v32, 0.0  ;;  %v2691_v16 = vmax.f32 %v2659_v13, 0.0  ;;  %v2692_v29 = vmax.f32 %v2660_v33, 0.0  ;;  %v2693_v37 = vmax.f32 %v2661_v27, 0.0 }
 0x22b   :  { %v5717_v45 = vadd.f32 %v6014_v11, %v2564_v50  ;;  %v5720_v5 = vadd.f32 %v6015_v60, %v2565_v58  ;;  %v5723_v61 = vadd.f32 %v6016_v7, %v2566_v23  ;;  %v5726_v51 = vadd.f32 %v6017_v62, %v2567_v48 }
 0x22c   :  { %v2997_v24 = vrot.slane %v2690_v55, %v5236_v12  ;;  %v3001_v17 = vrot.slane %v2690_v55, %v5240_v14  ;;  %v3005_v25 = vrot.slane %v2690_v55, %v5295_v15  ;;  %v3009_v59 = vrot.slane %v2690_v55, %v5306_v43 }
 0x22d   :  { %v3013_v1 = vrot.slane %v2691_v16, %v5236_v12  ;;  %v3017_v31 = vrot.slane %v2691_v16, %v5240_v14  ;;  %v3021_v28 = vrot.slane %v2691_v16, %v5295_v15  ;;  %v3025_v0 = vrot.slane %v2691_v16, %v5306_v43 }
 0x22e   :  { %v3029_v21 = vrot.slane %v2692_v29, %v5236_v12  ;;  %v3033_v3 = vrot.slane %v2692_v29, %v5240_v14  ;;  %v3037_v52 = vrot.slane %v2692_v29, %v5295_v15  ;;  %v3041_v18 = vrot.slane %v2692_v29, %v5306_v43 }
 0x22f   :  { %v3045_v38 = vrot.slane %v2693_v37, %v5236_v12  ;;  %v3049_v4 = vrot.slane %v2693_v37, %v5240_v14  ;;  %v3053_v46 = vrot.slane %v2693_v37, %v5295_v15  ;;  %v3057_v40 = vrot.slane %v2693_v37, %v5306_v43 }
 0x230   :  { %v4595_v49 = vpack.c.bf16 %v3001_v17, %v2997_v24  ;;  %v4596_v22 = vpack.c.bf16 %v3009_v59, %v3005_v25  ;;  %v4597_v39 = vpack.c.bf16 %v3017_v31, %v3013_v1  ;;  %v4598_v2 = vpack.c.bf16 %v3025_v0, %v3021_v28 }
 0x231   :  { %v4599_v47 = vpack.c.bf16 %v3033_v3, %v3029_v21  ;;  %v4600_v30 = vpack.c.bf16 %v3041_v18, %v3037_v52  ;;  %v4601_v10 = vpack.c.bf16 %v3049_v4, %v3045_v38  ;;  %v4602_v63 = vpack.c.bf16 %v3057_v40, %v3053_v46 }
 0x232   :  { %v3902_v8 = vunpack.c.l.b16 %v4595_v49  ;;  %v3903_v9 = vunpack.c.h.b16 %v4595_v49  ;;  %v3904_v34 = vunpack.c.l.b16 %v4596_v22  ;;  %v3905_v35 = vunpack.c.h.b16 %v4596_v22 }
 0x233   :  { %v3906_v57 = vunpack.c.l.b16 %v4597_v39  ;;  %v3907_v20 = vunpack.c.h.b16 %v4597_v39  ;;  %v3908_v6 = vunpack.c.l.b16 %v4598_v2  ;;  %v3909_v32 = vunpack.c.h.b16 %v4598_v2 }
 0x234   :  { %v3910_v13 = vunpack.c.l.b16 %v4599_v47  ;;  %v3911_v33 = vunpack.c.h.b16 %v4599_v47  ;;  %v3912_v27 = vunpack.c.l.b16 %v4600_v30  ;;  %v3913_v50 = vunpack.c.h.b16 %v4600_v30 }
 0x235   :  { %v3914_v58 = vunpack.c.l.b16 %v4601_v10  ;;  %v3915_v23 = vunpack.c.h.b16 %v4601_v10  ;;  %v3916_v48 = vunpack.c.l.b16 %v4602_v63  ;;  %v3917_v55 = vunpack.c.h.b16 %v4602_v63 }
 0x236   :  { %v4081_v16 = vrot.slane %v3902_v8, 7  ;;  %v4082_v29 = vrot.slane %v3906_v57, 6  ;;  %v4084_v37 = vrot.slane %v3910_v13, 5  ;;  %v4094_v24 = vrot.slane %v3903_v9, 7  ;;  %v6036_v57 = vld [vmem:[#allocation34_spill] sm:$0xff] }
 0x237   :  { %v4086_v17 = vrot.slane %v3914_v58, 4  ;;  %v4095_v25 = vrot.slane %v3907_v20, 6  ;;  %v4097_v59 = vrot.slane %v3911_v33, 5  ;;  %v4099_v1 = vrot.slane %v3915_v23, 4  ;;  %v6037_v20 = vld [vmem:[#allocation14_spill] sm:$0xff] }
 0x238   :  { %v4083_v31 = vsel %vm3968_vm7, %v4082_v29, %v4081_v16  ;;  %v4107_v28 = vrot.slane %v3904_v34, 7  ;;  %v4108_v0 = vrot.slane %v3908_v6, 6  ;;  %v4110_v21 = vrot.slane %v3912_v27, 5 }
 0x239   :  { %v4085_v3 = vsel %vm3971_vm8, %v4084_v37, %v4083_v31  ;;  %v4096_v52 = vsel %vm3968_vm7, %v4095_v25, %v4094_v24  ;;  %v4112_v18 = vrot.slane %v3916_v48, 4  ;;  %v4120_v38 = vrot.slane %v3905_v35, 7 }
 0x23a   :  { %v4087_v4 = vsel %vm3974_vm9, %v4086_v17, %v4085_v3  ;;  %v4098_v46 = vsel %vm3971_vm8, %v4097_v59, %v4096_v52  ;;  %v4109_v40 = vsel %vm3968_vm7, %v4108_v0, %v4107_v28  ;;  %v4121_v49 = vrot.slane %v3909_v32, 6 }
 0x23b   :  { %v4100_v22 = vsel %vm3974_vm9, %v4099_v1, %v4098_v46  ;;  %v4111_v39 = vsel %vm3971_vm8, %v4110_v21, %v4109_v40  ;;  %v4123_v2 = vrot.slane %v3913_v50, 5  ;;  %v4125_v47 = vrot.slane %v3917_v55, 4 }
 0x23c   :  { %v4113_v30 = vsel %vm3974_vm9, %v4112_v18, %v4111_v39  ;;  %v4122_v10 = vsel %vm3968_vm7, %v4121_v49, %v4120_v38  ;;  %v2694_v63 = vmax.f32 %v5717_v45, 0.0  ;;  %v2695_v8 = vmax.f32 %v5720_v5, 0.0 }
 0x23d   :  { %v4124_v9 = vsel %vm3971_vm8, %v4123_v2, %v4122_v10  ;;  %v2696_v34 = vmax.f32 %v5723_v61, 0.0  ;;  %v5759_v35 = vmax.f32 %v5726_v51, 0.0  ;;  %v5763_v6 = vmax.f32 %v6037_v20, %v6036_v57 }
 0x23e   :  { %v4126_v32 = vsel %vm3974_vm9, %v4125_v47, %v4124_v9  ;;  %v3061_v13 = vrot.slane %v2694_v63, %v5236_v12  ;;  %v3065_v33 = vrot.slane %v2694_v63, %v5240_v14  ;;  %v3069_v45 = vrot.slane %v2694_v63, %v5295_v15 }
 0x23f   :  { %v3073_v5 = vrot.slane %v2694_v63, %v5306_v43  ;;  %v3077_v27 = vrot.slane %v2695_v8, %v5236_v12  ;;  %v3081_v61 = vrot.slane %v2695_v8, %v5240_v14  ;;  %v3085_v51 = vrot.slane %v2695_v8, %v5295_v15 }
 0x240   :  { %v3089_v50 = vrot.slane %v2695_v8, %v5306_v43  ;;  %v3093_v58 = vrot.slane %v2696_v34, %v5236_v12  ;;  %v3097_v23 = vrot.slane %v2696_v34, %v5240_v14  ;;  %v3101_v48 = vrot.slane %v2696_v34, %v5295_v15 }
 0x241   :  { %v3105_v55 = vrot.slane %v2696_v34, %v5306_v43  ;;  %v3109_v16 = vrot.slane %v5759_v35, %v5236_v12  ;;  %v4603_v29 = vpack.c.bf16 %v3065_v33, %v3061_v13  ;;  %v4604_v37 = vpack.c.bf16 %v3073_v5, %v3069_v45 }
 0x242   :  { %v4605_v24 = vpack.c.bf16 %v3081_v61, %v3077_v27  ;;  %v3113_v17 = vrot.slane %v5759_v35, %v5240_v14  ;;  %v4606_v25 = vpack.c.bf16 %v3089_v50, %v3085_v51  ;;  %v4607_v59 = vpack.c.bf16 %v3097_v23, %v3093_v58 }
 0x243   :  { %v4608_v1 = vpack.c.bf16 %v3105_v55, %v3101_v48  ;;  %v3918_v31 = vunpack.c.l.b16 %v4603_v29  ;;  %v3919_v28 = vunpack.c.h.b16 %v4603_v29  ;;  %v3920_v0 = vunpack.c.l.b16 %v4604_v37 }
 0x244   :  { %v3921_v21 = vunpack.c.h.b16 %v4604_v37  ;;  %v3922_v3 = vunpack.c.l.b16 %v4605_v24  ;;  %v3923_v52 = vunpack.c.h.b16 %v4605_v24  ;;  %v3924_v18 = vunpack.c.l.b16 %v4606_v25 }
 0x245   :  { %v3926_v38 = vunpack.c.l.b16 %v4607_v59  ;;  %v3927_v46 = vunpack.c.h.b16 %v4607_v59  ;;  %v3928_v40 = vunpack.c.l.b16 %v4608_v1  ;;  %v3117_v49 = vrot.slane %v5759_v35, %v5295_v15 }
 0x246   :  { %v3121_v39 = vrot.slane %v5759_v35, %v5306_v43  ;;  %v5786_v2 = vpack.c.bf16 %v3113_v17, %v3109_v16  ;;  %v3925_v47 = vunpack.c.h.b16 %v4606_v25  ;;  %v3929_v10 = vunpack.c.h.b16 %v4608_v1  ;;  %v6038_v17 = vld [vmem:[#allocation35_spill] sm:$0xff] }
 0x247   :  { %v4088_v63 = vrot.slane %v3918_v31, 3  ;;  %v4090_v8 = vrot.slane %v3922_v3, 2  ;;  %v4092_v9 = vrot.slane %v3926_v38, 1  ;;  %v4101_v34 = vrot.slane %v3919_v28, 3  ;;  %v6039_v25 = vld [vmem:[#allocation15_spill] sm:$0xff]  ;;  %v6041_v31 = vld [vmem:[#allocation16_spill] sm:$0xff] }
 0x248   :  { %v4103_v57 = vrot.slane %v3923_v52, 2  ;;  %v4105_v20 = vrot.slane %v3927_v46, 1  ;;  %v4114_v13 = vrot.slane %v3920_v0, 3  ;;  %v4116_v45 = vrot.slane %v3924_v18, 2  ;;  %v6042_v0 = vld [vmem:[#allocation37_spill] sm:$0xff]  ;;  %v6044_v52 = vld [vmem:[#allocation38_spill] sm:$0xff] }
 0x249   :  { %v4089_v33 = vsel %vm3977_vm12, %v4088_v63, %v4087_v4  ;;  %v4118_v5 = vrot.slane %v3928_v40, 1  ;;  %v4127_v27 = vrot.slane %v3921_v21, 3  ;;  %v4102_v35 = vsel %vm3977_vm12, %v4101_v34, %v4100_v22  ;;  %v6043_v21 = vld [vmem:[#allocation17_spill] sm:$0xff]  ;;  %v6045_v18 = vld [vmem:[#allocation18_spill] sm:$0xff] }
 0x24a   :  { %v4091_v61 = vsel %vm3980_vm15, %v4090_v8, %v4089_v33  ;;  %v4115_v51 = vsel %vm3977_vm12, %v4114_v13, %v4113_v30  ;;  %v4129_v50 = vrot.slane %v3925_v47, 2  ;;  %v4104_v23 = vsel %vm3980_vm15, %v4103_v57, %v4102_v35  ;;  %v6046_v57 = vld [vmem:[#allocation39_spill] sm:$0xff] }
 0x24b   :  { %v4093_v58 = vsel %vm3983_vm0, %v4092_v9, %v4091_v61  ;;  %v4117_v48 = vsel %vm3980_vm15, %v4116_v45, %v4115_v51  ;;  %v4128_v55 = vsel %vm3977_vm12, %v4127_v27, %v4126_v32  ;;  %v4106_v4 = vsel %vm3983_vm0, %v4105_v20, %v4104_v23  ;;  %v6040_v32 = vld [vmem:[#allocation36_spill] sm:$0xff]  ;;  %v6047_v20 = vld [vmem:[#allocation19_spill] sm:$0xff] }
 0x24c   :  { %v4119_v16 = vsel %vm3983_vm0, %v4118_v5, %v4117_v48  ;;  %v4130_v29 = vsel %vm3980_vm15, %v4129_v50, %v4128_v55  ;;  %v4131_v37 = vrot.slane %v3929_v10, 1  ;;  %v4195_v24 = vpack.c.b16 %v4106_v4, %v4093_v58 }
 0x24d   :  { %v2344_v22 = vcombine.low %v5697_v44, %v5763_v6  ;;  %v2345_v30 = vcombine.high %v5697_v44, %v5763_v6  ;;  %v2091_v59 = vmax.f32 %v6039_v25, %v6038_v17  ;;  %v2092_v28 = vmax.f32 %v6041_v31, %v6040_v32 }
 0x24e   :  { %v4132_v1 = vsel %vm3983_vm0, %v4131_v37, %v4130_v29  ;;  %v2094_v3 = vmax.f32 %v6043_v21, %v6042_v0  ;;  %v2093_v38 = vmax.f32 %v6045_v18, %v6044_v52  ;;  %v4242_v40 = vsel %vm5482_vm3, %v4195_v24, 0 }
 0x24f   :  { %v4196_v46 = vpack.c.b16 %v4132_v1, %v4119_v16  ;;  %v2354_v44 = vrot.slane %v2344_v22, %v5262_v41  ;;  %v2361_v6 = vrot.slane %v2345_v30, %v5262_v41  ;;  %4243 = vst [vmem:[%s5953_s3 + $0x30] sm:$0xff] %v4242_v40  ;;  %v2346_v47 = vcombine.low %v5701_v56, %v2091_v59 }
 0x250   :  { %v2347_v10 = vcombine.high %v5701_v56, %v2091_v59  ;;  %v2380_v63 = vcombine.low %v2092_v28, %v2093_v38  ;;  %v2381_v8 = vcombine.high %v2092_v28, %v2093_v38  ;;  %v5821_v9 = vpack.c.bf16 %v3121_v39, %v3117_v49 }
 0x251   :  { %v4245_v34 = vsel %vm5482_vm3, %v4196_v46, 0  ;;  %v2095_v13 = vmax.f32 %v6047_v20, %v6046_v57  ;;  %v3930_v33 = vunpack.c.l.b16 %v5786_v2  ;;  %v3931_v45 = vunpack.c.h.b16 %v5786_v2 }
 0x252   :  { %4246 = vst [vmem:[%s5953_s3 + $0x38] sm:$0xff] %v4245_v34  ;;  %v2368_v56 = vrot.slane %v2346_v47, %v5262_v41  ;;  %v2375_v5 = vrot.slane %v2347_v10, %v5262_v41  ;;  %v2390_v49 = vrot.slane %v2380_v63, %v5262_v41  ;;  %v2397_v53 = vrot.slane %v2381_v8, %v5262_v41 }
 0x253   :  { %v2382_v39 = vcombine.low %v2094_v3, %v2095_v13  ;;  %v2383_v27 = vcombine.high %v2094_v3, %v2095_v13  ;;  %v3932_v58 = vunpack.c.l.b16 %v5821_v9  ;;  %v3933_v23 = vunpack.c.h.b16 %v5821_v9 }
 0x254   :  { %v2376_v61 = vcombine.low %v2354_v44, %v2368_v56  ;;  %v2377_v35 = vcombine.high %v2354_v44, %v2368_v56  ;;  %v2378_v51 = vcombine.low %v2361_v6, %v2375_v5  ;;  %v2379_v50 = vcombine.high %v2361_v6, %v2375_v5 }
 0x255   :  { %v2404_v48 = vrot.slane %v2382_v39, %v5262_v41  ;;  %v2411_v55 = vrot.slane %v2383_v27, %v5262_v41 }
 0x256   :  { %v4491_v4 = vrot.slane %v2376_v61, 9  ;;  %v4492_v16 = vrot.slane %v2377_v35, 9  ;;  %v4493_v29 = vrot.slane %v2378_v51, 9  ;;  %v4494_v37 = vrot.slane %v2379_v50, 9 }
 0x257   :  { %v2412_v24 = vcombine.low %v2390_v49, %v2404_v48  ;;  %v2413_v22 = vcombine.high %v2390_v49, %v2404_v48  ;;  %v2414_v30 = vcombine.low %v2397_v53, %v2411_v55  ;;  %v2415_v17 = vcombine.high %v2397_v53, %v2411_v55 }
 0x258   :  { %v2568_v25 = vmax.f32 %v2376_v61, %v4491_v4  ;;  %v2569_v59 = vmax.f32 %v2377_v35, %v4492_v16  ;;  %v2570_v1 = vmax.f32 %v2378_v51, %v4493_v29  ;;  %v2571_v32 = vmax.f32 %v2379_v50, %v4494_v37 }
 0x259   :  { %v4495_v31 = vrot.slane %v2412_v24, 9  ;;  %v4496_v28 = vrot.slane %v2413_v22, 9  ;;  %v4497_v0 = vrot.slane %v2414_v30, 9  ;;  %v4498_v21 = vrot.slane %v2415_v17, 9 }
 0x25a   :  { %v2666_v3 = vadd.f32 %v6010_v26, %v2568_v25  ;;  %v2667_v41 = vadd.f32 %v6011_v19, %v2569_v59  ;;  %v2668_v52 = vadd.f32 %v6012_v42, %v2570_v1  ;;  %v2669_v18 = vadd.f32 %v6013_v54, %v2571_v32 }
 0x25b   :  { %v2572_v38 = vmax.f32 %v2412_v24, %v4495_v31  ;;  %v2573_v46 = vmax.f32 %v2413_v22, %v4496_v28  ;;  %v2574_v40 = vmax.f32 %v2414_v30, %v4497_v0  ;;  %v2575_v44 = vmax.f32 %v2415_v17, %v4498_v21 }
 0x25c   :  { %v2698_v6 = vmax.f32 %v2666_v3, 0.0  ;;  %v2699_v47 = vmax.f32 %v2667_v41, 0.0  ;;  %v2700_v10 = vmax.f32 %v2668_v52, 0.0  ;;  %v2701_v63 = vmax.f32 %v2669_v18, 0.0 }
 0x25d   :  { %v5845_v8 = vadd.f32 %v6014_v11, %v2572_v38  ;;  %v5848_v34 = vadd.f32 %v6015_v60, %v2573_v46  ;;  %v5851_v26 = vadd.f32 %v6016_v7, %v2574_v40  ;;  %v5854_v19 = vadd.f32 %v6017_v62, %v2575_v44 }
 0x25e   :  { %v3125_v42 = vrot.slane %v2698_v6, %v5236_v12  ;;  %v3129_v54 = vrot.slane %v2698_v6, %v5240_v14  ;;  %v3133_v57 = vrot.slane %v2698_v6, %v5295_v15  ;;  %v3137_v20 = vrot.slane %v2698_v6, %v5306_v43 }
 0x25f   :  { %v3141_v11 = vrot.slane %v2699_v47, %v5236_v12  ;;  %v3145_v13 = vrot.slane %v2699_v47, %v5240_v14  ;;  %v3149_v60 = vrot.slane %v2699_v47, %v5295_v15  ;;  %v3153_v7 = vrot.slane %v2699_v47, %v5306_v43 }
 0x260   :  { %v3157_v56 = vrot.slane %v2700_v10, %v5236_v12  ;;  %v3161_v62 = vrot.slane %v2700_v10, %v5240_v14  ;;  %v3165_v5 = vrot.slane %v2700_v10, %v5295_v15  ;;  %v3169_v49 = vrot.slane %v2700_v10, %v5306_v43 }
 0x261   :  { %v3173_v53 = vrot.slane %v2701_v63, %v5236_v12  ;;  %v3177_v39 = vrot.slane %v2701_v63, %v5240_v14  ;;  %v3181_v27 = vrot.slane %v2701_v63, %v5295_v15  ;;  %v3185_v61 = vrot.slane %v2701_v63, %v5306_v43 }
 0x262   :  { %v4611_v35 = vpack.c.bf16 %v3129_v54, %v3125_v42  ;;  %v4612_v51 = vpack.c.bf16 %v3137_v20, %v3133_v57  ;;  %v4613_v50 = vpack.c.bf16 %v3145_v13, %v3141_v11  ;;  %v4614_v48 = vpack.c.bf16 %v3153_v7, %v3149_v60 }
 0x263   :  { %v4615_v55 = vpack.c.bf16 %v3161_v62, %v3157_v56  ;;  %v4616_v4 = vpack.c.bf16 %v3169_v49, %v3165_v5  ;;  %v4617_v16 = vpack.c.bf16 %v3177_v39, %v3173_v53  ;;  %v4618_v29 = vpack.c.bf16 %v3185_v61, %v3181_v27 }
 0x264   :  { %v3934_v37 = vunpack.c.l.b16 %v4611_v35  ;;  %v3935_v24 = vunpack.c.h.b16 %v4611_v35  ;;  %v3936_v22 = vunpack.c.l.b16 %v4612_v51  ;;  %v3937_v30 = vunpack.c.h.b16 %v4612_v51 }
 0x265   :  { %v3938_v17 = vunpack.c.l.b16 %v4613_v50  ;;  %v3939_v25 = vunpack.c.h.b16 %v4613_v50  ;;  %v3940_v59 = vunpack.c.l.b16 %v4614_v48  ;;  %v3941_v1 = vunpack.c.h.b16 %v4614_v48 }
 0x266   :  { %v3942_v32 = vunpack.c.l.b16 %v4615_v55  ;;  %v3943_v31 = vunpack.c.h.b16 %v4615_v55  ;;  %v3944_v28 = vunpack.c.l.b16 %v4616_v4  ;;  %v3945_v0 = vunpack.c.h.b16 %v4616_v4 }
 0x267   :  { %v3946_v21 = vunpack.c.l.b16 %v4617_v16  ;;  %v3947_v3 = vunpack.c.h.b16 %v4617_v16  ;;  %v3948_v41 = vunpack.c.l.b16 %v4618_v29  ;;  %v3949_v52 = vunpack.c.h.b16 %v4618_v29 }
 0x268   :  { %v4133_v18 = vrot.slane %v3934_v37, 7  ;;  %v4135_v38 = vrot.slane %v3938_v17, 6  ;;  %v4137_v46 = vrot.slane %v3942_v32, 5  ;;  %v4147_v40 = vrot.slane %v3935_v24, 7 }
 0x269   :  { %v4139_v44 = vrot.slane %v3946_v21, 4  ;;  %v4149_v6 = vrot.slane %v3939_v25, 6  ;;  %v4151_v47 = vrot.slane %v3943_v31, 5  ;;  %v4153_v10 = vrot.slane %v3947_v3, 4 }
 0x26a   :  { %v4134_v63 = vsel %vm4025_vm4, %v4133_v18, %v3930_v33  ;;  %v4148_v42 = vsel %vm4025_vm4, %v4147_v40, %v3931_v45  ;;  %v4161_v54 = vrot.slane %v3936_v22, 7  ;;  %v4163_v57 = vrot.slane %v3940_v59, 6 }
 0x26b   :  { %v4136_v20 = vsel %vm3968_vm7, %v4135_v38, %v4134_v63  ;;  %v4150_v11 = vsel %vm3968_vm7, %v4149_v6, %v4148_v42  ;;  %v4165_v13 = vrot.slane %v3944_v28, 5  ;;  %v4167_v60 = vrot.slane %v3948_v41, 4 }
 0x26c   :  { %v4138_v7 = vsel %vm3971_vm8, %v4137_v46, %v4136_v20  ;;  %v4152_v56 = vsel %vm3971_vm8, %v4151_v47, %v4150_v11  ;;  %v4162_v33 = vsel %vm4025_vm4, %v4161_v54, %v3932_v58  ;;  %v4175_v62 = vrot.slane %v3937_v30, 7 }
 0x26d   :  { %v4140_v2 = vsel %vm3974_vm9, %v4139_v44, %v4138_v7  ;;  %v4154_v45 = vsel %vm3974_vm9, %v4153_v10, %v4152_v56  ;;  %v4164_v5 = vsel %vm3968_vm7, %v4163_v57, %v4162_v33  ;;  %v4177_v49 = vrot.slane %v3941_v1, 6 }
 0x26e   :  { %v4166_v53 = vsel %vm3971_vm8, %v4165_v13, %v4164_v5  ;;  %v4176_v39 = vsel %vm4025_vm4, %v4175_v62, %v3933_v23  ;;  %v4179_v27 = vrot.slane %v3945_v0, 5  ;;  %v4181_v61 = vrot.slane %v3949_v52, 4 }
 0x26f   :  { %v4168_v35 = vsel %vm3974_vm9, %v4167_v60, %v4166_v53  ;;  %v4178_v58 = vsel %vm3968_vm7, %v4177_v49, %v4176_v39  ;;  %v2702_v51 = vmax.f32 %v5845_v8, 0.0  ;;  %v2703_v50 = vmax.f32 %v5848_v34, 0.0 }
 0x270   :  { %v4180_v48 = vsel %vm3971_vm8, %v4179_v27, %v4178_v58  ;;  %v2704_v55 = vmax.f32 %v5851_v26, 0.0  ;;  %v2705_v4 = vmax.f32 %v5854_v19, 0.0  ;;  %v4249_v27 = vld [vmem:[%s5953_s3 + $0x50] sm:$0x11] }
 0x271   :  { %v4182_v9 = vsel %vm3974_vm9, %v4181_v61, %v4180_v48  ;;  %v3189_v23 = vrot.slane %v2702_v51, %v5236_v12  ;;  %v3193_v16 = vrot.slane %v2702_v51, %v5240_v14  ;;  %v3197_v29 = vrot.slane %v2702_v51, %v5295_v15  ;;  %v4252_v61 = vld [vmem:[%s5953_s3 + $0x58] sm:$0x11] }
 0x272   :  { %v3201_v37 = vrot.slane %v2702_v51, %v5306_v43  ;;  %v3205_v8 = vrot.slane %v2703_v50, %v5236_v12  ;;  %v3209_v34 = vrot.slane %v2703_v50, %v5240_v14  ;;  %v3213_v24 = vrot.slane %v2703_v50, %v5295_v15 }
 0x273   :  { %v3217_v26 = vrot.slane %v2703_v50, %v5306_v43  ;;  %v3221_v19 = vrot.slane %v2704_v55, %v5236_v12  ;;  %v3225_v22 = vrot.slane %v2704_v55, %v5240_v14  ;;  %v3229_v30 = vrot.slane %v2704_v55, %v5295_v15 }
 0x274   :  { %v3233_v17 = vrot.slane %v2704_v55, %v5306_v43  ;;  %v3237_v25 = vrot.slane %v2705_v4, %v5236_v12  ;;  %v3241_v59 = vrot.slane %v2705_v4, %v5240_v14  ;;  %v3245_v1 = vrot.slane %v2705_v4, %v5295_v15 }
 0x275   :  { %v3249_v32 = vrot.slane %v2705_v4, %v5306_v43  ;;  %v4619_v31 = vpack.c.bf16 %v3193_v16, %v3189_v23  ;;  %v4620_v28 = vpack.c.bf16 %v3201_v37, %v3197_v29  ;;  %v4621_v0 = vpack.c.bf16 %v3209_v34, %v3205_v8 }
 0x276   :  { %v4622_v21 = vpack.c.bf16 %v3217_v26, %v3213_v24  ;;  %v4623_v3 = vpack.c.bf16 %v3225_v22, %v3221_v19  ;;  %v4624_v41 = vpack.c.bf16 %v3233_v17, %v3229_v30  ;;  %v4625_v52 = vpack.c.bf16 %v3241_v59, %v3237_v25 }
 0x277   :  { %v4626_v18 = vpack.c.bf16 %v3249_v32, %v3245_v1  ;;  %v3950_v38 = vunpack.c.l.b16 %v4619_v31  ;;  %v3951_v46 = vunpack.c.h.b16 %v4619_v31  ;;  %v3952_v40 = vunpack.c.l.b16 %v4620_v28 }
 0x278   :  { %v3953_v44 = vunpack.c.h.b16 %v4620_v28  ;;  %v3954_v6 = vunpack.c.l.b16 %v4621_v0  ;;  %v3955_v12 = vunpack.c.h.b16 %v4621_v0  ;;  %v3956_v47 = vunpack.c.l.b16 %v4622_v21 }
 0x279   :  { %v3957_v14 = vunpack.c.h.b16 %v4622_v21  ;;  %v3958_v10 = vunpack.c.l.b16 %v4623_v3  ;;  %v3959_v15 = vunpack.c.h.b16 %v4623_v3  ;;  %v3960_v63 = vunpack.c.l.b16 %v4624_v41 }
 0x27a   :  { %v3961_v43 = vunpack.c.h.b16 %v4624_v41  ;;  %v4141_v42 = vrot.slane %v3950_v38, 3  ;;  %v4143_v54 = vrot.slane %v3954_v6, 2  ;;  %v4155_v57 = vrot.slane %v3951_v46, 3 }
 0x27b   :  { %v4145_v20 = vrot.slane %v3958_v10, 1  ;;  %v4157_v11 = vrot.slane %v3955_v12, 2  ;;  %v4159_v13 = vrot.slane %v3959_v15, 1  ;;  %v4169_v60 = vrot.slane %v3952_v40, 3 }
 0x27c   :  { %v4142_v7 = vsel %vm3977_vm12, %v4141_v42, %v4140_v2  ;;  %v4156_v56 = vsel %vm3977_vm12, %v4155_v57, %v4154_v45  ;;  %v4171_v33 = vrot.slane %v3956_v47, 2  ;;  %v4173_v62 = vrot.slane %v3960_v63, 1 }
 0x27d   :  { %v4144_v5 = vsel %vm3980_vm15, %v4143_v54, %v4142_v7  ;;  %v4158_v49 = vsel %vm3980_vm15, %v4157_v11, %v4156_v56  ;;  %v4170_v53 = vsel %vm3977_vm12, %v4169_v60, %v4168_v35  ;;  %v4183_v39 = vrot.slane %v3953_v44, 3 }
 0x27e   :  { %v4146_v2 = vsel %vm3983_vm0, %v4145_v20, %v4144_v5  ;;  %v4160_v45 = vsel %vm3983_vm0, %v4159_v13, %v4158_v49  ;;  %v4172_v58 = vsel %vm3980_vm15, %v4171_v33, %v4170_v53  ;;  %v4185_v51 = vrot.slane %v3957_v14, 2 }
 0x27f   :  { %v4174_v50 = vsel %vm3983_vm0, %v4173_v62, %v4172_v58  ;;  %v4184_v35 = vsel %vm3977_vm12, %v4183_v39, %v4182_v9  ;;  %v4187_v48 = vrot.slane %v3961_v43, 1  ;;  %v4197_v55 = vpack.c.b16 %v4160_v45, %v4146_v2 }
 0x280   :  { %v4186_v4 = vsel %vm3980_vm15, %v4185_v51, %v4184_v35  ;;  %v4250_v23 = vsel %vm5646_vm14, %v4625_v52, %v4249_v27  ;;  %v4253_v16 = vsel %vm5646_vm14, %v4626_v18, %v4252_v61 }
 0x281   :  { %v4188_v29 = vsel %vm3983_vm0, %v4187_v48, %v4186_v4  ;;  %4247 = vst [vmem:[%s5953_s3 + $0x40] sm:$0xff] %v4197_v55  ;;  %4251 = vst [vmem:[%s5953_s3 + $0x50] sm:$0x11] %v4250_v23 }
 0x282   :  { %4254 = vst [vmem:[%s5953_s3 + $0x58] sm:$0x11] %v4253_v16  ;;  %v4198_v9 = vpack.c.b16 %v4188_v29, %v4174_v50 }
 0x284   :  { %4248 = vst [vmem:[%s5953_s3 + $0x48] sm:$0xff] %v4198_v9 }
 0x285   :  { %4259 = vsyncpa [#allocation3], 1 }
 0x286   :  { %4260 = vsyncpa [#allocation5], 1 }

// kernel: simple_cnn_forward.4
= control target key start
LH: loop header
LB: loop body
LE: loop exit
PB: predicated region body
PF: predicated region fallthrough
CT: control target
= control target key end

     0   :  { %8 = vsyncpa [#allocation3], 0  ;;  %s9120_s0 = inlined_call_operand.vmem [shape: bf16[2,18,512], index: 0, kind: input, shape index: {}]   ;;  %s9121_s1 = inlined_call_operand.hbm [shape: bf16[3,512,1024], index: 1, kind: input, shape index: {}]   ;;  %s9122_s2 = inlined_call_operand.hbm [shape: f32[1,512], index: 2, kind: input, shape index: {}]   ;;  %s9123_s3 = inlined_call_operand.vmem [shape: bf16[2,8,512], index: 3, kind: output, shape index: {}]  }
   0x1   :  { %9 = vsyncpa [#allocation5], 0  ;;  %s8440_s12 = smov [#allocation2]   ;;  %s8392_s16 = scalar_lea.hbm %s9121_s1, 98304 }
   0x2   :  { %s17_s13 = sshll.u32 %s8440_s12, 4  ;;  %p8393_p0 = scmp.ne.s32.totalorder %s9121_s1, %s8392_s16  ;;  %s18_s13 = int_to_ptr.vmem [resolvable:$true] %s17_s13 }
   0x3   :  { %p8396_p1 = scmp.lt.u32.totalorder %s8392_s16, %s9121_s1 }
   0x5   :  { %p8398_p2 = pnand %p8396_p1, %p8393_p0 }
   0x7   :  { %8401 = shalt.err (!%p8398_p2)
}
   0x8   :  { %s8402_s21 = scalar_lea.vmem %s18_s13, 98304  ;;  %p8407_p4 = scmp.lt.s32.totalorder %s18_s13, %s18_s13 }
   0x9   :  { %p8403_p3 = scmp.ne.s32.totalorder %s18_s13, %s8402_s21  ;;  %p8408_p5 = scmp.lt.s32.totalorder %s8402_s21, %s8402_s21 }
   0xb   :  { %p8409_p6 = por %p8408_p5, %p8407_p4 }
   0xd   :  { %p8410_p7 = pnand %p8409_p6, %p8403_p3 }
   0xf   :  { %8413 = shalt.err (!%p8410_p7)
}
  0x10   :  { %s8441_s22 = smov 512   ;;  %s8442_s23 = smov 32  }
  0x11   :  { %23 = dma.hbm_to_vmem [thread:$0]  %s9121_s1, 98304, %s18_s13, [#allocation3], %s8441_s22, %s8441_s22, %s8442_s23  }
  0x12   :  { %s8443_s26 = smov [#allocation4]   ;;  %s8414_s30 = scalar_lea.hbm %s9122_s2, 64 }
  0x13   :  { %s30_s27 = sshll.u32 %s8443_s26, 4  ;;  %p8415_p8 = scmp.ne.s32.totalorder %s9122_s2, %s8414_s30  ;;  %s31_s27 = int_to_ptr.vmem [resolvable:$true] %s30_s27 }
  0x14   :  { %p8418_p9 = scmp.lt.u32.totalorder %s8414_s30, %s9122_s2 }
  0x16   :  { %p8420_p10 = pnand %p8418_p9, %p8415_p8 }
  0x18   :  { %8423 = shalt.err (!%p8420_p10)
}
  0x19   :  { %s8424_s8 = scalar_lea.vmem %s31_s27, 64  ;;  %p8429_p12 = scmp.lt.s32.totalorder %s31_s27, %s31_s27 }
  0x1a   :  { %p8425_p11 = scmp.ne.s32.totalorder %s31_s27, %s8424_s8  ;;  %p8430_p13 = scmp.lt.s32.totalorder %s8424_s8, %s8424_s8 }
  0x1c   :  { %p8431_p0 = por %p8430_p13, %p8429_p12 }
  0x1e   :  { %p8432_p1 = pnand %p8431_p0, %p8425_p11 }
  0x20   :  { %8435 = shalt.err (!%p8432_p1)
}
  0x21   :  { %33 = dma.hbm_to_vmem [thread:$0]  %s9122_s2, 64, %s31_s27, [#allocation5]  }
  0x22   :  { %8436 = dma.done.wait [#allocation3], 98304  }
  0x23   :  { %8437 = vsyncadd [#allocation3], 4294868992 }
  0x24   :  { %8438 = dma.done.wait [#allocation5], 64  }
  0x25   :  { %8439 = vsyncadd [#allocation5], 4294967232  ;;  %v408_v0 = vld [vmem:[#allocation2 + $0x800] sm:$0xff]  ;;  %v409_v2 = vld [vmem:[#allocation2 + $0x808] sm:$0xff]  ;;  %vm308_vm0 = vsmask.f32 3328 }
  0x26   :  { %v412_v1 = vld [vmem:[#allocation2 + $0x820] sm:$0xff]  ;;  %v413_v4 = vld [vmem:[#allocation2 + $0x828] sm:$0xff]  ;;  %v42_v54 = vld [vmem:[%s9120_s0 + $0x10] sm:$0xff]  ;;  %vm309_vm1 = vsmask.f32 7440  ;;  %vm4156_vm3 = vcmask 1042432  }
  0x27   :  { %v7336_v3 = vcombine.high %v408_v0, %v412_v1  ;;  %v7335_v5 = vcombine.low %v408_v0, %v412_v1  ;;  %v416_v6 = vld [vmem:[#allocation2 + $0x840] sm:$0xff]  ;;  %v7338_v8 = vcombine.high %v409_v2, %v413_v4  ;;  %v7337_v9 = vcombine.low %v409_v2, %v413_v4  ;;  %v417_v11 = vld [vmem:[#allocation2 + $0x848] sm:$0xff]  ;;  %vm8500_vm2 = vmor %vm308_vm0, %vm309_vm1 }
  0x28   :  { %v420_v7 = vld [vmem:[#allocation2 + $0x860] sm:$0xff]  ;;  %v421_v12 = vld [vmem:[#allocation2 + $0x868] sm:$0xff]  ;;  %v321_v63 = vshll.u32 %v42_v54, 16  ;;  %v339_v0 = vshrl.u32 %v42_v54, 16  ;;  %vm4157_vm4 = vcmask 1046532   ;;  %vm7191_vm6 = vcmask 1041409  }
  0x29   :  { %v7344_v10 = vcombine.high %v416_v6, %v420_v7  ;;  %v424_v13 = vld [vmem:[#allocation2 + $0x880] sm:$0xff]  ;;  %1976 = vmatprep.subr.bf16.mxu0 %v7336_v3  ;;  %v7346_v14 = vcombine.high %v417_v11, %v421_v12  ;;  %v425_v16 = vld [vmem:[#allocation2 + $0x888] sm:$0xff]  ;;  %2082 = vmatprep.subr.bf16.mxu1 %v7338_v8  ;;  %v7343_v18 = vcombine.low %v416_v6, %v420_v7  ;;  %vm8706_vm5 = vmor %vm4156_vm3, %vm4157_vm4  ;;  %vm7194_vm7 = vcmask 1042434  }
  0x2a   :  { %v428_v15 = vld [vmem:[#allocation2 + $0x8a0] sm:$0xff]  ;;  %v429_v17 = vld [vmem:[#allocation2 + $0x8a8] sm:$0xff]  ;;  %1977 = vmatpush1.bf16.msra.mxu0 %v7335_v5  ;;  %2083 = vmatpush1.bf16.msra.mxu1 %v7337_v9  ;;  %v7345_v19 = vcombine.low %v417_v11, %v421_v12  ;;  %v323_v7 = vrot.slane %v321_v63, 5  ;;  %v341_v8 = vrot.slane %v339_v0, 4  ;;  %vm7197_vm8 = vcmask 1043459  }
  0x2b   :  { %1978 = vmatprep.subr.bf16.mxu0 %v7344_v10  ;;  %v7352_v20 = vcombine.high %v424_v13, %v428_v15  ;;  %2084 = vmatprep.subr.bf16.mxu1 %v7346_v14  ;;  %v7354_v21 = vcombine.high %v425_v16, %v429_v17  ;;  %v432_v22 = vld [vmem:[#allocation2 + $0x8c0] sm:$0xff]  ;;  %v433_v24 = vld [vmem:[#allocation2 + $0x8c8] sm:$0xff]  ;;  %v7351_v26 = vcombine.low %v424_v13, %v428_v15  ;;  %vm7200_vm9 = vcmask 1044484  }
  0x2c   :  { %v436_v23 = vld [vmem:[#allocation2 + $0x8e0] sm:$0xff]  ;;  %v437_v25 = vld [vmem:[#allocation2 + $0x8e8] sm:$0xff]  ;;  %v7353_v27 = vcombine.low %v425_v16, %v429_v17  ;;  %v342_v16 = vor.u32 %v341_v8, %v323_v7  ;;  %vm7203_vm10 = vcmask 1045509   ;;  %vm7206_vm11 = vcmask 1046534  }
  0x2d   :  { %v7360_v28 = vcombine.high %v432_v22, %v436_v23  ;;  %v7362_v29 = vcombine.high %v433_v24, %v437_v25  ;;  %v440_v30 = vld [vmem:[#allocation2 + $0x900] sm:$0xff]  ;;  %v441_v32 = vld [vmem:[#allocation2 + $0x908] sm:$0xff]  ;;  %v7359_v34 = vcombine.low %v432_v22, %v436_v23  ;;  %v7361_v35 = vcombine.low %v433_v24, %v437_v25 }
  0x2e   :  { %1979 = vmatpush1.bf16.msra.mxu0 %v7343_v18  ;;  %2085 = vmatpush1.bf16.msra.mxu1 %v7345_v19  ;;  %v444_v31 = vld [vmem:[#allocation2 + $0x920] sm:$0xff]  ;;  %v445_v33 = vld [vmem:[#allocation2 + $0x928] sm:$0xff]  ;;  %v343_v22 = vrot.slane %v342_v16, 4  ;;  %vm7209_vm12 = vcmask 1047559  }
  0x2f   :  { %1980 = vmatprep.subr.bf16.mxu0 %v7352_v20  ;;  %2086 = vmatprep.subr.bf16.mxu1 %v7354_v21  ;;  %v7368_v36 = vcombine.high %v440_v30, %v444_v31  ;;  %v7370_v37 = vcombine.high %v441_v32, %v445_v33  ;;  %v448_v38 = vld [vmem:[#allocation2 + $0x940] sm:$0xff]  ;;  %v449_v40 = vld [vmem:[#allocation2 + $0x948] sm:$0xff]  ;;  %v7367_v42 = vcombine.low %v440_v30, %v444_v31 }
  0x30   :  { %v452_v39 = vld [vmem:[#allocation2 + $0x960] sm:$0xff]  ;;  %v453_v41 = vld [vmem:[#allocation2 + $0x968] sm:$0xff]  ;;  %v7369_v43 = vcombine.low %v441_v32, %v445_v33 }
  0x31   :  { %v7376_v44 = vcombine.high %v448_v38, %v452_v39  ;;  %v7378_v45 = vcombine.high %v449_v40, %v453_v41  ;;  %v456_v46 = vld [vmem:[#allocation2 + $0x980] sm:$0xff]  ;;  %v457_v48 = vld [vmem:[#allocation2 + $0x988] sm:$0xff]  ;;  %v7375_v50 = vcombine.low %v448_v38, %v452_v39  ;;  %v7377_v51 = vcombine.low %v449_v40, %v453_v41 }
  0x32   :  { %1981 = vmatpush1.bf16.msra.mxu0 %v7351_v26  ;;  %2087 = vmatpush1.bf16.msra.mxu1 %v7353_v27  ;;  %v460_v47 = vld [vmem:[#allocation2 + $0x9a0] sm:$0xff]  ;;  %v461_v49 = vld [vmem:[#allocation2 + $0x9a8] sm:$0xff] }
  0x33   :  { %1982 = vmatprep.subr.bf16.mxu0 %v7360_v28  ;;  %2088 = vmatprep.subr.bf16.mxu1 %v7362_v29  ;;  %v7384_v52 = vcombine.high %v456_v46, %v460_v47  ;;  %v40_v53 = vld [vmem:[%s9120_s0] sm:$0xff]  ;;  %v7386_v55 = vcombine.high %v457_v48, %v461_v49  ;;  %v465_v61 = vld [vmem:[#allocation2 + $0x9c8] sm:$0xff]  ;;  %v7383_v2 = vcombine.low %v456_v46, %v460_v47 }
  0x34   :  { %v464_v56 = vld [vmem:[#allocation2 + $0x9c0] sm:$0xff]  ;;  %v312_v59 = vshrl.u32 %v40_v53, 16  ;;  %v315_v60 = vshll.u32 %v40_v53, 16  ;;  %v469_v62 = vld [vmem:[#allocation2 + $0x9e8] sm:$0xff]  ;;  %v7385_v5 = vcombine.low %v457_v48, %v461_v49 }
  0x35   :  { %v468_v57 = vld [vmem:[#allocation2 + $0x9e0] sm:$0xff]  ;;  %v7394_v9 = vcombine.high %v465_v61, %v469_v62  ;;  %v473_v13 = vld [vmem:[#allocation2 + $0xa08] sm:$0xff]  ;;  %v7393_v20 = vcombine.low %v465_v61, %v469_v62 }
  0x36   :  { %1983 = vmatpush1.bf16.msra.mxu0 %v7359_v34  ;;  %2089 = vmatpush1.bf16.msra.mxu1 %v7361_v35  ;;  %v304_v58 = vld [vmem:[%s9120_s0 + $0x20] sm:$0x11]  ;;  %v314_v3 = vrot.slane %v312_v59, 4  ;;  %v317_v4 = vrot.slane %v315_v60, 5  ;;  %v7392_v6 = vcombine.high %v464_v56, %v468_v57  ;;  %v477_v14 = vld [vmem:[#allocation2 + $0xa28] sm:$0xff]  ;;  %v7391_v18 = vcombine.low %v464_v56, %v468_v57 }
  0x37   :  { %1984 = vmatprep.subr.bf16.mxu0 %v7368_v36  ;;  %2090 = vmatprep.subr.bf16.mxu1 %v7370_v37  ;;  %v345_v1 = vshll.u32 %v304_v58, 16  ;;  %v472_v10 = vld [vmem:[#allocation2 + $0xa00] sm:$0xff]  ;;  %v7402_v23 = vcombine.high %v473_v13, %v477_v14  ;;  %v481_v27 = vld [vmem:[#allocation2 + $0xa48] sm:$0xff]  ;;  %v7401_v32 = vcombine.low %v473_v13, %v477_v14 }
  0x38   :  { %v476_v11 = vld [vmem:[#allocation2 + $0xa20] sm:$0xff]  ;;  %v318_v12 = vor.u32 %v317_v4, %v314_v3  ;;  %v485_v28 = vld [vmem:[#allocation2 + $0xa68] sm:$0xff] }
  0x39   :  { %v347_v17 = vrot.slane %v345_v1, 5  ;;  %v7400_v21 = vcombine.high %v472_v10, %v476_v11  ;;  %v480_v24 = vld [vmem:[#allocation2 + $0xa40] sm:$0xff]  ;;  %v7399_v30 = vcombine.low %v472_v10, %v476_v11  ;;  %v7410_v34 = vcombine.high %v481_v27, %v485_v28  ;;  %v489_v37 = vld [vmem:[#allocation2 + $0xa88] sm:$0xff] }
  0x3a   :  { %1985 = vmatpush1.bf16.msra.mxu0 %v7367_v42  ;;  %2091 = vmatpush1.bf16.msra.mxu1 %v7369_v43  ;;  %v319_v19 = vrot.slane %v318_v12, 4  ;;  %v484_v25 = vld [vmem:[#allocation2 + $0xa60] sm:$0xff]  ;;  %v493_v38 = vld [vmem:[#allocation2 + $0xaa8] sm:$0xff]  ;;  %v7409_v40 = vcombine.low %v481_v27, %v485_v28 }
  0x3b   :  { %1986 = vmatprep.subr.bf16.mxu0 %v7376_v44  ;;  %2092 = vmatprep.subr.bf16.mxu1 %v7378_v45  ;;  %v8510_v29 = vsel %vm8500_vm2, %v343_v22, %v347_v17  ;;  %v7408_v33 = vcombine.high %v480_v24, %v484_v25  ;;  %v488_v35 = vld [vmem:[#allocation2 + $0xa80] sm:$0xff]  ;;  %v7407_v39 = vcombine.low %v480_v24, %v484_v25  ;;  %v497_v45 = vld [vmem:[#allocation2 + $0xac8] sm:$0xff] }
  0x3c   :  { %v8506_v26 = vsel %vm8500_vm2, %v319_v19, %v323_v7  ;;  %v492_v36 = vld [vmem:[#allocation2 + $0xaa0] sm:$0xff]  ;;  %v7418_v42 = vcombine.high %v489_v37, %v493_v38  ;;  %v501_v46 = vld [vmem:[#allocation2 + $0xae8] sm:$0xff]  ;;  %v7417_v48 = vcombine.low %v489_v37, %v493_v38 }
  0x3d   :  { %v8514_v31 = vcombine.high %v8506_v26, %v8510_v29  ;;  %v7416_v41 = vcombine.high %v488_v35, %v492_v36  ;;  %v496_v43 = vld [vmem:[#allocation2 + $0xac0] sm:$0xff]  ;;  %v7415_v47 = vcombine.low %v488_v35, %v492_v36  ;;  %v505_v53 = vld [vmem:[#allocation2 + $0xb08] sm:$0xff]  ;;  %v7425_v58 = vcombine.low %v497_v45, %v501_v46 }
  0x3e   :  { %1987 = vmatpush1.bf16.msra.mxu0 %v7375_v50  ;;  %2093 = vmatpush1.bf16.msra.mxu1 %v7377_v51  ;;  %v500_v44 = vld [vmem:[#allocation2 + $0xae0] sm:$0xff]  ;;  %v7426_v51 = vcombine.high %v497_v45, %v501_v46  ;;  %v509_v54 = vld [vmem:[#allocation2 + $0xb28] sm:$0xff] }
  0x3f   :  { %1988 = vmatprep.subr.bf16.mxu0 %v7384_v52  ;;  %2094 = vmatprep.subr.bf16.mxu1 %v7386_v55  ;;  %v7424_v49 = vcombine.high %v496_v43, %v500_v44  ;;  %v504_v50 = vld [vmem:[#allocation2 + $0xb00] sm:$0xff]  ;;  %v44_v55 = vld [vmem:[%s9120_s0 + $0x30] sm:$0xff]  ;;  %v7423_v57 = vcombine.low %v496_v43, %v500_v44  ;;  %v7434_v60 = vcombine.high %v505_v53, %v509_v54  ;;  %v513_v63 = vld [vmem:[#allocation2 + $0xb48] sm:$0xff] }
  0x40   :  { %2008 = vmatprep.mubr.bf16.mxu0 %v8514_v31  ;;  %2114 = vmatprep.mubr.bf16.mxu1 %v8514_v31  ;;  %v508_v52 = vld [vmem:[#allocation2 + $0xb20] sm:$0xff]  ;;  %v517_v0 = vld [vmem:[#allocation2 + $0xb68] sm:$0xff]  ;;  %v360_v1 = vshrl.u32 %v44_v55, 16 }
  0x41   :  { %v46_v56 = vld [vmem:[%s9120_s0 + $0x40] sm:$0xff]  ;;  %v7432_v59 = vcombine.high %v504_v50, %v508_v52  ;;  %v7442_v8 = vcombine.high %v513_v63, %v517_v0  ;;  %v521_v16 = vld [vmem:[#allocation2 + $0xb88] sm:$0xff]  ;;  %v7441_v22 = vcombine.low %v513_v63, %v517_v0 }
  0x42   :  { %1989 = vmatpush1.bf16.msra.mxu0 %v7383_v2  ;;  %2095 = vmatpush1.bf16.msra.mxu1 %v7385_v5  ;;  %v512_v61 = vld [vmem:[#allocation2 + $0xb40] sm:$0xff]  ;;  %v363_v2 = vshll.u32 %v44_v55, 16  ;;  %v369_v3 = vshll.u32 %v46_v56, 16  ;;  %v387_v4 = vshrl.u32 %v46_v56, 16  ;;  %v7431_v5 = vcombine.low %v504_v50, %v508_v52  ;;  %v525_v17 = vld [vmem:[#allocation2 + $0xba8] sm:$0xff] }
  0x43   :  { %1990 = vmatprep.subr.bf16.mxu0 %v7392_v6  ;;  %2096 = vmatprep.subr.bf16.mxu1 %v7394_v9  ;;  %v516_v62 = vld [vmem:[#allocation2 + $0xb60] sm:$0xff]  ;;  %v7433_v6 = vcombine.low %v505_v53, %v509_v54  ;;  %v362_v11 = vrot.slane %v360_v1, 4  ;;  %v7450_v24 = vcombine.high %v521_v16, %v525_v17  ;;  %v537_v45 = vld [vmem:[#allocation2 + $0xc08] sm:$0xff] }
  0x44   :  { %v7440_v7 = vcombine.high %v512_v61, %v516_v62  ;;  %v520_v9 = vld [vmem:[#allocation2 + $0xb80] sm:$0xff]  ;;  %v365_v12 = vrot.slane %v363_v2, 5  ;;  %v371_v13 = vrot.slane %v369_v3, 5  ;;  %v389_v14 = vrot.slane %v387_v4, 4  ;;  %v541_v46 = vld [vmem:[#allocation2 + $0xc28] sm:$0xff] }
  0x45   :  { %v524_v10 = vld [vmem:[#allocation2 + $0xba0] sm:$0xff]  ;;  %v7439_v19 = vcombine.low %v512_v61, %v516_v62  ;;  %v305_v50 = vld [vmem:[%s9120_s0 + $0x28] sm:$0x11] }
  0x46   :  { %1991 = vmatpush1.bf16.msra.mxu0 %v7391_v18  ;;  %2097 = vmatpush1.bf16.msra.mxu1 %v7393_v20  ;;  %v306_v18 = vld [vmem:[%s9120_s0 + $0x50] sm:$0x11]  ;;  %v41_v20 = vld [vmem:[%s9120_s0 + $0x8] sm:$0xff]  ;;  %v528_v25 = vld [vmem:[#allocation2 + $0xbc0] sm:$0xff]  ;;  %v366_v28 = vor.u32 %v365_v12, %v362_v11  ;;  %v355_v62 = vshll.u32 %v305_v50, 16 }
  0x47   :  { %1992 = vmatprep.subr.bf16.mxu0 %v7400_v21  ;;  %2098 = vmatprep.subr.bf16.mxu1 %v7402_v23  ;;  %v43_v21 = vld [vmem:[%s9120_s0 + $0x18] sm:$0xff]  ;;  %v7448_v23 = vcombine.high %v520_v9, %v524_v10  ;;  %v532_v27 = vld [vmem:[#allocation2 + $0xbe0] sm:$0xff]  ;;  %v326_v35 = vshrl.u32 %v41_v20, 16  ;;  %v329_v36 = vshll.u32 %v41_v20, 16  ;;  %v545_v63 = vld [vmem:[#allocation2 + $0xc48] sm:$0xff] }
  0x48   :  { %v335_v37 = vshll.u32 %v43_v21, 16  ;;  %v349_v38 = vshrl.u32 %v43_v21, 16  ;;  %v540_v44 = vld [vmem:[#allocation2 + $0xc20] sm:$0xff]  ;;  %v7455_v55 = vcombine.low %v528_v25, %v532_v27  ;;  %v549_v0 = vld [vmem:[#allocation2 + $0xc68] sm:$0xff] }
  0x49   :  { %v331_v52 = vrot.slane %v329_v36, 5  ;;  %v548_v61 = vld [vmem:[#allocation2 + $0xc60] sm:$0xff]  ;;  %v557_v11 = vld [vmem:[#allocation2 + $0xca8] sm:$0xff] }
  0x4a   :  { %1993 = vmatpush1.bf16.msra.mxu0 %v7399_v30  ;;  %2099 = vmatpush1.bf16.msra.mxu1 %v7401_v32  ;;  %v390_v30 = vor.u32 %v389_v14, %v371_v13  ;;  %v393_v32 = vshll.u32 %v306_v18, 16  ;;  %v337_v53 = vrot.slane %v335_v37, 5  ;;  %v351_v54 = vrot.slane %v349_v38, 4  ;;  %v560_v20 = vld [vmem:[#allocation2 + $0xcc0] sm:$0xff]  ;;  %v569_v37 = vld [vmem:[#allocation2 + $0xd08] sm:$0xff] }
  0x4b   :  { %1994 = vmatprep.subr.bf16.mxu0 %v7408_v33  ;;  %2100 = vmatprep.subr.bf16.mxu1 %v7410_v34  ;;  %v529_v33 = vld [vmem:[#allocation2 + $0xbc8] sm:$0xff]  ;;  %v357_v14 = vrot.slane %v355_v62, 5  ;;  %v564_v21 = vld [vmem:[#allocation2 + $0xce0] sm:$0xff] }
  0x4c   :  { %v533_v34 = vld [vmem:[#allocation2 + $0xbe8] sm:$0xff]  ;;  %v352_v4 = vor.u32 %v351_v54, %v337_v53 }
  0x4d   :  { %v7458_v43 = vcombine.high %v529_v33, %v533_v34  ;;  %v7457_v56 = vcombine.low %v529_v33, %v533_v34  ;;  %v568_v34 = vld [vmem:[#allocation2 + $0xd00] sm:$0xff]  ;;  %v573_v38 = vld [vmem:[#allocation2 + $0xd28] sm:$0xff] }
  0x4e   :  { %1995 = vmatpush1.bf16.msra.mxu0 %v7407_v39  ;;  %2101 = vmatpush1.bf16.msra.mxu1 %v7409_v40  ;;  %v7447_v39 = vcombine.low %v520_v9, %v524_v10  ;;  %v7449_v40 = vcombine.low %v521_v16, %v525_v17  ;;  %v553_v10 = vld [vmem:[#allocation2 + $0xc88] sm:$0xff]  ;;  %v7473_v17 = vcombine.low %v545_v63, %v549_v0 }
  0x4f   :  { %1996 = vmatprep.subr.bf16.mxu0 %v7416_v41  ;;  %2102 = vmatprep.subr.bf16.mxu1 %v7418_v42  ;;  %v7456_v41 = vcombine.high %v528_v25, %v532_v27  ;;  %v536_v42 = vld [vmem:[#allocation2 + $0xc00] sm:$0xff]  ;;  %v589_v54 = vld [vmem:[#allocation2 + $0xda8] sm:$0xff] }
  0x50   :  { %v593_v62 = vld [vmem:[#allocation2 + $0xdc8] sm:$0xff] }
  0x52   :  { %1997 = vmatpush1.bf16.msra.mxu0 %v7415_v47  ;;  %2103 = vmatpush1.bf16.msra.mxu1 %v7417_v48  ;;  %v367_v47 = vrot.slane %v366_v28, 4  ;;  %v391_v48 = vrot.slane %v390_v30, 4  ;;  %v7481_v30 = vcombine.low %v553_v10, %v557_v11 }
  0x53   :  { %1998 = vmatprep.subr.bf16.mxu0 %v7424_v49  ;;  %2104 = vmatprep.subr.bf16.mxu1 %v7426_v51  ;;  %v395_v49 = vrot.slane %v393_v32, 5  ;;  %v328_v51 = vrot.slane %v326_v35, 4  ;;  %v7488_v32 = vcombine.high %v560_v20, %v564_v21  ;;  %v572_v35 = vld [vmem:[#allocation2 + $0xd20] sm:$0xff] }
  0x54   :  { %v372_v1 = vsel %vm8500_vm2, %v367_v47, %v371_v13  ;;  %v353_v13 = vrot.slane %v352_v4, 4  ;;  %v7495_v47 = vcombine.low %v568_v34, %v572_v35  ;;  %v600_v4 = vld [vmem:[#allocation2 + $0xe00] sm:$0xff] }
  0x55   :  { %v396_v2 = vsel %vm8500_vm2, %v391_v48, %v395_v49  ;;  %v332_v3 = vor.u32 %v331_v52, %v328_v51  ;;  %v7497_v48 = vcombine.low %v569_v37, %v573_v38  ;;  %v584_v51 = vld [vmem:[#allocation2 + $0xd80] sm:$0xff] }
  0x56   :  { %1999 = vmatpush1.bf16.msra.mxu0 %v7423_v57  ;;  %2105 = vmatpush1.bf16.msra.mxu1 %v7425_v58  ;;  %v7464_v57 = vcombine.high %v536_v42, %v540_v44  ;;  %v7466_v58 = vcombine.high %v537_v45, %v541_v46  ;;  %v8544_v9 = vcombine.high %v372_v1, %v396_v2  ;;  %v588_v52 = vld [vmem:[#allocation2 + $0xda0] sm:$0xff] }
  0x57   :  { %2000 = vmatprep.subr.bf16.mxu0 %v7432_v59  ;;  %2106 = vmatprep.subr.bf16.mxu1 %v7434_v60  ;;  %v8538_v59 = vcombine.low %v8506_v26, %v8510_v29  ;;  %v544_v60 = vld [vmem:[#allocation2 + $0xc40] sm:$0xff]  ;;  %v7474_v29 = vcombine.high %v545_v63, %v549_v0  ;;  %v333_v12 = vrot.slane %v332_v3, 4  ;;  %v8558_v27 = vsel %vm8500_vm2, %v353_v13, %v357_v14  ;;  %v597_v63 = vld [vmem:[#allocation2 + $0xde8] sm:$0xff] }
  0x58   :  { %v7472_v26 = vcombine.high %v544_v60, %v548_v61  ;;  %v7471_v16 = vcombine.low %v544_v60, %v548_v61  ;;  %v592_v60 = vld [vmem:[#allocation2 + $0xdc0] sm:$0xff]  ;;  %v7511_v0 = vcombine.low %v584_v51, %v588_v52  ;;  %v7522_v3 = vcombine.high %v593_v62, %v597_v63  ;;  %v609_v13 = vld [vmem:[#allocation2 + $0xe48] sm:$0xff] }
  0x59   :  { %v8554_v25 = vsel %vm8500_vm2, %v333_v12, %v337_v53  ;;  %v585_v53 = vld [vmem:[#allocation2 + $0xd88] sm:$0xff]  ;;  %v596_v61 = vld [vmem:[#allocation2 + $0xde0] sm:$0xff] }
  0x5a   :  { %2001 = vmatpush1.bf16.msra.mxu0 %v7431_v5  ;;  %2107 = vmatpush1.bf16.msra.mxu1 %v7433_v6  ;;  %v7463_v5 = vcombine.low %v536_v42, %v540_v44  ;;  %v7465_v6 = vcombine.low %v537_v45, %v541_v46  ;;  %v8562_v36 = vcombine.high %v8554_v25, %v8558_v27  ;;  %v580_v44 = vld [vmem:[#allocation2 + $0xd60] sm:$0xff]  ;;  %v577_v45 = vld [vmem:[#allocation2 + $0xd48] sm:$0xff] }
  0x5b   :  { %2002 = vmatprep.subr.bf16.mxu0 %v7440_v7  ;;  %2108 = vmatprep.subr.bf16.mxu1 %v7442_v8  ;;  %v552_v7 = vld [vmem:[#allocation2 + $0xc80] sm:$0xff]  ;;  %v7498_v42 = vcombine.high %v569_v37, %v573_v38  ;;  %v581_v46 = vld [vmem:[#allocation2 + $0xd68] sm:$0xff] }
  0x5c   :  { %v556_v8 = vld [vmem:[#allocation2 + $0xca0] sm:$0xff]  ;;  %v7506_v50 = vcombine.high %v577_v45, %v581_v46  ;;  %v613_v14 = vld [vmem:[#allocation2 + $0xe68] sm:$0xff] }
  0x5d   :  { %v7480_v18 = vcombine.high %v552_v7, %v556_v8  ;;  %v7479_v28 = vcombine.low %v552_v7, %v556_v8  ;;  %v7521_v7 = vcombine.low %v593_v62, %v597_v63  ;;  %v612_v12 = vld [vmem:[#allocation2 + $0xe60] sm:$0xff]  ;;  %v625_v37 = vld [vmem:[#allocation2 + $0xec8] sm:$0xff] }
  0x5e   :  { %2003 = vmatpush1.bf16.msra.mxu0 %v7439_v19  ;;  %2109 = vmatpush1.bf16.msra.mxu1 %v7441_v22  ;;  %v7482_v19 = vcombine.high %v553_v10, %v557_v11  ;;  %v561_v22 = vld [vmem:[#allocation2 + $0xcc8] sm:$0xff]  ;;  %v608_v11 = vld [vmem:[#allocation2 + $0xe40] sm:$0xff] }
  0x5f   :  { %2004 = vmatprep.subr.bf16.mxu0 %v7448_v23  ;;  %2110 = vmatprep.subr.bf16.mxu1 %v7450_v24  ;;  %v565_v23 = vld [vmem:[#allocation2 + $0xce8] sm:$0xff]  ;;  %v8550_v24 = vcombine.low %v372_v1, %v396_v2  ;;  %v7513_v1 = vcombine.low %v585_v53, %v589_v54  ;;  %v7520_v2 = vcombine.high %v592_v60, %v596_v61 }
  0x60   :  { %v7490_v33 = vcombine.high %v561_v22, %v565_v23  ;;  %v629_v38 = vld [vmem:[#allocation2 + $0xee8] sm:$0xff] }
  0x62   :  { %2005 = vmatpush1.bf16.msra.mxu0 %v7447_v39  ;;  %2111 = vmatpush1.bf16.msra.mxu1 %v7449_v40  ;;  %v7487_v39 = vcombine.low %v560_v20, %v564_v21  ;;  %v7489_v40 = vcombine.low %v561_v22, %v565_v23  ;;  %v616_v20 = vld [vmem:[#allocation2 + $0xe80] sm:$0xff]  ;;  %v617_v22 = vld [vmem:[#allocation2 + $0xe88] sm:$0xff] }
  0x63   :  { %2006 = vmatprep.subr.bf16.mxu0 %v7456_v41  ;;  %2112 = vmatprep.subr.bf16.mxu1 %v7458_v43  ;;  %v7496_v41 = vcombine.high %v568_v34, %v572_v35  ;;  %v576_v43 = vld [vmem:[#allocation2 + $0xd40] sm:$0xff]  ;;  %v621_v23 = vld [vmem:[#allocation2 + $0xea8] sm:$0xff] }
  0x64   :  { %v7504_v49 = vcombine.high %v576_v43, %v580_v44  ;;  %v620_v21 = vld [vmem:[#allocation2 + $0xea0] sm:$0xff] }
  0x65   :  { %v624_v34 = vld [vmem:[#allocation2 + $0xec0] sm:$0xff] }
  0x66   :  { %2007 = vmatpush1.bf16.msra.mxu0 %v7455_v55  ;;  %2113 = vmatpush1.bf16.msra.mxu1 %v7457_v56  ;;  %v7503_v55 = vcombine.low %v576_v43, %v580_v44  ;;  %v7505_v56 = vcombine.low %v577_v45, %v581_v46  ;;  %v628_v35 = vld [vmem:[#allocation2 + $0xee0] sm:$0xff]  ;;  %v633_v45 = vld [vmem:[#allocation2 + $0xf08] sm:$0xff] }
  0x67   :  { %2029 = vmatprep.subr.bf16.mxu0 %v7464_v57  ;;  %2135 = vmatprep.subr.bf16.mxu1 %v7466_v58  ;;  %v7512_v57 = vcombine.high %v584_v51, %v588_v52  ;;  %v7514_v58 = vcombine.high %v585_v53, %v589_v54  ;;  %v632_v43 = vld [vmem:[#allocation2 + $0xf00] sm:$0xff]  ;;  %v637_v46 = vld [vmem:[#allocation2 + $0xf28] sm:$0xff] }
  0x68   :  { %v636_v44 = vld [vmem:[#allocation2 + $0xf20] sm:$0xff]  ;;  %v7562_v52 = vcombine.high %v633_v45, %v637_v46  ;;  %v7561_v63 = vcombine.low %v633_v45, %v637_v46  ;;  %v422_v45 = vld [vmem:[#allocation2 + $0x870] sm:$0xff]  ;;  %v8579_v46 = vcombine.low %v8554_v25, %v8558_v27  ;;  %v427_v27 = vld [vmem:[#allocation2 + $0x898] sm:$0xff] }
  0x69   :  { %2009 = vmatmul.mubr.bf16.vlgmr.msra.gmra.mrb[0].mxu0 %v8538_v59  ;;  %2115 = vmatmul.mubr.bf16.vlgmr.msra.gmra.mrb[0].mxu1 %v8538_v59  ;;  %v7560_v51 = vcombine.high %v632_v43, %v636_v44  ;;  %v640_v53 = vld [vmem:[#allocation2 + $0xf40] sm:$0xff]  ;;  %v7559_v62 = vcombine.low %v632_v43, %v636_v44  ;;  %v418_v44 = vld [vmem:[#allocation2 + $0x850] sm:$0xff] }
  0x6a   :  { %2030 = vmatpush1.bf16.msra.mxu0 %v7463_v5  ;;  %2136 = vmatpush1.bf16.msra.mxu1 %v7465_v6  ;;  %v604_v5 = vld [vmem:[#allocation2 + $0xe20] sm:$0xff]  ;;  %v601_v6 = vld [vmem:[#allocation2 + $0xe08] sm:$0xff]  ;;  %v7347_v15 = vcombine.low %v418_v44, %v422_v45 }
  0x6b   :  { %2031 = vmatprep.subr.bf16.mxu0 %v7472_v26  ;;  %2137 = vmatprep.subr.bf16.mxu1 %v7474_v29  ;;  %v605_v26 = vld [vmem:[#allocation2 + $0xe28] sm:$0xff]  ;;  %v7519_v29 = vcombine.low %v592_v60, %v596_v61  ;;  %v7528_v8 = vcombine.high %v600_v4, %v604_v5  ;;  %v644_v54 = vld [vmem:[#allocation2 + $0xf60] sm:$0xff] }
  0x6c   :  { %2018 = vmatprep.mubr.bf16.mxu0 %v8544_v9  ;;  %2124 = vmatprep.mubr.bf16.mxu1 %v8544_v9  ;;  %v7530_v10 = vcombine.high %v601_v6, %v605_v26 }
  0x6e   :  { %2032 = vmatpush1.bf16.msra.mxu0 %v7471_v16  ;;  %2138 = vmatpush1.bf16.msra.mxu1 %v7473_v17  ;;  %v7527_v16 = vcombine.low %v600_v4, %v604_v5  ;;  %v7529_v17 = vcombine.low %v601_v6, %v605_v26  ;;  %v649_v4 = vld [vmem:[#allocation2 + $0xf88] sm:$0xff] }
  0x6f   :  { %2033 = vmatprep.subr.bf16.mxu0 %v7480_v18  ;;  %2139 = vmatprep.subr.bf16.mxu1 %v7482_v19  ;;  %v7536_v18 = vcombine.high %v608_v11, %v612_v12  ;;  %v7538_v19 = vcombine.high %v609_v13, %v613_v14  ;;  %v653_v5 = vld [vmem:[#allocation2 + $0xfa8] sm:$0xff] }
  0x71   :  { %2019 = vmatmul.mubr.bf16.gmra.mrb[4].mxu0 %v8550_v24  ;;  %2125 = vmatmul.mubr.bf16.gmra.mrb[4].mxu1 %v8550_v24 }
  0x72   :  { %2034 = vmatpush1.bf16.msra.mxu0 %v7479_v28  ;;  %2140 = vmatpush1.bf16.msra.mxu1 %v7481_v30  ;;  %v7535_v28 = vcombine.low %v608_v11, %v612_v12  ;;  %v7537_v30 = vcombine.low %v609_v13, %v613_v14  ;;  %v7578_v13 = vcombine.high %v649_v4, %v653_v5  ;;  %v656_v14 = vld [vmem:[#allocation2 + $0xfc0] sm:$0xff] }
  0x73   :  { %2035 = vmatprep.subr.bf16.mxu0 %v7488_v32  ;;  %2141 = vmatprep.subr.bf16.mxu1 %v7490_v33  ;;  %v7544_v32 = vcombine.high %v616_v20, %v620_v21  ;;  %v7546_v33 = vcombine.high %v617_v22, %v621_v23 }
  0x74   :  { %2061 = vmatprep.mubr.bf16.mxu0 %v8562_v36  ;;  %2167 = vmatprep.mubr.bf16.mxu1 %v8562_v36 }
  0x76   :  { %2036 = vmatpush1.bf16.msra.mxu0 %v7487_v39  ;;  %2142 = vmatpush1.bf16.msra.mxu1 %v7489_v40  ;;  %v7543_v39 = vcombine.low %v616_v20, %v620_v21  ;;  %v7545_v40 = vcombine.low %v617_v22, %v621_v23  ;;  %v7577_v23 = vcombine.low %v649_v4, %v653_v5 }
  0x77   :  { %2037 = vmatprep.subr.bf16.mxu0 %v7496_v41  ;;  %2143 = vmatprep.subr.bf16.mxu1 %v7498_v42  ;;  %v7552_v41 = vcombine.high %v624_v34, %v628_v35  ;;  %v7554_v42 = vcombine.high %v625_v37, %v629_v38 }
  0x7a   :  { %2038 = vmatpush1.bf16.msra.mxu0 %v7495_v47  ;;  %2144 = vmatpush1.bf16.msra.mxu1 %v7497_v48  ;;  %v7551_v47 = vcombine.low %v624_v34, %v628_v35  ;;  %v45_v48 = vld [vmem:[%s9120_s0 + $0x38] sm:$0xff] }
  0x7b   :  { %2039 = vmatprep.subr.bf16.mxu0 %v7504_v49  ;;  %2145 = vmatprep.subr.bf16.mxu1 %v7506_v50  ;;  %v47_v49 = vld [vmem:[%s9120_s0 + $0x48] sm:$0xff]  ;;  %v7553_v50 = vcombine.low %v625_v37, %v629_v38  ;;  %v411_v34 = vld [vmem:[#allocation2 + $0x818] sm:$0xff] }
  0x7c   :  { %v383_v60 = vshll.u32 %v47_v49, 16  ;;  %v397_v61 = vshrl.u32 %v47_v49, 16  ;;  %v415_v35 = vld [vmem:[#allocation2 + $0x838] sm:$0xff] }
  0x7d   :  { %v7342_v43 = vcombine.high %v411_v34, %v415_v35 }
  0x7e   :  { %2040 = vmatpush1.bf16.msra.mxu0 %v7503_v55  ;;  %2146 = vmatpush1.bf16.msra.mxu1 %v7505_v56  ;;  %v641_v55 = vld [vmem:[#allocation2 + $0xf48] sm:$0xff] }
  0x7f   :  { %2041 = vmatprep.subr.bf16.mxu0 %v7512_v57  ;;  %2147 = vmatprep.subr.bf16.mxu1 %v7514_v58  ;;  %v645_v56 = vld [vmem:[#allocation2 + $0xf68] sm:$0xff]  ;;  %v374_v57 = vshrl.u32 %v45_v48, 16  ;;  %v377_v58 = vshll.u32 %v45_v48, 16  ;;  %v423_v48 = vld [vmem:[#allocation2 + $0x878] sm:$0xff] }
  0x80   :  { %v7569_v11 = vcombine.low %v641_v55, %v645_v56 }
  0x81   :  { %v376_v6 = vrot.slane %v374_v57, 4  ;;  %v379_v26 = vrot.slane %v377_v58, 5  ;;  %v431_v57 = vld [vmem:[#allocation2 + $0x8b8] sm:$0xff] }
  0x82   :  { %2042 = vmatpush1.bf16.msra.mxu0 %v7511_v0  ;;  %2148 = vmatpush1.bf16.msra.mxu1 %v7513_v1  ;;  %v7568_v0 = vcombine.high %v640_v53, %v644_v54  ;;  %v7570_v1 = vcombine.high %v641_v55, %v645_v56  ;;  %v426_v55 = vld [vmem:[#allocation2 + $0x890] sm:$0xff]  ;;  %v7357_v4 = vcombine.low %v427_v27, %v431_v57 }
  0x83   :  { %2043 = vmatprep.subr.bf16.mxu0 %v7520_v2  ;;  %2149 = vmatprep.subr.bf16.mxu1 %v7522_v3  ;;  %v648_v2 = vld [vmem:[#allocation2 + $0xf80] sm:$0xff]  ;;  %v430_v56 = vld [vmem:[#allocation2 + $0x8b0] sm:$0xff] }
  0x84   :  { %v652_v3 = vld [vmem:[#allocation2 + $0xfa0] sm:$0xff] }
  0x85   :  { %v7576_v12 = vcombine.high %v648_v2, %v652_v3  ;;  %v7575_v22 = vcombine.low %v648_v2, %v652_v3  ;;  %v7355_v3 = vcombine.low %v426_v55, %v430_v56 }
  0x86   :  { %2044 = vmatpush1.bf16.msra.mxu0 %v7519_v29  ;;  %2150 = vmatpush1.bf16.msra.mxu1 %v7521_v7  ;;  %v385_v29 = vrot.slane %v383_v60, 5  ;;  %v399_v7 = vrot.slane %v397_v61, 4  ;;  %v7356_v60 = vcombine.high %v426_v55, %v430_v56  ;;  %v7358_v61 = vcombine.high %v427_v27, %v431_v57  ;;  %v486_v55 = vld [vmem:[#allocation2 + $0xa70] sm:$0xff]  ;;  %v483_v56 = vld [vmem:[#allocation2 + $0xa58] sm:$0xff] }
  0x87   :  { %2045 = vmatprep.subr.bf16.mxu0 %v7528_v8  ;;  %2151 = vmatprep.subr.bf16.mxu1 %v7530_v10  ;;  %v7567_v8 = vcombine.low %v640_v53, %v644_v54  ;;  %v307_v10 = vld [vmem:[%s9120_s0 + $0x58] sm:$0x11]  ;;  %v7348_v53 = vcombine.high %v418_v44, %v422_v45  ;;  %v474_v45 = vld [vmem:[#allocation2 + $0xa10] sm:$0xff] }
  0x88   :  { %v400_v20 = vor.u32 %v399_v7, %v385_v29  ;;  %v403_v21 = vshll.u32 %v307_v10, 16  ;;  %v443_v7 = vld [vmem:[#allocation2 + $0x918] sm:$0xff] }
  0x89   :  { %v487_v27 = vld [vmem:[#allocation2 + $0xa78] sm:$0xff] }
  0x8a   :  { %2046 = vmatpush1.bf16.msra.mxu0 %v7527_v16  ;;  %2152 = vmatpush1.bf16.msra.mxu1 %v7529_v17  ;;  %v660_v16 = vld [vmem:[#allocation2 + $0xfe0] sm:$0xff]  ;;  %v657_v17 = vld [vmem:[#allocation2 + $0xfc8] sm:$0xff]  ;;  %v401_v38 = vrot.slane %v400_v20, 4 }
  0x8b   :  { %2047 = vmatprep.subr.bf16.mxu0 %v7536_v18  ;;  %2153 = vmatprep.subr.bf16.mxu1 %v7538_v19  ;;  %v661_v18 = vld [vmem:[#allocation2 + $0xfe8] sm:$0xff]  ;;  %v380_v19 = vor.u32 %v379_v26, %v376_v6  ;;  %v442_v26 = vld [vmem:[#allocation2 + $0x910] sm:$0xff] }
  0x8d   :  { %v381_v37 = vrot.slane %v380_v19, 4 }
  0x8e   :  { %2048 = vmatpush1.bf16.msra.mxu0 %v7535_v28  ;;  %2154 = vmatpush1.bf16.msra.mxu1 %v7537_v30  ;;  %v7584_v28 = vcombine.high %v656_v14, %v660_v16  ;;  %v7586_v30 = vcombine.high %v657_v17, %v661_v18 }
  0x8f   :  { %2049 = vmatprep.subr.bf16.mxu0 %v7544_v32  ;;  %2155 = vmatprep.subr.bf16.mxu1 %v7546_v33  ;;  %v410_v32 = vld [vmem:[#allocation2 + $0x810] sm:$0xff]  ;;  %v386_v49 = vsel %vm8500_vm2, %v381_v37, %v385_v29 }
  0x90   :  { %v414_v33 = vld [vmem:[#allocation2 + $0x830] sm:$0xff] }
  0x91   :  { %v446_v29 = vld [vmem:[#allocation2 + $0x930] sm:$0xff] }
  0x92   :  { %2050 = vmatpush1.bf16.msra.mxu0 %v7543_v39  ;;  %2156 = vmatpush1.bf16.msra.mxu1 %v7545_v40  ;;  %v405_v39 = vrot.slane %v403_v21, 5  ;;  %v7583_v40 = vcombine.low %v656_v14, %v660_v16  ;;  %v450_v14 = vld [vmem:[#allocation2 + $0x950] sm:$0xff]  ;;  %v7371_v19 = vcombine.low %v442_v26, %v446_v29 }
  0x93   :  { %2051 = vmatprep.subr.bf16.mxu0 %v7552_v41  ;;  %2157 = vmatprep.subr.bf16.mxu1 %v7554_v42  ;;  %v7585_v41 = vcombine.low %v657_v17, %v661_v18  ;;  %v7340_v42 = vcombine.high %v410_v32, %v414_v33  ;;  %v454_v16 = vld [vmem:[#allocation2 + $0x970] sm:$0xff]  ;;  %v451_v17 = vld [vmem:[#allocation2 + $0x958] sm:$0xff] }
  0x94   :  { %v455_v18 = vld [vmem:[#allocation2 + $0x978] sm:$0xff]  ;;  %v7380_v21 = vcombine.high %v450_v14, %v454_v16  ;;  %v466_v37 = vld [vmem:[#allocation2 + $0x9d0] sm:$0xff] }
  0x96   :  { %2052 = vmatpush1.bf16.msra.mxu0 %v7551_v47  ;;  %2158 = vmatpush1.bf16.msra.mxu1 %v7553_v50  ;;  %v419_v47 = vld [vmem:[#allocation2 + $0x858] sm:$0xff]  ;;  %v406_v50 = vsel %vm8500_vm2, %v401_v38, %v405_v39  ;;  %v470_v38 = vld [vmem:[#allocation2 + $0x9f0] sm:$0xff] }
  0x97   :  { %2053 = vmatprep.subr.bf16.mxu0 %v7560_v51  ;;  %2159 = vmatprep.subr.bf16.mxu1 %v7562_v52  ;;  %v7339_v51 = vcombine.low %v410_v32, %v414_v33  ;;  %v7341_v52 = vcombine.low %v411_v34, %v415_v35  ;;  %v7350_v54 = vcombine.high %v419_v47, %v423_v48  ;;  %v463_v32 = vld [vmem:[#allocation2 + $0x9b8] sm:$0xff] }
  0x98   :  { %v8585_v25 = vcombine.high %v386_v49, %v406_v50  ;;  %v7349_v58 = vcombine.low %v419_v47, %v423_v48  ;;  %v8591_v2 = vcombine.low %v386_v49, %v406_v50  ;;  %v7379_v33 = vcombine.low %v450_v14, %v454_v16  ;;  %v467_v39 = vld [vmem:[#allocation2 + $0x9d8] sm:$0xff]  ;;  %v478_v47 = vld [vmem:[#allocation2 + $0xa30] sm:$0xff] }
  0x99   :  { %v7381_v34 = vcombine.low %v451_v17, %v455_v18  ;;  %v475_v48 = vld [vmem:[#allocation2 + $0xa18] sm:$0xff]  ;;  %v7395_v50 = vcombine.low %v466_v37, %v470_v38  ;;  %v7403_v57 = vcombine.low %v474_v45, %v478_v47  ;;  %v510_v14 = vld [vmem:[#allocation2 + $0xb30] sm:$0xff] }
  0x9a   :  { %2054 = vmatpush1.bf16.msra.mxu0 %v7559_v62  ;;  %2160 = vmatpush1.bf16.msra.mxu1 %v7561_v63  ;;  %v434_v62 = vld [vmem:[#allocation2 + $0x8d0] sm:$0xff]  ;;  %v479_v49 = vld [vmem:[#allocation2 + $0xa38] sm:$0xff] }
  0x9b   :  { %2055 = vmatprep.subr.bf16.mxu0 %v7568_v0  ;;  %2161 = vmatprep.subr.bf16.mxu1 %v7570_v1  ;;  %v438_v63 = vld [vmem:[#allocation2 + $0x8f0] sm:$0xff]  ;;  %v435_v0 = vld [vmem:[#allocation2 + $0x8d8] sm:$0xff] }
  0x9c   :  { %v439_v1 = vld [vmem:[#allocation2 + $0x8f8] sm:$0xff]  ;;  %v7364_v5 = vcombine.high %v434_v62, %v438_v63  ;;  %v7363_v10 = vcombine.low %v434_v62, %v438_v63  ;;  %v494_v62 = vld [vmem:[#allocation2 + $0xab0] sm:$0xff] }
  0x9d   :  { %v7366_v6 = vcombine.high %v435_v0, %v439_v1  ;;  %v491_v63 = vld [vmem:[#allocation2 + $0xa98] sm:$0xff] }
  0x9e   :  { %2056 = vmatpush1.bf16.msra.mxu0 %v7567_v8  ;;  %2162 = vmatpush1.bf16.msra.mxu1 %v7569_v11  ;;  %v447_v8 = vld [vmem:[#allocation2 + $0x938] sm:$0xff]  ;;  %v7365_v11 = vcombine.low %v435_v0, %v439_v1 }
  0x9f   :  { %2057 = vmatprep.subr.bf16.mxu0 %v7576_v12  ;;  %2163 = vmatprep.subr.bf16.mxu1 %v7578_v13  ;;  %v7372_v12 = vcombine.high %v442_v26, %v446_v29  ;;  %v7374_v13 = vcombine.high %v443_v7, %v447_v8  ;;  %v7373_v20 = vcombine.low %v443_v7, %v447_v8  ;;  %v495_v0 = vld [vmem:[#allocation2 + $0xab8] sm:$0xff]  ;;  %v502_v26 = vld [vmem:[#allocation2 + $0xaf0] sm:$0xff] }
  0xa0   :  { %v499_v29 = vld [vmem:[#allocation2 + $0xad8] sm:$0xff] }
  0xa1   :  { %v503_v7 = vld [vmem:[#allocation2 + $0xaf8] sm:$0xff] }
  0xa2   :  { %2058 = vmatpush1.bf16.msra.mxu0 %v7575_v22  ;;  %2164 = vmatpush1.bf16.msra.mxu1 %v7577_v23  ;;  %v7382_v22 = vcombine.high %v451_v17, %v455_v18  ;;  %v458_v23 = vld [vmem:[#allocation2 + $0x990] sm:$0xff]  ;;  %v507_v16 = vld [vmem:[#allocation2 + $0xb18] sm:$0xff] }
  0xa3   :  { %2059 = vmatprep.subr.bf16.mxu0 %v7584_v28  ;;  %2165 = vmatprep.subr.bf16.mxu1 %v7586_v30  ;;  %v462_v28 = vld [vmem:[#allocation2 + $0x9b0] sm:$0xff]  ;;  %v459_v30 = vld [vmem:[#allocation2 + $0x998] sm:$0xff] }
  0xa4   :  { %v7388_v35 = vcombine.high %v458_v23, %v462_v28  ;;  %v511_v17 = vld [vmem:[#allocation2 + $0xb38] sm:$0xff] }
  0xa6   :  { %2060 = vmatpush1.bf16.msra.mxu0 %v7583_v40  ;;  %2166 = vmatpush1.bf16.msra.mxu1 %v7585_v41  ;;  %v471_v40 = vld [vmem:[#allocation2 + $0x9f8] sm:$0xff]  ;;  %v7387_v41 = vcombine.low %v458_v23, %v462_v28  ;;  %v518_v23 = vld [vmem:[#allocation2 + $0xb70] sm:$0xff] }
  0xa7   :  { %2188 = vmatprep.subr.bf16.mxu0 %v7340_v42  ;;  %2294 = vmatprep.subr.bf16.mxu1 %v7342_v43  ;;  %v7389_v42 = vcombine.low %v459_v30, %v463_v32  ;;  %v7396_v43 = vcombine.high %v466_v37, %v470_v38  ;;  %v7398_v44 = vcombine.high %v467_v39, %v471_v40  ;;  %v515_v28 = vld [vmem:[#allocation2 + $0xb58] sm:$0xff]  ;;  %v526_v37 = vld [vmem:[#allocation2 + $0xbb0] sm:$0xff] }
  0xa8   :  { %v523_v38 = vld [vmem:[#allocation2 + $0xb98] sm:$0xff] }
  0xa9   :  { %2062 = vmatmul.mubr.bf16.vlgmr.msra.gmra.mrb[0].mxu0 %v8579_v46  ;;  %2168 = vmatmul.mubr.bf16.vlgmr.msra.gmra.mrb[0].mxu1 %v8579_v46 }
  0xaa   :  { %2189 = vmatpush1.bf16.msra.mxu0 %v7339_v51  ;;  %2295 = vmatpush1.bf16.msra.mxu1 %v7341_v52  ;;  %v7397_v51 = vcombine.low %v467_v39, %v471_v40  ;;  %v7404_v52 = vcombine.high %v474_v45, %v478_v47  ;;  %v527_v39 = vld [vmem:[#allocation2 + $0xbb8] sm:$0xff]  ;;  %v534_v45 = vld [vmem:[#allocation2 + $0xbf0] sm:$0xff] }
  0xab   :  { %2190 = vmatprep.subr.bf16.mxu0 %v7348_v53  ;;  %2296 = vmatprep.subr.bf16.mxu1 %v7350_v54  ;;  %v7406_v53 = vcombine.high %v475_v48, %v479_v49  ;;  %v482_v54 = vld [vmem:[#allocation2 + $0xa50] sm:$0xff]  ;;  %v531_v47 = vld [vmem:[#allocation2 + $0xbd8] sm:$0xff] }
  0xac   :  { %2071 = vmatprep.mubr.bf16.mxu0 %v8585_v25  ;;  %2177 = vmatprep.mubr.bf16.mxu1 %v8585_v25  ;;  %v7411_v1 = vcombine.low %v482_v54, %v486_v55 }
  0xae   :  { %2191 = vmatpush1.bf16.msra.mxu0 %v7347_v15  ;;  %2297 = vmatpush1.bf16.msra.mxu1 %v7349_v58  ;;  %v7405_v15 = vcombine.low %v475_v48, %v479_v49  ;;  %v7412_v58 = vcombine.high %v482_v54, %v486_v55  ;;  %v535_v48 = vld [vmem:[#allocation2 + $0xbf8] sm:$0xff]  ;;  %v542_v54 = vld [vmem:[#allocation2 + $0xc30] sm:$0xff] }
  0xaf   :  { %2192 = vmatprep.subr.bf16.mxu0 %v7356_v60  ;;  %2298 = vmatprep.subr.bf16.mxu1 %v7358_v61  ;;  %v7414_v60 = vcombine.high %v483_v56, %v487_v27  ;;  %v490_v61 = vld [vmem:[#allocation2 + $0xa90] sm:$0xff]  ;;  %v539_v55 = vld [vmem:[#allocation2 + $0xc18] sm:$0xff] }
  0xb0   :  { %v7419_v8 = vcombine.low %v490_v61, %v494_v62 }
  0xb1   :  { %2072 = vmatmul.mubr.bf16.gmra.mrb[4].mxu0 %v8591_v2  ;;  %2178 = vmatmul.mubr.bf16.gmra.mrb[4].mxu1 %v8591_v2 }
  0xb2   :  { %2193 = vmatpush1.bf16.msra.mxu0 %v7355_v3  ;;  %2299 = vmatpush1.bf16.msra.mxu1 %v7357_v4  ;;  %v7413_v3 = vcombine.low %v483_v56, %v487_v27  ;;  %v7420_v4 = vcombine.high %v490_v61, %v494_v62  ;;  %v543_v56 = vld [vmem:[#allocation2 + $0xc38] sm:$0xff]  ;;  %v550_v61 = vld [vmem:[#allocation2 + $0xc70] sm:$0xff] }
  0xb3   :  { %2194 = vmatprep.subr.bf16.mxu0 %v7364_v5  ;;  %2300 = vmatprep.subr.bf16.mxu1 %v7366_v6  ;;  %v7422_v5 = vcombine.high %v491_v63, %v495_v0  ;;  %v498_v6 = vld [vmem:[#allocation2 + $0xad0] sm:$0xff]  ;;  %v547_v62 = vld [vmem:[#allocation2 + $0xc58] sm:$0xff] }
  0xb4   :  { %2220 = vmatprep.mubr.bf16.mxu0 %v8514_v31  ;;  %2326 = vmatprep.mubr.bf16.mxu1 %v8514_v31  ;;  %v7390_v31 = vcombine.high %v459_v30, %v463_v32  ;;  %v7427_v18 = vcombine.low %v498_v6, %v502_v26  ;;  %v519_v30 = vld [vmem:[#allocation2 + $0xb78] sm:$0xff] }
  0xb6   :  { %2195 = vmatpush1.bf16.msra.mxu0 %v7363_v10  ;;  %2301 = vmatpush1.bf16.msra.mxu1 %v7365_v11  ;;  %v7421_v10 = vcombine.low %v491_v63, %v495_v0  ;;  %v7428_v11 = vcombine.high %v498_v6, %v502_v26  ;;  %v551_v63 = vld [vmem:[#allocation2 + $0xc78] sm:$0xff]  ;;  %v558_v6 = vld [vmem:[#allocation2 + $0xcb0] sm:$0xff] }
  0xb7   :  { %2196 = vmatprep.subr.bf16.mxu0 %v7372_v12  ;;  %2302 = vmatprep.subr.bf16.mxu1 %v7374_v13  ;;  %v7430_v12 = vcombine.high %v499_v29, %v503_v7  ;;  %v506_v13 = vld [vmem:[#allocation2 + $0xb10] sm:$0xff]  ;;  %v555_v26 = vld [vmem:[#allocation2 + $0xc98] sm:$0xff] }
  0xb8   :  { %v7435_v32 = vcombine.low %v506_v13, %v510_v14 }
  0xba   :  { %2197 = vmatpush1.bf16.msra.mxu0 %v7371_v19  ;;  %2303 = vmatpush1.bf16.msra.mxu1 %v7373_v20  ;;  %v7429_v19 = vcombine.low %v499_v29, %v503_v7  ;;  %v7436_v20 = vcombine.high %v506_v13, %v510_v14  ;;  %v559_v29 = vld [vmem:[#allocation2 + $0xcb8] sm:$0xff]  ;;  %v566_v13 = vld [vmem:[#allocation2 + $0xcf0] sm:$0xff] }
  0xbb   :  { %2198 = vmatprep.subr.bf16.mxu0 %v7380_v21  ;;  %2304 = vmatprep.subr.bf16.mxu1 %v7382_v22  ;;  %v7438_v21 = vcombine.high %v507_v16, %v511_v17  ;;  %v514_v22 = vld [vmem:[#allocation2 + $0xb50] sm:$0xff]  ;;  %v563_v14 = vld [vmem:[#allocation2 + $0xcd8] sm:$0xff] }
  0xbc   :  { %v7443_v40 = vcombine.low %v514_v22, %v518_v23 }
  0xbe   :  { %2199 = vmatpush1.bf16.msra.mxu0 %v7379_v33  ;;  %2305 = vmatpush1.bf16.msra.mxu1 %v7381_v34  ;;  %v7437_v33 = vcombine.low %v507_v16, %v511_v17  ;;  %v7444_v34 = vcombine.high %v514_v22, %v518_v23  ;;  %v567_v16 = vld [vmem:[#allocation2 + $0xcf8] sm:$0xff] }
  0xbf   :  { %2200 = vmatprep.subr.bf16.mxu0 %v7388_v35  ;;  %2306 = vmatprep.subr.bf16.mxu1 %v7390_v31  ;;  %v7446_v35 = vcombine.high %v515_v28, %v519_v30  ;;  %v522_v31 = vld [vmem:[#allocation2 + $0xb90] sm:$0xff]  ;;  %v571_v22 = vld [vmem:[#allocation2 + $0xd18] sm:$0xff] }
  0xc0   :  { %v7451_v49 = vcombine.low %v522_v31, %v526_v37  ;;  %v575_v23 = vld [vmem:[#allocation2 + $0xd38] sm:$0xff] }
  0xc2   :  { %2201 = vmatpush1.bf16.msra.mxu0 %v7387_v41  ;;  %2307 = vmatpush1.bf16.msra.mxu1 %v7389_v42  ;;  %v7445_v41 = vcombine.low %v515_v28, %v519_v30  ;;  %v7452_v42 = vcombine.high %v522_v31, %v526_v37  ;;  %v583_v31 = vld [vmem:[#allocation2 + $0xd78] sm:$0xff] }
  0xc3   :  { %2202 = vmatprep.subr.bf16.mxu0 %v7396_v43  ;;  %2308 = vmatprep.subr.bf16.mxu1 %v7398_v44  ;;  %v7454_v43 = vcombine.high %v523_v38, %v527_v39  ;;  %v530_v44 = vld [vmem:[#allocation2 + $0xbd0] sm:$0xff] }
  0xc4   :  { %v7459_v27 = vcombine.low %v530_v44, %v534_v45 }
  0xc6   :  { %2203 = vmatpush1.bf16.msra.mxu0 %v7395_v50  ;;  %2309 = vmatpush1.bf16.msra.mxu1 %v7397_v51  ;;  %v7453_v50 = vcombine.low %v523_v38, %v527_v39  ;;  %v7460_v51 = vcombine.high %v530_v44, %v534_v45  ;;  %v7501_v38 = vcombine.low %v571_v22, %v575_v23 }
  0xc7   :  { %2204 = vmatprep.subr.bf16.mxu0 %v7404_v52  ;;  %2310 = vmatprep.subr.bf16.mxu1 %v7406_v53  ;;  %v7462_v52 = vcombine.high %v531_v47, %v535_v48  ;;  %v538_v53 = vld [vmem:[#allocation2 + $0xc10] sm:$0xff] }
  0xc8   :  { %v7467_v0 = vcombine.low %v538_v53, %v542_v54 }
  0xca   :  { %2205 = vmatpush1.bf16.msra.mxu0 %v7403_v57  ;;  %2311 = vmatpush1.bf16.msra.mxu1 %v7405_v15  ;;  %v7461_v57 = vcombine.low %v531_v47, %v535_v48  ;;  %v7468_v15 = vcombine.high %v538_v53, %v542_v54  ;;  %v594_v48 = vld [vmem:[#allocation2 + $0xdd0] sm:$0xff] }
  0xcb   :  { %2206 = vmatprep.subr.bf16.mxu0 %v7412_v58  ;;  %2312 = vmatprep.subr.bf16.mxu1 %v7414_v60  ;;  %v7470_v58 = vcombine.high %v539_v55, %v543_v56  ;;  %v546_v60 = vld [vmem:[#allocation2 + $0xc50] sm:$0xff] }
  0xcc   :  { %v7475_v7 = vcombine.low %v546_v60, %v550_v61 }
  0xce   :  { %2207 = vmatpush1.bf16.msra.mxu0 %v7411_v1  ;;  %2313 = vmatpush1.bf16.msra.mxu1 %v7413_v3  ;;  %v7469_v1 = vcombine.low %v539_v55, %v543_v56  ;;  %v7476_v3 = vcombine.high %v546_v60, %v550_v61  ;;  %v602_v56 = vld [vmem:[#allocation2 + $0xe10] sm:$0xff] }
  0xcf   :  { %2208 = vmatprep.subr.bf16.mxu0 %v7420_v4  ;;  %2314 = vmatprep.subr.bf16.mxu1 %v7422_v5  ;;  %v7478_v4 = vcombine.high %v547_v62, %v551_v63  ;;  %v554_v5 = vld [vmem:[#allocation2 + $0xc90] sm:$0xff] }
  0xd0   :  { %v7483_v17 = vcombine.low %v554_v5, %v558_v6 }
  0xd2   :  { %2209 = vmatpush1.bf16.msra.mxu0 %v7419_v8  ;;  %2315 = vmatpush1.bf16.msra.mxu1 %v7421_v10  ;;  %v7477_v8 = vcombine.low %v547_v62, %v551_v63  ;;  %v7484_v10 = vcombine.high %v554_v5, %v558_v6  ;;  %v610_v63 = vld [vmem:[#allocation2 + $0xe50] sm:$0xff] }
  0xd3   :  { %2210 = vmatprep.subr.bf16.mxu0 %v7428_v11  ;;  %2316 = vmatprep.subr.bf16.mxu1 %v7430_v12  ;;  %v7486_v11 = vcombine.high %v555_v26, %v559_v29  ;;  %v562_v12 = vld [vmem:[#allocation2 + $0xcd0] sm:$0xff] }
  0xd4   :  { %v7491_v28 = vcombine.low %v562_v12, %v566_v13 }
  0xd6   :  { %2211 = vmatpush1.bf16.msra.mxu0 %v7427_v18  ;;  %2317 = vmatpush1.bf16.msra.mxu1 %v7429_v19  ;;  %v7492_v18 = vcombine.high %v562_v12, %v566_v13  ;;  %v7494_v19 = vcombine.high %v563_v14, %v567_v16 }
  0xd7   :  { %2212 = vmatprep.subr.bf16.mxu0 %v7436_v20  ;;  %2318 = vmatprep.subr.bf16.mxu1 %v7438_v21  ;;  %v570_v20 = vld [vmem:[#allocation2 + $0xd10] sm:$0xff] }
  0xd8   :  { %v574_v21 = vld [vmem:[#allocation2 + $0xd30] sm:$0xff] }
  0xd9   :  { %v7500_v30 = vcombine.high %v570_v20, %v574_v21  ;;  %v7499_v37 = vcombine.low %v570_v20, %v574_v21 }
  0xda   :  { %2213 = vmatpush1.bf16.msra.mxu0 %v7435_v32  ;;  %2319 = vmatpush1.bf16.msra.mxu1 %v7437_v33  ;;  %v7502_v32 = vcombine.high %v571_v22, %v575_v23  ;;  %v578_v33 = vld [vmem:[#allocation2 + $0xd50] sm:$0xff] }
  0xdb   :  { %2214 = vmatprep.subr.bf16.mxu0 %v7444_v34  ;;  %2320 = vmatprep.subr.bf16.mxu1 %v7446_v35  ;;  %v582_v34 = vld [vmem:[#allocation2 + $0xd70] sm:$0xff]  ;;  %v579_v35 = vld [vmem:[#allocation2 + $0xd58] sm:$0xff] }
  0xdc   :  { %v7510_v39 = vcombine.high %v579_v35, %v583_v31  ;;  %v7507_v44 = vcombine.low %v578_v33, %v582_v34  ;;  %v7509_v45 = vcombine.low %v579_v35, %v583_v31  ;;  %v634_v23 = vld [vmem:[#allocation2 + $0xf10] sm:$0xff] }
  0xdd   :  { %v642_v31 = vld [vmem:[#allocation2 + $0xf50] sm:$0xff] }
  0xde   :  { %2215 = vmatpush1.bf16.msra.mxu0 %v7443_v40  ;;  %2321 = vmatpush1.bf16.msra.mxu1 %v7445_v41  ;;  %v586_v40 = vld [vmem:[#allocation2 + $0xd90] sm:$0xff] }
  0xdf   :  { %2216 = vmatprep.subr.bf16.mxu0 %v7452_v42  ;;  %2322 = vmatprep.subr.bf16.mxu1 %v7454_v43  ;;  %v590_v41 = vld [vmem:[#allocation2 + $0xdb0] sm:$0xff]  ;;  %v587_v42 = vld [vmem:[#allocation2 + $0xd98] sm:$0xff] }
  0xe0   :  { %v591_v43 = vld [vmem:[#allocation2 + $0xdb8] sm:$0xff]  ;;  %v7516_v47 = vcombine.high %v586_v40, %v590_v41 }
  0xe1   :  { %v7517_v53 = vcombine.low %v587_v42, %v591_v43 }
  0xe2   :  { %2217 = vmatpush1.bf16.msra.mxu0 %v7451_v49  ;;  %2323 = vmatpush1.bf16.msra.mxu1 %v7453_v50  ;;  %v598_v49 = vld [vmem:[#allocation2 + $0xdf0] sm:$0xff]  ;;  %v595_v50 = vld [vmem:[#allocation2 + $0xdd8] sm:$0xff] }
  0xe3   :  { %2218 = vmatprep.subr.bf16.mxu0 %v7460_v51  ;;  %2324 = vmatprep.subr.bf16.mxu1 %v7462_v52  ;;  %v599_v51 = vld [vmem:[#allocation2 + $0xdf8] sm:$0xff]  ;;  %v7515_v52 = vcombine.low %v586_v40, %v590_v41  ;;  %v7524_v54 = vcombine.high %v594_v48, %v598_v49 }
  0xe4   :  { %v7526_v55 = vcombine.high %v595_v50, %v599_v51  ;;  %v7525_v60 = vcombine.low %v595_v50, %v599_v51  ;;  %v658_v51 = vld [vmem:[#allocation2 + $0xfd0] sm:$0xff] }
  0xe6   :  { %2219 = vmatpush1.bf16.msra.mxu0 %v7459_v27  ;;  %2325 = vmatpush1.bf16.msra.mxu1 %v7461_v57  ;;  %v606_v27 = vld [vmem:[#allocation2 + $0xe30] sm:$0xff]  ;;  %v603_v57 = vld [vmem:[#allocation2 + $0xe18] sm:$0xff] }
  0xe7   :  { %2241 = vmatprep.subr.bf16.mxu0 %v7468_v15  ;;  %2347 = vmatprep.subr.bf16.mxu1 %v7470_v58  ;;  %v607_v15 = vld [vmem:[#allocation2 + $0xe38] sm:$0xff]  ;;  %v7523_v58 = vcombine.low %v594_v48, %v598_v49  ;;  %v7532_v61 = vcombine.high %v602_v56, %v606_v27 }
  0xe8   :  { %v7534_v62 = vcombine.high %v603_v57, %v607_v15  ;;  %v7533_v5 = vcombine.low %v603_v57, %v607_v15  ;;  %v48_v15 = vld [vmem:[#allocation2] sm:$0xff] }
  0xe9   :  { %2221 = vmatmul.mubr.bf16.vlgmr.msra.gmra.mrb[8].mxu0 %v8538_v59  ;;  %2327 = vmatmul.mubr.bf16.vlgmr.msra.gmra.mrb[8].mxu1 %v8538_v59  ;;  %v7485_v59 = vcombine.low %v555_v26, %v559_v29  ;;  %v618_v29 = vld [vmem:[#allocation2 + $0xe90] sm:$0xff] }
  0xea   :  { %2242 = vmatpush1.bf16.msra.mxu0 %v7467_v0  ;;  %2348 = vmatpush1.bf16.msra.mxu1 %v7469_v1  ;;  %v614_v0 = vld [vmem:[#allocation2 + $0xe70] sm:$0xff]  ;;  %v611_v1 = vld [vmem:[#allocation2 + $0xe58] sm:$0xff] }
  0xeb   :  { %2243 = vmatprep.subr.bf16.mxu0 %v7476_v3  ;;  %2349 = vmatprep.subr.bf16.mxu1 %v7478_v4  ;;  %v615_v3 = vld [vmem:[#allocation2 + $0xe78] sm:$0xff]  ;;  %v7531_v4 = vcombine.low %v602_v56, %v606_v27  ;;  %v7540_v6 = vcombine.high %v610_v63, %v614_v0 }
  0xec   :  { %2230 = vmatprep.mubr.bf16.mxu0 %v8544_v9  ;;  %2336 = vmatprep.mubr.bf16.mxu1 %v8544_v9  ;;  %v7493_v9 = vcombine.low %v563_v14, %v567_v16  ;;  %v7542_v26 = vcombine.high %v611_v1, %v615_v3  ;;  %v7541_v12 = vcombine.low %v611_v1, %v615_v3  ;;  %v626_v16 = vld [vmem:[#allocation2 + $0xed0] sm:$0xff]  ;;  %v56_v3 = vld [vmem:[#allocation2 + $0x40] sm:$0xff] }
  0xee   :  { %2244 = vmatpush1.bf16.msra.mxu0 %v7475_v7  ;;  %2350 = vmatpush1.bf16.msra.mxu1 %v7477_v8  ;;  %v622_v7 = vld [vmem:[#allocation2 + $0xeb0] sm:$0xff]  ;;  %v619_v8 = vld [vmem:[#allocation2 + $0xe98] sm:$0xff] }
  0xef   :  { %2245 = vmatprep.subr.bf16.mxu0 %v7484_v10  ;;  %2351 = vmatprep.subr.bf16.mxu1 %v7486_v11  ;;  %v623_v10 = vld [vmem:[#allocation2 + $0xeb8] sm:$0xff]  ;;  %v7539_v11 = vcombine.low %v610_v63, %v614_v0  ;;  %v7548_v13 = vcombine.high %v618_v29, %v622_v7 }
  0xf0   :  { %v7550_v14 = vcombine.high %v619_v8, %v623_v10  ;;  %v7549_v20 = vcombine.low %v619_v8, %v623_v10  ;;  %v64_v10 = vld [vmem:[#allocation2 + $0x80] sm:$0xff] }
  0xf1   :  { %2231 = vmatmul.mubr.bf16.gmra.mrb[12].mxu0 %v8550_v24  ;;  %2337 = vmatmul.mubr.bf16.gmra.mrb[12].mxu1 %v8550_v24  ;;  %v7508_v24 = vcombine.high %v578_v33, %v582_v34 }
  0xf2   :  { %2246 = vmatpush1.bf16.msra.mxu0 %v7483_v17  ;;  %2352 = vmatpush1.bf16.msra.mxu1 %v7485_v59  ;;  %v630_v17 = vld [vmem:[#allocation2 + $0xef0] sm:$0xff]  ;;  %v627_v59 = vld [vmem:[#allocation2 + $0xed8] sm:$0xff] }
  0xf3   :  { %2247 = vmatprep.subr.bf16.mxu0 %v7492_v18  ;;  %2353 = vmatprep.subr.bf16.mxu1 %v7494_v19  ;;  %v631_v18 = vld [vmem:[#allocation2 + $0xef8] sm:$0xff]  ;;  %v7547_v19 = vcombine.low %v618_v29, %v622_v7  ;;  %v7556_v21 = vcombine.high %v626_v16, %v630_v17 }
  0xf4   :  { %2273 = vmatprep.mubr.bf16.mxu0 %v8562_v36  ;;  %2379 = vmatprep.mubr.bf16.mxu1 %v8562_v36  ;;  %v7518_v36 = vcombine.high %v587_v42, %v591_v43  ;;  %v7558_v22 = vcombine.high %v627_v59, %v631_v18  ;;  %v7557_v33 = vcombine.low %v627_v59, %v631_v18  ;;  %v650_v43 = vld [vmem:[#allocation2 + $0xf90] sm:$0xff]  ;;  %v72_v18 = vld [vmem:[#allocation2 + $0xc0] sm:$0xff] }
  0xf6   :  { %2248 = vmatpush1.bf16.msra.mxu0 %v7491_v28  ;;  %2354 = vmatpush1.bf16.msra.mxu1 %v7493_v9  ;;  %v638_v28 = vld [vmem:[#allocation2 + $0xf30] sm:$0xff]  ;;  %v635_v9 = vld [vmem:[#allocation2 + $0xf18] sm:$0xff] }
  0xf7   :  { %2249 = vmatprep.subr.bf16.mxu0 %v7500_v30  ;;  %2355 = vmatprep.subr.bf16.mxu1 %v7502_v32  ;;  %v639_v30 = vld [vmem:[#allocation2 + $0xf38] sm:$0xff]  ;;  %v7555_v32 = vcombine.low %v626_v16, %v630_v17  ;;  %v7564_v34 = vcombine.high %v634_v23, %v638_v28 }
  0xf8   :  { %v7566_v35 = vcombine.high %v635_v9, %v639_v30  ;;  %v7565_v40 = vcombine.low %v635_v9, %v639_v30  ;;  %v80_v9 = vld [vmem:[#allocation2 + $0x100] sm:$0xff] }
  0xf9   :  { %v84_v30 = vld [vmem:[#allocation2 + $0x120] sm:$0xff] }
  0xfa   :  { %2250 = vmatpush1.bf16.msra.mxu0 %v7499_v37  ;;  %2356 = vmatpush1.bf16.msra.mxu1 %v7501_v38  ;;  %v646_v37 = vld [vmem:[#allocation2 + $0xf70] sm:$0xff]  ;;  %v643_v38 = vld [vmem:[#allocation2 + $0xf58] sm:$0xff] }
  0xfb   :  { %2251 = vmatprep.subr.bf16.mxu0 %v7508_v24  ;;  %2357 = vmatprep.subr.bf16.mxu1 %v7510_v39  ;;  %v647_v24 = vld [vmem:[#allocation2 + $0xf78] sm:$0xff]  ;;  %v7563_v39 = vcombine.low %v634_v23, %v638_v28  ;;  %v7572_v41 = vcombine.high %v642_v31, %v646_v37 }
  0xfc   :  { %v7574_v42 = vcombine.high %v643_v38, %v647_v24  ;;  %v7573_v48 = vcombine.low %v643_v38, %v647_v24  ;;  %v7632_v38 = vcombine.high %v80_v9, %v84_v30 }
  0xfe   :  { %2252 = vmatpush1.bf16.msra.mxu0 %v7507_v44  ;;  %2358 = vmatpush1.bf16.msra.mxu1 %v7509_v45  ;;  %v654_v44 = vld [vmem:[#allocation2 + $0xfb0] sm:$0xff]  ;;  %v651_v45 = vld [vmem:[#allocation2 + $0xf98] sm:$0xff] }
  0xff   :  { %2253 = vmatprep.subr.bf16.mxu0 %v7516_v47  ;;  %2359 = vmatprep.subr.bf16.mxu1 %v7518_v36  ;;  %v655_v47 = vld [vmem:[#allocation2 + $0xfb8] sm:$0xff]  ;;  %v7571_v36 = vcombine.low %v642_v31, %v646_v37  ;;  %v7580_v49 = vcombine.high %v650_v43, %v654_v44 }
 0x100   :  { %v7582_v50 = vcombine.high %v651_v45, %v655_v47  ;;  %v7581_v56 = vcombine.low %v651_v45, %v655_v47  ;;  %v96_v47 = vld [vmem:[#allocation2 + $0x180] sm:$0xff] }
 0x102   :  { %2254 = vmatpush1.bf16.msra.mxu0 %v7515_v52  ;;  %2360 = vmatpush1.bf16.msra.mxu1 %v7517_v53  ;;  %v662_v52 = vld [vmem:[#allocation2 + $0xff0] sm:$0xff]  ;;  %v659_v53 = vld [vmem:[#allocation2 + $0xfd8] sm:$0xff] }
 0x103   :  { %2255 = vmatprep.subr.bf16.mxu0 %v7524_v54  ;;  %2361 = vmatprep.subr.bf16.mxu1 %v7526_v55  ;;  %v663_v54 = vld [vmem:[#allocation2 + $0xff8] sm:$0xff]  ;;  %v7579_v55 = vcombine.low %v650_v43, %v654_v44  ;;  %v7588_v27 = vcombine.high %v658_v51, %v662_v52  ;;  %v7631_v43 = vcombine.low %v80_v9, %v84_v30 }
 0x104   :  { %v7590_v57 = vcombine.high %v659_v53, %v663_v54  ;;  %v7589_v63 = vcombine.low %v659_v53, %v663_v54  ;;  %v104_v54 = vld [vmem:[#allocation2 + $0x1c0] sm:$0xff] }
 0x106   :  { %2256 = vmatpush1.bf16.msra.mxu0 %v7523_v58  ;;  %2362 = vmatpush1.bf16.msra.mxu1 %v7525_v60  ;;  %v52_v58 = vld [vmem:[#allocation2 + $0x20] sm:$0xff]  ;;  %v49_v60 = vld [vmem:[#allocation2 + $0x8] sm:$0xff] }
 0x107   :  { %2257 = vmatprep.subr.bf16.mxu0 %v7532_v61  ;;  %2363 = vmatprep.subr.bf16.mxu1 %v7534_v62  ;;  %v53_v61 = vld [vmem:[#allocation2 + $0x28] sm:$0xff]  ;;  %v7587_v62 = vcombine.low %v658_v51, %v662_v52  ;;  %v7600_v0 = vcombine.high %v48_v15, %v52_v58 }
 0x108   :  { %v7602_v1 = vcombine.high %v49_v60, %v53_v61  ;;  %v7601_v29 = vcombine.low %v49_v60, %v53_v61  ;;  %v112_v61 = vld [vmem:[#allocation2 + $0x200] sm:$0xff] }
 0x10a   :  { %2258 = vmatpush1.bf16.msra.mxu0 %v7531_v4  ;;  %2364 = vmatpush1.bf16.msra.mxu1 %v7533_v5  ;;  %v60_v4 = vld [vmem:[#allocation2 + $0x60] sm:$0xff]  ;;  %v57_v5 = vld [vmem:[#allocation2 + $0x48] sm:$0xff] }
 0x10b   :  { %2259 = vmatprep.subr.bf16.mxu0 %v7540_v6  ;;  %2365 = vmatprep.subr.bf16.mxu1 %v7542_v26  ;;  %v61_v6 = vld [vmem:[#allocation2 + $0x68] sm:$0xff]  ;;  %v7599_v26 = vcombine.low %v48_v15, %v52_v58  ;;  %v7608_v7 = vcombine.high %v56_v3, %v60_v4 }
 0x10c   :  { %v7610_v8 = vcombine.high %v57_v5, %v61_v6  ;;  %v7609_v16 = vcombine.low %v57_v5, %v61_v6  ;;  %v120_v6 = vld [vmem:[#allocation2 + $0x240] sm:$0xff] }
 0x10e   :  { %2260 = vmatpush1.bf16.msra.mxu0 %v7539_v11  ;;  %2366 = vmatpush1.bf16.msra.mxu1 %v7541_v12  ;;  %v68_v11 = vld [vmem:[#allocation2 + $0xa0] sm:$0xff]  ;;  %v65_v12 = vld [vmem:[#allocation2 + $0x88] sm:$0xff] }
 0x10f   :  { %2261 = vmatprep.subr.bf16.mxu0 %v7548_v13  ;;  %2367 = vmatprep.subr.bf16.mxu1 %v7550_v14  ;;  %v69_v13 = vld [vmem:[#allocation2 + $0xa8] sm:$0xff]  ;;  %v7607_v14 = vcombine.low %v56_v3, %v60_v4  ;;  %v7616_v17 = vcombine.high %v64_v10, %v68_v11 }
 0x110   :  { %v7618_v59 = vcombine.high %v65_v12, %v69_v13 }
 0x112   :  { %2262 = vmatpush1.bf16.msra.mxu0 %v7547_v19  ;;  %2368 = vmatpush1.bf16.msra.mxu1 %v7549_v20  ;;  %v76_v19 = vld [vmem:[#allocation2 + $0xe0] sm:$0xff]  ;;  %v73_v20 = vld [vmem:[#allocation2 + $0xc8] sm:$0xff] }
 0x113   :  { %2263 = vmatprep.subr.bf16.mxu0 %v7556_v21  ;;  %2369 = vmatprep.subr.bf16.mxu1 %v7558_v22  ;;  %v77_v21 = vld [vmem:[#allocation2 + $0xe8] sm:$0xff]  ;;  %v7615_v22 = vcombine.low %v64_v10, %v68_v11  ;;  %v7624_v23 = vcombine.high %v72_v18, %v76_v19  ;;  %v7623_v31 = vcombine.low %v72_v18, %v76_v19 }
 0x114   :  { %v7626_v28 = vcombine.high %v73_v20, %v77_v21  ;;  %v7625_v37 = vcombine.low %v73_v20, %v77_v21  ;;  %v136_v21 = vld [vmem:[#allocation2 + $0x2c0] sm:$0xff] }
 0x116   :  { %2264 = vmatpush1.bf16.msra.mxu0 %v7555_v32  ;;  %2370 = vmatpush1.bf16.msra.mxu1 %v7557_v33  ;;  %v8612_v32 = vld [vmem:[%s9120_s0] sm:$0xff]  ;;  %v8617_v33 = vld [vmem:[%s9120_s0 + $0x10] sm:$0xff] }
 0x117   :  { %2265 = vmatprep.subr.bf16.mxu0 %v7564_v34  ;;  %2371 = vmatprep.subr.bf16.mxu1 %v7566_v35  ;;  %v81_v34 = vld [vmem:[#allocation2 + $0x108] sm:$0xff] }
 0x118   :  { %v85_v35 = vld [vmem:[#allocation2 + $0x128] sm:$0xff] }
 0x119   :  { %v7634_v24 = vcombine.high %v81_v34, %v85_v35  ;;  %v7633_v44 = vcombine.low %v81_v34, %v85_v35  ;;  %v144_v35 = vld [vmem:[#allocation2 + $0x300] sm:$0xff] }
 0x11a   :  { %2266 = vmatpush1.bf16.msra.mxu0 %v7563_v39  ;;  %2372 = vmatpush1.bf16.msra.mxu1 %v7565_v40  ;;  %v88_v39 = vld [vmem:[#allocation2 + $0x140] sm:$0xff] }
 0x11b   :  { %2267 = vmatprep.subr.bf16.mxu0 %v7572_v41  ;;  %2373 = vmatprep.subr.bf16.mxu1 %v7574_v42  ;;  %v92_v40 = vld [vmem:[#allocation2 + $0x160] sm:$0xff]  ;;  %v89_v41 = vld [vmem:[#allocation2 + $0x148] sm:$0xff] }
 0x11c   :  { %v93_v42 = vld [vmem:[#allocation2 + $0x168] sm:$0xff] }
 0x11d   :  { %v7642_v45 = vcombine.high %v89_v41, %v93_v42  ;;  %v7641_v51 = vcombine.low %v89_v41, %v93_v42  ;;  %v152_v42 = vld [vmem:[#allocation2 + $0x340] sm:$0xff] }
 0x11e   :  { %2268 = vmatpush1.bf16.msra.mxu0 %v7571_v36  ;;  %2374 = vmatpush1.bf16.msra.mxu1 %v7573_v48  ;;  %v100_v36 = vld [vmem:[#allocation2 + $0x1a0] sm:$0xff]  ;;  %v97_v48 = vld [vmem:[#allocation2 + $0x188] sm:$0xff] }
 0x11f   :  { %2269 = vmatprep.subr.bf16.mxu0 %v7580_v49  ;;  %2375 = vmatprep.subr.bf16.mxu1 %v7582_v50  ;;  %v101_v49 = vld [vmem:[#allocation2 + $0x1a8] sm:$0xff]  ;;  %v7639_v50 = vcombine.low %v88_v39, %v92_v40  ;;  %v7648_v52 = vcombine.high %v96_v47, %v100_v36 }
 0x120   :  { %v7650_v53 = vcombine.high %v97_v48, %v101_v49  ;;  %v7649_v15 = vcombine.low %v97_v48, %v101_v49  ;;  %v160_v49 = vld [vmem:[#allocation2 + $0x380] sm:$0xff] }
 0x122   :  { %2270 = vmatpush1.bf16.msra.mxu0 %v7579_v55  ;;  %2376 = vmatpush1.bf16.msra.mxu1 %v7581_v56  ;;  %v108_v55 = vld [vmem:[#allocation2 + $0x1e0] sm:$0xff]  ;;  %v105_v56 = vld [vmem:[#allocation2 + $0x1c8] sm:$0xff] }
 0x123   :  { %2271 = vmatprep.subr.bf16.mxu0 %v7588_v27  ;;  %2377 = vmatprep.subr.bf16.mxu1 %v7590_v57  ;;  %v109_v27 = vld [vmem:[#allocation2 + $0x1e8] sm:$0xff]  ;;  %v7647_v57 = vcombine.low %v96_v47, %v100_v36  ;;  %v7656_v58 = vcombine.high %v104_v54, %v108_v55 }
 0x124   :  { %v7658_v60 = vcombine.high %v105_v56, %v109_v27  ;;  %v7657_v3 = vcombine.low %v105_v56, %v109_v27  ;;  %v168_v27 = vld [vmem:[#allocation2 + $0x3c0] sm:$0xff] }
 0x126   :  { %2272 = vmatpush1.bf16.msra.mxu0 %v7587_v62  ;;  %2378 = vmatpush1.bf16.msra.mxu1 %v7589_v63  ;;  %v116_v62 = vld [vmem:[#allocation2 + $0x220] sm:$0xff]  ;;  %v113_v63 = vld [vmem:[#allocation2 + $0x208] sm:$0xff] }
 0x127   :  { %3720 = vmatprep.subr.bf16.mxu0 %v7600_v0  ;;  %3826 = vmatprep.subr.bf16.mxu1 %v7602_v1  ;;  %v117_v0 = vld [vmem:[#allocation2 + $0x228] sm:$0xff]  ;;  %v7655_v1 = vcombine.low %v104_v54, %v108_v55  ;;  %v7664_v4 = vcombine.high %v112_v61, %v116_v62 }
 0x128   :  { %v7666_v5 = vcombine.high %v113_v63, %v117_v0  ;;  %v7665_v10 = vcombine.low %v113_v63, %v117_v0  ;;  %v176_v0 = vld [vmem:[#allocation2 + $0x400] sm:$0xff] }
 0x129   :  { %2274 = vmatmul.mubr.bf16.vlgmr.msra.gmra.mrb[8].mxu0 %v8579_v46  ;;  %2380 = vmatmul.mubr.bf16.vlgmr.msra.gmra.mrb[8].mxu1 %v8579_v46  ;;  %v7617_v46 = vcombine.low %v65_v12, %v69_v13  ;;  %v128_v13 = vld [vmem:[#allocation2 + $0x280] sm:$0xff] }
 0x12a   :  { %3721 = vmatpush1.bf16.msra.mxu0 %v7599_v26  ;;  %3827 = vmatpush1.bf16.msra.mxu1 %v7601_v29  ;;  %v124_v26 = vld [vmem:[#allocation2 + $0x260] sm:$0xff]  ;;  %v121_v29 = vld [vmem:[#allocation2 + $0x248] sm:$0xff] }
 0x12b   :  { %3722 = vmatprep.subr.bf16.mxu0 %v7608_v7  ;;  %3828 = vmatprep.subr.bf16.mxu1 %v7610_v8  ;;  %v125_v7 = vld [vmem:[#allocation2 + $0x268] sm:$0xff]  ;;  %v7663_v8 = vcombine.low %v112_v61, %v116_v62  ;;  %v7672_v11 = vcombine.high %v120_v6, %v124_v26 }
 0x12c   :  { %2283 = vmatprep.mubr.bf16.mxu0 %v8585_v25  ;;  %2389 = vmatprep.mubr.bf16.mxu1 %v8585_v25  ;;  %v8621_v25 = vcombine.high %v8612_v32, %v8617_v33  ;;  %v7674_v12 = vcombine.high %v121_v29, %v125_v7  ;;  %v7673_v18 = vcombine.low %v121_v29, %v125_v7  ;;  %v184_v7 = vld [vmem:[#allocation2 + $0x440] sm:$0xff] }
 0x12e   :  { %3723 = vmatpush1.bf16.msra.mxu0 %v7607_v14  ;;  %3829 = vmatpush1.bf16.msra.mxu1 %v7609_v16  ;;  %v132_v14 = vld [vmem:[#allocation2 + $0x2a0] sm:$0xff]  ;;  %v129_v16 = vld [vmem:[#allocation2 + $0x288] sm:$0xff] }
 0x12f   :  { %3724 = vmatprep.subr.bf16.mxu0 %v7616_v17  ;;  %3830 = vmatprep.subr.bf16.mxu1 %v7618_v59  ;;  %v133_v17 = vld [vmem:[#allocation2 + $0x2a8] sm:$0xff]  ;;  %v7671_v59 = vcombine.low %v120_v6, %v124_v26  ;;  %v7680_v19 = vcombine.high %v128_v13, %v132_v14 }
 0x130   :  { %v7682_v20 = vcombine.high %v129_v16, %v133_v17  ;;  %v7681_v9 = vcombine.low %v129_v16, %v133_v17 }
 0x131   :  { %2284 = vmatmul.mubr.bf16.gmra.mrb[12].mxu0 %v8591_v2  ;;  %2390 = vmatmul.mubr.bf16.gmra.mrb[12].mxu1 %v8591_v2  ;;  %v7640_v2 = vcombine.high %v88_v39, %v92_v40 }
 0x132   :  { %3725 = vmatpush1.bf16.msra.mxu0 %v7615_v22  ;;  %3831 = vmatpush1.bf16.msra.mxu1 %v7617_v46  ;;  %v140_v22 = vld [vmem:[#allocation2 + $0x2e0] sm:$0xff]  ;;  %v137_v46 = vld [vmem:[#allocation2 + $0x2c8] sm:$0xff] }
 0x133   :  { %3726 = vmatprep.subr.bf16.mxu0 %v7624_v23  ;;  %3832 = vmatprep.subr.bf16.mxu1 %v7626_v28  ;;  %v141_v23 = vld [vmem:[#allocation2 + $0x2e8] sm:$0xff]  ;;  %v7679_v28 = vcombine.low %v128_v13, %v132_v14  ;;  %v7688_v30 = vcombine.high %v136_v21, %v140_v22 }
 0x134   :  { %3752 = vmatprep.mubr.bf16.mxu0 %v8621_v25  ;;  %3858 = vmatprep.mubr.bf16.mxu1 %v8621_v25  ;;  %v7690_v34 = vcombine.high %v137_v46, %v141_v23  ;;  %v7689_v39 = vcombine.low %v137_v46, %v141_v23 }
 0x136   :  { %3727 = vmatpush1.bf16.msra.mxu0 %v7623_v31  ;;  %3833 = vmatpush1.bf16.msra.mxu1 %v7625_v37  ;;  %v148_v31 = vld [vmem:[#allocation2 + $0x320] sm:$0xff]  ;;  %v145_v37 = vld [vmem:[#allocation2 + $0x308] sm:$0xff] }
 0x137   :  { %3728 = vmatprep.subr.bf16.mxu0 %v7632_v38  ;;  %3834 = vmatprep.subr.bf16.mxu1 %v7634_v24  ;;  %v149_v38 = vld [vmem:[#allocation2 + $0x328] sm:$0xff]  ;;  %v7687_v24 = vcombine.low %v136_v21, %v140_v22  ;;  %v7696_v40 = vcombine.high %v144_v35, %v148_v31 }
 0x138   :  { %v7698_v41 = vcombine.high %v145_v37, %v149_v38  ;;  %v7697_v47 = vcombine.low %v145_v37, %v149_v38  ;;  %v197_v21 = vld [vmem:[#allocation2 + $0x4a8] sm:$0xff] }
 0x13a   :  { %3729 = vmatpush1.bf16.msra.mxu0 %v7631_v43  ;;  %3835 = vmatpush1.bf16.msra.mxu1 %v7633_v44  ;;  %v156_v43 = vld [vmem:[#allocation2 + $0x360] sm:$0xff]  ;;  %v153_v44 = vld [vmem:[#allocation2 + $0x348] sm:$0xff] }
 0x13b   :  { %3730 = vmatprep.subr.bf16.mxu0 %v7640_v2  ;;  %3836 = vmatprep.subr.bf16.mxu1 %v7642_v45  ;;  %v157_v2 = vld [vmem:[#allocation2 + $0x368] sm:$0xff]  ;;  %v7695_v45 = vcombine.low %v144_v35, %v148_v31  ;;  %v7704_v36 = vcombine.high %v152_v42, %v156_v43 }
 0x13c   :  { %v7706_v48 = vcombine.high %v153_v44, %v157_v2  ;;  %v7705_v54 = vcombine.low %v153_v44, %v157_v2  ;;  %v205_v35 = vld [vmem:[#allocation2 + $0x4e8] sm:$0xff] }
 0x13d   :  { %v209_v2 = vld [vmem:[#allocation2 + $0x508] sm:$0xff] }
 0x13e   :  { %3731 = vmatpush1.bf16.msra.mxu0 %v7639_v50  ;;  %3837 = vmatpush1.bf16.msra.mxu1 %v7641_v51  ;;  %v164_v50 = vld [vmem:[#allocation2 + $0x3a0] sm:$0xff]  ;;  %v161_v51 = vld [vmem:[#allocation2 + $0x388] sm:$0xff] }
 0x13f   :  { %3732 = vmatprep.subr.bf16.mxu0 %v7648_v52  ;;  %3838 = vmatprep.subr.bf16.mxu1 %v7650_v53  ;;  %v165_v52 = vld [vmem:[#allocation2 + $0x3a8] sm:$0xff]  ;;  %v7703_v53 = vcombine.low %v152_v42, %v156_v43  ;;  %v7712_v55 = vcombine.high %v160_v49, %v164_v50  ;;  %v8653_v43 = vld [vmem:[%s9120_s0 + $0x18] sm:$0xff] }
 0x140   :  { %v7714_v56 = vcombine.high %v161_v51, %v165_v52  ;;  %v7713_v61 = vcombine.low %v161_v51, %v165_v52  ;;  %v8648_v42 = vld [vmem:[%s9120_s0 + $0x8] sm:$0xff]  ;;  %v220_v51 = vld [vmem:[#allocation2 + $0x560] sm:$0xff] }
 0x141   :  { %v8657_v44 = vcombine.high %v8648_v42, %v8653_v43  ;;  %v217_v52 = vld [vmem:[#allocation2 + $0x548] sm:$0xff] }
 0x142   :  { %3733 = vmatpush1.bf16.msra.mxu0 %v7647_v57  ;;  %3839 = vmatpush1.bf16.msra.mxu1 %v7649_v15  ;;  %v172_v57 = vld [vmem:[#allocation2 + $0x3e0] sm:$0xff]  ;;  %v169_v15 = vld [vmem:[#allocation2 + $0x3c8] sm:$0xff] }
 0x143   :  { %3734 = vmatprep.subr.bf16.mxu0 %v7656_v58  ;;  %3840 = vmatprep.subr.bf16.mxu1 %v7658_v60  ;;  %v173_v58 = vld [vmem:[#allocation2 + $0x3e8] sm:$0xff]  ;;  %v7711_v60 = vcombine.low %v160_v49, %v164_v50  ;;  %v7720_v62 = vcombine.high %v168_v27, %v172_v57  ;;  %v216_v50 = vld [vmem:[#allocation2 + $0x540] sm:$0xff] }
 0x144   :  { %v7722_v63 = vcombine.high %v169_v15, %v173_v58  ;;  %v7721_v6 = vcombine.low %v169_v15, %v173_v58  ;;  %v228_v15 = vld [vmem:[#allocation2 + $0x5a0] sm:$0xff]  ;;  %v225_v58 = vld [vmem:[#allocation2 + $0x588] sm:$0xff] }
 0x146   :  { %3735 = vmatpush1.bf16.msra.mxu0 %v7655_v1  ;;  %3841 = vmatpush1.bf16.msra.mxu1 %v7657_v3  ;;  %v180_v1 = vld [vmem:[#allocation2 + $0x420] sm:$0xff]  ;;  %v177_v3 = vld [vmem:[#allocation2 + $0x408] sm:$0xff] }
 0x147   :  { %3736 = vmatprep.subr.bf16.mxu0 %v7664_v4  ;;  %3842 = vmatprep.subr.bf16.mxu1 %v7666_v5  ;;  %v181_v4 = vld [vmem:[#allocation2 + $0x428] sm:$0xff]  ;;  %v7719_v5 = vcombine.low %v168_v27, %v172_v57  ;;  %v7728_v26 = vcombine.high %v176_v0, %v180_v1  ;;  %v7727_v13 = vcombine.low %v176_v0, %v180_v1  ;;  %v224_v57 = vld [vmem:[#allocation2 + $0x580] sm:$0xff] }
 0x148   :  { %v7730_v29 = vcombine.high %v177_v3, %v181_v4  ;;  %v7729_v14 = vcombine.low %v177_v3, %v181_v4  ;;  %v232_v1 = vld [vmem:[#allocation2 + $0x5c0] sm:$0xff]  ;;  %v233_v4 = vld [vmem:[#allocation2 + $0x5c8] sm:$0xff] }
 0x149   :  { %v236_v3 = vld [vmem:[#allocation2 + $0x5e0] sm:$0xff] }
 0x14a   :  { %3737 = vmatpush1.bf16.msra.mxu0 %v7663_v8  ;;  %3843 = vmatpush1.bf16.msra.mxu1 %v7665_v10  ;;  %v188_v8 = vld [vmem:[#allocation2 + $0x460] sm:$0xff]  ;;  %v8629_v10 = vcombine.low %v8612_v32, %v8617_v33 }
 0x14b   :  { %3738 = vmatprep.subr.bf16.mxu0 %v7672_v11  ;;  %3844 = vmatprep.subr.bf16.mxu1 %v7674_v12  ;;  %v185_v11 = vld [vmem:[#allocation2 + $0x448] sm:$0xff]  ;;  %v7736_v16 = vcombine.high %v184_v7, %v188_v8  ;;  %v8379_v32 = vld [vmem:[%s9120_s0 + $0x40] sm:$0xff]  ;;  %v7735_v22 = vcombine.low %v184_v7, %v188_v8 }
 0x14c   :  { %v189_v12 = vld [vmem:[#allocation2 + $0x468] sm:$0xff]  ;;  %v240_v8 = vld [vmem:[#allocation2 + $0x600] sm:$0xff] }
 0x14d   :  { %v7738_v17 = vcombine.high %v185_v11, %v189_v12  ;;  %v7737_v46 = vcombine.low %v185_v11, %v189_v12  ;;  %v244_v11 = vld [vmem:[#allocation2 + $0x620] sm:$0xff]  ;;  %v241_v12 = vld [vmem:[#allocation2 + $0x608] sm:$0xff] }
 0x14e   :  { %3739 = vmatpush1.bf16.msra.mxu0 %v7671_v59  ;;  %3845 = vmatpush1.bf16.msra.mxu1 %v7673_v18  ;;  %v192_v59 = vld [vmem:[#allocation2 + $0x480] sm:$0xff] }
 0x14f   :  { %3740 = vmatprep.subr.bf16.mxu0 %v7680_v19  ;;  %3846 = vmatprep.subr.bf16.mxu1 %v7682_v20  ;;  %v196_v18 = vld [vmem:[#allocation2 + $0x4a0] sm:$0xff]  ;;  %v8378_v19 = vld [vmem:[%s9120_s0 + $0x30] sm:$0xff]  ;;  %v193_v20 = vld [vmem:[#allocation2 + $0x488] sm:$0xff] }
 0x150   :  { %v8637_v33 = vcombine.high %v8378_v19, %v8379_v32  ;;  %v7744_v23 = vcombine.high %v192_v59, %v196_v18  ;;  %v8643_v31 = vcombine.low %v8378_v19, %v8379_v32  ;;  %v7743_v37 = vcombine.low %v192_v59, %v196_v18  ;;  %v248_v18 = vld [vmem:[#allocation2 + $0x640] sm:$0xff]  ;;  %v249_v32 = vld [vmem:[#allocation2 + $0x648] sm:$0xff] }
 0x151   :  { %v7745_v38 = vcombine.low %v193_v20, %v197_v21  ;;  %v252_v19 = vld [vmem:[#allocation2 + $0x660] sm:$0xff] }
 0x152   :  { %3741 = vmatpush1.bf16.msra.mxu0 %v7679_v28  ;;  %3847 = vmatpush1.bf16.msra.mxu1 %v7681_v9  ;;  %v7746_v28 = vcombine.high %v193_v20, %v197_v21  ;;  %v200_v9 = vld [vmem:[#allocation2 + $0x4c0] sm:$0xff]  ;;  %v253_v20 = vld [vmem:[#allocation2 + $0x668] sm:$0xff]  ;;  %v7791_v21 = vcombine.low %v240_v8, %v244_v11 }
 0x153   :  { %3742 = vmatprep.subr.bf16.mxu0 %v7688_v30  ;;  %3848 = vmatprep.subr.bf16.mxu1 %v7690_v34  ;;  %v204_v30 = vld [vmem:[#allocation2 + $0x4e0] sm:$0xff]  ;;  %v201_v34 = vld [vmem:[#allocation2 + $0x4c8] sm:$0xff] }
 0x156   :  { %3743 = vmatpush1.bf16.msra.mxu0 %v7687_v24  ;;  %3849 = vmatpush1.bf16.msra.mxu1 %v7689_v39  ;;  %v7752_v24 = vcombine.high %v200_v9, %v204_v30  ;;  %v7754_v39 = vcombine.high %v201_v34, %v205_v35 }
 0x157   :  { %3744 = vmatprep.subr.bf16.mxu0 %v7696_v40  ;;  %3850 = vmatprep.subr.bf16.mxu1 %v7698_v41  ;;  %v208_v40 = vld [vmem:[#allocation2 + $0x500] sm:$0xff] }
 0x158   :  { %v212_v41 = vld [vmem:[#allocation2 + $0x520] sm:$0xff] }
 0x15a   :  { %3745 = vmatpush1.bf16.msra.mxu0 %v7695_v45  ;;  %3851 = vmatpush1.bf16.msra.mxu1 %v7697_v47  ;;  %v213_v45 = vld [vmem:[#allocation2 + $0x528] sm:$0xff]  ;;  %v7751_v47 = vcombine.low %v200_v9, %v204_v30  ;;  %v260_v9 = vld [vmem:[#allocation2 + $0x6a0] sm:$0xff] }
 0x15b   :  { %3746 = vmatprep.subr.bf16.mxu0 %v7704_v36  ;;  %3852 = vmatprep.subr.bf16.mxu1 %v7706_v48  ;;  %v7753_v36 = vcombine.low %v201_v34, %v205_v35  ;;  %v7760_v48 = vcombine.high %v208_v40, %v212_v41  ;;  %v7762_v49 = vcombine.high %v209_v2, %v213_v45  ;;  %v257_v30 = vld [vmem:[#allocation2 + $0x688] sm:$0xff] }
 0x15c   :  { %v261_v34 = vld [vmem:[#allocation2 + $0x6a8] sm:$0xff]  ;;  %v7799_v35 = vcombine.low %v248_v18, %v252_v19 }
 0x15e   :  { %3747 = vmatpush1.bf16.msra.mxu0 %v7703_v53  ;;  %3853 = vmatpush1.bf16.msra.mxu1 %v7705_v54  ;;  %v221_v53 = vld [vmem:[#allocation2 + $0x568] sm:$0xff]  ;;  %v7759_v54 = vcombine.low %v208_v40, %v212_v41  ;;  %v268_v40 = vld [vmem:[#allocation2 + $0x6e0] sm:$0xff] }
 0x15f   :  { %3748 = vmatprep.subr.bf16.mxu0 %v7712_v55  ;;  %3854 = vmatprep.subr.bf16.mxu1 %v7714_v56  ;;  %v7761_v55 = vcombine.low %v209_v2, %v213_v45  ;;  %v7768_v56 = vcombine.high %v216_v50, %v220_v51  ;;  %v7770_v27 = vcombine.high %v217_v52, %v221_v53  ;;  %v265_v41 = vld [vmem:[#allocation2 + $0x6c8] sm:$0xff] }
 0x160   :  { %v269_v2 = vld [vmem:[#allocation2 + $0x6e8] sm:$0xff] }
 0x162   :  { %3749 = vmatpush1.bf16.msra.mxu0 %v7711_v60  ;;  %3855 = vmatpush1.bf16.msra.mxu1 %v7713_v61  ;;  %v229_v60 = vld [vmem:[#allocation2 + $0x5a8] sm:$0xff]  ;;  %v7767_v61 = vcombine.low %v216_v50, %v220_v51  ;;  %v276_v50 = vld [vmem:[#allocation2 + $0x720] sm:$0xff] }
 0x163   :  { %3750 = vmatprep.subr.bf16.mxu0 %v7720_v62  ;;  %3856 = vmatprep.subr.bf16.mxu1 %v7722_v63  ;;  %v7769_v62 = vcombine.low %v217_v52, %v221_v53  ;;  %v7776_v63 = vcombine.high %v224_v57, %v228_v15  ;;  %v7778_v0 = vcombine.high %v225_v58, %v229_v60  ;;  %v273_v51 = vld [vmem:[#allocation2 + $0x708] sm:$0xff] }
 0x164   :  { %v277_v52 = vld [vmem:[#allocation2 + $0x728] sm:$0xff] }
 0x166   :  { %3751 = vmatpush1.bf16.msra.mxu0 %v7719_v5  ;;  %3857 = vmatpush1.bf16.msra.mxu1 %v7721_v6  ;;  %v237_v5 = vld [vmem:[#allocation2 + $0x5e8] sm:$0xff]  ;;  %v7775_v6 = vcombine.low %v224_v57, %v228_v15  ;;  %v284_v57 = vld [vmem:[#allocation2 + $0x760] sm:$0xff] }
 0x167   :  { %3773 = vmatprep.subr.bf16.mxu0 %v7728_v26  ;;  %3879 = vmatprep.subr.bf16.mxu1 %v7730_v29  ;;  %v7777_v26 = vcombine.low %v225_v58, %v229_v60  ;;  %v7784_v29 = vcombine.high %v232_v1, %v236_v3  ;;  %v7786_v7 = vcombine.high %v233_v4, %v237_v5  ;;  %v281_v15 = vld [vmem:[#allocation2 + $0x748] sm:$0xff] }
 0x168   :  { %v285_v58 = vld [vmem:[#allocation2 + $0x768] sm:$0xff] }
 0x169   :  { %3753 = vmatmul.mubr.bf16.vlgmr.msra.gmra.mrb[0].mxu0 %v8629_v10  ;;  %3859 = vmatmul.mubr.bf16.vlgmr.msra.gmra.mrb[0].mxu1 %v8629_v10 }
 0x16a   :  { %3774 = vmatpush1.bf16.msra.mxu0 %v7727_v13  ;;  %3880 = vmatpush1.bf16.msra.mxu1 %v7729_v14  ;;  %v245_v13 = vld [vmem:[#allocation2 + $0x628] sm:$0xff]  ;;  %v7783_v14 = vcombine.low %v232_v1, %v236_v3  ;;  %v292_v1 = vld [vmem:[#allocation2 + $0x7a0] sm:$0xff] }
 0x16b   :  { %3775 = vmatprep.subr.bf16.mxu0 %v7736_v16  ;;  %3881 = vmatprep.subr.bf16.mxu1 %v7738_v17  ;;  %v7785_v16 = vcombine.low %v233_v4, %v237_v5  ;;  %v7792_v17 = vcombine.high %v240_v8, %v244_v11  ;;  %v7794_v59 = vcombine.high %v241_v12, %v245_v13  ;;  %v289_v3 = vld [vmem:[#allocation2 + $0x788] sm:$0xff]  ;;  %v300_v8 = vld [vmem:[#allocation2 + $0x7e0] sm:$0xff] }
 0x16c   :  { %3762 = vmatprep.mubr.bf16.mxu0 %v8637_v33  ;;  %3868 = vmatprep.mubr.bf16.mxu1 %v8637_v33  ;;  %v293_v4 = vld [vmem:[#allocation2 + $0x7a8] sm:$0xff] }
 0x16d   :  { %v297_v11 = vld [vmem:[#allocation2 + $0x7c8] sm:$0xff] }
 0x16e   :  { %3776 = vmatpush1.bf16.msra.mxu0 %v7735_v22  ;;  %3882 = vmatpush1.bf16.msra.mxu1 %v7737_v46  ;;  %v7793_v22 = vcombine.low %v241_v12, %v245_v13  ;;  %v7800_v46 = vcombine.high %v248_v18, %v252_v19  ;;  %v301_v12 = vld [vmem:[#allocation2 + $0x7e8] sm:$0xff]  ;;  %v54_v18 = vld [vmem:[#allocation2 + $0x30] sm:$0xff]  ;;  %v51_v19 = vld [vmem:[#allocation2 + $0x18] sm:$0xff] }
 0x16f   :  { %3777 = vmatprep.subr.bf16.mxu0 %v7744_v23  ;;  %3883 = vmatprep.subr.bf16.mxu1 %v7746_v28  ;;  %v7802_v23 = vcombine.high %v249_v32, %v253_v20  ;;  %v256_v28 = vld [vmem:[#allocation2 + $0x680] sm:$0xff] }
 0x170   :  { %v7807_v45 = vcombine.low %v256_v28, %v260_v9 }
 0x171   :  { %3763 = vmatmul.mubr.bf16.gmra.mrb[4].mxu0 %v8643_v31  ;;  %3869 = vmatmul.mubr.bf16.gmra.mrb[4].mxu1 %v8643_v31 }
 0x172   :  { %3778 = vmatpush1.bf16.msra.mxu0 %v7743_v37  ;;  %3884 = vmatpush1.bf16.msra.mxu1 %v7745_v38  ;;  %v7801_v37 = vcombine.low %v249_v32, %v253_v20  ;;  %v7808_v38 = vcombine.high %v256_v28, %v260_v9  ;;  %v55_v32 = vld [vmem:[#allocation2 + $0x38] sm:$0xff]  ;;  %v62_v28 = vld [vmem:[#allocation2 + $0x70] sm:$0xff]  ;;  %v8665_v9 = vcombine.low %v8648_v42, %v8653_v43  ;;  %v8383_v42 = vld [vmem:[%s9120_s0 + $0x48] sm:$0xff] }
 0x173   :  { %3779 = vmatprep.subr.bf16.mxu0 %v7752_v24  ;;  %3885 = vmatprep.subr.bf16.mxu1 %v7754_v39  ;;  %v7810_v24 = vcombine.high %v257_v30, %v261_v34  ;;  %v264_v39 = vld [vmem:[#allocation2 + $0x6c0] sm:$0xff] }
 0x174   :  { %3805 = vmatprep.mubr.bf16.mxu0 %v8657_v44  ;;  %3911 = vmatprep.mubr.bf16.mxu1 %v8657_v44  ;;  %v7815_v53 = vcombine.low %v264_v39, %v268_v40 }
 0x176   :  { %3780 = vmatpush1.bf16.msra.mxu0 %v7751_v47  ;;  %3886 = vmatpush1.bf16.msra.mxu1 %v7753_v36  ;;  %v7809_v47 = vcombine.low %v257_v30, %v261_v34  ;;  %v7816_v36 = vcombine.high %v264_v39, %v268_v40  ;;  %v59_v30 = vld [vmem:[#allocation2 + $0x58] sm:$0xff]  ;;  %v66_v39 = vld [vmem:[#allocation2 + $0x90] sm:$0xff] }
 0x177   :  { %3781 = vmatprep.subr.bf16.mxu0 %v7760_v48  ;;  %3887 = vmatprep.subr.bf16.mxu1 %v7762_v49  ;;  %v7818_v48 = vcombine.high %v265_v41, %v269_v2  ;;  %v272_v49 = vld [vmem:[#allocation2 + $0x700] sm:$0xff]  ;;  %v63_v34 = vld [vmem:[#allocation2 + $0x78] sm:$0xff]  ;;  %v70_v40 = vld [vmem:[#allocation2 + $0xb0] sm:$0xff] }
 0x178   :  { %v7823_v60 = vcombine.low %v272_v49, %v276_v50 }
 0x17a   :  { %3782 = vmatpush1.bf16.msra.mxu0 %v7759_v54  ;;  %3888 = vmatpush1.bf16.msra.mxu1 %v7761_v55  ;;  %v7817_v54 = vcombine.low %v265_v41, %v269_v2  ;;  %v7824_v55 = vcombine.high %v272_v49, %v276_v50  ;;  %v8382_v41 = vld [vmem:[%s9120_s0 + $0x38] sm:$0xff]  ;;  %v74_v50 = vld [vmem:[#allocation2 + $0xd0] sm:$0xff] }
 0x17b   :  { %3783 = vmatprep.subr.bf16.mxu0 %v7768_v56  ;;  %3889 = vmatprep.subr.bf16.mxu1 %v7770_v27  ;;  %v7826_v56 = vcombine.high %v273_v51, %v277_v52  ;;  %v280_v27 = vld [vmem:[#allocation2 + $0x740] sm:$0xff]  ;;  %v8673_v43 = vcombine.high %v8382_v41, %v8383_v42  ;;  %v67_v2 = vld [vmem:[#allocation2 + $0x98] sm:$0xff] }
 0x17c   :  { %v7831_v5 = vcombine.low %v280_v27, %v284_v57 }
 0x17e   :  { %3784 = vmatpush1.bf16.msra.mxu0 %v7767_v61  ;;  %3890 = vmatpush1.bf16.msra.mxu1 %v7769_v62  ;;  %v7825_v61 = vcombine.low %v273_v51, %v277_v52  ;;  %v7832_v62 = vcombine.high %v280_v27, %v284_v57  ;;  %v78_v51 = vld [vmem:[#allocation2 + $0xf0] sm:$0xff]  ;;  %v75_v52 = vld [vmem:[#allocation2 + $0xd8] sm:$0xff] }
 0x17f   :  { %3785 = vmatprep.subr.bf16.mxu0 %v7776_v63  ;;  %3891 = vmatprep.subr.bf16.mxu1 %v7778_v0  ;;  %v7834_v63 = vcombine.high %v281_v15, %v285_v58  ;;  %v288_v0 = vld [vmem:[#allocation2 + $0x780] sm:$0xff]  ;;  %v7628_v27 = vcombine.high %v74_v50, %v78_v51 }
 0x180   :  { %v7839_v13 = vcombine.low %v288_v0, %v292_v1 }
 0x182   :  { %3786 = vmatpush1.bf16.msra.mxu0 %v7775_v6  ;;  %3892 = vmatpush1.bf16.msra.mxu1 %v7777_v26  ;;  %v7833_v6 = vcombine.low %v281_v15, %v285_v58  ;;  %v7840_v26 = vcombine.high %v288_v0, %v292_v1  ;;  %v82_v15 = vld [vmem:[#allocation2 + $0x110] sm:$0xff] }
 0x183   :  { %3787 = vmatprep.subr.bf16.mxu0 %v7784_v29  ;;  %3893 = vmatprep.subr.bf16.mxu1 %v7786_v7  ;;  %v7842_v29 = vcombine.high %v289_v3, %v293_v4  ;;  %v296_v7 = vld [vmem:[#allocation2 + $0x7c0] sm:$0xff]  ;;  %v86_v58 = vld [vmem:[#allocation2 + $0x130] sm:$0xff] }
 0x184   :  { %v7847_v20 = vcombine.low %v296_v7, %v300_v8  ;;  %v7636_v0 = vcombine.high %v82_v15, %v86_v58 }
 0x186   :  { %3788 = vmatpush1.bf16.msra.mxu0 %v7783_v14  ;;  %3894 = vmatpush1.bf16.msra.mxu1 %v7785_v16  ;;  %v7841_v14 = vcombine.low %v289_v3, %v293_v4  ;;  %v7848_v16 = vcombine.high %v296_v7, %v300_v8  ;;  %v90_v3 = vld [vmem:[#allocation2 + $0x150] sm:$0xff] }
 0x187   :  { %3789 = vmatprep.subr.bf16.mxu0 %v7792_v17  ;;  %3895 = vmatprep.subr.bf16.mxu1 %v7794_v59  ;;  %v7850_v17 = vcombine.high %v297_v11, %v301_v12  ;;  %v50_v59 = vld [vmem:[#allocation2 + $0x10] sm:$0xff] }
 0x188   :  { %v94_v4 = vld [vmem:[#allocation2 + $0x170] sm:$0xff] }
 0x189   :  { %v7644_v7 = vcombine.high %v90_v3, %v94_v4 }
 0x18a   :  { %3790 = vmatpush1.bf16.msra.mxu0 %v7791_v21  ;;  %3896 = vmatpush1.bf16.msra.mxu1 %v7793_v22  ;;  %v7849_v21 = vcombine.low %v297_v11, %v301_v12  ;;  %v7604_v22 = vcombine.high %v50_v59, %v54_v18  ;;  %v98_v11 = vld [vmem:[#allocation2 + $0x190] sm:$0xff] }
 0x18b   :  { %3791 = vmatprep.subr.bf16.mxu0 %v7800_v46  ;;  %3897 = vmatprep.subr.bf16.mxu1 %v7802_v23  ;;  %v7606_v46 = vcombine.high %v51_v19, %v55_v32  ;;  %v58_v23 = vld [vmem:[#allocation2 + $0x50] sm:$0xff] }
 0x18c   :  { %v102_v12 = vld [vmem:[#allocation2 + $0x1b0] sm:$0xff] }
 0x18e   :  { %3792 = vmatpush1.bf16.msra.mxu0 %v7799_v35  ;;  %3898 = vmatpush1.bf16.msra.mxu1 %v7801_v37  ;;  %v7603_v35 = vcombine.low %v50_v59, %v54_v18  ;;  %v7605_v37 = vcombine.low %v51_v19, %v55_v32  ;;  %v7652_v59 = vcombine.high %v98_v11, %v102_v12  ;;  %v106_v18 = vld [vmem:[#allocation2 + $0x1d0] sm:$0xff]  ;;  %v107_v32 = vld [vmem:[#allocation2 + $0x1d8] sm:$0xff] }
 0x18f   :  { %3793 = vmatprep.subr.bf16.mxu0 %v7808_v38  ;;  %3899 = vmatprep.subr.bf16.mxu1 %v7810_v24  ;;  %v7612_v38 = vcombine.high %v58_v23, %v62_v28  ;;  %v7614_v24 = vcombine.high %v59_v30, %v63_v34  ;;  %v110_v19 = vld [vmem:[#allocation2 + $0x1f0] sm:$0xff] }
 0x192   :  { %3794 = vmatpush1.bf16.msra.mxu0 %v7807_v45  ;;  %3900 = vmatpush1.bf16.msra.mxu1 %v7809_v47  ;;  %v71_v45 = vld [vmem:[#allocation2 + $0xb8] sm:$0xff]  ;;  %v7611_v47 = vcombine.low %v58_v23, %v62_v28  ;;  %v114_v28 = vld [vmem:[#allocation2 + $0x210] sm:$0xff] }
 0x193   :  { %3795 = vmatprep.subr.bf16.mxu0 %v7816_v36  ;;  %3901 = vmatprep.subr.bf16.mxu1 %v7818_v48  ;;  %v7613_v36 = vcombine.low %v59_v30, %v63_v34  ;;  %v7620_v48 = vcombine.high %v66_v39, %v70_v40  ;;  %v7622_v49 = vcombine.high %v67_v2, %v71_v45  ;;  %v118_v30 = vld [vmem:[#allocation2 + $0x230] sm:$0xff]  ;;  %v115_v34 = vld [vmem:[#allocation2 + $0x218] sm:$0xff] }
 0x196   :  { %3796 = vmatpush1.bf16.msra.mxu0 %v7815_v53  ;;  %3902 = vmatpush1.bf16.msra.mxu1 %v7817_v54  ;;  %v79_v53 = vld [vmem:[#allocation2 + $0xf8] sm:$0xff]  ;;  %v8679_v54 = vcombine.low %v8382_v41, %v8383_v42  ;;  %v126_v41 = vld [vmem:[#allocation2 + $0x270] sm:$0xff] }
 0x197   :  { %3797 = vmatprep.subr.bf16.mxu0 %v7824_v55  ;;  %3903 = vmatprep.subr.bf16.mxu1 %v7826_v56  ;;  %v7619_v55 = vcombine.low %v66_v39, %v70_v40  ;;  %v7621_v56 = vcombine.low %v67_v2, %v71_v45  ;;  %v7630_v57 = vcombine.high %v75_v52, %v79_v53  ;;  %v122_v40 = vld [vmem:[#allocation2 + $0x250] sm:$0xff]  ;;  %v123_v42 = vld [vmem:[#allocation2 + $0x258] sm:$0xff] }
 0x198   :  { %v127_v2 = vld [vmem:[#allocation2 + $0x278] sm:$0xff]  ;;  %v7667_v45 = vcombine.low %v114_v28, %v118_v30 }
 0x19a   :  { %3798 = vmatpush1.bf16.msra.mxu0 %v7823_v60  ;;  %3904 = vmatpush1.bf16.msra.mxu1 %v7825_v61  ;;  %v83_v60 = vld [vmem:[#allocation2 + $0x118] sm:$0xff] }
 0x19b   :  { %3799 = vmatprep.subr.bf16.mxu0 %v7832_v62  ;;  %3905 = vmatprep.subr.bf16.mxu1 %v7834_v63  ;;  %v87_v61 = vld [vmem:[#allocation2 + $0x138] sm:$0xff]  ;;  %v7627_v62 = vcombine.low %v74_v50, %v78_v51  ;;  %v7629_v63 = vcombine.low %v75_v52, %v79_v53  ;;  %v134_v50 = vld [vmem:[#allocation2 + $0x2b0] sm:$0xff]  ;;  %v7675_v53 = vcombine.low %v122_v40, %v126_v41 }
 0x19c   :  { %v7638_v1 = vcombine.high %v83_v60, %v87_v61  ;;  %v131_v51 = vld [vmem:[#allocation2 + $0x298] sm:$0xff] }
 0x19d   :  { %v135_v52 = vld [vmem:[#allocation2 + $0x2b8] sm:$0xff] }
 0x19e   :  { %3800 = vmatpush1.bf16.msra.mxu0 %v7831_v5  ;;  %3906 = vmatpush1.bf16.msra.mxu1 %v7833_v6  ;;  %v91_v5 = vld [vmem:[#allocation2 + $0x158] sm:$0xff] }
 0x19f   :  { %3801 = vmatprep.subr.bf16.mxu0 %v7840_v26  ;;  %3907 = vmatprep.subr.bf16.mxu1 %v7842_v29  ;;  %v95_v6 = vld [vmem:[#allocation2 + $0x178] sm:$0xff]  ;;  %v7635_v26 = vcombine.low %v82_v15, %v86_v58  ;;  %v7637_v29 = vcombine.low %v83_v60, %v87_v61  ;;  %v142_v15 = vld [vmem:[#allocation2 + $0x2f0] sm:$0xff] }
 0x1a0   :  { %v7646_v8 = vcombine.high %v91_v5, %v95_v6  ;;  %v139_v58 = vld [vmem:[#allocation2 + $0x2d8] sm:$0xff] }
 0x1a1   :  { %v143_v60 = vld [vmem:[#allocation2 + $0x2f8] sm:$0xff] }
 0x1a2   :  { %3802 = vmatpush1.bf16.msra.mxu0 %v7839_v13  ;;  %3908 = vmatpush1.bf16.msra.mxu1 %v7841_v14  ;;  %v99_v13 = vld [vmem:[#allocation2 + $0x198] sm:$0xff] }
 0x1a3   :  { %3803 = vmatprep.subr.bf16.mxu0 %v7848_v16  ;;  %3909 = vmatprep.subr.bf16.mxu1 %v7850_v17  ;;  %v103_v14 = vld [vmem:[#allocation2 + $0x1b8] sm:$0xff]  ;;  %v7643_v16 = vcombine.low %v90_v3, %v94_v4  ;;  %v7645_v17 = vcombine.low %v91_v5, %v95_v6  ;;  %v150_v3 = vld [vmem:[#allocation2 + $0x330] sm:$0xff] }
 0x1a4   :  { %v147_v4 = vld [vmem:[#allocation2 + $0x318] sm:$0xff] }
 0x1a5   :  { %v151_v5 = vld [vmem:[#allocation2 + $0x338] sm:$0xff] }
 0x1a6   :  { %3804 = vmatpush1.bf16.msra.mxu0 %v7847_v20  ;;  %3910 = vmatpush1.bf16.msra.mxu1 %v7849_v21  ;;  %v111_v20 = vld [vmem:[#allocation2 + $0x1f8] sm:$0xff]  ;;  %v7651_v21 = vcombine.low %v98_v11, %v102_v12  ;;  %v158_v11 = vld [vmem:[#allocation2 + $0x370] sm:$0xff] }
 0x1a7   :  { %3932 = vmatprep.subr.bf16.mxu0 %v7604_v22  ;;  %4038 = vmatprep.subr.bf16.mxu1 %v7606_v46  ;;  %v7653_v22 = vcombine.low %v99_v13, %v103_v14  ;;  %v7660_v46 = vcombine.high %v106_v18, %v110_v19  ;;  %v7662_v23 = vcombine.high %v107_v32, %v111_v20  ;;  %v155_v12 = vld [vmem:[#allocation2 + $0x358] sm:$0xff] }
 0x1a9   :  { %3806 = vmatmul.mubr.bf16.vlgmr.msra.gmra.mrb[0].mxu0 %v8665_v9  ;;  %3912 = vmatmul.mubr.bf16.vlgmr.msra.gmra.mrb[0].mxu1 %v8665_v9 }
 0x1aa   :  { %3933 = vmatpush1.bf16.msra.mxu0 %v7603_v35  ;;  %4039 = vmatpush1.bf16.msra.mxu1 %v7605_v37  ;;  %v119_v35 = vld [vmem:[#allocation2 + $0x238] sm:$0xff]  ;;  %v7659_v37 = vcombine.low %v106_v18, %v110_v19  ;;  %v166_v18 = vld [vmem:[#allocation2 + $0x3b0] sm:$0xff] }
 0x1ab   :  { %3934 = vmatprep.subr.bf16.mxu0 %v7612_v38  ;;  %4040 = vmatprep.subr.bf16.mxu1 %v7614_v24  ;;  %v7661_v38 = vcombine.low %v107_v32, %v111_v20  ;;  %v7668_v24 = vcombine.high %v114_v28, %v118_v30  ;;  %v7670_v39 = vcombine.high %v115_v34, %v119_v35  ;;  %v163_v19 = vld [vmem:[#allocation2 + $0x398] sm:$0xff]  ;;  %v174_v28 = vld [vmem:[#allocation2 + $0x3f0] sm:$0xff] }
 0x1ac   :  { %3815 = vmatprep.mubr.bf16.mxu0 %v8673_v43  ;;  %3921 = vmatprep.mubr.bf16.mxu1 %v8673_v43  ;;  %v167_v32 = vld [vmem:[#allocation2 + $0x3b8] sm:$0xff] }
 0x1ad   :  { %v171_v30 = vld [vmem:[#allocation2 + $0x3d8] sm:$0xff] }
 0x1ae   :  { %3935 = vmatpush1.bf16.msra.mxu0 %v7611_v47  ;;  %4041 = vmatpush1.bf16.msra.mxu1 %v7613_v36  ;;  %v7669_v47 = vcombine.low %v115_v34, %v119_v35  ;;  %v7676_v36 = vcombine.high %v122_v40, %v126_v41  ;;  %v175_v34 = vld [vmem:[#allocation2 + $0x3f8] sm:$0xff]  ;;  %v182_v40 = vld [vmem:[#allocation2 + $0x430] sm:$0xff] }
 0x1af   :  { %3936 = vmatprep.subr.bf16.mxu0 %v7620_v48  ;;  %4042 = vmatprep.subr.bf16.mxu1 %v7622_v49  ;;  %v7678_v48 = vcombine.high %v123_v42, %v127_v2  ;;  %v130_v49 = vld [vmem:[#allocation2 + $0x290] sm:$0xff]  ;;  %v179_v41 = vld [vmem:[#allocation2 + $0x418] sm:$0xff] }
 0x1b0   :  { %v7683_v61 = vcombine.low %v130_v49, %v134_v50 }
 0x1b1   :  { %3816 = vmatmul.mubr.bf16.gmra.mrb[4].mxu0 %v8679_v54  ;;  %3922 = vmatmul.mubr.bf16.gmra.mrb[4].mxu1 %v8679_v54 }
 0x1b2   :  { %3937 = vmatpush1.bf16.msra.mxu0 %v7619_v55  ;;  %4043 = vmatpush1.bf16.msra.mxu1 %v7621_v56  ;;  %v7677_v55 = vcombine.low %v123_v42, %v127_v2  ;;  %v7684_v56 = vcombine.high %v130_v49, %v134_v50  ;;  %v183_v42 = vld [vmem:[#allocation2 + $0x438] sm:$0xff]  ;;  %v190_v49 = vld [vmem:[#allocation2 + $0x470] sm:$0xff] }
 0x1b3   :  { %3938 = vmatprep.subr.bf16.mxu0 %v7628_v27  ;;  %4044 = vmatprep.subr.bf16.mxu1 %v7630_v57  ;;  %v7686_v27 = vcombine.high %v131_v51, %v135_v52  ;;  %v138_v57 = vld [vmem:[#allocation2 + $0x2d0] sm:$0xff]  ;;  %v187_v50 = vld [vmem:[#allocation2 + $0x458] sm:$0xff] }
 0x1b4   :  { %3964 = vmatprep.mubr.bf16.mxu0 %v8621_v25  ;;  %4070 = vmatprep.mubr.bf16.mxu1 %v8621_v25  ;;  %v7654_v25 = vcombine.high %v99_v13, %v103_v14  ;;  %v7691_v6 = vcombine.low %v138_v57, %v142_v15  ;;  %v159_v13 = vld [vmem:[#allocation2 + $0x378] sm:$0xff] }
 0x1b6   :  { %3939 = vmatpush1.bf16.msra.mxu0 %v7627_v62  ;;  %4045 = vmatpush1.bf16.msra.mxu1 %v7629_v63  ;;  %v7685_v62 = vcombine.low %v131_v51, %v135_v52  ;;  %v7692_v63 = vcombine.high %v138_v57, %v142_v15  ;;  %v191_v51 = vld [vmem:[#allocation2 + $0x478] sm:$0xff]  ;;  %v198_v57 = vld [vmem:[#allocation2 + $0x4b0] sm:$0xff] }
 0x1b7   :  { %3940 = vmatprep.subr.bf16.mxu0 %v7636_v0  ;;  %4046 = vmatprep.subr.bf16.mxu1 %v7638_v1  ;;  %v7694_v0 = vcombine.high %v139_v58, %v143_v60  ;;  %v146_v1 = vld [vmem:[#allocation2 + $0x310] sm:$0xff]  ;;  %v195_v15 = vld [vmem:[#allocation2 + $0x498] sm:$0xff] }
 0x1b8   :  { %v7699_v14 = vcombine.low %v146_v1, %v150_v3 }
 0x1ba   :  { %3941 = vmatpush1.bf16.msra.mxu0 %v7635_v26  ;;  %4047 = vmatpush1.bf16.msra.mxu1 %v7637_v29  ;;  %v7693_v26 = vcombine.low %v139_v58, %v143_v60  ;;  %v7700_v29 = vcombine.high %v146_v1, %v150_v3  ;;  %v199_v58 = vld [vmem:[#allocation2 + $0x4b8] sm:$0xff]  ;;  %v206_v1 = vld [vmem:[#allocation2 + $0x4f0] sm:$0xff] }
 0x1bb   :  { %3942 = vmatprep.subr.bf16.mxu0 %v7644_v7  ;;  %4048 = vmatprep.subr.bf16.mxu1 %v7646_v8  ;;  %v7702_v7 = vcombine.high %v147_v4, %v151_v5  ;;  %v154_v8 = vld [vmem:[#allocation2 + $0x350] sm:$0xff]  ;;  %v203_v3 = vld [vmem:[#allocation2 + $0x4d8] sm:$0xff] }
 0x1bc   :  { %v7707_v20 = vcombine.low %v154_v8, %v158_v11 }
 0x1be   :  { %3943 = vmatpush1.bf16.msra.mxu0 %v7643_v16  ;;  %4049 = vmatpush1.bf16.msra.mxu1 %v7645_v17  ;;  %v7701_v16 = vcombine.low %v147_v4, %v151_v5  ;;  %v7708_v17 = vcombine.high %v154_v8, %v158_v11  ;;  %v207_v4 = vld [vmem:[#allocation2 + $0x4f8] sm:$0xff] }
 0x1bf   :  { %3944 = vmatprep.subr.bf16.mxu0 %v7652_v59  ;;  %4050 = vmatprep.subr.bf16.mxu1 %v7654_v25  ;;  %v7710_v59 = vcombine.high %v155_v12, %v159_v13  ;;  %v162_v25 = vld [vmem:[#allocation2 + $0x390] sm:$0xff]  ;;  %v211_v8 = vld [vmem:[#allocation2 + $0x518] sm:$0xff] }
 0x1c0   :  { %v7715_v35 = vcombine.low %v162_v25, %v166_v18  ;;  %v215_v11 = vld [vmem:[#allocation2 + $0x538] sm:$0xff] }
 0x1c2   :  { %3945 = vmatpush1.bf16.msra.mxu0 %v7651_v21  ;;  %4051 = vmatpush1.bf16.msra.mxu1 %v7653_v22  ;;  %v7709_v21 = vcombine.low %v155_v12, %v159_v13  ;;  %v7716_v22 = vcombine.high %v162_v25, %v166_v18  ;;  %v223_v25 = vld [vmem:[#allocation2 + $0x578] sm:$0xff] }
 0x1c3   :  { %3946 = vmatprep.subr.bf16.mxu0 %v7660_v46  ;;  %4052 = vmatprep.subr.bf16.mxu1 %v7662_v23  ;;  %v7718_v46 = vcombine.high %v163_v19, %v167_v32  ;;  %v170_v23 = vld [vmem:[#allocation2 + $0x3d0] sm:$0xff] }
 0x1c4   :  { %v7723_v2 = vcombine.low %v170_v23, %v174_v28 }
 0x1c6   :  { %3947 = vmatpush1.bf16.msra.mxu0 %v7659_v37  ;;  %4053 = vmatpush1.bf16.msra.mxu1 %v7661_v38  ;;  %v7717_v37 = vcombine.low %v163_v19, %v167_v32  ;;  %v7724_v38 = vcombine.high %v170_v23, %v174_v28  ;;  %v7765_v19 = vcombine.low %v211_v8, %v215_v11 }
 0x1c7   :  { %3948 = vmatprep.subr.bf16.mxu0 %v7668_v24  ;;  %4054 = vmatprep.subr.bf16.mxu1 %v7670_v39  ;;  %v7726_v24 = vcombine.high %v171_v30, %v175_v34  ;;  %v178_v39 = vld [vmem:[#allocation2 + $0x410] sm:$0xff] }
 0x1c8   :  { %v7731_v52 = vcombine.low %v178_v39, %v182_v40 }
 0x1ca   :  { %3949 = vmatpush1.bf16.msra.mxu0 %v7667_v45  ;;  %4055 = vmatpush1.bf16.msra.mxu1 %v7669_v47  ;;  %v7725_v45 = vcombine.low %v171_v30, %v175_v34  ;;  %v7732_v47 = vcombine.high %v178_v39, %v182_v40  ;;  %v234_v34 = vld [vmem:[#allocation2 + $0x5d0] sm:$0xff] }
 0x1cb   :  { %3950 = vmatprep.subr.bf16.mxu0 %v7676_v36  ;;  %4056 = vmatprep.subr.bf16.mxu1 %v7678_v48  ;;  %v7734_v36 = vcombine.high %v179_v41, %v183_v42  ;;  %v186_v48 = vld [vmem:[#allocation2 + $0x450] sm:$0xff] }
 0x1cc   :  { %v7739_v60 = vcombine.low %v186_v48, %v190_v49 }
 0x1ce   :  { %3951 = vmatpush1.bf16.msra.mxu0 %v7675_v53  ;;  %4057 = vmatpush1.bf16.msra.mxu1 %v7677_v55  ;;  %v7733_v53 = vcombine.low %v179_v41, %v183_v42  ;;  %v7740_v55 = vcombine.high %v186_v48, %v190_v49  ;;  %v242_v42 = vld [vmem:[#allocation2 + $0x610] sm:$0xff] }
 0x1cf   :  { %3952 = vmatprep.subr.bf16.mxu0 %v7684_v56  ;;  %4058 = vmatprep.subr.bf16.mxu1 %v7686_v27  ;;  %v7742_v56 = vcombine.high %v187_v50, %v191_v51  ;;  %v194_v27 = vld [vmem:[#allocation2 + $0x490] sm:$0xff] }
 0x1d0   :  { %v7747_v5 = vcombine.low %v194_v27, %v198_v57 }
 0x1d2   :  { %3953 = vmatpush1.bf16.msra.mxu0 %v7683_v61  ;;  %4059 = vmatpush1.bf16.msra.mxu1 %v7685_v62  ;;  %v7741_v61 = vcombine.low %v187_v50, %v191_v51  ;;  %v7748_v62 = vcombine.high %v194_v27, %v198_v57  ;;  %v250_v51 = vld [vmem:[#allocation2 + $0x650] sm:$0xff] }
 0x1d3   :  { %3954 = vmatprep.subr.bf16.mxu0 %v7692_v63  ;;  %4060 = vmatprep.subr.bf16.mxu1 %v7694_v0  ;;  %v7750_v63 = vcombine.high %v195_v15, %v199_v58  ;;  %v202_v0 = vld [vmem:[#allocation2 + $0x4d0] sm:$0xff] }
 0x1d4   :  { %v7755_v12 = vcombine.low %v202_v0, %v206_v1 }
 0x1d6   :  { %3955 = vmatpush1.bf16.msra.mxu0 %v7691_v6  ;;  %4061 = vmatpush1.bf16.msra.mxu1 %v7693_v26  ;;  %v7756_v6 = vcombine.high %v202_v0, %v206_v1  ;;  %v7758_v26 = vcombine.high %v203_v3, %v207_v4 }
 0x1d7   :  { %3956 = vmatprep.subr.bf16.mxu0 %v7700_v29  ;;  %4062 = vmatprep.subr.bf16.mxu1 %v7702_v7  ;;  %v210_v29 = vld [vmem:[#allocation2 + $0x510] sm:$0xff] }
 0x1d8   :  { %v214_v7 = vld [vmem:[#allocation2 + $0x530] sm:$0xff] }
 0x1d9   :  { %v7764_v13 = vcombine.high %v210_v29, %v214_v7  ;;  %v7763_v18 = vcombine.low %v210_v29, %v214_v7 }
 0x1da   :  { %3957 = vmatpush1.bf16.msra.mxu0 %v7699_v14  ;;  %4063 = vmatpush1.bf16.msra.mxu1 %v7701_v16  ;;  %v7766_v14 = vcombine.high %v211_v8, %v215_v11  ;;  %v218_v16 = vld [vmem:[#allocation2 + $0x550] sm:$0xff] }
 0x1db   :  { %3958 = vmatprep.subr.bf16.mxu0 %v7708_v17  ;;  %4064 = vmatprep.subr.bf16.mxu1 %v7710_v59  ;;  %v222_v17 = vld [vmem:[#allocation2 + $0x570] sm:$0xff]  ;;  %v219_v59 = vld [vmem:[#allocation2 + $0x558] sm:$0xff] }
 0x1dc   :  { %v7774_v32 = vcombine.high %v219_v59, %v223_v25  ;;  %v7771_v23 = vcombine.low %v218_v16, %v222_v17  ;;  %v7773_v28 = vcombine.low %v219_v59, %v223_v25  ;;  %v274_v11 = vld [vmem:[#allocation2 + $0x710] sm:$0xff] }
 0x1dd   :  { %v282_v25 = vld [vmem:[#allocation2 + $0x750] sm:$0xff] }
 0x1de   :  { %3959 = vmatpush1.bf16.msra.mxu0 %v7707_v20  ;;  %4065 = vmatpush1.bf16.msra.mxu1 %v7709_v21  ;;  %v226_v20 = vld [vmem:[#allocation2 + $0x590] sm:$0xff] }
 0x1df   :  { %3960 = vmatprep.subr.bf16.mxu0 %v7716_v22  ;;  %4066 = vmatprep.subr.bf16.mxu1 %v7718_v46  ;;  %v230_v21 = vld [vmem:[#allocation2 + $0x5b0] sm:$0xff]  ;;  %v227_v22 = vld [vmem:[#allocation2 + $0x598] sm:$0xff] }
 0x1e0   :  { %v231_v46 = vld [vmem:[#allocation2 + $0x5b8] sm:$0xff]  ;;  %v7780_v30 = vcombine.high %v226_v20, %v230_v21 }
 0x1e1   :  { %v7781_v39 = vcombine.low %v227_v22, %v231_v46 }
 0x1e2   :  { %3961 = vmatpush1.bf16.msra.mxu0 %v7715_v35  ;;  %4067 = vmatpush1.bf16.msra.mxu1 %v7717_v37  ;;  %v238_v35 = vld [vmem:[#allocation2 + $0x5f0] sm:$0xff]  ;;  %v235_v37 = vld [vmem:[#allocation2 + $0x5d8] sm:$0xff] }
 0x1e3   :  { %3962 = vmatprep.subr.bf16.mxu0 %v7724_v38  ;;  %4068 = vmatprep.subr.bf16.mxu1 %v7726_v24  ;;  %v239_v38 = vld [vmem:[#allocation2 + $0x5f8] sm:$0xff]  ;;  %v7779_v24 = vcombine.low %v226_v20, %v230_v21  ;;  %v7788_v40 = vcombine.high %v234_v34, %v238_v35 }
 0x1e4   :  { %v7790_v41 = vcombine.high %v235_v37, %v239_v38  ;;  %v7789_v48 = vcombine.low %v235_v37, %v239_v38  ;;  %v298_v38 = vld [vmem:[#allocation2 + $0x7d0] sm:$0xff] }
 0x1e6   :  { %3963 = vmatpush1.bf16.msra.mxu0 %v7723_v2  ;;  %4069 = vmatpush1.bf16.msra.mxu1 %v7725_v45  ;;  %v246_v2 = vld [vmem:[#allocation2 + $0x630] sm:$0xff]  ;;  %v243_v45 = vld [vmem:[#allocation2 + $0x618] sm:$0xff] }
 0x1e7   :  { %3985 = vmatprep.subr.bf16.mxu0 %v7732_v47  ;;  %4091 = vmatprep.subr.bf16.mxu1 %v7734_v36  ;;  %v247_v47 = vld [vmem:[#allocation2 + $0x638] sm:$0xff]  ;;  %v7787_v36 = vcombine.low %v234_v34, %v238_v35  ;;  %v7796_v49 = vcombine.high %v242_v42, %v246_v2 }
 0x1e8   :  { %v7798_v50 = vcombine.high %v243_v45, %v247_v47  ;;  %v7797_v27 = vcombine.low %v243_v45, %v247_v47  ;;  %v4188_v47 = vld [vmem:[#allocation2 + $0x1000] sm:$0xff] }
 0x1e9   :  { %3965 = vmatmul.mubr.bf16.vlgmr.msra.gmra.mrb[8].mxu0 %v8629_v10  ;;  %4071 = vmatmul.mubr.bf16.vlgmr.msra.gmra.mrb[8].mxu1 %v8629_v10  ;;  %v7749_v10 = vcombine.low %v195_v15, %v199_v58  ;;  %v258_v58 = vld [vmem:[#allocation2 + $0x690] sm:$0xff] }
 0x1ea   :  { %3986 = vmatpush1.bf16.msra.mxu0 %v7731_v52  ;;  %4092 = vmatpush1.bf16.msra.mxu1 %v7733_v53  ;;  %v254_v52 = vld [vmem:[#allocation2 + $0x670] sm:$0xff]  ;;  %v251_v53 = vld [vmem:[#allocation2 + $0x658] sm:$0xff] }
 0x1eb   :  { %3987 = vmatprep.subr.bf16.mxu0 %v7740_v55  ;;  %4093 = vmatprep.subr.bf16.mxu1 %v7742_v56  ;;  %v255_v55 = vld [vmem:[#allocation2 + $0x678] sm:$0xff]  ;;  %v7795_v56 = vcombine.low %v242_v42, %v246_v2  ;;  %v7804_v57 = vcombine.high %v250_v51, %v254_v52 }
 0x1ec   :  { %3974 = vmatprep.mubr.bf16.mxu0 %v8637_v33  ;;  %4080 = vmatprep.mubr.bf16.mxu1 %v8637_v33  ;;  %v7757_v33 = vcombine.low %v203_v3, %v207_v4  ;;  %v7806_v15 = vcombine.high %v251_v53, %v255_v55  ;;  %v7805_v0 = vcombine.low %v251_v53, %v255_v55  ;;  %v266_v4 = vld [vmem:[#allocation2 + $0x6d0] sm:$0xff]  ;;  %v4196_v55 = vld [vmem:[#allocation2 + $0x1040] sm:$0xff] }
 0x1ee   :  { %3988 = vmatpush1.bf16.msra.mxu0 %v7739_v60  ;;  %4094 = vmatpush1.bf16.msra.mxu1 %v7741_v61  ;;  %v262_v60 = vld [vmem:[#allocation2 + $0x6b0] sm:$0xff]  ;;  %v259_v61 = vld [vmem:[#allocation2 + $0x698] sm:$0xff] }
 0x1ef   :  { %3989 = vmatprep.subr.bf16.mxu0 %v7748_v62  ;;  %4095 = vmatprep.subr.bf16.mxu1 %v7750_v63  ;;  %v263_v62 = vld [vmem:[#allocation2 + $0x6b8] sm:$0xff]  ;;  %v7803_v63 = vcombine.low %v250_v51, %v254_v52  ;;  %v7812_v1 = vcombine.high %v258_v58, %v262_v60 }
 0x1f0   :  { %v7814_v3 = vcombine.high %v259_v61, %v263_v62  ;;  %v7813_v29 = vcombine.low %v259_v61, %v263_v62  ;;  %v4144_v61 = vld [vmem:[%s9120_s0] sm:$0xee] }
 0x1f1   :  { %3975 = vmatmul.mubr.bf16.gmra.mrb[12].mxu0 %v8643_v31  ;;  %4081 = vmatmul.mubr.bf16.gmra.mrb[12].mxu1 %v8643_v31  ;;  %v7772_v31 = vcombine.high %v218_v16, %v222_v17 }
 0x1f2   :  { %3990 = vmatpush1.bf16.msra.mxu0 %v7747_v5  ;;  %4096 = vmatpush1.bf16.msra.mxu1 %v7749_v10  ;;  %v270_v5 = vld [vmem:[#allocation2 + $0x6f0] sm:$0xff]  ;;  %v267_v10 = vld [vmem:[#allocation2 + $0x6d8] sm:$0xff] }
 0x1f3   :  { %3991 = vmatprep.subr.bf16.mxu0 %v7756_v6  ;;  %4097 = vmatprep.subr.bf16.mxu1 %v7758_v26  ;;  %v271_v6 = vld [vmem:[#allocation2 + $0x6f8] sm:$0xff]  ;;  %v7811_v26 = vcombine.low %v258_v58, %v262_v60  ;;  %v7820_v7 = vcombine.high %v266_v4, %v270_v5 }
 0x1f4   :  { %4017 = vmatprep.mubr.bf16.mxu0 %v8657_v44  ;;  %4123 = vmatprep.mubr.bf16.mxu1 %v8657_v44  ;;  %v7782_v44 = vcombine.high %v227_v22, %v231_v46  ;;  %v7822_v8 = vcombine.high %v267_v10, %v271_v6  ;;  %v7821_v16 = vcombine.low %v267_v10, %v271_v6  ;;  %v290_v46 = vld [vmem:[#allocation2 + $0x790] sm:$0xff]  ;;  %v7855_v10 = vrot.slane %v4144_v61, 9 }
 0x1f6   :  { %3992 = vmatpush1.bf16.msra.mxu0 %v7755_v12  ;;  %4098 = vmatpush1.bf16.msra.mxu1 %v7757_v33  ;;  %v278_v12 = vld [vmem:[#allocation2 + $0x730] sm:$0xff]  ;;  %v275_v33 = vld [vmem:[#allocation2 + $0x718] sm:$0xff] }
 0x1f7   :  { %3993 = vmatprep.subr.bf16.mxu0 %v7764_v13  ;;  %4099 = vmatprep.subr.bf16.mxu1 %v7766_v14  ;;  %v279_v13 = vld [vmem:[#allocation2 + $0x738] sm:$0xff]  ;;  %v7819_v14 = vcombine.low %v266_v4, %v270_v5  ;;  %v7828_v17 = vcombine.high %v274_v11, %v278_v12  ;;  %v4205_v4 = vld [vmem:[#allocation2 + $0x1088] sm:$0xff] }
 0x1f8   :  { %v7830_v59 = vcombine.high %v275_v33, %v279_v13  ;;  %v7829_v20 = vcombine.low %v275_v33, %v279_v13  ;;  %v4209_v5 = vld [vmem:[#allocation2 + $0x10a8] sm:$0xff]  ;;  %v4212_v13 = vld [vmem:[#allocation2 + $0x10c0] sm:$0xff] }
 0x1f9   :  { %v7886_v33 = vcombine.high %v4205_v4, %v4209_v5 }
 0x1fa   :  { %3994 = vmatpush1.bf16.msra.mxu0 %v7763_v18  ;;  %4100 = vmatpush1.bf16.msra.mxu1 %v7765_v19  ;;  %v286_v18 = vld [vmem:[#allocation2 + $0x770] sm:$0xff]  ;;  %v283_v19 = vld [vmem:[#allocation2 + $0x758] sm:$0xff] }
 0x1fb   :  { %3995 = vmatprep.subr.bf16.mxu0 %v7772_v31  ;;  %4101 = vmatprep.subr.bf16.mxu1 %v7774_v32  ;;  %v287_v31 = vld [vmem:[#allocation2 + $0x778] sm:$0xff]  ;;  %v7827_v32 = vcombine.low %v274_v11, %v278_v12  ;;  %v7836_v21 = vcombine.high %v282_v25, %v286_v18 }
 0x1fc   :  { %v7838_v22 = vcombine.high %v283_v19, %v287_v31  ;;  %v7837_v34 = vcombine.low %v283_v19, %v287_v31 }
 0x1fe   :  { %3996 = vmatpush1.bf16.msra.mxu0 %v7771_v23  ;;  %4102 = vmatpush1.bf16.msra.mxu1 %v7773_v28  ;;  %v294_v23 = vld [vmem:[#allocation2 + $0x7b0] sm:$0xff]  ;;  %v291_v28 = vld [vmem:[#allocation2 + $0x798] sm:$0xff] }
 0x1ff   :  { %3997 = vmatprep.subr.bf16.mxu0 %v7780_v30  ;;  %4103 = vmatprep.subr.bf16.mxu1 %v7782_v44  ;;  %v295_v30 = vld [vmem:[#allocation2 + $0x7b8] sm:$0xff]  ;;  %v7835_v44 = vcombine.low %v282_v25, %v286_v18  ;;  %v7844_v35 = vcombine.high %v290_v46, %v294_v23  ;;  %v7885_v18 = vcombine.low %v4205_v4, %v4209_v5  ;;  %v4261_v4 = vld [vmem:[#allocation2 + $0x1248] sm:$0xff] }
 0x200   :  { %v7846_v37 = vcombine.high %v291_v28, %v295_v30  ;;  %v7845_v42 = vcombine.low %v291_v28, %v295_v30  ;;  %v4265_v5 = vld [vmem:[#allocation2 + $0x1268] sm:$0xff] }
 0x202   :  { %3998 = vmatpush1.bf16.msra.mxu0 %v7779_v24  ;;  %4104 = vmatpush1.bf16.msra.mxu1 %v7781_v39  ;;  %v302_v24 = vld [vmem:[#allocation2 + $0x7f0] sm:$0xff]  ;;  %v299_v39 = vld [vmem:[#allocation2 + $0x7d8] sm:$0xff] }
 0x203   :  { %3999 = vmatprep.subr.bf16.mxu0 %v7788_v40  ;;  %4105 = vmatprep.subr.bf16.mxu1 %v7790_v41  ;;  %v303_v40 = vld [vmem:[#allocation2 + $0x7f8] sm:$0xff]  ;;  %v7843_v41 = vcombine.low %v290_v46, %v294_v23  ;;  %v7852_v2 = vcombine.high %v298_v38, %v302_v24 }
 0x204   :  { %v7854_v45 = vcombine.high %v299_v39, %v303_v40  ;;  %v7853_v51 = vcombine.low %v299_v39, %v303_v40  ;;  %v4236_v40 = vld [vmem:[#allocation2 + $0x1180] sm:$0xff] }
 0x206   :  { %4000 = vmatpush1.bf16.msra.mxu0 %v7787_v36  ;;  %4106 = vmatpush1.bf16.msra.mxu1 %v7789_v48  ;;  %v4192_v36 = vld [vmem:[#allocation2 + $0x1020] sm:$0xff]  ;;  %v4189_v48 = vld [vmem:[#allocation2 + $0x1008] sm:$0xff] }
 0x207   :  { %4001 = vmatprep.subr.bf16.mxu0 %v7796_v49  ;;  %4107 = vmatprep.subr.bf16.mxu1 %v7798_v50  ;;  %v4193_v49 = vld [vmem:[#allocation2 + $0x1028] sm:$0xff]  ;;  %v7851_v50 = vcombine.low %v298_v38, %v302_v24  ;;  %v7868_v52 = vcombine.high %v4188_v47, %v4192_v36  ;;  %v7867_v60 = vcombine.low %v4188_v47, %v4192_v36 }
 0x208   :  { %v7870_v53 = vcombine.high %v4189_v48, %v4193_v49  ;;  %v7869_v62 = vcombine.low %v4189_v48, %v4193_v49  ;;  %v4244_v49 = vld [vmem:[#allocation2 + $0x11c0] sm:$0xff] }
 0x20a   :  { %4002 = vmatpush1.bf16.msra.mxu0 %v7795_v56  ;;  %4108 = vmatpush1.bf16.msra.mxu1 %v7797_v27  ;;  %v4200_v56 = vld [vmem:[#allocation2 + $0x1060] sm:$0xff]  ;;  %v4197_v27 = vld [vmem:[#allocation2 + $0x1048] sm:$0xff] }
 0x20b   :  { %4003 = vmatprep.subr.bf16.mxu0 %v7804_v57  ;;  %4109 = vmatprep.subr.bf16.mxu1 %v7806_v15  ;;  %v4201_v57 = vld [vmem:[#allocation2 + $0x1068] sm:$0xff]  ;;  %v8384_v15 = vld [vmem:[%s9120_s0 + $0x10] sm:$0xff] }
 0x20c   :  { %v4161_v58 = vrot.slane %v8384_v15, 5  ;;  %v7877_v11 = vcombine.low %v4197_v27, %v4201_v57  ;;  %v4256_v15 = vld [vmem:[#allocation2 + $0x1220] sm:$0xff] }
 0x20e   :  { %4004 = vmatpush1.bf16.msra.mxu0 %v7803_v63  ;;  %4110 = vmatpush1.bf16.msra.mxu1 %v7805_v0  ;;  %v7876_v63 = vcombine.high %v4196_v55, %v4200_v56  ;;  %v7878_v0 = vcombine.high %v4197_v27, %v4201_v57  ;;  %v4167_v6 = vrot.slane %v4161_v58, 4  ;;  %v4252_v57 = vld [vmem:[#allocation2 + $0x1200] sm:$0xff] }
 0x20f   :  { %4005 = vmatprep.subr.bf16.mxu0 %v7812_v1  ;;  %4111 = vmatprep.subr.bf16.mxu1 %v7814_v3  ;;  %v4204_v1 = vld [vmem:[#allocation2 + $0x1080] sm:$0xff] }
 0x210   :  { %v4208_v3 = vld [vmem:[#allocation2 + $0x10a0] sm:$0xff] }
 0x211   :  { %v7884_v12 = vcombine.high %v4204_v1, %v4208_v3  ;;  %v7883_v25 = vcombine.low %v4204_v1, %v4208_v3  ;;  %v4260_v1 = vld [vmem:[#allocation2 + $0x1240] sm:$0xff] }
 0x212   :  { %4006 = vmatpush1.bf16.msra.mxu0 %v7811_v26  ;;  %4112 = vmatpush1.bf16.msra.mxu1 %v7813_v29  ;;  %v8385_v26 = vld [vmem:[%s9120_s0 + $0x20] sm:$0x11] }
 0x213   :  { %4007 = vmatprep.subr.bf16.mxu0 %v7820_v7  ;;  %4113 = vmatprep.subr.bf16.mxu1 %v7822_v8  ;;  %v4168_v29 = vrot.slane %v8385_v26, 5  ;;  %v7875_v7 = vcombine.low %v4196_v55, %v4200_v56  ;;  %v4264_v3 = vld [vmem:[#allocation2 + $0x1260] sm:$0xff] }
 0x214   :  { %v7940_v26 = vcombine.high %v4260_v1, %v4264_v3 }
 0x216   :  { %4008 = vmatpush1.bf16.msra.mxu0 %v7819_v14  ;;  %4114 = vmatpush1.bf16.msra.mxu1 %v7821_v16  ;;  %v4216_v14 = vld [vmem:[#allocation2 + $0x10e0] sm:$0xff]  ;;  %v4213_v16 = vld [vmem:[#allocation2 + $0x10c8] sm:$0xff] }
 0x217   :  { %4009 = vmatprep.subr.bf16.mxu0 %v7828_v17  ;;  %4115 = vmatprep.subr.bf16.mxu1 %v7830_v59  ;;  %v8714_v17 = vsel %vm8706_vm5, %v7855_v10, %v4161_v58  ;;  %v8718_v59 = vsel %vm8706_vm5, %v4167_v6, %v4168_v29  ;;  %v7892_v19 = vcombine.high %v4212_v13, %v4216_v14  ;;  %v4253_v58 = vld [vmem:[#allocation2 + $0x1208] sm:$0xff] }
 0x218   :  { %v7891_v46 = vcombine.low %v4212_v13, %v4216_v14  ;;  %v7931_v10 = vcombine.low %v4252_v57, %v4256_v15  ;;  %v7942_v29 = vcombine.high %v4261_v4, %v4265_v5  ;;  %v7939_v13 = vcombine.low %v4260_v1, %v4264_v3  ;;  %v4320_v1 = vld [vmem:[#allocation2 + $0x1420] sm:$0xff]  ;;  %v4317_v3 = vld [vmem:[#allocation2 + $0x1408] sm:$0xff] }
 0x219   :  { %v7941_v14 = vcombine.low %v4261_v4, %v4265_v5  ;;  %v4321_v4 = vld [vmem:[#allocation2 + $0x1428] sm:$0xff] }
 0x21a   :  { %4010 = vmatpush1.bf16.msra.mxu0 %v7827_v32  ;;  %4116 = vmatpush1.bf16.msra.mxu1 %v7829_v20  ;;  %v4220_v32 = vld [vmem:[#allocation2 + $0x1100] sm:$0xff] }
 0x21b   :  { %4011 = vmatprep.subr.bf16.mxu0 %v7836_v21  ;;  %4117 = vmatprep.subr.bf16.mxu1 %v7838_v22  ;;  %v4224_v20 = vld [vmem:[#allocation2 + $0x1120] sm:$0xff]  ;;  %v4221_v21 = vld [vmem:[#allocation2 + $0x1108] sm:$0xff] }
 0x21c   :  { %v4225_v22 = vld [vmem:[#allocation2 + $0x1128] sm:$0xff]  ;;  %v7900_v28 = vcombine.high %v4220_v32, %v4224_v20  ;;  %v7899_v38 = vcombine.low %v4220_v32, %v4224_v20 }
 0x21d   :  { %v7902_v30 = vcombine.high %v4221_v21, %v4225_v22  ;;  %v7901_v24 = vcombine.low %v4221_v21, %v4225_v22 }
 0x21e   :  { %4012 = vmatpush1.bf16.msra.mxu0 %v7835_v44  ;;  %4118 = vmatpush1.bf16.msra.mxu1 %v7837_v34  ;;  %v4228_v44 = vld [vmem:[#allocation2 + $0x1140] sm:$0xff] }
 0x21f   :  { %4013 = vmatprep.subr.bf16.mxu0 %v7844_v35  ;;  %4119 = vmatprep.subr.bf16.mxu1 %v7846_v37  ;;  %v4232_v34 = vld [vmem:[#allocation2 + $0x1160] sm:$0xff]  ;;  %v4229_v35 = vld [vmem:[#allocation2 + $0x1148] sm:$0xff] }
 0x220   :  { %v4233_v37 = vld [vmem:[#allocation2 + $0x1168] sm:$0xff] }
 0x221   :  { %v7910_v39 = vcombine.high %v4229_v35, %v4233_v37  ;;  %v7909_v47 = vcombine.low %v4229_v35, %v4233_v37 }
 0x222   :  { %4014 = vmatpush1.bf16.msra.mxu0 %v7843_v41  ;;  %4120 = vmatpush1.bf16.msra.mxu1 %v7845_v42  ;;  %v4240_v41 = vld [vmem:[#allocation2 + $0x11a0] sm:$0xff]  ;;  %v4237_v42 = vld [vmem:[#allocation2 + $0x1188] sm:$0xff] }
 0x223   :  { %4015 = vmatprep.subr.bf16.mxu0 %v7852_v2  ;;  %4121 = vmatprep.subr.bf16.mxu1 %v7854_v45  ;;  %v4241_v2 = vld [vmem:[#allocation2 + $0x11a8] sm:$0xff]  ;;  %v7907_v45 = vcombine.low %v4228_v44, %v4232_v34  ;;  %v7916_v36 = vcombine.high %v4236_v40, %v4240_v41 }
 0x224   :  { %v7918_v48 = vcombine.high %v4237_v42, %v4241_v2  ;;  %v7917_v55 = vcombine.low %v4237_v42, %v4241_v2 }
 0x226   :  { %4016 = vmatpush1.bf16.msra.mxu0 %v7851_v50  ;;  %4122 = vmatpush1.bf16.msra.mxu1 %v7853_v51  ;;  %v4248_v50 = vld [vmem:[#allocation2 + $0x11e0] sm:$0xff]  ;;  %v4245_v51 = vld [vmem:[#allocation2 + $0x11c8] sm:$0xff] }
 0x227   :  { %5756 = vmatprep.subr.bf16.mxu0 %v7868_v52  ;;  %5862 = vmatprep.subr.bf16.mxu1 %v7870_v53  ;;  %v4249_v52 = vld [vmem:[#allocation2 + $0x11e8] sm:$0xff]  ;;  %v7915_v53 = vcombine.low %v4236_v40, %v4240_v41  ;;  %v7924_v56 = vcombine.high %v4244_v49, %v4248_v50  ;;  %v7923_v61 = vcombine.low %v4244_v49, %v4248_v50 }
 0x228   :  { %v7926_v27 = vcombine.high %v4245_v51, %v4249_v52 }
 0x229   :  { %4018 = vmatmul.mubr.bf16.vlgmr.msra.gmra.mrb[8].mxu0 %v8665_v9  ;;  %4124 = vmatmul.mubr.bf16.vlgmr.msra.gmra.mrb[8].mxu1 %v8665_v9  ;;  %v4217_v9 = vld [vmem:[#allocation2 + $0x10e8] sm:$0xff] }
 0x22a   :  { %5757 = vmatpush1.bf16.msra.mxu0 %v7867_v60  ;;  %5863 = vmatpush1.bf16.msra.mxu1 %v7869_v62  ;;  %v7894_v31 = vcombine.high %v4213_v16, %v4217_v9  ;;  %v7893_v23 = vcombine.low %v4213_v16, %v4217_v9  ;;  %v4257_v60 = vld [vmem:[#allocation2 + $0x1228] sm:$0xff]  ;;  %v7925_v62 = vcombine.low %v4245_v51, %v4249_v52 }
 0x22b   :  { %5758 = vmatprep.subr.bf16.mxu0 %v7876_v63  ;;  %5864 = vmatprep.subr.bf16.mxu1 %v7878_v0  ;;  %v7932_v63 = vcombine.high %v4252_v57, %v4256_v15  ;;  %v7934_v0 = vcombine.high %v4253_v58, %v4257_v60  ;;  %v7933_v6 = vcombine.low %v4253_v58, %v4257_v60  ;;  %v8386_v57 = vld [vmem:[%s9120_s0 + $0x40] sm:$0xff]  ;;  %v4146_v60 = vld [vmem:[%s9120_s0 + $0x30] sm:$0xee] }
 0x22c   :  { %4027 = vmatprep.mubr.bf16.mxu0 %v8673_v43  ;;  %4133 = vmatprep.mubr.bf16.mxu1 %v8673_v43  ;;  %v8722_v43 = vcombine.high %v8714_v17, %v8718_v59  ;;  %v4175_v15 = vrot.slane %v8386_v57, 5  ;;  %v7857_v5 = vrot.slane %v4146_v60, 9 }
 0x22e   :  { %5759 = vmatpush1.bf16.msra.mxu0 %v7875_v7  ;;  %5865 = vmatpush1.bf16.msra.mxu1 %v7877_v11  ;;  %v4268_v7 = vld [vmem:[#allocation2 + $0x1280] sm:$0xff] }
 0x22f   :  { %5760 = vmatprep.subr.bf16.mxu0 %v7884_v12  ;;  %5866 = vmatprep.subr.bf16.mxu1 %v7886_v33  ;;  %v4272_v11 = vld [vmem:[#allocation2 + $0x12a0] sm:$0xff]  ;;  %v4269_v12 = vld [vmem:[#allocation2 + $0x1288] sm:$0xff] }
 0x230   :  { %v4273_v33 = vld [vmem:[#allocation2 + $0x12a8] sm:$0xff]  ;;  %v7948_v16 = vcombine.high %v4268_v7, %v4272_v11  ;;  %v7947_v32 = vcombine.low %v4268_v7, %v4272_v11 }
 0x231   :  { %4028 = vmatmul.mubr.bf16.gmra.mrb[12].mxu0 %v8679_v54  ;;  %4134 = vmatmul.mubr.bf16.gmra.mrb[12].mxu1 %v8679_v54  ;;  %v7908_v54 = vcombine.high %v4228_v44, %v4232_v34  ;;  %v7950_v9 = vcombine.high %v4269_v12, %v4273_v33  ;;  %v7949_v20 = vcombine.low %v4269_v12, %v4273_v33  ;;  %v4324_v33 = vld [vmem:[#allocation2 + $0x1440] sm:$0xff] }
 0x232   :  { %5761 = vmatpush1.bf16.msra.mxu0 %v7883_v25  ;;  %5867 = vmatpush1.bf16.msra.mxu1 %v7885_v18  ;;  %v4276_v25 = vld [vmem:[#allocation2 + $0x12c0] sm:$0xff]  ;;  %v7998_v12 = vcombine.high %v4317_v3, %v4321_v4 }
 0x233   :  { %5762 = vmatprep.subr.bf16.mxu0 %v7892_v19  ;;  %5868 = vmatprep.subr.bf16.mxu1 %v7894_v31  ;;  %v4280_v18 = vld [vmem:[#allocation2 + $0x12e0] sm:$0xff]  ;;  %v4277_v19 = vld [vmem:[#allocation2 + $0x12c8] sm:$0xff] }
 0x234   :  { %5788 = vmatprep.mubr.bf16.mxu0 %v8722_v43  ;;  %5894 = vmatprep.mubr.bf16.mxu1 %v8722_v43  ;;  %v4281_v31 = vld [vmem:[#allocation2 + $0x12e8] sm:$0xff]  ;;  %v7956_v21 = vcombine.high %v4276_v25, %v4280_v18  ;;  %v7955_v44 = vcombine.low %v4276_v25, %v4280_v18  ;;  %v4176_v25 = vsel %vm8706_vm5, %v7857_v5, %v4175_v15 }
 0x235   :  { %v7958_v22 = vcombine.high %v4277_v19, %v4281_v31  ;;  %v7957_v34 = vcombine.low %v4277_v19, %v4281_v31  ;;  %v8388_v19 = vld [vmem:[%s9120_s0 + $0x18] sm:$0xff] }
 0x236   :  { %5763 = vmatpush1.bf16.msra.mxu0 %v7891_v46  ;;  %5869 = vmatpush1.bf16.msra.mxu1 %v7893_v23  ;;  %v4284_v46 = vld [vmem:[#allocation2 + $0x1300] sm:$0xff]  ;;  %v4165_v31 = vrot.slane %v8388_v19, 5 }
 0x237   :  { %5764 = vmatprep.subr.bf16.mxu0 %v7900_v28  ;;  %5870 = vmatprep.subr.bf16.mxu1 %v7902_v30  ;;  %v4288_v23 = vld [vmem:[#allocation2 + $0x1320] sm:$0xff]  ;;  %v4285_v28 = vld [vmem:[#allocation2 + $0x1308] sm:$0xff] }
 0x238   :  { %v4289_v30 = vld [vmem:[#allocation2 + $0x1328] sm:$0xff]  ;;  %v7964_v35 = vcombine.high %v4284_v46, %v4288_v23  ;;  %v7963_v40 = vcombine.low %v4284_v46, %v4288_v23  ;;  %v4336_v46 = vld [vmem:[#allocation2 + $0x14a0] sm:$0xff] }
 0x239   :  { %v7966_v37 = vcombine.high %v4285_v28, %v4289_v30  ;;  %v7965_v41 = vcombine.low %v4285_v28, %v4289_v30  ;;  %v4333_v28 = vld [vmem:[#allocation2 + $0x1488] sm:$0xff] }
 0x23a   :  { %5765 = vmatpush1.bf16.msra.mxu0 %v7899_v38  ;;  %5871 = vmatpush1.bf16.msra.mxu1 %v7901_v24  ;;  %v4292_v38 = vld [vmem:[#allocation2 + $0x1340] sm:$0xff]  ;;  %v4337_v30 = vld [vmem:[#allocation2 + $0x14a8] sm:$0xff] }
 0x23b   :  { %5766 = vmatprep.subr.bf16.mxu0 %v7908_v54  ;;  %5872 = vmatprep.subr.bf16.mxu1 %v7910_v39  ;;  %v4296_v24 = vld [vmem:[#allocation2 + $0x1360] sm:$0xff]  ;;  %v4293_v54 = vld [vmem:[#allocation2 + $0x1348] sm:$0xff] }
 0x23c   :  { %v4297_v39 = vld [vmem:[#allocation2 + $0x1368] sm:$0xff]  ;;  %v7972_v42 = vcombine.high %v4292_v38, %v4296_v24  ;;  %v7971_v49 = vcombine.low %v4292_v38, %v4296_v24 }
 0x23d   :  { %v7974_v2 = vcombine.high %v4293_v54, %v4297_v39  ;;  %v7973_v50 = vcombine.low %v4293_v54, %v4297_v39  ;;  %v8014_v39 = vcombine.high %v4333_v28, %v4337_v30 }
 0x23e   :  { %5767 = vmatpush1.bf16.msra.mxu0 %v7907_v45  ;;  %5873 = vmatpush1.bf16.msra.mxu1 %v7909_v47  ;;  %v4300_v45 = vld [vmem:[#allocation2 + $0x1380] sm:$0xff] }
 0x23f   :  { %5768 = vmatprep.subr.bf16.mxu0 %v7916_v36  ;;  %5874 = vmatprep.subr.bf16.mxu1 %v7918_v48  ;;  %v4304_v47 = vld [vmem:[#allocation2 + $0x13a0] sm:$0xff]  ;;  %v4301_v36 = vld [vmem:[#allocation2 + $0x1388] sm:$0xff] }
 0x240   :  { %v4305_v48 = vld [vmem:[#allocation2 + $0x13a8] sm:$0xff]  ;;  %v7980_v51 = vcombine.high %v4300_v45, %v4304_v47  ;;  %v7979_v58 = vcombine.low %v4300_v45, %v4304_v47 }
 0x241   :  { %v7982_v52 = vcombine.high %v4301_v36, %v4305_v48 }
 0x242   :  { %5769 = vmatpush1.bf16.msra.mxu0 %v7915_v53  ;;  %5875 = vmatpush1.bf16.msra.mxu1 %v7917_v55  ;;  %v4308_v53 = vld [vmem:[#allocation2 + $0x13c0] sm:$0xff] }
 0x243   :  { %5770 = vmatprep.subr.bf16.mxu0 %v7924_v56  ;;  %5876 = vmatprep.subr.bf16.mxu1 %v7926_v27  ;;  %v4312_v55 = vld [vmem:[#allocation2 + $0x13e0] sm:$0xff]  ;;  %v4309_v56 = vld [vmem:[#allocation2 + $0x13c8] sm:$0xff] }
 0x244   :  { %v4313_v27 = vld [vmem:[#allocation2 + $0x13e8] sm:$0xff] }
 0x245   :  { %v7989_v7 = vcombine.low %v4309_v56, %v4313_v27 }
 0x246   :  { %5771 = vmatpush1.bf16.msra.mxu0 %v7923_v61  ;;  %5877 = vmatpush1.bf16.msra.mxu1 %v7925_v62  ;;  %v7981_v61 = vcombine.low %v4301_v36, %v4305_v48  ;;  %v7988_v62 = vcombine.high %v4308_v53, %v4312_v55 }
 0x247   :  { %5772 = vmatprep.subr.bf16.mxu0 %v7932_v63  ;;  %5878 = vmatprep.subr.bf16.mxu1 %v7934_v0  ;;  %v7990_v63 = vcombine.high %v4309_v56, %v4313_v27  ;;  %v4316_v0 = vld [vmem:[#allocation2 + $0x1400] sm:$0xff]  ;;  %v4349_v56 = vld [vmem:[#allocation2 + $0x1508] sm:$0xff] }
 0x248   :  { %v7996_v11 = vcombine.high %v4316_v0, %v4320_v1  ;;  %v4353_v27 = vld [vmem:[#allocation2 + $0x1528] sm:$0xff] }
 0x249   :  { %v8030_v60 = vcombine.high %v4349_v56, %v4353_v27 }
 0x24a   :  { %5773 = vmatpush1.bf16.msra.mxu0 %v7931_v10  ;;  %5879 = vmatpush1.bf16.msra.mxu1 %v7933_v6  ;;  %v4181_v10 = vrot.slane %v4175_v15, 4  ;;  %v8387_v6 = vld [vmem:[%s9120_s0 + $0x50] sm:$0x11] }
 0x24b   :  { %5774 = vmatprep.subr.bf16.mxu0 %v7940_v26  ;;  %5880 = vmatprep.subr.bf16.mxu1 %v7942_v29  ;;  %v4182_v26 = vrot.slane %v8387_v6, 5  ;;  %v7987_v29 = vcombine.low %v4308_v53, %v4312_v55  ;;  %v4352_v53 = vld [vmem:[#allocation2 + $0x1520] sm:$0xff] }
 0x24c   :  { %v4368_v6 = vld [vmem:[#allocation2 + $0x15a0] sm:$0xff] }
 0x24d   :  { %v4183_v18 = vsel %vm8706_vm5, %v4181_v10, %v4182_v26  ;;  %v4364_v10 = vld [vmem:[#allocation2 + $0x1580] sm:$0xff]  ;;  %v4365_v26 = vld [vmem:[#allocation2 + $0x1588] sm:$0xff] }
 0x24e   :  { %5775 = vmatpush1.bf16.msra.mxu0 %v7939_v13  ;;  %5881 = vmatpush1.bf16.msra.mxu1 %v7941_v14  ;;  %v4328_v13 = vld [vmem:[#allocation2 + $0x1460] sm:$0xff]  ;;  %v8739_v14 = vcombine.low %v8714_v17, %v8718_v59  ;;  %v4145_v17 = vld [vmem:[%s9120_s0 + $0x8] sm:$0xee]  ;;  %v7997_v59 = vcombine.low %v4317_v3, %v4321_v4  ;;  %v8751_v23 = vcombine.high %v4176_v25, %v4183_v18 }
 0x24f   :  { %5776 = vmatprep.subr.bf16.mxu0 %v7948_v16  ;;  %5882 = vmatprep.subr.bf16.mxu1 %v7950_v9  ;;  %v4325_v16 = vld [vmem:[#allocation2 + $0x1448] sm:$0xff]  ;;  %v8003_v38 = vcombine.low %v4324_v33, %v4328_v13  ;;  %v8760_v45 = vcombine.low %v4176_v25, %v4183_v18  ;;  %v8029_v3 = vcombine.low %v4349_v56, %v4353_v27 }
 0x250   :  { %v4329_v9 = vld [vmem:[#allocation2 + $0x1468] sm:$0xff]  ;;  %v8043_v18 = vcombine.low %v4364_v10, %v4368_v6 }
 0x251   :  { %v8005_v24 = vcombine.low %v4325_v16, %v4329_v9  ;;  %v4377_v25 = vld [vmem:[#allocation2 + $0x15e8] sm:$0xff] }
 0x252   :  { %5777 = vmatpush1.bf16.msra.mxu0 %v7947_v32  ;;  %5883 = vmatpush1.bf16.msra.mxu1 %v7949_v20  ;;  %v7995_v32 = vcombine.low %v4316_v0, %v4320_v1  ;;  %v8004_v20 = vcombine.high %v4324_v33, %v4328_v13  ;;  %v4361_v0 = vld [vmem:[#allocation2 + $0x1568] sm:$0xff]  ;;  %v4372_v13 = vld [vmem:[#allocation2 + $0x15c0] sm:$0xff] }
 0x253   :  { %5778 = vmatprep.subr.bf16.mxu0 %v7956_v21  ;;  %5884 = vmatprep.subr.bf16.mxu1 %v7958_v22  ;;  %v8006_v21 = vcombine.high %v4325_v16, %v4329_v9  ;;  %v4332_v22 = vld [vmem:[#allocation2 + $0x1480] sm:$0xff]  ;;  %v4373_v9 = vld [vmem:[#allocation2 + $0x15c8] sm:$0xff] }
 0x254   :  { %v8012_v54 = vcombine.high %v4332_v22, %v4336_v46  ;;  %v8011_v48 = vcombine.low %v4332_v22, %v4336_v46  ;;  %v4376_v16 = vld [vmem:[#allocation2 + $0x15e0] sm:$0xff]  ;;  %v8053_v46 = vcombine.low %v4373_v9, %v4377_v25  ;;  %v4405_v56 = vld [vmem:[#allocation2 + $0x16c8] sm:$0xff] }
 0x255   :  { %v8051_v22 = vcombine.low %v4372_v13, %v4376_v16  ;;  %v4409_v27 = vld [vmem:[#allocation2 + $0x16e8] sm:$0xff] }
 0x256   :  { %5779 = vmatpush1.bf16.msra.mxu0 %v7955_v44  ;;  %5885 = vmatpush1.bf16.msra.mxu1 %v7957_v34  ;;  %v7856_v44 = vrot.slane %v4145_v17, 9  ;;  %v4170_v34 = vrot.slane %v4165_v31, 4  ;;  %v4380_v17 = vld [vmem:[#allocation2 + $0x1600] sm:$0xff] }
 0x257   :  { %5780 = vmatprep.subr.bf16.mxu0 %v7964_v35  ;;  %5886 = vmatprep.subr.bf16.mxu1 %v7966_v37  ;;  %v8389_v35 = vld [vmem:[%s9120_s0 + $0x28] sm:$0x11] }
 0x258   :  { %v4171_v37 = vrot.slane %v8389_v35, 5  ;;  %v8764_v47 = vsel %vm8706_vm5, %v7856_v44, %v4165_v31  ;;  %v8052_v31 = vcombine.high %v4372_v13, %v4376_v16  ;;  %v4388_v44 = vld [vmem:[#allocation2 + $0x1640] sm:$0xff]  ;;  %v4389_v35 = vld [vmem:[#allocation2 + $0x1648] sm:$0xff] }
 0x259   :  { %v4428_v13 = vld [vmem:[#allocation2 + $0x1780] sm:$0xff] }
 0x25a   :  { %5781 = vmatpush1.bf16.msra.mxu0 %v7963_v40  ;;  %5887 = vmatpush1.bf16.msra.mxu1 %v7965_v41  ;;  %v4340_v40 = vld [vmem:[#allocation2 + $0x14c0] sm:$0xff]  ;;  %v8768_v36 = vsel %vm8706_vm5, %v4170_v34, %v4171_v37  ;;  %v4393_v37 = vld [vmem:[#allocation2 + $0x1668] sm:$0xff] }
 0x25b   :  { %5782 = vmatprep.subr.bf16.mxu0 %v7972_v42  ;;  %5888 = vmatprep.subr.bf16.mxu1 %v7974_v2  ;;  %v4344_v41 = vld [vmem:[#allocation2 + $0x14e0] sm:$0xff]  ;;  %v4341_v42 = vld [vmem:[#allocation2 + $0x14c8] sm:$0xff]  ;;  %v8772_v55 = vcombine.high %v8764_v47, %v8768_v36 }
 0x25c   :  { %v4345_v2 = vld [vmem:[#allocation2 + $0x14e8] sm:$0xff]  ;;  %v8019_v57 = vcombine.low %v4340_v40, %v4344_v41  ;;  %v4392_v34 = vld [vmem:[#allocation2 + $0x1660] sm:$0xff] }
 0x25d   :  { %v8021_v15 = vcombine.low %v4341_v42, %v4345_v2  ;;  %v4432_v16 = vld [vmem:[#allocation2 + $0x17a0] sm:$0xff] }
 0x25e   :  { %5783 = vmatpush1.bf16.msra.mxu0 %v7971_v49  ;;  %5889 = vmatpush1.bf16.msra.mxu1 %v7973_v50  ;;  %v8013_v49 = vcombine.low %v4333_v28, %v4337_v30  ;;  %v8020_v50 = vcombine.high %v4340_v40, %v4344_v41  ;;  %v4396_v40 = vld [vmem:[#allocation2 + $0x1680] sm:$0xff] }
 0x25f   :  { %5784 = vmatprep.subr.bf16.mxu0 %v7980_v51  ;;  %5890 = vmatprep.subr.bf16.mxu1 %v7982_v52  ;;  %v8022_v51 = vcombine.high %v4341_v42, %v4345_v2  ;;  %v4348_v52 = vld [vmem:[#allocation2 + $0x1500] sm:$0xff]  ;;  %v4397_v42 = vld [vmem:[#allocation2 + $0x1688] sm:$0xff] }
 0x260   :  { %v8027_v1 = vcombine.low %v4348_v52, %v4352_v53  ;;  %v4400_v41 = vld [vmem:[#allocation2 + $0x16a0] sm:$0xff]  ;;  %v4401_v2 = vld [vmem:[#allocation2 + $0x16a8] sm:$0xff] }
 0x262   :  { %5785 = vmatpush1.bf16.msra.mxu0 %v7979_v58  ;;  %5891 = vmatpush1.bf16.msra.mxu1 %v7981_v61  ;;  %v8028_v58 = vcombine.high %v4348_v52, %v4352_v53  ;;  %v4356_v61 = vld [vmem:[#allocation2 + $0x1540] sm:$0xff] }
 0x263   :  { %5786 = vmatprep.subr.bf16.mxu0 %v7988_v62  ;;  %5892 = vmatprep.subr.bf16.mxu1 %v7990_v63  ;;  %v4360_v62 = vld [vmem:[#allocation2 + $0x1560] sm:$0xff]  ;;  %v4357_v63 = vld [vmem:[#allocation2 + $0x1548] sm:$0xff] }
 0x264   :  { %v8036_v4 = vcombine.high %v4356_v61, %v4360_v62  ;;  %v8038_v5 = vcombine.high %v4357_v63, %v4361_v0  ;;  %v4404_v52 = vld [vmem:[#allocation2 + $0x16c0] sm:$0xff] }
 0x265   :  { %v4408_v53 = vld [vmem:[#allocation2 + $0x16e0] sm:$0xff] }
 0x266   :  { %5787 = vmatpush1.bf16.msra.mxu0 %v7987_v29  ;;  %5893 = vmatpush1.bf16.msra.mxu1 %v7989_v7  ;;  %v4369_v29 = vld [vmem:[#allocation2 + $0x15a8] sm:$0xff]  ;;  %v8035_v7 = vcombine.low %v4356_v61, %v4360_v62  ;;  %v4412_v61 = vld [vmem:[#allocation2 + $0x1700] sm:$0xff] }
 0x267   :  { %5809 = vmatprep.subr.bf16.mxu0 %v7996_v11  ;;  %5915 = vmatprep.subr.bf16.mxu1 %v7998_v12  ;;  %v8037_v11 = vcombine.low %v4357_v63, %v4361_v0  ;;  %v8044_v12 = vcombine.high %v4364_v10, %v4368_v6  ;;  %v8046_v33 = vcombine.high %v4365_v26, %v4369_v29  ;;  %v4416_v62 = vld [vmem:[#allocation2 + $0x1720] sm:$0xff]  ;;  %v4413_v63 = vld [vmem:[#allocation2 + $0x1708] sm:$0xff] }
 0x268   :  { %v8045_v19 = vcombine.low %v4365_v26, %v4369_v29  ;;  %v4417_v0 = vld [vmem:[#allocation2 + $0x1728] sm:$0xff]  ;;  %v4420_v10 = vld [vmem:[#allocation2 + $0x1740] sm:$0xff] }
 0x269   :  { %5789 = vmatmul.mubr.bf16.vlgmr.msra.gmra.mrb[0].mxu0 %v8739_v14  ;;  %5895 = vmatmul.mubr.bf16.vlgmr.msra.gmra.mrb[0].mxu1 %v8739_v14  ;;  %v4424_v6 = vld [vmem:[#allocation2 + $0x1760] sm:$0xff]  ;;  %v4421_v26 = vld [vmem:[#allocation2 + $0x1748] sm:$0xff] }
 0x26a   :  { %5810 = vmatpush1.bf16.msra.mxu0 %v7995_v32  ;;  %5916 = vmatpush1.bf16.msra.mxu1 %v7997_v59  ;;  %v8054_v32 = vcombine.high %v4373_v9, %v4377_v25  ;;  %v4384_v59 = vld [vmem:[#allocation2 + $0x1620] sm:$0xff]  ;;  %v4425_v29 = vld [vmem:[#allocation2 + $0x1768] sm:$0xff] }
 0x26b   :  { %5811 = vmatprep.subr.bf16.mxu0 %v8004_v20  ;;  %5917 = vmatprep.subr.bf16.mxu1 %v8006_v21  ;;  %v4381_v20 = vld [vmem:[#allocation2 + $0x1608] sm:$0xff]  ;;  %v8060_v28 = vcombine.high %v4380_v17, %v4384_v59 }
 0x26c   :  { %5798 = vmatprep.mubr.bf16.mxu0 %v8751_v23  ;;  %5904 = vmatprep.mubr.bf16.mxu1 %v8751_v23  ;;  %v4385_v21 = vld [vmem:[#allocation2 + $0x1628] sm:$0xff] }
 0x26d   :  { %v8062_v30 = vcombine.high %v4381_v20, %v4385_v21  ;;  %v4429_v9 = vld [vmem:[#allocation2 + $0x1788] sm:$0xff] }
 0x26e   :  { %5812 = vmatpush1.bf16.msra.mxu0 %v8003_v38  ;;  %5918 = vmatpush1.bf16.msra.mxu1 %v8005_v24  ;;  %v8059_v38 = vcombine.low %v4380_v17, %v4384_v59  ;;  %v8061_v24 = vcombine.low %v4381_v20, %v4385_v21  ;;  %v4433_v25 = vld [vmem:[#allocation2 + $0x17a8] sm:$0xff]  ;;  %v4436_v17 = vld [vmem:[#allocation2 + $0x17c0] sm:$0xff] }
 0x26f   :  { %5813 = vmatprep.subr.bf16.mxu0 %v8012_v54  ;;  %5919 = vmatprep.subr.bf16.mxu1 %v8014_v39  ;;  %v8068_v54 = vcombine.high %v4388_v44, %v4392_v34  ;;  %v8070_v39 = vcombine.high %v4389_v35, %v4393_v37  ;;  %v4440_v59 = vld [vmem:[#allocation2 + $0x17e0] sm:$0xff]  ;;  %v4437_v20 = vld [vmem:[#allocation2 + $0x17c8] sm:$0xff] }
 0x270   :  { %v4441_v21 = vld [vmem:[#allocation2 + $0x17e8] sm:$0xff] }
 0x271   :  { %5799 = vmatmul.mubr.bf16.gmra.mrb[4].mxu0 %v8760_v45  ;;  %5905 = vmatmul.mubr.bf16.gmra.mrb[4].mxu1 %v8760_v45 }
 0x272   :  { %5814 = vmatpush1.bf16.msra.mxu0 %v8011_v48  ;;  %5920 = vmatpush1.bf16.msra.mxu1 %v8013_v49  ;;  %v8067_v48 = vcombine.low %v4388_v44, %v4392_v34  ;;  %v8069_v49 = vcombine.low %v4389_v35, %v4393_v37  ;;  %v8109_v44 = vcombine.low %v4429_v9, %v4433_v25  ;;  %v4190_v37 = vld [vmem:[#allocation2 + $0x1010] sm:$0xff] }
 0x273   :  { %5815 = vmatprep.subr.bf16.mxu0 %v8020_v50  ;;  %5921 = vmatprep.subr.bf16.mxu1 %v8022_v51  ;;  %v8076_v50 = vcombine.high %v4396_v40, %v4400_v41  ;;  %v8078_v51 = vcombine.high %v4397_v42, %v4401_v2  ;;  %v8116_v34 = vcombine.high %v4436_v17, %v4440_v59 }
 0x274   :  { %5841 = vmatprep.mubr.bf16.mxu0 %v8772_v55  ;;  %5947 = vmatprep.mubr.bf16.mxu1 %v8772_v55  ;;  %v8118_v35 = vcombine.high %v4437_v20, %v4441_v21 }
 0x276   :  { %5816 = vmatpush1.bf16.msra.mxu0 %v8019_v57  ;;  %5922 = vmatpush1.bf16.msra.mxu1 %v8021_v15  ;;  %v8075_v57 = vcombine.low %v4396_v40, %v4400_v41  ;;  %v8077_v15 = vcombine.low %v4397_v42, %v4401_v2  ;;  %v8391_v41 = vld [vmem:[%s9120_s0 + $0x58] sm:$0x11]  ;;  %v8115_v2 = vcombine.low %v4436_v17, %v4440_v59  ;;  %v4230_v59 = vld [vmem:[#allocation2 + $0x1150] sm:$0xff] }
 0x277   :  { %5817 = vmatprep.subr.bf16.mxu0 %v8028_v58  ;;  %5923 = vmatprep.subr.bf16.mxu1 %v8030_v60  ;;  %v8084_v58 = vcombine.high %v4404_v52, %v4408_v53  ;;  %v8086_v60 = vcombine.high %v4405_v56, %v4409_v27  ;;  %v4185_v42 = vrot.slane %v8391_v41, 5  ;;  %v4250_v41 = vld [vmem:[#allocation2 + $0x11f0] sm:$0xff] }
 0x27a   :  { %5818 = vmatpush1.bf16.msra.mxu0 %v8027_v1  ;;  %5924 = vmatpush1.bf16.msra.mxu1 %v8029_v3  ;;  %v8083_v1 = vcombine.low %v4404_v52, %v4408_v53  ;;  %v8085_v3 = vcombine.low %v4405_v56, %v4409_v27  ;;  %v4202_v52 = vld [vmem:[#allocation2 + $0x1070] sm:$0xff]  ;;  %v8789_v53 = vcombine.low %v8764_v47, %v8768_v36  ;;  %v4199_v56 = vld [vmem:[#allocation2 + $0x1058] sm:$0xff] }
 0x27b   :  { %5819 = vmatprep.subr.bf16.mxu0 %v8036_v4  ;;  %5925 = vmatprep.subr.bf16.mxu1 %v8038_v5  ;;  %v8092_v4 = vcombine.high %v4412_v61, %v4416_v62  ;;  %v8094_v5 = vcombine.high %v4413_v63, %v4417_v0  ;;  %v4203_v27 = vld [vmem:[#allocation2 + $0x1078] sm:$0xff]  ;;  %v4206_v47 = vld [vmem:[#allocation2 + $0x1090] sm:$0xff] }
 0x27c   :  { %v4210_v36 = vld [vmem:[#allocation2 + $0x10b0] sm:$0xff] }
 0x27e   :  { %5820 = vmatpush1.bf16.msra.mxu0 %v8035_v7  ;;  %5926 = vmatpush1.bf16.msra.mxu1 %v8037_v11  ;;  %v8091_v7 = vcombine.low %v4412_v61, %v4416_v62  ;;  %v8093_v11 = vcombine.low %v4413_v63, %v4417_v0  ;;  %v7882_v62 = vcombine.high %v4199_v56, %v4203_v27  ;;  %v4207_v0 = vld [vmem:[#allocation2 + $0x1098] sm:$0xff] }
 0x27f   :  { %5821 = vmatprep.subr.bf16.mxu0 %v8044_v12  ;;  %5927 = vmatprep.subr.bf16.mxu1 %v8046_v33  ;;  %v8100_v12 = vcombine.high %v4420_v10, %v4424_v6  ;;  %v8102_v33 = vcombine.high %v4421_v26, %v4425_v29 }
 0x282   :  { %5822 = vmatpush1.bf16.msra.mxu0 %v8043_v18  ;;  %5928 = vmatpush1.bf16.msra.mxu1 %v8045_v19  ;;  %v8099_v18 = vcombine.low %v4420_v10, %v4424_v6  ;;  %v8101_v19 = vcombine.low %v4421_v26, %v4425_v29  ;;  %v4214_v10 = vld [vmem:[#allocation2 + $0x10d0] sm:$0xff]  ;;  %v4215_v29 = vld [vmem:[#allocation2 + $0x10d8] sm:$0xff] }
 0x283   :  { %5823 = vmatprep.subr.bf16.mxu0 %v8052_v31  ;;  %5929 = vmatprep.subr.bf16.mxu1 %v8054_v32  ;;  %v8108_v31 = vcombine.high %v4428_v13, %v4432_v16  ;;  %v8110_v32 = vcombine.high %v4429_v9, %v4433_v25  ;;  %v4218_v6 = vld [vmem:[#allocation2 + $0x10f0] sm:$0xff]  ;;  %v4223_v25 = vld [vmem:[#allocation2 + $0x1118] sm:$0xff] }
 0x284   :  { %v4226_v9 = vld [vmem:[#allocation2 + $0x1130] sm:$0xff] }
 0x286   :  { %5824 = vmatpush1.bf16.msra.mxu0 %v8051_v22  ;;  %5930 = vmatpush1.bf16.msra.mxu1 %v8053_v46  ;;  %v8390_v22 = vld [vmem:[%s9120_s0 + $0x48] sm:$0xff] }
 0x287   :  { %5825 = vmatprep.subr.bf16.mxu0 %v8060_v28  ;;  %5931 = vmatprep.subr.bf16.mxu1 %v8062_v30  ;;  %v4179_v46 = vrot.slane %v8390_v22, 5  ;;  %v8107_v28 = vcombine.low %v4428_v13, %v4432_v16  ;;  %v4147_v30 = vld [vmem:[%s9120_s0 + $0x38] sm:$0xee]  ;;  %v4222_v16 = vld [vmem:[#allocation2 + $0x1110] sm:$0xff] }
 0x288   :  { %v4235_v22 = vld [vmem:[#allocation2 + $0x1178] sm:$0xff] }
 0x289   :  { %v4184_v40 = vrot.slane %v4179_v46, 4 }
 0x28a   :  { %5826 = vmatpush1.bf16.msra.mxu0 %v8059_v38  ;;  %5932 = vmatpush1.bf16.msra.mxu1 %v8061_v24  ;;  %v4194_v38 = vld [vmem:[#allocation2 + $0x1030] sm:$0xff]  ;;  %v4191_v24 = vld [vmem:[#allocation2 + $0x1018] sm:$0xff] }
 0x28b   :  { %5827 = vmatprep.subr.bf16.mxu0 %v8068_v54  ;;  %5933 = vmatprep.subr.bf16.mxu1 %v8070_v39  ;;  %v4195_v54 = vld [vmem:[#allocation2 + $0x1038] sm:$0xff]  ;;  %v7858_v39 = vrot.slane %v4147_v30, 9 }
 0x28e   :  { %5828 = vmatpush1.bf16.msra.mxu0 %v8067_v48  ;;  %5934 = vmatpush1.bf16.msra.mxu1 %v8069_v49  ;;  %v8117_v48 = vcombine.low %v4437_v20, %v4441_v21  ;;  %v7872_v49 = vcombine.high %v4190_v37, %v4194_v38  ;;  %v4234_v20 = vld [vmem:[#allocation2 + $0x1170] sm:$0xff]  ;;  %v4231_v21 = vld [vmem:[#allocation2 + $0x1158] sm:$0xff] }
 0x28f   :  { %5829 = vmatprep.subr.bf16.mxu0 %v8076_v50  ;;  %5935 = vmatprep.subr.bf16.mxu1 %v8078_v51  ;;  %v7874_v50 = vcombine.high %v4191_v24, %v4195_v54  ;;  %v4198_v51 = vld [vmem:[#allocation2 + $0x1050] sm:$0xff]  ;;  %v7912_v30 = vcombine.high %v4230_v59, %v4234_v20 }
 0x290   :  { %v7880_v61 = vcombine.high %v4198_v51, %v4202_v52  ;;  %v7879_v8 = vcombine.low %v4198_v51, %v4202_v52  ;;  %v4254_v52 = vld [vmem:[#allocation2 + $0x1210] sm:$0xff] }
 0x292   :  { %5830 = vmatpush1.bf16.msra.mxu0 %v8075_v57  ;;  %5936 = vmatpush1.bf16.msra.mxu1 %v8077_v15  ;;  %v4180_v57 = vsel %vm8706_vm5, %v7858_v39, %v4179_v46  ;;  %v4186_v15 = vsel %vm8706_vm5, %v4184_v40, %v4185_v42  ;;  %v7903_v46 = vcombine.low %v4222_v16, %v4226_v9  ;;  %v4246_v40 = vld [vmem:[#allocation2 + $0x11d0] sm:$0xff]  ;;  %v4247_v42 = vld [vmem:[#allocation2 + $0x11d8] sm:$0xff] }
 0x293   :  { %5831 = vmatprep.subr.bf16.mxu0 %v8084_v58  ;;  %5937 = vmatprep.subr.bf16.mxu1 %v8086_v60  ;;  %v7871_v58 = vcombine.low %v4190_v37, %v4194_v38  ;;  %v7873_v60 = vcombine.low %v4191_v24, %v4195_v54  ;;  %v8795_v63 = vcombine.high %v4180_v57, %v4186_v15  ;;  %v4239_v37 = vld [vmem:[#allocation2 + $0x1198] sm:$0xff] }
 0x294   :  { %v8801_v26 = vcombine.low %v4180_v57, %v4186_v15  ;;  %v4243_v38 = vld [vmem:[#allocation2 + $0x11b8] sm:$0xff]  ;;  %v7911_v24 = vcombine.low %v4230_v59, %v4234_v20  ;;  %v7913_v54 = vcombine.low %v4231_v21, %v4235_v22  ;;  %v7927_v15 = vcombine.low %v4246_v40, %v4250_v41  ;;  %v4290_v59 = vld [vmem:[#allocation2 + $0x1330] sm:$0xff] }
 0x295   :  { %v4259_v57 = vld [vmem:[#allocation2 + $0x1238] sm:$0xff] }
 0x296   :  { %5832 = vmatpush1.bf16.msra.mxu0 %v8083_v1  ;;  %5938 = vmatpush1.bf16.msra.mxu1 %v8085_v3  ;;  %v4211_v1 = vld [vmem:[#allocation2 + $0x10b8] sm:$0xff]  ;;  %v7881_v3 = vcombine.low %v4199_v56, %v4203_v27  ;;  %v4258_v56 = vld [vmem:[#allocation2 + $0x1230] sm:$0xff] }
 0x297   :  { %5833 = vmatprep.subr.bf16.mxu0 %v8092_v4  ;;  %5939 = vmatprep.subr.bf16.mxu1 %v8094_v5  ;;  %v7888_v4 = vcombine.high %v4206_v47, %v4210_v36  ;;  %v7890_v5 = vcombine.high %v4207_v0, %v4211_v1  ;;  %v4255_v27 = vld [vmem:[#allocation2 + $0x1218] sm:$0xff] }
 0x298   :  { %v4287_v20 = vld [vmem:[#allocation2 + $0x1318] sm:$0xff] }
 0x29a   :  { %5834 = vmatpush1.bf16.msra.mxu0 %v8091_v7  ;;  %5940 = vmatpush1.bf16.msra.mxu1 %v8093_v11  ;;  %v4219_v7 = vld [vmem:[#allocation2 + $0x10f8] sm:$0xff]  ;;  %v7887_v11 = vcombine.low %v4206_v47, %v4210_v36  ;;  %v4266_v47 = vld [vmem:[#allocation2 + $0x1270] sm:$0xff] }
 0x29b   :  { %5835 = vmatprep.subr.bf16.mxu0 %v8100_v12  ;;  %5941 = vmatprep.subr.bf16.mxu1 %v8102_v33  ;;  %v7889_v12 = vcombine.low %v4207_v0, %v4211_v1  ;;  %v7896_v33 = vcombine.high %v4214_v10, %v4218_v6  ;;  %v7898_v13 = vcombine.high %v4215_v29, %v4219_v7  ;;  %v4263_v36 = vld [vmem:[#allocation2 + $0x1258] sm:$0xff] }
 0x29c   :  { %v4267_v0 = vld [vmem:[#allocation2 + $0x1278] sm:$0xff]  ;;  %v7935_v1 = vcombine.low %v4254_v52, %v4258_v56 }
 0x29e   :  { %5836 = vmatpush1.bf16.msra.mxu0 %v8099_v18  ;;  %5942 = vmatpush1.bf16.msra.mxu1 %v8101_v19  ;;  %v4227_v18 = vld [vmem:[#allocation2 + $0x1138] sm:$0xff]  ;;  %v7895_v19 = vcombine.low %v4214_v10, %v4218_v6  ;;  %v4274_v10 = vld [vmem:[#allocation2 + $0x12b0] sm:$0xff] }
 0x29f   :  { %5837 = vmatprep.subr.bf16.mxu0 %v8108_v31  ;;  %5943 = vmatprep.subr.bf16.mxu1 %v8110_v32  ;;  %v7897_v31 = vcombine.low %v4215_v29, %v4219_v7  ;;  %v7904_v32 = vcombine.high %v4222_v16, %v4226_v9  ;;  %v7906_v17 = vcombine.high %v4223_v25, %v4227_v18  ;;  %v4271_v6 = vld [vmem:[#allocation2 + $0x1298] sm:$0xff]  ;;  %v4282_v16 = vld [vmem:[#allocation2 + $0x12f0] sm:$0xff] }
 0x2a0   :  { %v4275_v29 = vld [vmem:[#allocation2 + $0x12b8] sm:$0xff] }
 0x2a1   :  { %v4279_v9 = vld [vmem:[#allocation2 + $0x12d8] sm:$0xff] }
 0x2a2   :  { %5838 = vmatpush1.bf16.msra.mxu0 %v8107_v28  ;;  %5944 = vmatpush1.bf16.msra.mxu1 %v8109_v44  ;;  %v7905_v28 = vcombine.low %v4223_v25, %v4227_v18  ;;  %v7914_v44 = vcombine.high %v4231_v21, %v4235_v22  ;;  %v4283_v25 = vld [vmem:[#allocation2 + $0x12f8] sm:$0xff] }
 0x2a3   :  { %5839 = vmatprep.subr.bf16.mxu0 %v8116_v34  ;;  %5945 = vmatprep.subr.bf16.mxu1 %v8118_v35  ;;  %v4238_v34 = vld [vmem:[#allocation2 + $0x1190] sm:$0xff]  ;;  %v4291_v21 = vld [vmem:[#allocation2 + $0x1338] sm:$0xff] }
 0x2a4   :  { %v4242_v35 = vld [vmem:[#allocation2 + $0x11b0] sm:$0xff] }
 0x2a5   :  { %v7920_v39 = vcombine.high %v4238_v34, %v4242_v35 }
 0x2a6   :  { %5840 = vmatpush1.bf16.msra.mxu0 %v8115_v2  ;;  %5946 = vmatpush1.bf16.msra.mxu1 %v8117_v48  ;;  %v4251_v2 = vld [vmem:[#allocation2 + $0x11f8] sm:$0xff]  ;;  %v7919_v48 = vcombine.low %v4238_v34, %v4242_v35  ;;  %v4298_v34 = vld [vmem:[#allocation2 + $0x1370] sm:$0xff] }
 0x2a7   :  { %5968 = vmatprep.subr.bf16.mxu0 %v7872_v49  ;;  %6074 = vmatprep.subr.bf16.mxu1 %v7874_v50  ;;  %v7921_v49 = vcombine.low %v4239_v37, %v4243_v38  ;;  %v7928_v50 = vcombine.high %v4246_v40, %v4250_v41  ;;  %v7930_v51 = vcombine.high %v4247_v42, %v4251_v2  ;;  %v4295_v35 = vld [vmem:[#allocation2 + $0x1358] sm:$0xff]  ;;  %v4306_v40 = vld [vmem:[#allocation2 + $0x13b0] sm:$0xff] }
 0x2a8   :  { %v4303_v41 = vld [vmem:[#allocation2 + $0x1398] sm:$0xff] }
 0x2a9   :  { %5842 = vmatmul.mubr.bf16.vlgmr.msra.gmra.mrb[0].mxu0 %v8789_v53  ;;  %5948 = vmatmul.mubr.bf16.vlgmr.msra.gmra.mrb[0].mxu1 %v8789_v53 }
 0x2aa   :  { %5969 = vmatpush1.bf16.msra.mxu0 %v7871_v58  ;;  %6075 = vmatpush1.bf16.msra.mxu1 %v7873_v60  ;;  %v7929_v58 = vcombine.low %v4247_v42, %v4251_v2  ;;  %v7936_v60 = vcombine.high %v4254_v52, %v4258_v56  ;;  %v4307_v42 = vld [vmem:[#allocation2 + $0x13b8] sm:$0xff]  ;;  %v4314_v52 = vld [vmem:[#allocation2 + $0x13f0] sm:$0xff] }
 0x2ab   :  { %5970 = vmatprep.subr.bf16.mxu0 %v7880_v61  ;;  %6076 = vmatprep.subr.bf16.mxu1 %v7882_v62  ;;  %v7938_v61 = vcombine.high %v4255_v27, %v4259_v57  ;;  %v4262_v62 = vld [vmem:[#allocation2 + $0x1250] sm:$0xff]  ;;  %v4311_v56 = vld [vmem:[#allocation2 + $0x13d8] sm:$0xff] }
 0x2ac   :  { %5851 = vmatprep.mubr.bf16.mxu0 %v8795_v63  ;;  %5957 = vmatprep.mubr.bf16.mxu1 %v8795_v63  ;;  %v7943_v7 = vcombine.low %v4262_v62, %v4266_v47 }
 0x2ae   :  { %5971 = vmatpush1.bf16.msra.mxu0 %v7879_v8  ;;  %6077 = vmatpush1.bf16.msra.mxu1 %v7881_v3  ;;  %v7937_v8 = vcombine.low %v4255_v27, %v4259_v57  ;;  %v7944_v3 = vcombine.high %v4262_v62, %v4266_v47  ;;  %v4315_v27 = vld [vmem:[#allocation2 + $0x13f8] sm:$0xff]  ;;  %v4322_v62 = vld [vmem:[#allocation2 + $0x1430] sm:$0xff] }
 0x2af   :  { %5972 = vmatprep.subr.bf16.mxu0 %v7888_v4  ;;  %6078 = vmatprep.subr.bf16.mxu1 %v7890_v5  ;;  %v7946_v4 = vcombine.high %v4263_v36, %v4267_v0  ;;  %v4270_v5 = vld [vmem:[#allocation2 + $0x1290] sm:$0xff]  ;;  %v4319_v47 = vld [vmem:[#allocation2 + $0x1418] sm:$0xff] }
 0x2b0   :  { %v7951_v18 = vcombine.low %v4270_v5, %v4274_v10 }
 0x2b1   :  { %5852 = vmatmul.mubr.bf16.gmra.mrb[4].mxu0 %v8801_v26  ;;  %5958 = vmatmul.mubr.bf16.gmra.mrb[4].mxu1 %v8801_v26 }
 0x2b2   :  { %5973 = vmatpush1.bf16.msra.mxu0 %v7887_v11  ;;  %6079 = vmatpush1.bf16.msra.mxu1 %v7889_v12  ;;  %v7945_v11 = vcombine.low %v4263_v36, %v4267_v0  ;;  %v7952_v12 = vcombine.high %v4270_v5, %v4274_v10  ;;  %v4323_v36 = vld [vmem:[#allocation2 + $0x1438] sm:$0xff]  ;;  %v4330_v5 = vld [vmem:[#allocation2 + $0x1470] sm:$0xff] }
 0x2b3   :  { %5974 = vmatprep.subr.bf16.mxu0 %v7896_v33  ;;  %6080 = vmatprep.subr.bf16.mxu1 %v7898_v13  ;;  %v7954_v33 = vcombine.high %v4271_v6, %v4275_v29  ;;  %v4278_v13 = vld [vmem:[#allocation2 + $0x12d0] sm:$0xff]  ;;  %v4327_v10 = vld [vmem:[#allocation2 + $0x1458] sm:$0xff] }
 0x2b4   :  { %6000 = vmatprep.mubr.bf16.mxu0 %v8722_v43  ;;  %6106 = vmatprep.mubr.bf16.mxu1 %v8722_v43  ;;  %v7922_v43 = vcombine.high %v4239_v37, %v4243_v38  ;;  %v7959_v22 = vcombine.low %v4278_v13, %v4282_v16  ;;  %v4299_v37 = vld [vmem:[#allocation2 + $0x1378] sm:$0xff] }
 0x2b6   :  { %5975 = vmatpush1.bf16.msra.mxu0 %v7895_v19  ;;  %6081 = vmatpush1.bf16.msra.mxu1 %v7897_v31  ;;  %v7953_v19 = vcombine.low %v4271_v6, %v4275_v29  ;;  %v7960_v31 = vcombine.high %v4278_v13, %v4282_v16  ;;  %v4331_v6 = vld [vmem:[#allocation2 + $0x1478] sm:$0xff]  ;;  %v4338_v13 = vld [vmem:[#allocation2 + $0x14b0] sm:$0xff] }
 0x2b7   :  { %5976 = vmatprep.subr.bf16.mxu0 %v7904_v32  ;;  %6082 = vmatprep.subr.bf16.mxu1 %v7906_v17  ;;  %v7962_v32 = vcombine.high %v4279_v9, %v4283_v25  ;;  %v4286_v17 = vld [vmem:[#allocation2 + $0x1310] sm:$0xff]  ;;  %v4335_v16 = vld [vmem:[#allocation2 + $0x1498] sm:$0xff] }
 0x2b8   :  { %v7967_v38 = vcombine.low %v4286_v17, %v4290_v59 }
 0x2ba   :  { %5977 = vmatpush1.bf16.msra.mxu0 %v7903_v46  ;;  %6083 = vmatpush1.bf16.msra.mxu1 %v7905_v28  ;;  %v7961_v46 = vcombine.low %v4279_v9, %v4283_v25  ;;  %v7968_v28 = vcombine.high %v4286_v17, %v4290_v59  ;;  %v4339_v9 = vld [vmem:[#allocation2 + $0x14b8] sm:$0xff]  ;;  %v4346_v17 = vld [vmem:[#allocation2 + $0x14f0] sm:$0xff] }
 0x2bb   :  { %5978 = vmatprep.subr.bf16.mxu0 %v7912_v30  ;;  %6084 = vmatprep.subr.bf16.mxu1 %v7914_v44  ;;  %v7970_v30 = vcombine.high %v4287_v20, %v4291_v21  ;;  %v4294_v44 = vld [vmem:[#allocation2 + $0x1350] sm:$0xff]  ;;  %v4343_v59 = vld [vmem:[#allocation2 + $0x14d8] sm:$0xff] }
 0x2bc   :  { %v7975_v2 = vcombine.low %v4294_v44, %v4298_v34 }
 0x2be   :  { %5979 = vmatpush1.bf16.msra.mxu0 %v7911_v24  ;;  %6085 = vmatpush1.bf16.msra.mxu1 %v7913_v54  ;;  %v7969_v24 = vcombine.low %v4287_v20, %v4291_v21  ;;  %v7976_v54 = vcombine.high %v4294_v44, %v4298_v34  ;;  %v4347_v20 = vld [vmem:[#allocation2 + $0x14f8] sm:$0xff] }
 0x2bf   :  { %5980 = vmatprep.subr.bf16.mxu0 %v7920_v39  ;;  %6086 = vmatprep.subr.bf16.mxu1 %v7922_v43  ;;  %v7978_v39 = vcombine.high %v4295_v35, %v4299_v37  ;;  %v4302_v43 = vld [vmem:[#allocation2 + $0x1390] sm:$0xff]  ;;  %v4351_v44 = vld [vmem:[#allocation2 + $0x1518] sm:$0xff] }
 0x2c0   :  { %v7983_v57 = vcombine.low %v4302_v43, %v4306_v40  ;;  %v4355_v34 = vld [vmem:[#allocation2 + $0x1538] sm:$0xff] }
 0x2c2   :  { %5981 = vmatpush1.bf16.msra.mxu0 %v7919_v48  ;;  %6087 = vmatpush1.bf16.msra.mxu1 %v7921_v49  ;;  %v7977_v48 = vcombine.low %v4295_v35, %v4299_v37  ;;  %v7984_v49 = vcombine.high %v4302_v43, %v4306_v40  ;;  %v4363_v43 = vld [vmem:[#allocation2 + $0x1578] sm:$0xff] }
 0x2c3   :  { %5982 = vmatprep.subr.bf16.mxu0 %v7928_v50  ;;  %6088 = vmatprep.subr.bf16.mxu1 %v7930_v51  ;;  %v7986_v50 = vcombine.high %v4303_v41, %v4307_v42  ;;  %v4310_v51 = vld [vmem:[#allocation2 + $0x13d0] sm:$0xff] }
 0x2c4   :  { %v7991_v0 = vcombine.low %v4310_v51, %v4314_v52 }
 0x2c6   :  { %5983 = vmatpush1.bf16.msra.mxu0 %v7927_v15  ;;  %6089 = vmatpush1.bf16.msra.mxu1 %v7929_v58  ;;  %v7985_v15 = vcombine.low %v4303_v41, %v4307_v42  ;;  %v7992_v58 = vcombine.high %v4310_v51, %v4314_v52  ;;  %v8033_v41 = vcombine.low %v4351_v44, %v4355_v34 }
 0x2c7   :  { %5984 = vmatprep.subr.bf16.mxu0 %v7936_v60  ;;  %6090 = vmatprep.subr.bf16.mxu1 %v7938_v61  ;;  %v7994_v60 = vcombine.high %v4311_v56, %v4315_v27  ;;  %v4318_v61 = vld [vmem:[#allocation2 + $0x1410] sm:$0xff] }
 0x2c8   :  { %v7999_v29 = vcombine.low %v4318_v61, %v4322_v62 }
 0x2ca   :  { %5985 = vmatpush1.bf16.msra.mxu0 %v7935_v1  ;;  %6091 = vmatpush1.bf16.msra.mxu1 %v7937_v8  ;;  %v7993_v1 = vcombine.low %v4311_v56, %v4315_v27  ;;  %v8000_v8 = vcombine.high %v4318_v61, %v4322_v62  ;;  %v4374_v27 = vld [vmem:[#allocation2 + $0x15d0] sm:$0xff] }
 0x2cb   :  { %5986 = vmatprep.subr.bf16.mxu0 %v7944_v3  ;;  %6092 = vmatprep.subr.bf16.mxu1 %v7946_v4  ;;  %v8002_v3 = vcombine.high %v4319_v47, %v4323_v36  ;;  %v4326_v4 = vld [vmem:[#allocation2 + $0x1450] sm:$0xff] }
 0x2cc   :  { %v8007_v25 = vcombine.low %v4326_v4, %v4330_v5 }
 0x2ce   :  { %5987 = vmatpush1.bf16.msra.mxu0 %v7943_v7  ;;  %6093 = vmatpush1.bf16.msra.mxu1 %v7945_v11  ;;  %v8001_v7 = vcombine.low %v4319_v47, %v4323_v36  ;;  %v8008_v11 = vcombine.high %v4326_v4, %v4330_v5  ;;  %v4382_v36 = vld [vmem:[#allocation2 + $0x1610] sm:$0xff] }
 0x2cf   :  { %5988 = vmatprep.subr.bf16.mxu0 %v7952_v12  ;;  %6094 = vmatprep.subr.bf16.mxu1 %v7954_v33  ;;  %v8010_v12 = vcombine.high %v4327_v10, %v4331_v6  ;;  %v4334_v33 = vld [vmem:[#allocation2 + $0x1490] sm:$0xff] }
 0x2d0   :  { %v8015_v21 = vcombine.low %v4334_v33, %v4338_v13 }
 0x2d2   :  { %5989 = vmatpush1.bf16.msra.mxu0 %v7951_v18  ;;  %6095 = vmatpush1.bf16.msra.mxu1 %v7953_v19  ;;  %v8009_v18 = vcombine.low %v4327_v10, %v4331_v6  ;;  %v8016_v19 = vcombine.high %v4334_v33, %v4338_v13  ;;  %v4390_v6 = vld [vmem:[#allocation2 + $0x1650] sm:$0xff] }
 0x2d3   :  { %5990 = vmatprep.subr.bf16.mxu0 %v7960_v31  ;;  %6096 = vmatprep.subr.bf16.mxu1 %v7962_v32  ;;  %v8018_v31 = vcombine.high %v4335_v16, %v4339_v9  ;;  %v4342_v32 = vld [vmem:[#allocation2 + $0x14d0] sm:$0xff] }
 0x2d4   :  { %v8023_v35 = vcombine.low %v4342_v32, %v4346_v17 }
 0x2d6   :  { %5991 = vmatpush1.bf16.msra.mxu0 %v7959_v22  ;;  %6097 = vmatpush1.bf16.msra.mxu1 %v7961_v46  ;;  %v8024_v22 = vcombine.high %v4342_v32, %v4346_v17  ;;  %v8026_v46 = vcombine.high %v4343_v59, %v4347_v20 }
 0x2d7   :  { %5992 = vmatprep.subr.bf16.mxu0 %v7968_v28  ;;  %6098 = vmatprep.subr.bf16.mxu1 %v7970_v30  ;;  %v4350_v28 = vld [vmem:[#allocation2 + $0x1510] sm:$0xff] }
 0x2d8   :  { %v4354_v30 = vld [vmem:[#allocation2 + $0x1530] sm:$0xff] }
 0x2d9   :  { %v8032_v37 = vcombine.high %v4350_v28, %v4354_v30  ;;  %v8031_v40 = vcombine.low %v4350_v28, %v4354_v30 }
 0x2da   :  { %5993 = vmatpush1.bf16.msra.mxu0 %v7967_v38  ;;  %6099 = vmatpush1.bf16.msra.mxu1 %v7969_v24  ;;  %v8034_v38 = vcombine.high %v4351_v44, %v4355_v34  ;;  %v4358_v24 = vld [vmem:[#allocation2 + $0x1550] sm:$0xff] }
 0x2db   :  { %5994 = vmatprep.subr.bf16.mxu0 %v7976_v54  ;;  %6100 = vmatprep.subr.bf16.mxu1 %v7978_v39  ;;  %v4362_v54 = vld [vmem:[#allocation2 + $0x1570] sm:$0xff]  ;;  %v4359_v39 = vld [vmem:[#allocation2 + $0x1558] sm:$0xff] }
 0x2dc   :  { %v8042_v42 = vcombine.high %v4359_v39, %v4363_v43  ;;  %v8039_v51 = vcombine.low %v4358_v24, %v4362_v54  ;;  %v8041_v52 = vcombine.low %v4359_v39, %v4363_v43  ;;  %v4414_v34 = vld [vmem:[#allocation2 + $0x1710] sm:$0xff] }
 0x2dd   :  { %v4422_v43 = vld [vmem:[#allocation2 + $0x1750] sm:$0xff] }
 0x2de   :  { %5995 = vmatpush1.bf16.msra.mxu0 %v7975_v2  ;;  %6101 = vmatpush1.bf16.msra.mxu1 %v7977_v48  ;;  %v4366_v2 = vld [vmem:[#allocation2 + $0x1590] sm:$0xff] }
 0x2df   :  { %5996 = vmatprep.subr.bf16.mxu0 %v7984_v49  ;;  %6102 = vmatprep.subr.bf16.mxu1 %v7986_v50  ;;  %v4370_v48 = vld [vmem:[#allocation2 + $0x15b0] sm:$0xff]  ;;  %v4367_v49 = vld [vmem:[#allocation2 + $0x1598] sm:$0xff] }
 0x2e0   :  { %v4371_v50 = vld [vmem:[#allocation2 + $0x15b8] sm:$0xff]  ;;  %v8048_v56 = vcombine.high %v4366_v2, %v4370_v48 }
 0x2e1   :  { %v8049_v61 = vcombine.low %v4367_v49, %v4371_v50 }
 0x2e2   :  { %5997 = vmatpush1.bf16.msra.mxu0 %v7983_v57  ;;  %6103 = vmatpush1.bf16.msra.mxu1 %v7985_v15  ;;  %v4378_v57 = vld [vmem:[#allocation2 + $0x15f0] sm:$0xff]  ;;  %v4375_v15 = vld [vmem:[#allocation2 + $0x15d8] sm:$0xff] }
 0x2e3   :  { %5998 = vmatprep.subr.bf16.mxu0 %v7992_v58  ;;  %6104 = vmatprep.subr.bf16.mxu1 %v7994_v60  ;;  %v4379_v58 = vld [vmem:[#allocation2 + $0x15f8] sm:$0xff]  ;;  %v8047_v60 = vcombine.low %v4366_v2, %v4370_v48  ;;  %v8056_v62 = vcombine.high %v4374_v27, %v4378_v57 }
 0x2e4   :  { %v8058_v47 = vcombine.high %v4375_v15, %v4379_v58  ;;  %v8057_v4 = vcombine.low %v4375_v15, %v4379_v58  ;;  %v4438_v58 = vld [vmem:[#allocation2 + $0x17d0] sm:$0xff] }
 0x2e6   :  { %5999 = vmatpush1.bf16.msra.mxu0 %v7991_v0  ;;  %6105 = vmatpush1.bf16.msra.mxu1 %v7993_v1  ;;  %v4386_v0 = vld [vmem:[#allocation2 + $0x1630] sm:$0xff]  ;;  %v4383_v1 = vld [vmem:[#allocation2 + $0x1618] sm:$0xff] }
 0x2e7   :  { %6021 = vmatprep.subr.bf16.mxu0 %v8000_v8  ;;  %6127 = vmatprep.subr.bf16.mxu1 %v8002_v3  ;;  %v4387_v8 = vld [vmem:[#allocation2 + $0x1638] sm:$0xff]  ;;  %v8055_v3 = vcombine.low %v4374_v27, %v4378_v57  ;;  %v8064_v5 = vcombine.high %v4382_v36, %v4386_v0 }
 0x2e8   :  { %v8066_v10 = vcombine.high %v4383_v1, %v4387_v8  ;;  %v8065_v33 = vcombine.low %v4383_v1, %v4387_v8 }
 0x2e9   :  { %6001 = vmatmul.mubr.bf16.vlgmr.msra.gmra.mrb[8].mxu0 %v8739_v14  ;;  %6107 = vmatmul.mubr.bf16.vlgmr.msra.gmra.mrb[8].mxu1 %v8739_v14  ;;  %v8017_v14 = vcombine.low %v4335_v16, %v4339_v9  ;;  %v4398_v9 = vld [vmem:[#allocation2 + $0x1690] sm:$0xff] }
 0x2ea   :  { %6022 = vmatpush1.bf16.msra.mxu0 %v7999_v29  ;;  %6128 = vmatpush1.bf16.msra.mxu1 %v8001_v7  ;;  %v4394_v29 = vld [vmem:[#allocation2 + $0x1670] sm:$0xff]  ;;  %v4391_v7 = vld [vmem:[#allocation2 + $0x1658] sm:$0xff] }
 0x2eb   :  { %6023 = vmatprep.subr.bf16.mxu0 %v8008_v11  ;;  %6129 = vmatprep.subr.bf16.mxu1 %v8010_v12  ;;  %v4395_v11 = vld [vmem:[#allocation2 + $0x1678] sm:$0xff]  ;;  %v8063_v12 = vcombine.low %v4382_v36, %v4386_v0  ;;  %v8072_v13 = vcombine.high %v4390_v6, %v4394_v29 }
 0x2ec   :  { %6010 = vmatprep.mubr.bf16.mxu0 %v8751_v23  ;;  %6116 = vmatprep.mubr.bf16.mxu1 %v8751_v23  ;;  %v8025_v23 = vcombine.low %v4343_v59, %v4347_v20  ;;  %v8074_v16 = vcombine.high %v4391_v7, %v4395_v11  ;;  %v8073_v32 = vcombine.low %v4391_v7, %v4395_v11  ;;  %v4406_v20 = vld [vmem:[#allocation2 + $0x16d0] sm:$0xff] }
 0x2ee   :  { %6024 = vmatpush1.bf16.msra.mxu0 %v8007_v25  ;;  %6130 = vmatpush1.bf16.msra.mxu1 %v8009_v18  ;;  %v4402_v25 = vld [vmem:[#allocation2 + $0x16b0] sm:$0xff]  ;;  %v4399_v18 = vld [vmem:[#allocation2 + $0x1698] sm:$0xff] }
 0x2ef   :  { %6025 = vmatprep.subr.bf16.mxu0 %v8016_v19  ;;  %6131 = vmatprep.subr.bf16.mxu1 %v8018_v31  ;;  %v4403_v19 = vld [vmem:[#allocation2 + $0x16b8] sm:$0xff]  ;;  %v8071_v31 = vcombine.low %v4390_v6, %v4394_v29  ;;  %v8080_v17 = vcombine.high %v4398_v9, %v4402_v25 }
 0x2f0   :  { %v8082_v59 = vcombine.high %v4399_v18, %v4403_v19  ;;  %v8081_v28 = vcombine.low %v4399_v18, %v4403_v19  ;;  %v6251_v18 = vlaneseq }
 0x2f1   :  { %6011 = vmatmul.mubr.bf16.gmra.mrb[12].mxu0 %v8760_v45  ;;  %6117 = vmatmul.mubr.bf16.gmra.mrb[12].mxu1 %v8760_v45  ;;  %v8040_v45 = vcombine.high %v4358_v24, %v4362_v54 }
 0x2f2   :  { %6026 = vmatpush1.bf16.msra.mxu0 %v8015_v21  ;;  %6132 = vmatpush1.bf16.msra.mxu1 %v8017_v14  ;;  %v4410_v21 = vld [vmem:[#allocation2 + $0x16f0] sm:$0xff]  ;;  %v4407_v14 = vld [vmem:[#allocation2 + $0x16d8] sm:$0xff]  ;;  %v6252_v19 = vshrl.u32 %v6251_v18, 7 }
 0x2f3   :  { %6027 = vmatprep.subr.bf16.mxu0 %v8024_v22  ;;  %6133 = vmatprep.subr.bf16.mxu1 %v8026_v46  ;;  %v4411_v22 = vld [vmem:[#allocation2 + $0x16f8] sm:$0xff]  ;;  %v8079_v46 = vcombine.low %v4398_v9, %v4402_v25  ;;  %v8088_v30 = vcombine.high %v4406_v20, %v4410_v21 }
 0x2f4   :  { %6053 = vmatprep.mubr.bf16.mxu0 %v8772_v55  ;;  %6159 = vmatprep.mubr.bf16.mxu1 %v8772_v55  ;;  %v8050_v55 = vcombine.high %v4367_v49, %v4371_v50  ;;  %v8090_v44 = vcombine.high %v4407_v14, %v4411_v22  ;;  %v8089_v24 = vcombine.low %v4407_v14, %v4411_v22  ;;  %v4430_v50 = vld [vmem:[#allocation2 + $0x1790] sm:$0xff] }
 0x2f6   :  { %6028 = vmatpush1.bf16.msra.mxu0 %v8023_v35  ;;  %6134 = vmatpush1.bf16.msra.mxu1 %v8025_v23  ;;  %v4418_v35 = vld [vmem:[#allocation2 + $0x1730] sm:$0xff]  ;;  %v4415_v23 = vld [vmem:[#allocation2 + $0x1718] sm:$0xff] }
 0x2f7   :  { %6029 = vmatprep.subr.bf16.mxu0 %v8032_v37  ;;  %6135 = vmatprep.subr.bf16.mxu1 %v8034_v38  ;;  %v4419_v37 = vld [vmem:[#allocation2 + $0x1738] sm:$0xff]  ;;  %v8087_v38 = vcombine.low %v4406_v20, %v4410_v21  ;;  %v8096_v54 = vcombine.high %v4414_v34, %v4418_v35  ;;  %v6468_v20 = vld [vmem:[#allocation4] sm:$0xf]  ;;  %v8444_v21 = vmov 1983009808  }
 0x2f8   :  { %v8098_v39 = vcombine.high %v4415_v23, %v4419_v37  ;;  %v8097_v2 = vcombine.low %v4415_v23, %v4419_v37  ;;  %v6249_v14 = vunpack.c.l.s4 %v8444_v21 }
 0x2fa   :  { %6030 = vmatpush1.bf16.msra.mxu0 %v8031_v40  ;;  %6136 = vmatpush1.bf16.msra.mxu1 %v8033_v41  ;;  %v4426_v40 = vld [vmem:[#allocation2 + $0x1770] sm:$0xff]  ;;  %v4423_v41 = vld [vmem:[#allocation2 + $0x1758] sm:$0xff] }
 0x2fb   :  { %6031 = vmatprep.subr.bf16.mxu0 %v8040_v45  ;;  %6137 = vmatprep.subr.bf16.mxu1 %v8042_v42  ;;  %v4427_v45 = vld [vmem:[#allocation2 + $0x1778] sm:$0xff]  ;;  %v8095_v42 = vcombine.low %v4414_v34, %v4418_v35  ;;  %v8104_v48 = vcombine.high %v4422_v43, %v4426_v40 }
 0x2fc   :  { %v8106_v49 = vcombine.high %v4423_v41, %v4427_v45  ;;  %v8105_v27 = vcombine.low %v4423_v41, %v4427_v45 }
 0x2fe   :  { %6032 = vmatpush1.bf16.msra.mxu0 %v8039_v51  ;;  %6138 = vmatpush1.bf16.msra.mxu1 %v8041_v52  ;;  %v4434_v51 = vld [vmem:[#allocation2 + $0x17b0] sm:$0xff]  ;;  %v4431_v52 = vld [vmem:[#allocation2 + $0x1798] sm:$0xff] }
 0x2ff   :  { %6033 = vmatprep.subr.bf16.mxu0 %v8048_v56  ;;  %6139 = vmatprep.subr.bf16.mxu1 %v8050_v55  ;;  %v4435_v56 = vld [vmem:[#allocation2 + $0x17b8] sm:$0xff]  ;;  %v8103_v55 = vcombine.low %v4422_v43, %v4426_v40  ;;  %v8112_v57 = vcombine.high %v4430_v50, %v4434_v51 }
 0x300   :  { %v8114_v15 = vcombine.high %v4431_v52, %v4435_v56  ;;  %v8113_v36 = vcombine.low %v4431_v52, %v4435_v56 }
 0x302   :  { %6034 = vmatpush1.bf16.msra.mxu0 %v8047_v60  ;;  %6140 = vmatpush1.bf16.msra.mxu1 %v8049_v61  ;;  %v4442_v60 = vld [vmem:[#allocation2 + $0x17f0] sm:$0xff]  ;;  %v4439_v61 = vld [vmem:[#allocation2 + $0x17d8] sm:$0xff] }
 0x303   :  { %6035 = vmatprep.subr.bf16.mxu0 %v8056_v62  ;;  %6141 = vmatprep.subr.bf16.mxu1 %v8058_v47  ;;  %v4443_v62 = vld [vmem:[#allocation2 + $0x17f8] sm:$0xff]  ;;  %v8111_v47 = vcombine.low %v4430_v50, %v4434_v51  ;;  %v8120_v0 = vcombine.high %v4438_v58, %v4442_v60  ;;  %v8119_v8 = vcombine.low %v4438_v58, %v4442_v60 }
 0x304   :  { %v8122_v1 = vcombine.high %v4439_v61, %v4443_v62 }
 0x306   :  { %6036 = vmatpush1.bf16.msra.mxu0 %v8055_v3  ;;  %6142 = vmatpush1.bf16.msra.mxu1 %v8057_v4  ;;  %v8121_v3 = vcombine.low %v4439_v61, %v4443_v62 }
 0x307   :  { %6037 = vmatprep.subr.bf16.mxu0 %v8064_v5  ;;  %6143 = vmatprep.subr.bf16.mxu1 %v8066_v10 }
 0x30a   :  { %6038 = vmatpush1.bf16.msra.mxu0 %v8063_v12  ;;  %6144 = vmatpush1.bf16.msra.mxu1 %v8065_v33 }
 0x30b   :  { %6039 = vmatprep.subr.bf16.mxu0 %v8072_v13  ;;  %6145 = vmatprep.subr.bf16.mxu1 %v8074_v16 }
 0x30e   :  { %6040 = vmatpush1.bf16.msra.mxu0 %v8071_v31  ;;  %6146 = vmatpush1.bf16.msra.mxu1 %v8073_v32  ;;  %v8837_v31 = vsub.s32 0, %v6252_v19  ;;  %v6476_v32 = vsub.s32 1, %v6252_v19 }
 0x30f   :  { %6041 = vmatprep.subr.bf16.mxu0 %v8080_v17  ;;  %6147 = vmatprep.subr.bf16.mxu1 %v8082_v59  ;;  %v8839_v17 = vsub.s32 2, %v6252_v19  ;;  %v6484_v59 = vsub.s32 3, %v6252_v19 }
 0x310   :  { %v6473_v22 = vrot.slane %v6468_v20, %v8837_v31 }
 0x312   :  { %6042 = vmatpush1.bf16.msra.mxu0 %v8079_v46  ;;  %6148 = vmatpush1.bf16.msra.mxu1 %v8081_v28  ;;  %v6477_v46 = vrot.slane %v6468_v20, %v6476_v32  ;;  %v6481_v28 = vrot.slane %v6468_v20, %v8839_v17 }
 0x313   :  { %6043 = vmatprep.subr.bf16.mxu0 %v8088_v30  ;;  %6149 = vmatprep.subr.bf16.mxu1 %v8090_v44  ;;  %v6485_v30 = vrot.slane %v6468_v20, %v6484_v59  ;;  %v6250_v44 = vunpack.c.0.s8 %v6249_v14 }
 0x314   :  { %v6486_v34 = vcombine.low %v6473_v22, %v6477_v46 }
 0x315   :  { %v6488_v35 = vcombine.low %v6481_v28, %v6485_v30  ;;  %v8843_v23 = vsub.s32 %v6250_v44, %v6252_v19 }
 0x316   :  { %6044 = vmatpush1.bf16.msra.mxu0 %v8087_v38  ;;  %6150 = vmatpush1.bf16.msra.mxu1 %v8089_v24  ;;  %v6487_v24 = vcombine.high %v6473_v22, %v6477_v46 }
 0x317   :  { %6045 = vmatprep.subr.bf16.mxu0 %v8096_v54  ;;  %6151 = vmatprep.subr.bf16.mxu1 %v8098_v39  ;;  %v6496_v37 = vrot.slane %v6486_v34, %v8843_v23  ;;  %v6510_v38 = vrot.slane %v6488_v35, %v8843_v23  ;;  %v6489_v54 = vcombine.high %v6481_v28, %v6485_v30 }
 0x318   :  { %v6503_v40 = vrot.slane %v6487_v24, %v8843_v23 }
 0x319   :  { %v8847_v39 = vcombine.low %v6496_v37, %v6510_v38  ;;  %v8849_v43 = vcombine.high %v6496_v37, %v6510_v38  ;;  %v6517_v41 = vrot.slane %v6489_v54, %v8843_v23 }
 0x31a   :  { %6046 = vmatpush1.bf16.msra.mxu0 %v8095_v42  ;;  %6152 = vmatpush1.bf16.msra.mxu1 %v8097_v2 }
 0x31b   :  { %6047 = vmatprep.subr.bf16.mxu0 %v8104_v48  ;;  %6153 = vmatprep.subr.bf16.mxu1 %v8106_v49  ;;  %v6522_v49 = vrot.slane %v8847_v39, 1  ;;  %v9126_v56 = vrot.slane %v8849_v43, 1  ;;  %v8857_v61 = vcombine.low %v6503_v40, %v6517_v41  ;;  %v8859_v62 = vcombine.high %v6503_v40, %v6517_v41 }
 0x31e   :  { %6048 = vmatpush1.bf16.msra.mxu0 %v8103_v55  ;;  %6154 = vmatpush1.bf16.msra.mxu1 %v8105_v27  ;;  %v8855_v55 = vsub.s32 4, %v6252_v19 }
 0x31f   :  { %6049 = vmatprep.subr.bf16.mxu0 %v8112_v57  ;;  %6155 = vmatprep.subr.bf16.mxu1 %v8114_v15 }
 0x322   :  { %6050 = vmatpush1.bf16.msra.mxu0 %v8111_v47  ;;  %6156 = vmatpush1.bf16.msra.mxu1 %v8113_v36 }
 0x323   :  { %6051 = vmatprep.subr.bf16.mxu0 %v8120_v0  ;;  %6157 = vmatprep.subr.bf16.mxu1 %v8122_v1 }
 0x326   :  { %6052 = vmatpush1.bf16.msra.mxu0 %v8119_v8  ;;  %6158 = vmatpush1.bf16.msra.mxu1 %v8121_v3 }
 0x329   :  { %6054 = vmatmul.mubr.bf16.vlgmr.msra.gmra.mrb[8].mxu0 %v8789_v53  ;;  %6160 = vmatmul.mubr.bf16.vlgmr.msra.gmra.mrb[8].mxu1 %v8789_v53 }
 0x32a   :  { %6063 = vmatprep.mubr.bf16.mxu0 %v8795_v63  ;;  %6169 = vmatprep.mubr.bf16.mxu1 %v8795_v63 }
 0x331   :  { %6064 = vmatmul.mubr.bf16.gmra.mrb[12].mxu0 %v8801_v26  ;;  %6170 = vmatmul.mubr.bf16.gmra.mrb[12].mxu1 %v8801_v26 }
 0x37c   :  { %v5843_v4 = vpop.f32.mrb[0].mxu0  ;;  %v5949_v5 = vpop.f32.mrb[0].mxu1 }
 0x37d   :  { %v5845_v10 = vpop.f32.mrb[1].mxu0  ;;  %v5951_v6 = vpop.f32.mrb[1].mxu1 }
 0x37e   :  { %v5847_v29 = vpop.f32.mrb[2].mxu0  ;;  %v5953_v7 = vpop.f32.mrb[2].mxu1 }
 0x37f   :  { %v5849_v11 = vpop.f32.mrb[3].mxu0  ;;  %v5955_v12 = vpop.f32.mrb[3].mxu1 }
 0x384   :  { %v8821_v33 = vpop.f32.mrb[4].mxu0  ;;  %v8823_v13 = vpop.f32.mrb[4].mxu1 }
 0x385   :  { %v8825_v53 = vpop.f32.mrb[5].mxu0  ;;  %v8827_v16 = vpop.f32.mrb[5].mxu1 }
 0x386   :  { %v8829_v63 = vpop.f32.mrb[6].mxu0  ;;  %v8831_v9 = vpop.f32.mrb[6].mxu1 }
 0x387   :  { %v8833_v26 = vpop.f32.mrb[7].mxu0  ;;  %v8835_v25 = vpop.f32.mrb[7].mxu1 }
 0x3fc   :  { %v6055_v45 = vpop.f32.mrb[8].mxu0  ;;  %v6161_v2 = vpop.f32.mrb[8].mxu1 }
 0x3fd   :  { %v6212_v42 = vmax.f32 %v5843_v4, %v6055_v45  ;;  %v6057_v48 = vpop.f32.mrb[9].mxu0  ;;  %v6214_v50 = vmax.f32 %v5949_v5, %v6161_v2  ;;  %v6163_v52 = vpop.f32.mrb[9].mxu1  ;;  %v8861_v5 = vsub.s32 6, %v6252_v19  ;;  %v9125_v19 = vrot.slane %v8857_v61, 1 }
 0x3fe   :  { %v6213_v51 = vmax.f32 %v5845_v10, %v6057_v48  ;;  %v6059_v27 = vpop.f32.mrb[10].mxu0  ;;  %v6215_v57 = vmax.f32 %v5951_v6, %v6163_v52  ;;  %v6165_v58 = vpop.f32.mrb[10].mxu1 }
 0x3ff   :  { %v6216_v15 = vmax.f32 %v5847_v29, %v6059_v27  ;;  %v6061_v60 = vpop.f32.mrb[11].mxu0  ;;  %v6218_v0 = vmax.f32 %v5953_v7, %v6165_v58  ;;  %v6167_v8 = vpop.f32.mrb[11].mxu1 }
 0x400   :  { %v6244_v47 = vcombine.low %v6212_v42, %v6213_v51  ;;  %v6245_v36 = vcombine.high %v6212_v42, %v6213_v51  ;;  %v6217_v1 = vmax.f32 %v5849_v11, %v6061_v60  ;;  %v6246_v3 = vcombine.low %v6214_v50, %v6215_v57 }
 0x401   :  { %v6247_v4 = vcombine.high %v6214_v50, %v6215_v57  ;;  %v6219_v10 = vmax.f32 %v5955_v12, %v6167_v8  ;;  %v9124_v12 = vrot.slane %v8859_v62, 1 }
 0x402   :  { %v6254_v18 = vrot.slane %v6244_v47, %v8843_v23  ;;  %v6261_v6 = vrot.slane %v6245_v36, %v8843_v23  ;;  %v6280_v29 = vcombine.low %v6216_v15, %v6217_v1  ;;  %v6281_v32 = vcombine.high %v6216_v15, %v6217_v1 }
 0x403   :  { %v6268_v59 = vrot.slane %v6246_v3, %v8843_v23  ;;  %v6275_v20 = vrot.slane %v6247_v4, %v8843_v23  ;;  %v6282_v21 = vcombine.low %v6218_v0, %v6219_v10  ;;  %v6283_v14 = vcombine.high %v6218_v0, %v6219_v10 }
 0x404   :  { %v6290_v7 = vrot.slane %v6280_v29, %v8843_v23  ;;  %v6297_v11 = vrot.slane %v6281_v32, %v8843_v23  ;;  %v6065_v22 = vpop.f32.mrb[12].mxu0  ;;  %v6171_v34 = vpop.f32.mrb[12].mxu1 }
 0x405   :  { %v6276_v46 = vcombine.low %v6254_v18, %v6268_v59  ;;  %v6277_v28 = vcombine.high %v6254_v18, %v6268_v59  ;;  %v6278_v30 = vcombine.low %v6261_v6, %v6275_v20  ;;  %v6279_v44 = vcombine.high %v6261_v6, %v6275_v20  ;;  %v8871_v35 = vpop.f32.mrb[13].mxu0  ;;  %v8881_v40 = vpop.f32.mrb[13].mxu1 }
 0x406   :  { %v6304_v37 = vrot.slane %v6282_v21, %v8843_v23  ;;  %v6311_v38 = vrot.slane %v6283_v14, %v8843_v23  ;;  %v8876_v24 = vmax.f32 %v8821_v33, %v6065_v22  ;;  %v8879_v54 = vmax.f32 %v8823_v13, %v6171_v34  ;;  %v8883_v41 = vpop.f32.mrb[14].mxu0  ;;  %v8885_v50 = vpop.f32.mrb[14].mxu1 }
 0x407   :  { %v8123_v45 = vrot.slane %v6276_v46, 9  ;;  %v8124_v42 = vrot.slane %v6277_v28, 9  ;;  %v8125_v2 = vrot.slane %v6278_v30, 9  ;;  %v8126_v48 = vrot.slane %v6279_v44, 9  ;;  %v8887_v51 = vpop.f32.mrb[15].mxu0  ;;  %v8889_v15 = vpop.f32.mrb[15].mxu1 }
 0x408   :  { %v6312_v52 = vcombine.low %v6290_v7, %v6304_v37  ;;  %v6313_v27 = vcombine.high %v6290_v7, %v6304_v37  ;;  %v6314_v57 = vcombine.low %v6297_v11, %v6311_v38  ;;  %v6315_v33 = vcombine.high %v6297_v11, %v6311_v38 }
 0x409   :  { %v6452_v13 = vmax.f32 %v6276_v46, %v8123_v45  ;;  %v6453_v58 = vmax.f32 %v6277_v28, %v8124_v42  ;;  %v6454_v60 = vmax.f32 %v6278_v30, %v8125_v2  ;;  %v6455_v47 = vmax.f32 %v6279_v44, %v8126_v48 }
 0x40a   :  { %v8127_v36 = vrot.slane %v6312_v52, 9  ;;  %v8128_v0 = vrot.slane %v6313_v27, 9  ;;  %v8129_v1 = vrot.slane %v6314_v57, 9  ;;  %v8130_v8 = vrot.slane %v6315_v33, 9 }
 0x40b   :  { %v6534_v3 = vadd.f32 %v8847_v39, %v6452_v13  ;;  %v6535_v4 = vadd.f32 %v6522_v49, %v6453_v58  ;;  %v6536_v10 = vadd.f32 %v8849_v43, %v6454_v60  ;;  %v6537_v18 = vadd.f32 %v9126_v56, %v6455_v47 }
 0x40c   :  { %v6456_v6 = vmax.f32 %v6312_v52, %v8127_v36  ;;  %v6457_v29 = vmax.f32 %v6313_v27, %v8128_v0  ;;  %v6458_v32 = vmax.f32 %v6314_v57, %v8129_v1  ;;  %v6459_v59 = vmax.f32 %v6315_v33, %v8130_v8 }
 0x40d   :  { %v6550_v20 = vmax.f32 %v6534_v3, 0.0  ;;  %v6551_v21 = vmax.f32 %v6535_v4, 0.0  ;;  %v6552_v14 = vmax.f32 %v6536_v10, 0.0  ;;  %v6553_v7 = vmax.f32 %v6537_v18, 0.0 }
 0x40e   :  { %v8898_v11 = vadd.f32 %v8857_v61, %v6456_v6  ;;  %v8902_v22 = vadd.f32 %v9125_v19, %v6457_v29  ;;  %v8905_v46 = vadd.f32 %v8859_v62, %v6458_v32  ;;  %v8909_v28 = vadd.f32 %v9124_v12, %v6459_v59 }
 0x40f   :  { %v6585_v30 = vrot.slane %v6550_v20, %v8837_v31  ;;  %v6589_v44 = vrot.slane %v6550_v20, %v8839_v17  ;;  %v6593_v34 = vrot.slane %v6550_v20, %v8855_v55  ;;  %v6597_v37 = vrot.slane %v6550_v20, %v8861_v5 }
 0x410   :  { %v6601_v38 = vrot.slane %v6551_v21, %v8837_v31  ;;  %v6605_v45 = vrot.slane %v6551_v21, %v8839_v17  ;;  %v6609_v42 = vrot.slane %v6551_v21, %v8855_v55  ;;  %v6613_v2 = vrot.slane %v6551_v21, %v8861_v5 }
 0x411   :  { %v6617_v48 = vrot.slane %v6552_v14, %v8837_v31  ;;  %v6621_v52 = vrot.slane %v6552_v14, %v8839_v17  ;;  %v6625_v27 = vrot.slane %v6552_v14, %v8855_v55  ;;  %v6629_v57 = vrot.slane %v6552_v14, %v8861_v5 }
 0x412   :  { %v6633_v33 = vrot.slane %v6553_v7, %v8837_v31  ;;  %v6637_v13 = vrot.slane %v6553_v7, %v8839_v17  ;;  %v6641_v58 = vrot.slane %v6553_v7, %v8855_v55  ;;  %v6645_v60 = vrot.slane %v6553_v7, %v8861_v5 }
 0x413   :  { %v8171_v47 = vpack.c.bf16 %v6589_v44, %v6585_v30  ;;  %v8172_v36 = vpack.c.bf16 %v6597_v37, %v6593_v34  ;;  %v8173_v0 = vpack.c.bf16 %v6605_v45, %v6601_v38  ;;  %v8174_v1 = vpack.c.bf16 %v6613_v2, %v6609_v42 }
 0x414   :  { %v8175_v8 = vpack.c.bf16 %v6621_v52, %v6617_v48  ;;  %v8176_v3 = vpack.c.bf16 %v6629_v57, %v6625_v27  ;;  %v8177_v4 = vpack.c.bf16 %v6637_v13, %v6633_v33  ;;  %v8178_v10 = vpack.c.bf16 %v6645_v60, %v6641_v58 }
 0x415   :  { %v7126_v18 = vunpack.c.l.b16 %v8171_v47  ;;  %v7127_v6 = vunpack.c.h.b16 %v8171_v47  ;;  %v7128_v29 = vunpack.c.l.b16 %v8172_v36  ;;  %v7129_v32 = vunpack.c.h.b16 %v8172_v36 }
 0x416   :  { %v7130_v59 = vunpack.c.l.b16 %v8173_v0  ;;  %v7131_v20 = vunpack.c.h.b16 %v8173_v0  ;;  %v7132_v21 = vunpack.c.l.b16 %v8174_v1  ;;  %v7133_v14 = vunpack.c.h.b16 %v8174_v1 }
 0x417   :  { %v7134_v12 = vunpack.c.l.b16 %v8175_v8  ;;  %v7135_v19 = vunpack.c.h.b16 %v8175_v8  ;;  %v7136_v7 = vunpack.c.l.b16 %v8176_v3  ;;  %v7137_v56 = vunpack.c.h.b16 %v8176_v3 }
 0x418   :  { %v7138_v30 = vunpack.c.l.b16 %v8177_v4  ;;  %v7139_v44 = vunpack.c.h.b16 %v8177_v4  ;;  %v7140_v34 = vunpack.c.l.b16 %v8178_v10  ;;  %v7141_v37 = vunpack.c.h.b16 %v8178_v10 }
 0x419   :  { %v7190_v38 = vrot.slane %v7130_v59, 7  ;;  %v7193_v45 = vrot.slane %v7134_v12, 6  ;;  %v7211_v42 = vrot.slane %v7131_v20, 7  ;;  %v7213_v2 = vrot.slane %v7135_v19, 6 }
 0x41a   :  { %v7196_v48 = vrot.slane %v7138_v30, 5  ;;  %v7215_v52 = vrot.slane %v7139_v44, 5  ;;  %v7225_v27 = vrot.slane %v7132_v21, 7  ;;  %v7227_v57 = vrot.slane %v7136_v7, 6 }
 0x41b   :  { %v7192_v33 = vsel %vm7191_vm6, %v7190_v38, %v7126_v18  ;;  %v7212_v13 = vsel %vm7191_vm6, %v7211_v42, %v7127_v6  ;;  %v7229_v58 = vrot.slane %v7140_v34, 5  ;;  %v7239_v60 = vrot.slane %v7133_v14, 7 }
 0x41c   :  { %v7195_v47 = vsel %vm7194_vm7, %v7193_v45, %v7192_v33  ;;  %v7214_v36 = vsel %vm7194_vm7, %v7213_v2, %v7212_v13  ;;  %v7226_v0 = vsel %vm7191_vm6, %v7225_v27, %v7128_v29  ;;  %v7241_v1 = vrot.slane %v7137_v56, 6 }
 0x41d   :  { %v8933_v12 = vsel %vm7197_vm8, %v7196_v48, %v7195_v47  ;;  %v8936_v19 = vsel %vm7197_vm8, %v7215_v52, %v7214_v36  ;;  %v7228_v8 = vsel %vm7194_vm7, %v7227_v57, %v7226_v0  ;;  %v7240_v3 = vsel %vm7191_vm6, %v7239_v60, %v7129_v32 }
 0x41e   :  { %v8941_v4 = vsel %vm7197_vm8, %v7229_v58, %v7228_v8  ;;  %v7242_v10 = vsel %vm7194_vm7, %v7241_v1, %v7240_v3  ;;  %v7243_v18 = vrot.slane %v7141_v37, 5  ;;  %v6554_v6 = vmax.f32 %v8898_v11, 0.0 }
 0x41f   :  { %v6555_v56 = vmax.f32 %v8902_v22, 0.0  ;;  %v6556_v29 = vmax.f32 %v8905_v46, 0.0  ;;  %v6557_v59 = vmax.f32 %v8909_v28, 0.0  ;;  %v8950_v20 = vmax.f32 %v8825_v53, %v8871_v35 }
 0x420   :  { %v8953_v32 = vsel %vm7197_vm8, %v7243_v18, %v7242_v10  ;;  %v6649_v21 = vrot.slane %v6554_v6, %v8837_v31  ;;  %v6653_v14 = vrot.slane %v6554_v6, %v8839_v17  ;;  %v6657_v7 = vrot.slane %v6554_v6, %v8855_v55 }
 0x421   :  { %v6661_v11 = vrot.slane %v6554_v6, %v8861_v5  ;;  %v6665_v22 = vrot.slane %v6555_v56, %v8837_v31  ;;  %v6669_v46 = vrot.slane %v6555_v56, %v8839_v17  ;;  %v6673_v28 = vrot.slane %v6555_v56, %v8855_v55 }
 0x422   :  { %v6677_v53 = vrot.slane %v6555_v56, %v8861_v5  ;;  %v6681_v35 = vrot.slane %v6556_v29, %v8837_v31  ;;  %v6685_v30 = vrot.slane %v6556_v29, %v8839_v17  ;;  %v6689_v44 = vrot.slane %v6556_v29, %v8855_v55 }
 0x423   :  { %v6693_v34 = vrot.slane %v6556_v29, %v8861_v5  ;;  %v6697_v37 = vrot.slane %v6557_v59, %v8837_v31  ;;  %v6701_v38 = vrot.slane %v6557_v59, %v8839_v17  ;;  %v6705_v45 = vrot.slane %v6557_v59, %v8855_v55 }
 0x424   :  { %v6709_v42 = vrot.slane %v6557_v59, %v8861_v5  ;;  %v8179_v2 = vpack.c.bf16 %v6653_v14, %v6649_v21  ;;  %v8180_v48 = vpack.c.bf16 %v6661_v11, %v6657_v7  ;;  %v8181_v52 = vpack.c.bf16 %v6669_v46, %v6665_v22 }
 0x425   :  { %v8182_v27 = vpack.c.bf16 %v6677_v53, %v6673_v28  ;;  %v8183_v57 = vpack.c.bf16 %v6685_v30, %v6681_v35  ;;  %v8184_v33 = vpack.c.bf16 %v6693_v34, %v6689_v44  ;;  %v8185_v13 = vpack.c.bf16 %v6701_v38, %v6697_v37 }
 0x426   :  { %v8186_v58 = vpack.c.bf16 %v6709_v42, %v6705_v45  ;;  %v7142_v60 = vunpack.c.l.b16 %v8179_v2  ;;  %v7143_v47 = vunpack.c.h.b16 %v8179_v2  ;;  %v7144_v36 = vunpack.c.l.b16 %v8180_v48 }
 0x427   :  { %v7145_v0 = vunpack.c.h.b16 %v8180_v48  ;;  %v7146_v1 = vunpack.c.l.b16 %v8181_v52  ;;  %v7147_v8 = vunpack.c.h.b16 %v8181_v52  ;;  %v7148_v3 = vunpack.c.l.b16 %v8182_v27 }
 0x428   :  { %v7149_v10 = vunpack.c.h.b16 %v8182_v27  ;;  %v7150_v18 = vunpack.c.l.b16 %v8183_v57  ;;  %v7151_v6 = vunpack.c.h.b16 %v8183_v57  ;;  %v7152_v56 = vunpack.c.l.b16 %v8184_v33 }
 0x429   :  { %v7153_v29 = vunpack.c.h.b16 %v8184_v33  ;;  %v7154_v59 = vunpack.c.l.b16 %v8185_v13  ;;  %v7155_v21 = vunpack.c.h.b16 %v8185_v13  ;;  %v7156_v14 = vunpack.c.l.b16 %v8186_v58 }
 0x42a   :  { %v7157_v7 = vunpack.c.h.b16 %v8186_v58  ;;  %v7199_v11 = vrot.slane %v7142_v60, 4  ;;  %v7202_v22 = vrot.slane %v7146_v1, 3  ;;  %v7205_v46 = vrot.slane %v7150_v18, 2 }
 0x42b   :  { %v7208_v28 = vrot.slane %v7154_v59, 1  ;;  %v7217_v53 = vrot.slane %v7143_v47, 4  ;;  %v7219_v35 = vrot.slane %v7147_v8, 3  ;;  %v7221_v30 = vrot.slane %v7151_v6, 2 }
 0x42c   :  { %v7201_v44 = vsel %vm7200_vm9, %v7199_v11, %v8933_v12  ;;  %v7223_v34 = vrot.slane %v7155_v21, 1  ;;  %v7231_v37 = vrot.slane %v7144_v36, 4  ;;  %v7233_v38 = vrot.slane %v7148_v3, 3 }
 0x42d   :  { %v7204_v45 = vsel %vm7203_vm10, %v7202_v22, %v7201_v44  ;;  %v7218_v42 = vsel %vm7200_vm9, %v7217_v53, %v8936_v19  ;;  %v7235_v2 = vrot.slane %v7152_v56, 2  ;;  %v7237_v48 = vrot.slane %v7156_v14, 1 }
 0x42e   :  { %v7207_v52 = vsel %vm7206_vm11, %v7205_v46, %v7204_v45  ;;  %v7220_v27 = vsel %vm7203_vm10, %v7219_v35, %v7218_v42  ;;  %v7232_v57 = vsel %vm7200_vm9, %v7231_v37, %v8941_v4  ;;  %v7245_v33 = vrot.slane %v7145_v0, 4 }
 0x42f   :  { %v7210_v12 = vsel %vm7209_vm12, %v7208_v28, %v7207_v52  ;;  %v7222_v13 = vsel %vm7206_vm11, %v7221_v30, %v7220_v27  ;;  %v7234_v58 = vsel %vm7203_vm10, %v7233_v38, %v7232_v57  ;;  %v7247_v60 = vrot.slane %v7149_v10, 3 }
 0x430   :  { %v7224_v47 = vsel %vm7209_vm12, %v7223_v34, %v7222_v13  ;;  %v7236_v19 = vsel %vm7206_vm11, %v7235_v2, %v7234_v58  ;;  %v7246_v36 = vsel %vm7200_vm9, %v7245_v33, %v8953_v32  ;;  %v7249_v1 = vrot.slane %v7153_v29, 2 }
 0x431   :  { %v7238_v8 = vsel %vm7209_vm12, %v7237_v48, %v7236_v19  ;;  %v7248_v4 = vsel %vm7203_vm10, %v7247_v60, %v7246_v36  ;;  %v7251_v0 = vrot.slane %v7157_v7, 1  ;;  %v7309_v3 = vpack.c.b16 %v7224_v47, %v7210_v12 }
 0x432   :  { %v7250_v18 = vsel %vm7206_vm11, %v7249_v1, %v7248_v4  ;;  %v6316_v6 = vcombine.low %v8876_v24, %v8950_v20  ;;  %v6317_v10 = vcombine.high %v8876_v24, %v8950_v20  ;;  %v6223_v56 = vmax.f32 %v8827_v16, %v8881_v40 }
 0x433   :  { %v7252_v32 = vsel %vm7209_vm12, %v7251_v0, %v7250_v18  ;;  %7317 = vst [vmem:[%s9123_s3] sm:$0xff] %v7309_v3  ;;  %v6224_v29 = vmax.f32 %v8829_v63, %v8883_v41  ;;  %v6226_v59 = vmax.f32 %v8831_v9, %v8885_v50  ;;  %v6225_v21 = vmax.f32 %v8833_v26, %v8887_v51 }
 0x434   :  { %v7310_v14 = vpack.c.b16 %v7252_v32, %v7238_v8  ;;  %v6326_v24 = vrot.slane %v6316_v6, %v8843_v23  ;;  %v6333_v16 = vrot.slane %v6317_v10, %v8843_v23  ;;  %v6318_v40 = vcombine.low %v8879_v54, %v6223_v56 }
 0x435   :  { %v6319_v20 = vcombine.high %v8879_v54, %v6223_v56  ;;  %v6352_v7 = vcombine.low %v6224_v29, %v6225_v21  ;;  %v6353_v11 = vcombine.high %v6224_v29, %v6225_v21  ;;  %v6227_v63 = vmax.f32 %v8835_v25, %v8889_v15 }
 0x436   :  { %7318 = vst [vmem:[%s9123_s3 + $0x8] sm:$0xff] %v7310_v14  ;;  %v6340_v9 = vrot.slane %v6318_v40, %v8843_v23  ;;  %v9131_v47 = vrot.slane %v8849_v43, 1 }
 0x437   :  { %v6347_v26 = vrot.slane %v6319_v20, %v8843_v23  ;;  %v6362_v41 = vrot.slane %v6352_v7, %v8843_v23  ;;  %v6354_v50 = vcombine.low %v6226_v59, %v6227_v63  ;;  %v6369_v54 = vrot.slane %v6353_v11, %v8843_v23 }
 0x438   :  { %v6348_v51 = vcombine.low %v6326_v24, %v6340_v9  ;;  %v6349_v22 = vcombine.high %v6326_v24, %v6340_v9  ;;  %v6355_v46 = vcombine.high %v6226_v59, %v6227_v63 }
 0x439   :  { %v6350_v28 = vcombine.low %v6333_v16, %v6347_v26  ;;  %v6351_v53 = vcombine.high %v6333_v16, %v6347_v26  ;;  %v6376_v25 = vrot.slane %v6354_v50, %v8843_v23 }
 0x43a   :  { %v8131_v15 = vrot.slane %v6348_v51, 9  ;;  %v8132_v35 = vrot.slane %v6349_v22, 9  ;;  %v6383_v30 = vrot.slane %v6355_v46, %v8843_v23 }
 0x43b   :  { %v8133_v44 = vrot.slane %v6350_v28, 9  ;;  %v8134_v34 = vrot.slane %v6351_v53, 9  ;;  %v6384_v37 = vcombine.low %v6362_v41, %v6376_v25  ;;  %v6385_v38 = vcombine.high %v6362_v41, %v6376_v25 }
 0x43c   :  { %v6460_v45 = vmax.f32 %v6348_v51, %v8131_v15  ;;  %v6461_v42 = vmax.f32 %v6349_v22, %v8132_v35  ;;  %v6386_v2 = vcombine.low %v6369_v54, %v6383_v30  ;;  %v6387_v48 = vcombine.high %v6369_v54, %v6383_v30 }
 0x43d   :  { %v6462_v52 = vmax.f32 %v6350_v28, %v8133_v44  ;;  %v6463_v27 = vmax.f32 %v6351_v53, %v8134_v34  ;;  %v8135_v57 = vrot.slane %v6384_v37, 9  ;;  %v8136_v33 = vrot.slane %v6385_v38, 9 }
 0x43e   :  { %v6542_v12 = vadd.f32 %v8847_v39, %v6460_v45  ;;  %v6543_v13 = vadd.f32 %v6522_v49, %v6461_v42  ;;  %v8137_v58 = vrot.slane %v6386_v2, 9  ;;  %v8138_v60 = vrot.slane %v6387_v48, 9 }
 0x43f   :  { %v6544_v23 = vadd.f32 %v8849_v43, %v6462_v52  ;;  %v6545_v19 = vadd.f32 %v9131_v47, %v6463_v27  ;;  %v6464_v36 = vmax.f32 %v6384_v37, %v8135_v57  ;;  %v6465_v1 = vmax.f32 %v6385_v38, %v8136_v33 }
 0x440   :  { %v6558_v8 = vmax.f32 %v6542_v12, 0.0  ;;  %v6559_v4 = vmax.f32 %v6543_v13, 0.0  ;;  %v9027_v0 = vmax.f32 %v6386_v2, %v8137_v58  ;;  %v9029_v3 = vmax.f32 %v6387_v48, %v8138_v60 }
 0x441   :  { %v6560_v18 = vmax.f32 %v6544_v23, 0.0  ;;  %v6561_v6 = vmax.f32 %v6545_v19, 0.0  ;;  %v9032_v39 = vadd.f32 %v8857_v61, %v6464_v36  ;;  %v9132_v49 = vrot.slane %v8857_v61, 1 }
 0x442   :  { %v6713_v43 = vrot.slane %v6558_v8, %v8837_v31  ;;  %v6717_v56 = vrot.slane %v6558_v8, %v8839_v17  ;;  %v6721_v32 = vrot.slane %v6558_v8, %v8855_v55  ;;  %v6725_v29 = vrot.slane %v6558_v8, %v8861_v5 }
 0x443   :  { %v9036_v10 = vadd.f32 %v9132_v49, %v6465_v1  ;;  %v6729_v59 = vrot.slane %v6559_v4, %v8837_v31  ;;  %v6733_v21 = vrot.slane %v6559_v4, %v8839_v17  ;;  %v6737_v14 = vrot.slane %v6559_v4, %v8855_v55 }
 0x444   :  { %v6741_v24 = vrot.slane %v6559_v4, %v8861_v5  ;;  %v6745_v61 = vrot.slane %v6560_v18, %v8837_v31  ;;  %v6749_v16 = vrot.slane %v6560_v18, %v8839_v17  ;;  %v6753_v40 = vrot.slane %v6560_v18, %v8855_v55 }
 0x445   :  { %v6757_v20 = vrot.slane %v6560_v18, %v8861_v5  ;;  %v6761_v7 = vrot.slane %v6561_v6, %v8837_v31  ;;  %v6765_v11 = vrot.slane %v6561_v6, %v8839_v17  ;;  %v6769_v63 = vrot.slane %v6561_v6, %v8855_v55 }
 0x446   :  { %v6773_v9 = vrot.slane %v6561_v6, %v8861_v5  ;;  %v8187_v26 = vpack.c.bf16 %v6717_v56, %v6713_v43  ;;  %v8188_v41 = vpack.c.bf16 %v6725_v29, %v6721_v32  ;;  %v8189_v50 = vpack.c.bf16 %v6733_v21, %v6729_v59 }
 0x447   :  { %v8190_v51 = vpack.c.bf16 %v6741_v24, %v6737_v14  ;;  %v8191_v22 = vpack.c.bf16 %v6749_v16, %v6745_v61  ;;  %v8192_v54 = vpack.c.bf16 %v6757_v20, %v6753_v40  ;;  %v8193_v46 = vpack.c.bf16 %v6765_v11, %v6761_v7 }
 0x448   :  { %v8194_v28 = vpack.c.bf16 %v6773_v9, %v6769_v63  ;;  %v7158_v53 = vunpack.c.l.b16 %v8187_v26  ;;  %v7159_v25 = vunpack.c.h.b16 %v8187_v26  ;;  %v7160_v15 = vunpack.c.l.b16 %v8188_v41 }
 0x449   :  { %v7161_v35 = vunpack.c.h.b16 %v8188_v41  ;;  %v7162_v30 = vunpack.c.l.b16 %v8189_v50  ;;  %v7163_v44 = vunpack.c.h.b16 %v8189_v50  ;;  %v7164_v34 = vunpack.c.l.b16 %v8190_v51 }
 0x44a   :  { %v7165_v37 = vunpack.c.h.b16 %v8190_v51  ;;  %v7166_v38 = vunpack.c.l.b16 %v8191_v22  ;;  %v7167_v45 = vunpack.c.h.b16 %v8191_v22  ;;  %v7168_v42 = vunpack.c.l.b16 %v8192_v54 }
 0x44b   :  { %v7169_v2 = vunpack.c.h.b16 %v8192_v54  ;;  %v7170_v48 = vunpack.c.l.b16 %v8193_v46  ;;  %v7171_v52 = vunpack.c.h.b16 %v8193_v46  ;;  %v7172_v27 = vunpack.c.l.b16 %v8194_v28 }
 0x44c   :  { %v7173_v57 = vunpack.c.h.b16 %v8194_v28  ;;  %v7253_v33 = vrot.slane %v7162_v30, 7  ;;  %v7255_v12 = vrot.slane %v7166_v38, 6  ;;  %v7267_v13 = vrot.slane %v7163_v44, 7 }
 0x44d   :  { %v7269_v58 = vrot.slane %v7167_v45, 6  ;;  %v7257_v60 = vrot.slane %v7170_v48, 5  ;;  %v7271_v23 = vrot.slane %v7171_v52, 5  ;;  %v7281_v47 = vrot.slane %v7164_v34, 7 }
 0x44e   :  { %v7283_v19 = vrot.slane %v7168_v42, 6  ;;  %v7254_v36 = vsel %vm7191_vm6, %v7253_v33, %v7158_v53  ;;  %v7268_v1 = vsel %vm7191_vm6, %v7267_v13, %v7159_v25  ;;  %v7285_v8 = vrot.slane %v7172_v27, 5 }
 0x44f   :  { %v7295_v4 = vrot.slane %v7165_v37, 7  ;;  %v7256_v18 = vsel %vm7194_vm7, %v7255_v12, %v7254_v36  ;;  %v7270_v6 = vsel %vm7194_vm7, %v7269_v58, %v7268_v1  ;;  %v7282_v49 = vsel %vm7191_vm6, %v7281_v47, %v7160_v15 }
 0x450   :  { %v7297_v43 = vrot.slane %v7169_v2, 6  ;;  %v7258_v56 = vsel %vm7197_vm8, %v7257_v60, %v7256_v18  ;;  %v9061_v32 = vsel %vm7197_vm8, %v7271_v23, %v7270_v6  ;;  %v7284_v29 = vsel %vm7194_vm7, %v7283_v19, %v7282_v49 }
 0x451   :  { %v7296_v59 = vsel %vm7191_vm6, %v7295_v4, %v7161_v35  ;;  %v9066_v21 = vsel %vm7197_vm8, %v7285_v8, %v7284_v29  ;;  %v7299_v24 = vrot.slane %v7173_v57, 5  ;;  %v6548_v61 = vadd.f32 %v8859_v62, %v9027_v0 }
 0x452   :  { %v7298_v14 = vsel %vm7194_vm7, %v7297_v43, %v7296_v59  ;;  %v9133_v16 = vrot.slane %v8859_v62, 1  ;;  %v6562_v20 = vmax.f32 %v9032_v39, 0.0  ;;  %v6563_v7 = vmax.f32 %v9036_v10, 0.0 }
 0x453   :  { %v9077_v11 = vsel %vm7197_vm8, %v7299_v24, %v7298_v14  ;;  %v6564_v63 = vmax.f32 %v6548_v61, 0.0 }
 0x454   :  { %v6549_v40 = vadd.f32 %v9133_v16, %v9029_v3  ;;  %v6777_v26 = vrot.slane %v6562_v20, %v8837_v31  ;;  %v6781_v41 = vrot.slane %v6562_v20, %v8839_v17  ;;  %v6785_v50 = vrot.slane %v6562_v20, %v8855_v55 }
 0x455   :  { %v6789_v0 = vrot.slane %v6562_v20, %v8861_v5  ;;  %v6793_v62 = vrot.slane %v6563_v7, %v8837_v31  ;;  %v6797_v3 = vrot.slane %v6563_v7, %v8839_v17  ;;  %v6801_v39 = vrot.slane %v6563_v7, %v8855_v55 }
 0x456   :  { %v6565_v9 = vmax.f32 %v6549_v40, 0.0  ;;  %v6805_v10 = vrot.slane %v6563_v7, %v8861_v5  ;;  %v6809_v51 = vrot.slane %v6564_v63, %v8837_v31  ;;  %v6813_v22 = vrot.slane %v6564_v63, %v8839_v17 }
 0x457   :  { %v6817_v54 = vrot.slane %v6564_v63, %v8855_v55  ;;  %v6821_v46 = vrot.slane %v6564_v63, %v8861_v5  ;;  %v8195_v35 = vpack.c.bf16 %v6781_v41, %v6777_v26  ;;  %v8196_v30 = vpack.c.bf16 %v6789_v0, %v6785_v50 }
 0x458   :  { %v6825_v28 = vrot.slane %v6565_v9, %v8837_v31  ;;  %v6829_v53 = vrot.slane %v6565_v9, %v8839_v17  ;;  %v6833_v25 = vrot.slane %v6565_v9, %v8855_v55  ;;  %v6837_v15 = vrot.slane %v6565_v9, %v8861_v5 }
 0x459   :  { %v8197_v44 = vpack.c.bf16 %v6797_v3, %v6793_v62  ;;  %v8198_v34 = vpack.c.bf16 %v6805_v10, %v6801_v39  ;;  %v8199_v37 = vpack.c.bf16 %v6813_v22, %v6809_v51  ;;  %v8200_v38 = vpack.c.bf16 %v6821_v46, %v6817_v54 }
 0x45a   :  { %v8201_v45 = vpack.c.bf16 %v6829_v53, %v6825_v28  ;;  %v8202_v42 = vpack.c.bf16 %v6837_v15, %v6833_v25  ;;  %v7174_v2 = vunpack.c.l.b16 %v8195_v35  ;;  %v7175_v48 = vunpack.c.h.b16 %v8195_v35 }
 0x45b   :  { %v7176_v52 = vunpack.c.l.b16 %v8196_v30  ;;  %v7177_v27 = vunpack.c.h.b16 %v8196_v30  ;;  %v7178_v57 = vunpack.c.l.b16 %v8197_v44  ;;  %v7179_v31 = vunpack.c.h.b16 %v8197_v44 }
 0x45c   :  { %v7180_v33 = vunpack.c.l.b16 %v8198_v34  ;;  %v7181_v17 = vunpack.c.h.b16 %v8198_v34  ;;  %v7182_v12 = vunpack.c.l.b16 %v8199_v37  ;;  %v7183_v55 = vunpack.c.h.b16 %v8199_v37 }
 0x45d   :  { %v7184_v13 = vunpack.c.l.b16 %v8200_v38  ;;  %v7185_v5 = vunpack.c.h.b16 %v8200_v38  ;;  %v7186_v58 = vunpack.c.l.b16 %v8201_v45  ;;  %v7187_v60 = vunpack.c.h.b16 %v8201_v45 }
 0x45e   :  { %v7188_v23 = vunpack.c.l.b16 %v8202_v42  ;;  %v7189_v47 = vunpack.c.h.b16 %v8202_v42  ;;  %v7259_v19 = vrot.slane %v7174_v2, 4  ;;  %v7261_v36 = vrot.slane %v7178_v57, 3 }
 0x45f   :  { %v7263_v1 = vrot.slane %v7182_v12, 2  ;;  %v7265_v8 = vrot.slane %v7186_v58, 1  ;;  %v7273_v4 = vrot.slane %v7175_v48, 4  ;;  %v7275_v18 = vrot.slane %v7179_v31, 3 }
 0x460   :  { %v7277_v6 = vrot.slane %v7183_v55, 2  ;;  %v7260_v49 = vsel %vm7200_vm9, %v7259_v19, %v7258_v56  ;;  %v7279_v43 = vrot.slane %v7187_v60, 1  ;;  %v7287_v29 = vrot.slane %v7176_v52, 4 }
 0x461   :  { %v7289_v59 = vrot.slane %v7180_v33, 3  ;;  %v7262_v14 = vsel %vm7203_vm10, %v7261_v36, %v7260_v49  ;;  %v7274_v24 = vsel %vm7200_vm9, %v7273_v4, %v9061_v32  ;;  %v7291_v61 = vrot.slane %v7184_v13, 2 }
 0x462   :  { %v7293_v16 = vrot.slane %v7188_v23, 1  ;;  %v7264_v40 = vsel %vm7206_vm11, %v7263_v1, %v7262_v14  ;;  %v7276_v20 = vsel %vm7203_vm10, %v7275_v18, %v7274_v24  ;;  %v7288_v7 = vsel %vm7200_vm9, %v7287_v29, %v9066_v21 }
 0x463   :  { %v7301_v63 = vrot.slane %v7177_v27, 4  ;;  %v7266_v56 = vsel %vm7209_vm12, %v7265_v8, %v7264_v40  ;;  %v7278_v9 = vsel %vm7206_vm11, %v7277_v6, %v7276_v20  ;;  %v7290_v26 = vsel %vm7203_vm10, %v7289_v59, %v7288_v7 }
 0x464   :  { %v7303_v41 = vrot.slane %v7181_v17, 3  ;;  %v7280_v50 = vsel %vm7209_vm12, %v7279_v43, %v7278_v9  ;;  %v7292_v32 = vsel %vm7206_vm11, %v7291_v61, %v7290_v26  ;;  %v7305_v62 = vrot.slane %v7185_v5, 2 }
 0x465   :  { %v7302_v0 = vsel %vm7200_vm9, %v7301_v63, %v9077_v11  ;;  %v7294_v3 = vsel %vm7209_vm12, %v7293_v16, %v7292_v32  ;;  %v7307_v39 = vrot.slane %v7189_v47, 1  ;;  %v7311_v10 = vpack.c.b16 %v7280_v50, %v7266_v56 }
 0x466   :  { %v7304_v21 = vsel %vm7203_vm10, %v7303_v41, %v7302_v0 }
 0x467   :  { %v7306_v51 = vsel %vm7206_vm11, %v7305_v62, %v7304_v21  ;;  %7319 = vst [vmem:[%s9123_s3 + $0x10] sm:$0xff] %v7311_v10 }
 0x468   :  { %v7308_v22 = vsel %vm7209_vm12, %v7307_v39, %v7306_v51 }
 0x469   :  { %v7312_v54 = vpack.c.b16 %v7308_v22, %v7294_v3 }
 0x46b   :  { %7320 = vst [vmem:[%s9123_s3 + $0x18] sm:$0xff] %v7312_v54 }
 0x46c   :  { %7325 = vsyncpa [#allocation3], 1 }
 0x46d   :  { %7326 = vsyncpa [#allocation5], 1 }

</bundles_post_ra>
